<compile_context>
chip_gen: v5e
topology: v5e:2x2
jax: 0.10.0
libtpu: 0.0.40
codegen_flags: <defaults>
</compile_context>

<pallas_src>
import jax
import jax.numpy as jnp
from jax import lax
from jax.experimental import pallas as pl
from jax.experimental.pallas import tpu as pltpu

N_BATCH = 16          # fixed by the trash1/trash2 buffer shapes in Net2.__init__
H_IN, W_IN, C_IN = 28, 28, 1


# --------------------------------------------------------------------------
# Pallas kernel: the whole forward pass, all heavy math on the MXU.
# --------------------------------------------------------------------------
def net2_kernel(x_ref, w1b_ref, b1_ref, w2b_ref, b2_ref,
                bf1_ref, wf2_ref, bf2_ref, wf1_hbm,
                o_ref, wf1_vmem, wf1_sem):
    f32 = jnp.float32

    # Kick off the big (1.92 MB) fc1-weight DMA immediately; it overlaps with the
    # conv1/conv2 matmuls below and is only waited on right before fc1.
    wf1_copy = pltpu.make_async_copy(wf1_hbm, wf1_vmem, wf1_sem)
    wf1_copy.start()

    x = x_ref[...]                                   # (28, 16, 28) = (h_in, n, w_in)

    # ---- conv1 (5x5, valid) as 5 banded MXU matmuls, K = 28 -------------------
    # rows = (oi, n); cols = (parity p, j, co) with oj = 2j + p  (oj in 0..23)
    acc1 = jnp.zeros((24 * N_BATCH, 240), f32)
    for di in range(5):
        lhs = x[di:di + 24].reshape(24 * N_BATCH, 28)
        acc1 = acc1 + jnp.dot(lhs, w1b_ref[di], preferred_element_type=f32)
    r1 = jnp.maximum(acc1 + b1_ref[...], 0.0)        # relu(cat(conv1, trash1))
    r1 = r1.reshape(12, 2, N_BATCH, 240)
    r1h = jnp.maximum(r1[:, 0], r1[:, 1])            # 2x pool over H -> (12, 16, 240)
    p1 = jnp.maximum(r1h[:, :, 0:120], r1h[:, :, 120:240])   # 2x pool over W -> (12,16,120)

    # ---- conv2 (5x5, valid) as 5 banded MXU matmuls, K = 120 ------------------
    # p1 lanes = (j, ci) with j the pooled column; rows = (oi2, n)
    acc2 = jnp.zeros((8 * N_BATCH, 240), f32)
    for di in range(5):
        lhs = p1[di:di + 8].reshape(8 * N_BATCH, 120)
        acc2 = acc2 + jnp.dot(lhs, w2b_ref[di], preferred_element_type=f32)
    r2 = jnp.maximum(acc2 + b2_ref[...], 0.0)        # relu(cat(conv2, trash2))
    r2 = r2.reshape(4, 2, N_BATCH, 240)
    r2h = jnp.maximum(r2[:, 0], r2[:, 1])            # -> (4, 16, 240)
    p2 = jnp.maximum(r2h[:, :, 0:120], r2h[:, :, 120:240])   # -> (4, 16, 120)

    # ---- fc1: 4 MXU matmuls over the pooled rows (total K = 480) --------------
    wf1_copy.wait()                                  # fc1 weights now resident in VMEM
    y1 = jnp.zeros((N_BATCH, 1000), f32)
    for i in range(4):
        y1 = y1 + jnp.dot(p2[i], wf1_vmem[i], preferred_element_type=f32)
    y1 = jnp.maximum(y1 + bf1_ref[...], 0.0)

    # ---- fc2 -------------------------------------------------------------------
    o_ref[...] = jnp.dot(y1, wf2_ref[...], preferred_element_type=f32) + bf2_ref[...]


# --------------------------------------------------------------------------
# Host-side layout plumbing: banded weight matrices + (h, n, w) activations.
# --------------------------------------------------------------------------
def _prep_inputs(x_nchw, params):
    (w1_t, b1_t, w2_t, b2_t, wf1_t, bf1_t, wf2_t, bf2_t) = params
    f32 = jnp.float32

    x_hnw = jnp.transpose(x_nchw[:, 0], (1, 0, 2)).astype(f32)             # (28, 16, 28)

    # conv1: pad with the 2 zero "trash1" output channels, then build the band
    # W1B[di, w_in, p*120 + j*10 + co] = w1[co, di, w_in - (2j+p)]   (0 <= dj < 5)
    w1p = jnp.concatenate([w1_t[:, 0], jnp.zeros((2, 5, 5), f32)], axis=0)  # (10,5,5)
    w_in = jnp.arange(28)[:, None]
    oj = jnp.arange(24)[None, :]
    dj = w_in - oj
    b1w = jnp.transpose(w1p, (1, 2, 0))[:, jnp.clip(dj, 0, 4), :]           # (5,28,24,10)
    b1w = jnp.where(((dj >= 0) & (dj < 5))[None, :, :, None], b1w, 0.0)
    even_odd_24 = jnp.concatenate([jnp.arange(0, 24, 2), jnp.arange(1, 24, 2)])
    W1B = b1w[:, :, even_odd_24, :].reshape(5, 28, 240)
    b1row = jnp.tile(jnp.concatenate([b1_t, jnp.zeros((2,), f32)]), 24).reshape(1, 240)

    # conv2: pad with the 6 zero "trash2" output channels, band over pooled cols
    # W2B[di, j*10 + ci, q*120 + m*30 + co] = w2[co, ci, di, j - (2m+q)]
    w2p = jnp.concatenate([w2_t, jnp.zeros((6, 10, 5, 5), f32)], axis=0)    # (30,10,5,5)
    jj = jnp.arange(12)[:, None]
    oj2 = jnp.arange(8)[None, :]
    dj2 = jj - oj2
    b2w = jnp.transpose(w2p, (2, 3, 1, 0))[:, jnp.clip(dj2, 0, 4), :, :]    # (5,12,8,10,30)
    b2w = jnp.where(((dj2 >= 0) & (dj2 < 5))[None, :, :, None, None], b2w, 0.0)
    b2w = jnp.transpose(b2w, (0, 1, 3, 2, 4))                               # (5,12,10,8,30)
    even_odd_8 = jnp.concatenate([jnp.arange(0, 8, 2), jnp.arange(1, 8, 2)])
    W2B = b2w[:, :, :, even_odd_8, :].reshape(5, 120, 240)
    b2row = jnp.tile(jnp.concatenate([b2_t, jnp.zeros((6,), f32)]), 8).reshape(1, 240)

    # fc1: torch column index = c*16 + i*4 + j  ->  WF1B[i, j*30 + c, f]
    WF1B = jnp.transpose(wf1_t.reshape(1000, 30, 4, 4), (2, 3, 1, 0)).reshape(4, 120, 1000)
    bf1row = bf1_t.reshape(1, 1000)
    wf2k = jnp.transpose(wf2_t)                                             # (1000, 10)
    bf2row = bf2_t.reshape(1, 10)
    return x_hnw, W1B, b1row, W2B, b2row, bf1row, wf2k, bf2row, WF1B


def net2_forward_pallas(x_nchw, params):
    f32 = jnp.float32
    (x_hnw, W1B, b1row, W2B, b2row,
     bf1row, wf2k, bf2row, WF1B) = _prep_inputs(x_nchw, params)

    vmem = pl.BlockSpec(memory_space=pltpu.MemorySpace.VMEM)
    return pl.pallas_call(
        net2_kernel,
        out_shape=jax.ShapeDtypeStruct((N_BATCH, 10), f32),
        in_specs=[vmem] * 8 + [pl.BlockSpec(memory_space=pl.ANY)],   # wf1 stays in HBM
        out_specs=vmem,
        scratch_shapes=[pltpu.VMEM((4, 120, 1000), f32),             # fc1 weight landing
                        pltpu.SemaphoreType.DMA(())],
    )(x_hnw, W1B, b1row, W2B, b2row, bf1row, wf2k, bf2row, WF1B)


# ---------------- pure-JAX reference (for correctness check) ----------------
def _conv_ref(y, w, b):
    out = lax.conv_general_dilated(y, w, (1, 1), 'VALID',
                                   dimension_numbers=('NCHW', 'OIHW', 'NCHW'))
    return out + b.reshape(1, -1, 1, 1)


def _pool_ref(y):
    return lax.reduce_window(y, -jnp.inf, lax.max, (1, 1, 2, 2), (1, 1, 2, 2), 'VALID')


def net2_reference(x, params):
    (w1, b1, w2, b2, wf1, bf1, wf2, bf2) = params
    n = x.shape[0]
    y = _conv_ref(x, w1, b1)                                                   # (N, 8, 24, 24)
    y = jnp.concatenate([y, jnp.zeros((n, 2, 24, 24), x.dtype)], axis=1)       # cat trash1
    y = jax.nn.relu(y)
    y = _pool_ref(y)                                                           # (N, 10, 12, 12)
    y = _conv_ref(y, w2, b2)                                                   # (N, 24, 8, 8)
    y = jnp.concatenate([y, jnp.zeros((n, 6, 8, 8), x.dtype)], axis=1)         # cat trash2
    y = jax.nn.relu(y)
    y = _pool_ref(y)                                                           # (N, 30, 4, 4)
    y = y.reshape(n, 30 * 4 * 4)
    y = jax.nn.relu(y @ wf1.T + bf1)
    return y @ wf2.T + bf2


def _init_params(key):
    def u(k, shape, fan_in):
        b = 1.0 / (fan_in ** 0.5)
        return jax.random.uniform(k, shape, jnp.float32, -b, b)
    ks = jax.random.split(key, 8)
    w1 = u(ks[0], (8, 1, 5, 5), 25)        # conv1
    b1 = u(ks[1], (8,), 25)
    w2 = u(ks[2], (24, 10, 5, 5), 250)     # conv2
    b2 = u(ks[3], (24,), 250)
    wf1 = u(ks[4], (1000, 480), 480)       # fc1
    bf1 = u(ks[5], (1000,), 480)
    wf2 = u(ks[6], (10, 1000), 1000)       # fc2
    bf2 = u(ks[7], (10,), 1000)
    # fc3 exists in __init__ but is unused in forward -> not instantiated.
    return (w1, b1, w2, b2, wf1, bf1, wf2, bf2)


if __name__ == "__main__":
    root = jax.random.PRNGKey(0)
    k_x, k_p = jax.random.split(root)
    params = _init_params(k_p)
    x = jax.random.normal(k_x, (N_BATCH, C_IN, H_IN, W_IN), jnp.float32)  # NCHW, like torch

    # TODO(synk): torch forward has a host-side `print(x.shape)` debug print; omitted.
    out = jax.jit(net2_forward_pallas)(x, params)
    out = jax.block_until_ready(out)

    ref = jax.block_until_ready(net2_reference(x, params))
    assert out.shape == (N_BATCH, 10) and out.dtype == jnp.float32
    assert jnp.allclose(out, ref, rtol=1e-3, atol=1e-3), (
        f"mismatch: max abs err {jnp.max(jnp.abs(out - ref))}")

    print("KERNEL_OK")
</pallas_src>

<mosaic_0001>
module attributes {stable_mosaic.version = 11 : i64} {
  func.func @net2_kernel(%arg0: memref<28x16x28xf32, #tpu.memory_space<vmem>>, %arg1: memref<5x28x240xf32, #tpu.memory_space<vmem>>, %arg2: memref<1x240xf32, #tpu.memory_space<vmem>>, %arg3: memref<5x120x240xf32, #tpu.memory_space<vmem>>, %arg4: memref<1x240xf32, #tpu.memory_space<vmem>>, %arg5: memref<1x1000xf32, #tpu.memory_space<vmem>>, %arg6: memref<1000x10xf32, #tpu.memory_space<vmem>>, %arg7: memref<1x10xf32, #tpu.memory_space<vmem>>, %arg8: memref<4x120x1000xf32, #tpu.memory_space<any>>, %arg9: memref<16x10xf32, #tpu.memory_space<vmem>>, %arg10: memref<4x120x1000xf32, #tpu.memory_space<vmem>>, %arg11: memref<!tpu.dma_semaphore, #tpu.memory_space<semaphore_mem>>) attributes {dimension_semantics = [], scalar_prefetch = 0 : i64, scratch_operands = 2 : i64, tpu.core_type = #tpu.core_type<tc>} {
    tpu.enqueue_dma source(%arg8 : memref<4x120x1000xf32, #tpu.memory_space<any>>) target(%arg10 : memref<4x120x1000xf32, #tpu.memory_space<vmem>>) target_semaphore(%arg11 : memref<!tpu.dma_semaphore, #tpu.memory_space<semaphore_mem>>)
    %c0 = arith.constant 0 : index
    %c0_0 = arith.constant 0 : index
    %c0_1 = arith.constant 0 : index
    %0 = vector.load %arg0[%c0, %c0_0, %c0_1] : memref<28x16x28xf32, #tpu.memory_space<vmem>>, vector<28x16x28xf32>
    %cst = arith.constant 0.000000e+00 : f32
    %1 = vector.broadcast %cst : f32 to vector<384x240xf32>
    %2 = vector.extract_strided_slice %0 {offsets = [0, 0, 0], sizes = [24, 16, 28], strides = [1, 1, 1]} : vector<28x16x28xf32> to vector<24x16x28xf32>
    %3 = vector.shape_cast %2 : vector<24x16x28xf32> to vector<384x28xf32>
    %c0_2 = arith.constant 0 : index
    %c0_3 = arith.constant 0 : index
    %c0_4 = arith.constant 0 : index
    %4 = vector.load %arg1[%c0_2, %c0_3, %c0_4] : memref<5x28x240xf32, #tpu.memory_space<vmem>>, vector<1x28x240xf32>
    %5 = vector.shape_cast %4 : vector<1x28x240xf32> to vector<28x240xf32>
    %cst_5 = arith.constant dense<0.000000e+00> : vector<384x240xf32>
    %6 = tpu.matmul %3, %5, %cst_5 {dimension_numbers = #tpu.dot_dimension_numbers<[1], [0], [0], [1], [0, 0, 1, 1], [], []>} : vector<384x28xf32>, vector<28x240xf32>, vector<384x240xf32> -> vector<384x240xf32>
    %7 = arith.addf %1, %6 : vector<384x240xf32>
    %8 = vector.extract_strided_slice %0 {offsets = [1, 0, 0], sizes = [24, 16, 28], strides = [1, 1, 1]} : vector<28x16x28xf32> to vector<24x16x28xf32>
    %9 = vector.shape_cast %8 : vector<24x16x28xf32> to vector<384x28xf32>
    %c1 = arith.constant 1 : index
    %c0_6 = arith.constant 0 : index
    %c0_7 = arith.constant 0 : index
    %10 = vector.load %arg1[%c1, %c0_6, %c0_7] : memref<5x28x240xf32, #tpu.memory_space<vmem>>, vector<1x28x240xf32>
    %11 = vector.shape_cast %10 : vector<1x28x240xf32> to vector<28x240xf32>
    %cst_8 = arith.constant dense<0.000000e+00> : vector<384x240xf32>
    %12 = tpu.matmul %9, %11, %cst_8 {dimension_numbers = #tpu.dot_dimension_numbers<[1], [0], [0], [1], [0, 0, 1, 1], [], []>} : vector<384x28xf32>, vector<28x240xf32>, vector<384x240xf32> -> vector<384x240xf32>
    %13 = arith.addf %7, %12 : vector<384x240xf32>
    %14 = vector.extract_strided_slice %0 {offsets = [2, 0, 0], sizes = [24, 16, 28], strides = [1, 1, 1]} : vector<28x16x28xf32> to vector<24x16x28xf32>
    %15 = vector.shape_cast %14 : vector<24x16x28xf32> to vector<384x28xf32>
    %c2 = arith.constant 2 : index
    %c0_9 = arith.constant 0 : index
    %c0_10 = arith.constant 0 : index
    %16 = vector.load %arg1[%c2, %c0_9, %c0_10] : memref<5x28x240xf32, #tpu.memory_space<vmem>>, vector<1x28x240xf32>
    %17 = vector.shape_cast %16 : vector<1x28x240xf32> to vector<28x240xf32>
    %cst_11 = arith.constant dense<0.000000e+00> : vector<384x240xf32>
    %18 = tpu.matmul %15, %17, %cst_11 {dimension_numbers = #tpu.dot_dimension_numbers<[1], [0], [0], [1], [0, 0, 1, 1], [], []>} : vector<384x28xf32>, vector<28x240xf32>, vector<384x240xf32> -> vector<384x240xf32>
    %19 = arith.addf %13, %18 : vector<384x240xf32>
    %20 = vector.extract_strided_slice %0 {offsets = [3, 0, 0], sizes = [24, 16, 28], strides = [1, 1, 1]} : vector<28x16x28xf32> to vector<24x16x28xf32>
    %21 = vector.shape_cast %20 : vector<24x16x28xf32> to vector<384x28xf32>
    %c3 = arith.constant 3 : index
    %c0_12 = arith.constant 0 : index
    %c0_13 = arith.constant 0 : index
    %22 = vector.load %arg1[%c3, %c0_12, %c0_13] : memref<5x28x240xf32, #tpu.memory_space<vmem>>, vector<1x28x240xf32>
    %23 = vector.shape_cast %22 : vector<1x28x240xf32> to vector<28x240xf32>
    %cst_14 = arith.constant dense<0.000000e+00> : vector<384x240xf32>
    %24 = tpu.matmul %21, %23, %cst_14 {dimension_numbers = #tpu.dot_dimension_numbers<[1], [0], [0], [1], [0, 0, 1, 1], [], []>} : vector<384x28xf32>, vector<28x240xf32>, vector<384x240xf32> -> vector<384x240xf32>
    %25 = arith.addf %19, %24 : vector<384x240xf32>
    %26 = vector.extract_strided_slice %0 {offsets = [4, 0, 0], sizes = [24, 16, 28], strides = [1, 1, 1]} : vector<28x16x28xf32> to vector<24x16x28xf32>
    %27 = vector.shape_cast %26 : vector<24x16x28xf32> to vector<384x28xf32>
    %c4 = arith.constant 4 : index
    %c0_15 = arith.constant 0 : index
    %c0_16 = arith.constant 0 : index
    %28 = vector.load %arg1[%c4, %c0_15, %c0_16] : memref<5x28x240xf32, #tpu.memory_space<vmem>>, vector<1x28x240xf32>
    %29 = vector.shape_cast %28 : vector<1x28x240xf32> to vector<28x240xf32>
    %cst_17 = arith.constant dense<0.000000e+00> : vector<384x240xf32>
    %30 = tpu.matmul %27, %29, %cst_17 {dimension_numbers = #tpu.dot_dimension_numbers<[1], [0], [0], [1], [0, 0, 1, 1], [], []>} : vector<384x28xf32>, vector<28x240xf32>, vector<384x240xf32> -> vector<384x240xf32>
    %31 = arith.addf %25, %30 : vector<384x240xf32>
    %c0_18 = arith.constant 0 : index
    %c0_19 = arith.constant 0 : index
    %32 = vector.load %arg2[%c0_18, %c0_19] : memref<1x240xf32, #tpu.memory_space<vmem>>, vector<1x240xf32>
    %33 = vector.broadcast %32 : vector<1x240xf32> to vector<384x240xf32>
    %34 = arith.addf %31, %33 : vector<384x240xf32>
    %cst_20 = arith.constant 0.000000e+00 : f32
    %35 = vector.broadcast %cst_20 : f32 to vector<384x240xf32>
    %36 = arith.maximumf %34, %35 : vector<384x240xf32>
    %37 = vector.shape_cast %36 : vector<384x240xf32> to vector<12x2x16x240xf32>
    %38 = vector.extract_strided_slice %37 {offsets = [0, 0, 0, 0], sizes = [12, 1, 16, 240], strides = [1, 1, 1, 1]} : vector<12x2x16x240xf32> to vector<12x1x16x240xf32>
    %39 = vector.shape_cast %38 : vector<12x1x16x240xf32> to vector<12x16x240xf32>
    %40 = vector.extract_strided_slice %37 {offsets = [0, 1, 0, 0], sizes = [12, 1, 16, 240], strides = [1, 1, 1, 1]} : vector<12x2x16x240xf32> to vector<12x1x16x240xf32>
    %41 = vector.shape_cast %40 : vector<12x1x16x240xf32> to vector<12x16x240xf32>
    %42 = arith.maximumf %39, %41 : vector<12x16x240xf32>
    %43 = vector.extract_strided_slice %42 {offsets = [0, 0, 0], sizes = [12, 16, 120], strides = [1, 1, 1]} : vector<12x16x240xf32> to vector<12x16x120xf32>
    %44 = vector.extract_strided_slice %42 {offsets = [0, 0, 120], sizes = [12, 16, 120], strides = [1, 1, 1]} : vector<12x16x240xf32> to vector<12x16x120xf32>
    %45 = arith.maximumf %43, %44 : vector<12x16x120xf32>
    %cst_21 = arith.constant 0.000000e+00 : f32
    %46 = vector.broadcast %cst_21 : f32 to vector<128x240xf32>
    %47 = vector.extract_strided_slice %45 {offsets = [0, 0, 0], sizes = [8, 16, 120], strides = [1, 1, 1]} : vector<12x16x120xf32> to vector<8x16x120xf32>
    %48 = vector.shape_cast %47 : vector<8x16x120xf32> to vector<128x120xf32>
    %c0_22 = arith.constant 0 : index
    %c0_23 = arith.constant 0 : index
    %c0_24 = arith.constant 0 : index
    %49 = vector.load %arg3[%c0_22, %c0_23, %c0_24] : memref<5x120x240xf32, #tpu.memory_space<vmem>>, vector<1x120x240xf32>
    %50 = vector.shape_cast %49 : vector<1x120x240xf32> to vector<120x240xf32>
    %cst_25 = arith.constant dense<0.000000e+00> : vector<128x240xf32>
    %51 = tpu.matmul %48, %50, %cst_25 {dimension_numbers = #tpu.dot_dimension_numbers<[1], [0], [0], [1], [0, 0, 1, 1], [], []>} : vector<128x120xf32>, vector<120x240xf32>, vector<128x240xf32> -> vector<128x240xf32>
    %52 = arith.addf %46, %51 : vector<128x240xf32>
    %53 = vector.extract_strided_slice %45 {offsets = [1, 0, 0], sizes = [8, 16, 120], strides = [1, 1, 1]} : vector<12x16x120xf32> to vector<8x16x120xf32>
    %54 = vector.shape_cast %53 : vector<8x16x120xf32> to vector<128x120xf32>
    %c1_26 = arith.constant 1 : index
    %c0_27 = arith.constant 0 : index
    %c0_28 = arith.constant 0 : index
    %55 = vector.load %arg3[%c1_26, %c0_27, %c0_28] : memref<5x120x240xf32, #tpu.memory_space<vmem>>, vector<1x120x240xf32>
    %56 = vector.shape_cast %55 : vector<1x120x240xf32> to vector<120x240xf32>
    %cst_29 = arith.constant dense<0.000000e+00> : vector<128x240xf32>
    %57 = tpu.matmul %54, %56, %cst_29 {dimension_numbers = #tpu.dot_dimension_numbers<[1], [0], [0], [1], [0, 0, 1, 1], [], []>} : vector<128x120xf32>, vector<120x240xf32>, vector<128x240xf32> -> vector<128x240xf32>
    %58 = arith.addf %52, %57 : vector<128x240xf32>
    %59 = vector.extract_strided_slice %45 {offsets = [2, 0, 0], sizes = [8, 16, 120], strides = [1, 1, 1]} : vector<12x16x120xf32> to vector<8x16x120xf32>
    %60 = vector.shape_cast %59 : vector<8x16x120xf32> to vector<128x120xf32>
    %c2_30 = arith.constant 2 : index
    %c0_31 = arith.constant 0 : index
    %c0_32 = arith.constant 0 : index
    %61 = vector.load %arg3[%c2_30, %c0_31, %c0_32] : memref<5x120x240xf32, #tpu.memory_space<vmem>>, vector<1x120x240xf32>
    %62 = vector.shape_cast %61 : vector<1x120x240xf32> to vector<120x240xf32>
    %cst_33 = arith.constant dense<0.000000e+00> : vector<128x240xf32>
    %63 = tpu.matmul %60, %62, %cst_33 {dimension_numbers = #tpu.dot_dimension_numbers<[1], [0], [0], [1], [0, 0, 1, 1], [], []>} : vector<128x120xf32>, vector<120x240xf32>, vector<128x240xf32> -> vector<128x240xf32>
    %64 = arith.addf %58, %63 : vector<128x240xf32>
    %65 = vector.extract_strided_slice %45 {offsets = [3, 0, 0], sizes = [8, 16, 120], strides = [1, 1, 1]} : vector<12x16x120xf32> to vector<8x16x120xf32>
    %66 = vector.shape_cast %65 : vector<8x16x120xf32> to vector<128x120xf32>
    %c3_34 = arith.constant 3 : index
    %c0_35 = arith.constant 0 : index
    %c0_36 = arith.constant 0 : index
    %67 = vector.load %arg3[%c3_34, %c0_35, %c0_36] : memref<5x120x240xf32, #tpu.memory_space<vmem>>, vector<1x120x240xf32>
    %68 = vector.shape_cast %67 : vector<1x120x240xf32> to vector<120x240xf32>
    %cst_37 = arith.constant dense<0.000000e+00> : vector<128x240xf32>
    %69 = tpu.matmul %66, %68, %cst_37 {dimension_numbers = #tpu.dot_dimension_numbers<[1], [0], [0], [1], [0, 0, 1, 1], [], []>} : vector<128x120xf32>, vector<120x240xf32>, vector<128x240xf32> -> vector<128x240xf32>
    %70 = arith.addf %64, %69 : vector<128x240xf32>
    %71 = vector.extract_strided_slice %45 {offsets = [4, 0, 0], sizes = [8, 16, 120], strides = [1, 1, 1]} : vector<12x16x120xf32> to vector<8x16x120xf32>
    %72 = vector.shape_cast %71 : vector<8x16x120xf32> to vector<128x120xf32>
    %c4_38 = arith.constant 4 : index
    %c0_39 = arith.constant 0 : index
    %c0_40 = arith.constant 0 : index
    %73 = vector.load %arg3[%c4_38, %c0_39, %c0_40] : memref<5x120x240xf32, #tpu.memory_space<vmem>>, vector<1x120x240xf32>
    %74 = vector.shape_cast %73 : vector<1x120x240xf32> to vector<120x240xf32>
    %cst_41 = arith.constant dense<0.000000e+00> : vector<128x240xf32>
    %75 = tpu.matmul %72, %74, %cst_41 {dimension_numbers = #tpu.dot_dimension_numbers<[1], [0], [0], [1], [0, 0, 1, 1], [], []>} : vector<128x120xf32>, vector<120x240xf32>, vector<128x240xf32> -> vector<128x240xf32>
    %76 = arith.addf %70, %75 : vector<128x240xf32>
    %c0_42 = arith.constant 0 : index
    %c0_43 = arith.constant 0 : index
    %77 = vector.load %arg4[%c0_42, %c0_43] : memref<1x240xf32, #tpu.memory_space<vmem>>, vector<1x240xf32>
    %78 = vector.broadcast %77 : vector<1x240xf32> to vector<128x240xf32>
    %79 = arith.addf %76, %78 : vector<128x240xf32>
    %cst_44 = arith.constant 0.000000e+00 : f32
    %80 = vector.broadcast %cst_44 : f32 to vector<128x240xf32>
    %81 = arith.maximumf %79, %80 : vector<128x240xf32>
    %82 = vector.shape_cast %81 : vector<128x240xf32> to vector<4x2x16x240xf32>
    %83 = vector.extract_strided_slice %82 {offsets = [0, 0, 0, 0], sizes = [4, 1, 16, 240], strides = [1, 1, 1, 1]} : vector<4x2x16x240xf32> to vector<4x1x16x240xf32>
    %84 = vector.shape_cast %83 : vector<4x1x16x240xf32> to vector<4x16x240xf32>
    %85 = vector.extract_strided_slice %82 {offsets = [0, 1, 0, 0], sizes = [4, 1, 16, 240], strides = [1, 1, 1, 1]} : vector<4x2x16x240xf32> to vector<4x1x16x240xf32>
    %86 = vector.shape_cast %85 : vector<4x1x16x240xf32> to vector<4x16x240xf32>
    %87 = arith.maximumf %84, %86 : vector<4x16x240xf32>
    %88 = vector.extract_strided_slice %87 {offsets = [0, 0, 0], sizes = [4, 16, 120], strides = [1, 1, 1]} : vector<4x16x240xf32> to vector<4x16x120xf32>
    %89 = vector.extract_strided_slice %87 {offsets = [0, 0, 120], sizes = [4, 16, 120], strides = [1, 1, 1]} : vector<4x16x240xf32> to vector<4x16x120xf32>
    %90 = arith.maximumf %88, %89 : vector<4x16x120xf32>
    tpu.wait_dma2 semaphore(%arg11 : memref<!tpu.dma_semaphore, #tpu.memory_space<semaphore_mem>>) src(%arg8 : memref<4x120x1000xf32, #tpu.memory_space<any>>) dst(%arg10 : memref<4x120x1000xf32, #tpu.memory_space<vmem>>)
    %cst_45 = arith.constant 0.000000e+00 : f32
    %91 = vector.broadcast %cst_45 : f32 to vector<16x1000xf32>
    %92 = vector.extract_strided_slice %90 {offsets = [0, 0, 0], sizes = [1, 16, 120], strides = [1, 1, 1]} : vector<4x16x120xf32> to vector<1x16x120xf32>
    %93 = vector.shape_cast %92 : vector<1x16x120xf32> to vector<16x120xf32>
    %c0_46 = arith.constant 0 : index
    %c0_47 = arith.constant 0 : index
    %c0_48 = arith.constant 0 : index
    %94 = vector.load %arg10[%c0_46, %c0_47, %c0_48] : memref<4x120x1000xf32, #tpu.memory_space<vmem>>, vector<1x120x1000xf32>
    %95 = vector.shape_cast %94 : vector<1x120x1000xf32> to vector<120x1000xf32>
    %cst_49 = arith.constant dense<0.000000e+00> : vector<16x1000xf32>
    %96 = tpu.matmul %93, %95, %cst_49 {dimension_numbers = #tpu.dot_dimension_numbers<[1], [0], [0], [1], [0, 0, 1, 1], [], []>} : vector<16x120xf32>, vector<120x1000xf32>, vector<16x1000xf32> -> vector<16x1000xf32>
    %97 = arith.addf %91, %96 : vector<16x1000xf32>
    %98 = vector.extract_strided_slice %90 {offsets = [1, 0, 0], sizes = [1, 16, 120], strides = [1, 1, 1]} : vector<4x16x120xf32> to vector<1x16x120xf32>
    %99 = vector.shape_cast %98 : vector<1x16x120xf32> to vector<16x120xf32>
    %c1_50 = arith.constant 1 : index
    %c0_51 = arith.constant 0 : index
    %c0_52 = arith.constant 0 : index
    %100 = vector.load %arg10[%c1_50, %c0_51, %c0_52] : memref<4x120x1000xf32, #tpu.memory_space<vmem>>, vector<1x120x1000xf32>
    %101 = vector.shape_cast %100 : vector<1x120x1000xf32> to vector<120x1000xf32>
    %cst_53 = arith.constant dense<0.000000e+00> : vector<16x1000xf32>
    %102 = tpu.matmul %99, %101, %cst_53 {dimension_numbers = #tpu.dot_dimension_numbers<[1], [0], [0], [1], [0, 0, 1, 1], [], []>} : vector<16x120xf32>, vector<120x1000xf32>, vector<16x1000xf32> -> vector<16x1000xf32>
    %103 = arith.addf %97, %102 : vector<16x1000xf32>
    %104 = vector.extract_strided_slice %90 {offsets = [2, 0, 0], sizes = [1, 16, 120], strides = [1, 1, 1]} : vector<4x16x120xf32> to vector<1x16x120xf32>
    %105 = vector.shape_cast %104 : vector<1x16x120xf32> to vector<16x120xf32>
    %c2_54 = arith.constant 2 : index
    %c0_55 = arith.constant 0 : index
    %c0_56 = arith.constant 0 : index
    %106 = vector.load %arg10[%c2_54, %c0_55, %c0_56] : memref<4x120x1000xf32, #tpu.memory_space<vmem>>, vector<1x120x1000xf32>
    %107 = vector.shape_cast %106 : vector<1x120x1000xf32> to vector<120x1000xf32>
    %cst_57 = arith.constant dense<0.000000e+00> : vector<16x1000xf32>
    %108 = tpu.matmul %105, %107, %cst_57 {dimension_numbers = #tpu.dot_dimension_numbers<[1], [0], [0], [1], [0, 0, 1, 1], [], []>} : vector<16x120xf32>, vector<120x1000xf32>, vector<16x1000xf32> -> vector<16x1000xf32>
    %109 = arith.addf %103, %108 : vector<16x1000xf32>
    %110 = vector.extract_strided_slice %90 {offsets = [3, 0, 0], sizes = [1, 16, 120], strides = [1, 1, 1]} : vector<4x16x120xf32> to vector<1x16x120xf32>
    %111 = vector.shape_cast %110 : vector<1x16x120xf32> to vector<16x120xf32>
    %c3_58 = arith.constant 3 : index
    %c0_59 = arith.constant 0 : index
    %c0_60 = arith.constant 0 : index
    %112 = vector.load %arg10[%c3_58, %c0_59, %c0_60] : memref<4x120x1000xf32, #tpu.memory_space<vmem>>, vector<1x120x1000xf32>
    %113 = vector.shape_cast %112 : vector<1x120x1000xf32> to vector<120x1000xf32>
    %cst_61 = arith.constant dense<0.000000e+00> : vector<16x1000xf32>
    %114 = tpu.matmul %111, %113, %cst_61 {dimension_numbers = #tpu.dot_dimension_numbers<[1], [0], [0], [1], [0, 0, 1, 1], [], []>} : vector<16x120xf32>, vector<120x1000xf32>, vector<16x1000xf32> -> vector<16x1000xf32>
    %115 = arith.addf %109, %114 : vector<16x1000xf32>
    %c0_62 = arith.constant 0 : index
    %c0_63 = arith.constant 0 : index
    %116 = vector.load %arg5[%c0_62, %c0_63] : memref<1x1000xf32, #tpu.memory_space<vmem>>, vector<1x1000xf32>
    %117 = vector.broadcast %116 : vector<1x1000xf32> to vector<16x1000xf32>
    %118 = arith.addf %115, %117 : vector<16x1000xf32>
    %cst_64 = arith.constant 0.000000e+00 : f32
    %119 = vector.broadcast %cst_64 : f32 to vector<16x1000xf32>
    %120 = arith.maximumf %118, %119 : vector<16x1000xf32>
    %c0_65 = arith.constant 0 : index
    %c0_66 = arith.constant 0 : index
    %121 = vector.load %arg6[%c0_65, %c0_66] : memref<1000x10xf32, #tpu.memory_space<vmem>>, vector<1000x10xf32>
    %cst_67 = arith.constant dense<0.000000e+00> : vector<16x10xf32>
    %122 = tpu.matmul %120, %121, %cst_67 {dimension_numbers = #tpu.dot_dimension_numbers<[1], [0], [0], [1], [0, 0, 1, 1], [], []>} : vector<16x1000xf32>, vector<1000x10xf32>, vector<16x10xf32> -> vector<16x10xf32>
    %c0_68 = arith.constant 0 : index
    %c0_69 = arith.constant 0 : index
    %123 = vector.load %arg7[%c0_68, %c0_69] : memref<1x10xf32, #tpu.memory_space<vmem>>, vector<1x10xf32>
    %124 = vector.broadcast %123 : vector<1x10xf32> to vector<16x10xf32>
    %125 = arith.addf %122, %124 : vector<16x10xf32>
    %c0_70 = arith.constant 0 : index
    %c0_71 = arith.constant 0 : index
    %126 = vector.load %arg9[%c0_70, %c0_71] : memref<16x10xf32, #tpu.memory_space<vmem>>, vector<16x10xf32>
    tpu.vector_store %arg9[%c0_70, %c0_71], %125 {strides = array<i32>} : memref<16x10xf32, #tpu.memory_space<vmem>>, vector<16x10xf32>,
    return
  }
}

</mosaic_0001>

<bundles_post_ra>
// kernel: tile.13
= control target key start
LH: loop header
LB: loop body
LE: loop exit
PB: predicated region body
PF: predicated region fallthrough
CT: control target
= control target key end

     0   :  { %s34_s0 = inlined_call_operand.vmem [shape: f32[10], index: 0, kind: input, shape index: {}]   ;;  %s35_s1 = inlined_call_operand.vmem [shape: f32[24,10], index: 1, kind: output, shape index: {}]  }
   0x1   :  { %v4_v0 = vld [vmem:[%s34_s0] ss:$0 sm:$0xff] }
   0x2   :  { %5 = vst [vmem:[%s35_s1] sm:$0xff] %v4_v0 }
   0x3   :  { %10 = vst [vmem:[%s35_s1 + $0x8] sm:$0xff] %v4_v0 }
   0x4   :  { %11 = vst [vmem:[%s35_s1 + $0x10] sm:$0xff] %v4_v0 }

// kernel: tile.14
= control target key start
LH: loop header
LB: loop body
LE: loop exit
PB: predicated region body
PF: predicated region fallthrough
CT: control target
= control target key end

     0   :  { %vm9_vm0 = vcmask 64512   ;;  %s221_s10 = smov 102   ;;  %s222_s13 = smov 120   ;;  %vm3_vm1 = vcmask 80896   ;;  %vm13_vm2 = vcmask 15360   ;;  %vm16_vm3 = vcmask 1048512   ;;  %s335_s0 = inlined_call_operand.vmem [shape: f32[24,10], index: 0, kind: input, shape index: {}]   ;;  %s336_s1 = inlined_call_operand.vmem [shape: f32[1,240], index: 1, kind: output, shape index: {}]  }
   0x1   :  { %v176_v0 = vld [vmem:[%s335_s0 + $0x17] sm:$0x1]   ;;  %v173_v1 = vld [vmem:[%s335_s0 + $0xc] sm:$0x1]   ;;  %v178_v4 = vld [vmem:[%s335_s0 + $0x16] sm:$0x1]  }
   0x2   :  { %26 = vrot.lane.b32.xlu1 %v176_v0, %s221_s10  ;;  %v174_v2 = vld [vmem:[%s335_s0 + $0xc] sm:$0x1]   ;;  %s223_s16 = smov 92   ;;  %v177_v5 = vld [vmem:[%s335_s0 + $0xa] sm:$0x1]   ;;  %s224_s21 = smov 100  }
   0x3   :  { %v10_v3 = vsel %vm9_vm0, %v174_v2, %v173_v1  ;;  %39 = vrot.lane.b32.xlu2 %v178_v4, %s223_s16  ;;  %v175_v6 = vld [vmem:[%s335_s0 + $0xb] sm:$0x1]   ;;  %v179_v7 = vld [vmem:[%s335_s0 + $0x9] sm:$0x1]   ;;  %s225_s24 = smov 110   ;;  %s226_s25 = smov 90  }
   0x4   :  { %11 = vrot.lane.b32.xlu0 %v10_v3, %s222_s13  ;;  %v181_v8 = vld [vmem:[%s335_s0 + $0x8] sm:$0x1]   ;;  %v180_v9 = vld [vmem:[%s335_s0 + $0x15] sm:$0x1]   ;;  %s227_s30 = smov 80   ;;  %s228_s4 = smov 82  }
   0x5   :  { %v182_v10 = vld [vmem:[%s335_s0 + $0x14] sm:$0x1]   ;;  %s229_s5 = smov 72   ;;  %v184_v11 = vld [vmem:[%s335_s0 + $0x13] sm:$0x1]   ;;  %s230_s10 = smov 62  }
   0x6   :  { %v183_v12 = vld [vmem:[%s335_s0 + $0x7] sm:$0x1]   ;;  %v185_v13 = vld [vmem:[%s335_s0 + $0x6] sm:$0x1]   ;;  %s231_s13 = smov 70   ;;  %s232_s14 = smov 60  }
   0x7   :  { %v187_v14 = vld [vmem:[%s335_s0 + $0x5] sm:$0x1]   ;;  %v186_v15 = vld [vmem:[%s335_s0 + $0x12] sm:$0x1]   ;;  %s233_s19 = smov 50   ;;  %s234_s22 = smov 52  }
   0x8   :  { %v188_v16 = vld [vmem:[%s335_s0 + $0x11] sm:$0x1]   ;;  %s235_s23 = smov 42   ;;  %v190_v17 = vld [vmem:[%s335_s0 + $0x10] sm:$0x1]   ;;  %s236_s28 = smov 32  }
   0x9   :  { %v189_v18 = vld [vmem:[%s335_s0 + $0x4] sm:$0x1]   ;;  %v191_v19 = vld [vmem:[%s335_s0 + $0x3] sm:$0x1]   ;;  %s237_s2 = smov 40   ;;  %s238_s3 = smov 30  }
   0xa   :  { %33 = vrot.lane.b32.xlu1 %v177_v5, %s224_s21  ;;  %v193_v20 = vld [vmem:[%s335_s0 + $0x2] sm:$0x1]   ;;  %v192_v21 = vld [vmem:[%s335_s0 + $0xf] sm:$0x1]   ;;  %s239_s8 = smov 20   ;;  %s240_s11 = smov 22  }
   0xb   :  { %46 = vrot.lane.b32.xlu2 %v179_v7, %s226_s25  ;;  %v194_v22 = vld [vmem:[%s335_s0 + $0xe] sm:$0x1]   ;;  %s241_s12 = smov 12   ;;  %v196_v23 = vld [vmem:[%s335_s0 + $0xd] sm:$0x1]   ;;  %s242_s17 = smov 2  }
   0xc   :  { %20 = vrot.lane.b32.xlu0 %v175_v6, %s225_s24  ;;  %v195_v24 = vld [vmem:[%s335_s0 + $0x1] sm:$0x1]   ;;  %s243_s18 = smov 10   ;;  %v2_v25 = vld [vmem:[%s335_s0] sm:$0x1]   ;;  %vm28_vm4 = vcmask 917296  }
   0xd   :  { %4 = vst.msk [vmem:[#allocation0] sm:$0x1] %vm3_vm1, %v2_v25   ;;  %vm41_vm5 = vcmask 835296   ;;  %vm22_vm6 = vcmask 982896   ;;  %vm35_vm7 = vcmask 900896   ;;  %vm48_vm8 = vcmask 818896  }
   0xe   :  { %vm61_vm9 = vcmask 736896   ;;  %vm54_vm10 = vcmask 753296   ;;  %vm67_vm11 = vcmask 671296   ;;  %vm80_vm12 = vcmask 589296  }
   0xf   :  { %vm74_vm13 = vcmask 654896   ;;  %vm87_vm14 = vcmask 572896   ;;  %vm100_vm15 = vcmask 490896   ;;  %vm93_vm0 = vcmask 507296  }
  0x10   :  { %vm106_vm1 = vcmask 425296  }
  0x12   :  { %59 = vrot.lane.b32.xlu1 %v181_v8, %s227_s30 }
  0x13   :  { %65 = vrot.lane.b32.xlu2 %v182_v10, %s229_s5 }
  0x14   :  { %52 = vrot.lane.b32.xlu0 %v180_v9, %s228_s4 }
  0x1a   :  { %78 = vrot.lane.b32.xlu1 %v184_v11, %s230_s10 }
  0x1b   :  { %85 = vrot.lane.b32.xlu2 %v185_v13, %s232_s14 }
  0x1c   :  { %72 = vrot.lane.b32.xlu0 %v183_v12, %s231_s13 }
  0x22   :  { %98 = vrot.lane.b32.xlu1 %v187_v14, %s233_s19 }
  0x23   :  { %104 = vrot.lane.b32.xlu2 %v188_v16, %s235_s23 }
  0x24   :  { %91 = vrot.lane.b32.xlu0 %v186_v15, %s234_s22 }
  0x2a   :  { %117 = vrot.lane.b32.xlu1 %v190_v17, %s236_s28 }
  0x2b   :  { %124 = vrot.lane.b32.xlu2 %v191_v19, %s238_s3 }
  0x2c   :  { %111 = vrot.lane.b32.xlu0 %v189_v18, %s237_s2 }
  0x32   :  { %137 = vrot.lane.b32.xlu1 %v193_v20, %s239_s8 }
  0x33   :  { %143 = vrot.lane.b32.xlu2 %v194_v22, %s241_s12 }
  0x34   :  { %130 = vrot.lane.b32.xlu0 %v192_v21, %s240_s11 }
  0x3a   :  { %156 = vrot.lane.b32.xlu1 %v196_v23, %s242_s17 }
  0x3c   :  { %150 = vrot.lane.b32.xlu0 %v195_v24, %s243_s18 }
  0x5d   :  { %v40_v26 = vpop.permute.xlu2 %39  }
  0x65   :  { %v47_v27 = vpop.permute.xlu2 %46  }
  0x6d   :  { %v66_v28 = vpop.permute.xlu2 %65  }
  0x74   :  { %v27_v29 = vpop.permute.xlu1 %26  }
  0x75   :  { %v86_v31 = vpop.permute.xlu2 %85  }
  0x76   :  { %v12_v30 = vpop.permute.xlu0 %11  }
  0x77   :  { %15 = vst.msk [vmem:[#allocation0 + $0x8] sm:$0x1] %vm13_vm2, %v12_v30   ;;  %vm119_vm2 = vcmask 343296  }
  0x78   :  { %17 = vst.msk [vmem:[#allocation0] sm:$0x1] %vm16_vm3, %v12_v30   ;;  %vm113_vm3 = vcmask 408896  }
  0x79   :  { %30 = vst.msk [vmem:[#allocation0 + $0x8] sm:$0x1] %vm28_vm4, %v27_v29   ;;  %vm126_vm4 = vcmask 326896  }
  0x7a   :  { %43 = vst.msk [vmem:[#allocation0 + $0x8] sm:$0x1] %vm41_vm5, %v40_v26   ;;  %vm139_vm5 = vcmask 244896  }
  0x7c   :  { %v34_v32 = vpop.permute.xlu1 %33  }
  0x7d   :  { %v105_v34 = vpop.permute.xlu2 %104  }
  0x7e   :  { %v21_v33 = vpop.permute.xlu0 %20  }
  0x7f   :  { %23 = vst.msk [vmem:[#allocation0] sm:$0x1] %vm22_vm6, %v21_v33   ;;  %vm132_vm6 = vcmask 261296  }
  0x80   :  { %36 = vst.msk [vmem:[#allocation0] sm:$0x1] %vm35_vm7, %v34_v32   ;;  %vm145_vm7 = vcmask 179296  }
  0x81   :  { %49 = vst.msk [vmem:[#allocation0] sm:$0x1] %vm48_vm8, %v47_v27   ;;  %vm158_vm8 = vcmask 97296  }
  0x84   :  { %v60_v35 = vpop.permute.xlu1 %59  }
  0x85   :  { %62 = vst.msk [vmem:[#allocation0] sm:$0x1] %vm61_vm9, %v60_v35   ;;  %v125_v37 = vpop.permute.xlu2 %124   ;;  %vm152_vm9 = vcmask 162896  }
  0x86   :  { %v53_v36 = vpop.permute.xlu0 %52  }
  0x87   :  { %56 = vst.msk [vmem:[#allocation0 + $0x8] sm:$0x1] %vm54_vm10, %v53_v36  }
  0x88   :  { %69 = vst.msk [vmem:[#allocation0 + $0x8] sm:$0x1] %vm67_vm11, %v66_v28  }
  0x8c   :  { %v79_v38 = vpop.permute.xlu1 %78  }
  0x8d   :  { %82 = vst.msk [vmem:[#allocation0 + $0x8] sm:$0x1] %vm80_vm12, %v79_v38   ;;  %v144_v40 = vpop.permute.xlu2 %143  }
  0x8e   :  { %v73_v39 = vpop.permute.xlu0 %72  }
  0x8f   :  { %75 = vst.msk [vmem:[#allocation0] sm:$0x1] %vm74_vm13, %v73_v39  }
  0x90   :  { %88 = vst.msk [vmem:[#allocation0] sm:$0x1] %vm87_vm14, %v86_v31  }
  0x94   :  { %v99_v41 = vpop.permute.xlu1 %98  }
  0x95   :  { %101 = vst.msk [vmem:[#allocation0] sm:$0x1] %vm100_vm15, %v99_v41  }
  0x96   :  { %v92_v42 = vpop.permute.xlu0 %91  }
  0x97   :  { %95 = vst.msk [vmem:[#allocation0 + $0x8] sm:$0x1] %vm93_vm0, %v92_v42  }
  0x98   :  { %108 = vst.msk [vmem:[#allocation0 + $0x8] sm:$0x1] %vm106_vm1, %v105_v34  }
  0x9c   :  { %v118_v43 = vpop.permute.xlu1 %117  }
  0x9d   :  { %121 = vst.msk [vmem:[#allocation0 + $0x8] sm:$0x1] %vm119_vm2, %v118_v43  }
  0x9e   :  { %v112_v44 = vpop.permute.xlu0 %111  }
  0x9f   :  { %114 = vst.msk [vmem:[#allocation0] sm:$0x1] %vm113_vm3, %v112_v44  }
  0xa0   :  { %127 = vst.msk [vmem:[#allocation0] sm:$0x1] %vm126_vm4, %v125_v37  }
  0xa4   :  { %v138_v45 = vpop.permute.xlu1 %137  }
  0xa5   :  { %140 = vst.msk [vmem:[#allocation0] sm:$0x1] %vm139_vm5, %v138_v45  }
  0xa6   :  { %v131_v46 = vpop.permute.xlu0 %130  }
  0xa7   :  { %134 = vst.msk [vmem:[#allocation0 + $0x8] sm:$0x1] %vm132_vm6, %v131_v46  }
  0xa8   :  { %147 = vst.msk [vmem:[#allocation0 + $0x8] sm:$0x1] %vm145_vm7, %v144_v40  }
  0xac   :  { %v157_v47 = vpop.permute.xlu1 %156  }
  0xad   :  { %160 = vst.msk [vmem:[#allocation0 + $0x8] sm:$0x1] %vm158_vm8, %v157_v47  }
  0xae   :  { %v151_v48 = vpop.permute.xlu0 %150  }
  0xaf   :  { %153 = vst.msk [vmem:[#allocation0] sm:$0x1] %vm152_vm9, %v151_v48  }
  0xb4   :  { %v168_v49 = vld [vmem:[#allocation0 + $0x8] sm:$0x1] }
  0xb5   :  { %197 = vst [vmem:[%s336_s1 + $0x1] sm:$0x1] %v168_v49 }
  0xb6   :  { %v163_v50 = vld [vmem:[#allocation0] sm:$0x1] }
  0xb7   :  { %166 = vst [vmem:[%s336_s1] sm:$0x1] %v163_v50 }

// kernel: tile.18
= control target key start
LH: loop header
LB: loop body
LE: loop exit
PB: predicated region body
PF: predicated region fallthrough
CT: control target
= control target key end

     0   :  { %s22_s0 = inlined_call_operand.vmem [shape: f32[30], index: 0, kind: input, shape index: {}]   ;;  %s23_s1 = inlined_call_operand.vmem [shape: f32[8,30], index: 1, kind: output, shape index: {}]  }
   0x1   :  { %v4_v0 = vld [vmem:[%s22_s0] ss:$0 sm:$0xff] }
   0x2   :  { %5 = vst [vmem:[%s23_s1] sm:$0xff] %v4_v0 }

// kernel: tile.19
= control target key start
LH: loop header
LB: loop body
LE: loop exit
PB: predicated region body
PF: predicated region fallthrough
CT: control target
= control target key end

     0   :  { %vm9_vm0 = vcmask 64512   ;;  %s85_s12 = smov 120   ;;  %s86_s13 = smov 82   ;;  %vm3_vm1 = vcmask 244736   ;;  %vm13_vm2 = vcmask 179200   ;;  %vm16_vm3 = vcmask 1048512   ;;  %s135_s0 = inlined_call_operand.vmem [shape: f32[8,30], index: 0, kind: input, shape index: {}]   ;;  %s136_s1 = inlined_call_operand.vmem [shape: f32[1,240], index: 1, kind: output, shape index: {}]  }
   0x1   :  { %v69_v0 = vld [vmem:[%s135_s0 + $0x4] sm:$0x1]   ;;  %v72_v3 = vld [vmem:[%s135_s0 + $0x7] sm:$0x1]   ;;  %v74_v4 = vld [vmem:[%s135_s0 + $0x6] sm:$0x1]  }
   0x2   :  { %v70_v1 = vld [vmem:[%s135_s0 + $0x4] sm:$0x1]   ;;  %26 = vrot.lane.b32.xlu1 %v72_v3, %s86_s13  ;;  %s87_s16 = smov 52   ;;  %v71_v5 = vld [vmem:[%s135_s0 + $0x3] sm:$0x1]   ;;  %s88_s23 = smov 90  }
   0x3   :  { %v10_v2 = vsel %vm9_vm0, %v70_v1, %v69_v0  ;;  %39 = vrot.lane.b32.xlu2 %v74_v4, %s87_s16  ;;  %v73_v6 = vld [vmem:[%s135_s0 + $0x2] sm:$0x1]   ;;  %v75_v7 = vld [vmem:[%s135_s0 + $0x1] sm:$0x1]   ;;  %s89_s24 = smov 60   ;;  %s90_s25 = smov 30  }
   0x4   :  { %11 = vrot.lane.b32.xlu0 %v10_v2, %s85_s12  ;;  %v76_v8 = vld [vmem:[%s135_s0 + $0x5] sm:$0x1]   ;;  %s91_s28 = smov 22   ;;  %v2_v9 = vld [vmem:[%s135_s0] sm:$0x1]   ;;  %vm28_vm4 = vcmask 917136  }
   0x5   :  { %4 = vst.msk [vmem:[#allocation0] sm:$0x1] %vm3_vm1, %v2_v9   ;;  %vm41_vm5 = vcmask 671136   ;;  %vm22_vm6 = vcmask 982736   ;;  %vm35_vm7 = vcmask 736736   ;;  %vm48_vm8 = vcmask 490736  }
   0x6   :  { %vm54_vm9 = vcmask 425136  }
   0xa   :  { %33 = vrot.lane.b32.xlu1 %v73_v6, %s89_s24 }
   0xb   :  { %46 = vrot.lane.b32.xlu2 %v75_v7, %s90_s25 }
   0xc   :  { %20 = vrot.lane.b32.xlu0 %v71_v5, %s88_s23 }
  0x14   :  { %52 = vrot.lane.b32.xlu0 %v76_v8, %s91_s28 }
  0x5d   :  { %v40_v10 = vpop.permute.xlu2 %39  }
  0x65   :  { %v47_v11 = vpop.permute.xlu2 %46  }
  0x74   :  { %v27_v13 = vpop.permute.xlu1 %26  }
  0x76   :  { %v12_v12 = vpop.permute.xlu0 %11  }
  0x77   :  { %15 = vst.msk [vmem:[#allocation0 + $0x8] sm:$0x1] %vm13_vm2, %v12_v12  }
  0x78   :  { %17 = vst.msk [vmem:[#allocation0] sm:$0x1] %vm16_vm3, %v12_v12  }
  0x79   :  { %30 = vst.msk [vmem:[#allocation0 + $0x8] sm:$0x1] %vm28_vm4, %v27_v13  }
  0x7a   :  { %43 = vst.msk [vmem:[#allocation0 + $0x8] sm:$0x1] %vm41_vm5, %v40_v10  }
  0x7c   :  { %v34_v15 = vpop.permute.xlu1 %33  }
  0x7e   :  { %v21_v14 = vpop.permute.xlu0 %20  }
  0x7f   :  { %23 = vst.msk [vmem:[#allocation0] sm:$0x1] %vm22_vm6, %v21_v14  }
  0x80   :  { %36 = vst.msk [vmem:[#allocation0] sm:$0x1] %vm35_vm7, %v34_v15  }
  0x81   :  { %49 = vst.msk [vmem:[#allocation0] sm:$0x1] %vm48_vm8, %v47_v11  }
  0x86   :  { %v53_v16 = vpop.permute.xlu0 %52  }
  0x87   :  { %56 = vst.msk [vmem:[#allocation0 + $0x8] sm:$0x1] %vm54_vm9, %v53_v16  }
  0x88   :  { %v59_v17 = vld [vmem:[#allocation0] sm:$0x1] }
  0x89   :  { %62 = vst [vmem:[%s136_s1] sm:$0x1] %v59_v17 }
  0x8e   :  { %v64_v18 = vld [vmem:[#allocation0 + $0x8] sm:$0x1] }
  0x8f   :  { %77 = vst [vmem:[%s136_s1 + $0x1] sm:$0x1] %v64_v18 }

// kernel: net2_forward_pallas.1
= control target key start
LH: loop header
LB: loop body
LE: loop exit
PB: predicated region body
PF: predicated region fallthrough
CT: control target
= control target key end

     0   :  { %14 = vsyncpa [#allocation5], 0  ;;  %s14591_s0 = inlined_call_operand.vmem [shape: f32[28,16,28], index: 0, kind: input, shape index: {}]   ;;  %s14592_s1 = inlined_call_operand.vmem [shape: f32[5,28,240], index: 1, kind: input, shape index: {}]   ;;  %s14593_s2 = inlined_call_operand.vmem [shape: f32[1,240], index: 2, kind: input, shape index: {}]   ;;  %s14594_s3 = inlined_call_operand.vmem [shape: f32[5,120,240], index: 3, kind: input, shape index: {}]   ;;  %s14595_s4 = inlined_call_operand.vmem [shape: f32[1,240], index: 4, kind: input, shape index: {}]   ;;  %s14596_s5 = inlined_call_operand.vmem [shape: f32[1,1000], index: 5, kind: input, shape index: {}]   ;;  %s14597_s6 = inlined_call_operand.vmem [shape: f32[1000,10], index: 6, kind: input, shape index: {}]   ;;  %s14598_s7 = inlined_call_operand.vmem [shape: f32[1,10], index: 7, kind: input, shape index: {}]   ;;  %s14599_s8 = inlined_call_operand.vmem [shape: f32[4,120,1000], index: 8, kind: input, shape index: {}]   ;;  %s14600_s9 = inlined_call_operand.hbm [shape: f32[16,10], index: 9, kind: output, shape index: {}]  }
   0x1   :  { %v7483_v0 = vld [vmem:[%s14599_s8] sm:$0xff]  ;;  %v7488_v1 = vld [vmem:[%s14599_s8 + $0x8] sm:$0xff]  ;;  %v7493_v2 = vld [vmem:[%s14599_s8 + $0x10] sm:$0xff] }
   0x2   :  { %14619 = vst [vmem:[#allocation9_spill] sm:$0xff] %v7483_v0  ;;  %v7498_v3 = vld [vmem:[%s14599_s8 + $0x18] sm:$0xff]  ;;  %v7503_v4 = vld [vmem:[%s14599_s8 + $0x20] sm:$0xff]  ;;  %v7508_v5 = vld [vmem:[%s14599_s8 + $0x28] sm:$0xff] }
   0x3   :  { %14620 = vst [vmem:[#allocation10_spill] sm:$0xff] %v7488_v1  ;;  %v7513_v6 = vld [vmem:[%s14599_s8 + $0x30] sm:$0xff]  ;;  %v7518_v7 = vld [vmem:[%s14599_s8 + $0x38] sm:$0xff]  ;;  %v7523_v8 = vld [vmem:[%s14599_s8 + $0x40] sm:$0xff] }
   0x4   :  { %14621 = vst [vmem:[#allocation11_spill] sm:$0xff] %v7493_v2  ;;  %v7528_v9 = vld [vmem:[%s14599_s8 + $0x48] sm:$0xff]  ;;  %v7533_v10 = vld [vmem:[%s14599_s8 + $0x50] sm:$0xff]  ;;  %v7538_v11 = vld [vmem:[%s14599_s8 + $0x58] sm:$0xff] }
   0x5   :  { %14622 = vst [vmem:[#allocation12_spill] sm:$0xff] %v7498_v3  ;;  %v7543_v12 = vld [vmem:[%s14599_s8 + $0x60] sm:$0xff]  ;;  %v7548_v13 = vld [vmem:[%s14599_s8 + $0x68] sm:$0xff]  ;;  %v7553_v14 = vld [vmem:[%s14599_s8 + $0x70] sm:$0xff] }
   0x6   :  { %14623 = vst [vmem:[#allocation13_spill] sm:$0xff] %v7503_v4  ;;  %v7558_v15 = vld [vmem:[%s14599_s8 + $0x78] sm:$0xff]  ;;  %v7563_v16 = vld [vmem:[%s14599_s8 + $0x80] sm:$0xff]  ;;  %v7568_v17 = vld [vmem:[%s14599_s8 + $0x88] sm:$0xff] }
   0x7   :  { %14624 = vst [vmem:[#allocation14_spill] sm:$0xff] %v7508_v5  ;;  %v7573_v18 = vld [vmem:[%s14599_s8 + $0x90] sm:$0xff]  ;;  %v7578_v19 = vld [vmem:[%s14599_s8 + $0x98] sm:$0xff]  ;;  %v7583_v20 = vld [vmem:[%s14599_s8 + $0xa0] sm:$0xff] }
   0x8   :  { %14625 = vst [vmem:[#allocation15_spill] sm:$0xff] %v7513_v6  ;;  %v7588_v21 = vld [vmem:[%s14599_s8 + $0xa8] sm:$0xff]  ;;  %v7593_v22 = vld [vmem:[%s14599_s8 + $0xb0] sm:$0xff]  ;;  %v7598_v23 = vld [vmem:[%s14599_s8 + $0xb8] sm:$0xff] }
   0x9   :  { %14626 = vst [vmem:[#allocation16_spill] sm:$0xff] %v7518_v7  ;;  %v7603_v24 = vld [vmem:[%s14599_s8 + $0xc0] sm:$0xff]  ;;  %v7608_v25 = vld [vmem:[%s14599_s8 + $0xc8] sm:$0xff]  ;;  %v7613_v26 = vld [vmem:[%s14599_s8 + $0xd0] sm:$0xff] }
   0xa   :  { %14627 = vst [vmem:[#allocation17_spill] sm:$0xff] %v7523_v8  ;;  %v7618_v27 = vld [vmem:[%s14599_s8 + $0xd8] sm:$0xff]  ;;  %v7623_v28 = vld [vmem:[%s14599_s8 + $0xe0] sm:$0xff]  ;;  %v7628_v29 = vld [vmem:[%s14599_s8 + $0xe8] sm:$0xff] }
   0xb   :  { %14628 = vst [vmem:[#allocation18_spill] sm:$0xff] %v7528_v9  ;;  %v7633_v30 = vld [vmem:[%s14599_s8 + $0xf0] sm:$0xff]  ;;  %v7638_v31 = vld [vmem:[%s14599_s8 + $0xf8] sm:$0xff]  ;;  %v7643_v32 = vld [vmem:[%s14599_s8 + $0x100] sm:$0xff] }
   0xc   :  { %14629 = vst [vmem:[#allocation19_spill] sm:$0xff] %v7533_v10  ;;  %v7648_v33 = vld [vmem:[%s14599_s8 + $0x108] sm:$0xff]  ;;  %v7653_v34 = vld [vmem:[%s14599_s8 + $0x110] sm:$0xff]  ;;  %v7658_v35 = vld [vmem:[%s14599_s8 + $0x118] sm:$0xff] }
   0xd   :  { %14630 = vst [vmem:[#allocation20_spill] sm:$0xff] %v7538_v11  ;;  %v7663_v36 = vld [vmem:[%s14599_s8 + $0x120] sm:$0xff]  ;;  %v7668_v37 = vld [vmem:[%s14599_s8 + $0x128] sm:$0xff]  ;;  %v7673_v38 = vld [vmem:[%s14599_s8 + $0x130] sm:$0xff] }
   0xe   :  { %14631 = vst [vmem:[#allocation21_spill] sm:$0xff] %v7543_v12  ;;  %v7678_v39 = vld [vmem:[%s14599_s8 + $0x138] sm:$0xff]  ;;  %v7683_v40 = vld [vmem:[%s14599_s8 + $0x140] sm:$0xff]  ;;  %v7688_v41 = vld [vmem:[%s14599_s8 + $0x148] sm:$0xff] }
   0xf   :  { %14632 = vst [vmem:[#allocation22_spill] sm:$0xff] %v7548_v13  ;;  %v7693_v42 = vld [vmem:[%s14599_s8 + $0x150] sm:$0xff]  ;;  %v7698_v43 = vld [vmem:[%s14599_s8 + $0x158] sm:$0xff]  ;;  %v7703_v44 = vld [vmem:[%s14599_s8 + $0x160] sm:$0xff] }
  0x10   :  { %14633 = vst [vmem:[#allocation23_spill] sm:$0xff] %v7553_v14  ;;  %v7708_v45 = vld [vmem:[%s14599_s8 + $0x168] sm:$0xff]  ;;  %v7713_v46 = vld [vmem:[%s14599_s8 + $0x170] sm:$0xff]  ;;  %v7718_v47 = vld [vmem:[%s14599_s8 + $0x178] sm:$0xff] }
  0x11   :  { %14634 = vst [vmem:[#allocation24_spill] sm:$0xff] %v7558_v15  ;;  %v7723_v48 = vld [vmem:[%s14599_s8 + $0x180] sm:$0xff]  ;;  %v7728_v49 = vld [vmem:[%s14599_s8 + $0x188] sm:$0xff]  ;;  %v7733_v50 = vld [vmem:[%s14599_s8 + $0x190] sm:$0xff] }
  0x12   :  { %14635 = vst [vmem:[#allocation25_spill] sm:$0xff] %v7563_v16  ;;  %v7738_v51 = vld [vmem:[%s14599_s8 + $0x198] sm:$0xff]  ;;  %v7743_v52 = vld [vmem:[%s14599_s8 + $0x1a0] sm:$0xff]  ;;  %v7748_v53 = vld [vmem:[%s14599_s8 + $0x1a8] sm:$0xff] }
  0x13   :  { %14636 = vst [vmem:[#allocation26_spill] sm:$0xff] %v7568_v17  ;;  %v7753_v54 = vld [vmem:[%s14599_s8 + $0x1b0] sm:$0xff]  ;;  %v7758_v55 = vld [vmem:[%s14599_s8 + $0x1b8] sm:$0xff]  ;;  %v7763_v56 = vld [vmem:[%s14599_s8 + $0x1c0] sm:$0xff] }
  0x14   :  { %14637 = vst [vmem:[#allocation27_spill] sm:$0xff] %v7573_v18  ;;  %v7768_v57 = vld [vmem:[%s14599_s8 + $0x1c8] sm:$0xff]  ;;  %v7773_v58 = vld [vmem:[%s14599_s8 + $0x1d0] sm:$0xff]  ;;  %v7778_v59 = vld [vmem:[%s14599_s8 + $0x1d8] sm:$0xff] }
  0x15   :  { %14638 = vst [vmem:[#allocation28_spill] sm:$0xff] %v7578_v19  ;;  %v7783_v60 = vld [vmem:[%s14599_s8 + $0x1e0] sm:$0xff]  ;;  %v7788_v61 = vld [vmem:[%s14599_s8 + $0x1e8] sm:$0xff]  ;;  %v7793_v62 = vld [vmem:[%s14599_s8 + $0x1f0] sm:$0xff] }
  0x16   :  { %14639 = vst [vmem:[#allocation29_spill] sm:$0xff] %v7583_v20  ;;  %v7798_v63 = vld [vmem:[%s14599_s8 + $0x1f8] sm:$0xff]  ;;  %v7803_v7 = vld [vmem:[%s14599_s8 + $0x200] sm:$0xff]  ;;  %v7808_v6 = vld [vmem:[%s14599_s8 + $0x208] sm:$0xff] }
  0x17   :  { %14640 = vst [vmem:[#allocation30_spill] sm:$0xff] %v7588_v21  ;;  %v7813_v5 = vld [vmem:[%s14599_s8 + $0x210] sm:$0xff]  ;;  %v7818_v4 = vld [vmem:[%s14599_s8 + $0x218] sm:$0xff]  ;;  %v7823_v15 = vld [vmem:[%s14599_s8 + $0x220] sm:$0xff] }
  0x18   :  { %14641 = vst [vmem:[#allocation31_spill] sm:$0xff] %v7593_v22  ;;  %v7828_v14 = vld [vmem:[%s14599_s8 + $0x228] sm:$0xff]  ;;  %v7833_v13 = vld [vmem:[%s14599_s8 + $0x230] sm:$0xff]  ;;  %v7838_v12 = vld [vmem:[%s14599_s8 + $0x238] sm:$0xff] }
  0x19   :  { %14642 = vst [vmem:[#allocation32_spill] sm:$0xff] %v7598_v23  ;;  %v7843_v23 = vld [vmem:[%s14599_s8 + $0x240] sm:$0xff]  ;;  %v7848_v22 = vld [vmem:[%s14599_s8 + $0x248] sm:$0xff]  ;;  %v7853_v21 = vld [vmem:[%s14599_s8 + $0x250] sm:$0xff] }
  0x1a   :  { %14643 = vst [vmem:[#allocation33_spill] sm:$0xff] %v7603_v24  ;;  %v7858_v20 = vld [vmem:[%s14599_s8 + $0x258] sm:$0xff]  ;;  %v8083_v3 = vld [vmem:[%s14599_s8 + $0x3c0] sm:$0xff]  ;;  %v8108_v2 = vld [vmem:[%s14599_s8 + $0x3e8] sm:$0xff] }
  0x1b   :  { %14644 = vst [vmem:[#allocation34_spill] sm:$0xff] %v7608_v25  ;;  %v8113_v1 = vld [vmem:[%s14599_s8 + $0x3f0] sm:$0xff]  ;;  %v8118_v0 = vld [vmem:[%s14599_s8 + $0x3f8] sm:$0xff]  ;;  %v8123_v11 = vld [vmem:[%s14599_s8 + $0x400] sm:$0xff] }
  0x1c   :  { %14645 = vst [vmem:[#allocation35_spill] sm:$0xff] %v7613_v26  ;;  %v8128_v10 = vld [vmem:[%s14599_s8 + $0x408] sm:$0xff]  ;;  %v8133_v9 = vld [vmem:[%s14599_s8 + $0x410] sm:$0xff]  ;;  %v8138_v8 = vld [vmem:[%s14599_s8 + $0x418] sm:$0xff] }
  0x1d   :  { %14646 = vst [vmem:[#allocation36_spill] sm:$0xff] %v7618_v27  ;;  %v8143_v19 = vld [vmem:[%s14599_s8 + $0x420] sm:$0xff]  ;;  %v8148_v18 = vld [vmem:[%s14599_s8 + $0x428] sm:$0xff]  ;;  %v8153_v17 = vld [vmem:[%s14599_s8 + $0x430] sm:$0xff] }
  0x1e   :  { %14647 = vst [vmem:[#allocation37_spill] sm:$0xff] %v7623_v28  ;;  %v7878_v28 = vld [vmem:[%s14599_s8 + $0x278] sm:$0xff]  ;;  %v8163_v27 = vld [vmem:[%s14599_s8 + $0x440] sm:$0xff]  ;;  %v8168_v26 = vld [vmem:[%s14599_s8 + $0x448] sm:$0xff] }
  0x1f   :  { %14648 = vst [vmem:[#allocation38_spill] sm:$0xff] %v7628_v29  ;;  %v7873_v29 = vld [vmem:[%s14599_s8 + $0x270] sm:$0xff]  ;;  %v8158_v16 = vld [vmem:[%s14599_s8 + $0x438] sm:$0xff] }
  0x20   :  { %14649 = vst [vmem:[#allocation39_spill] sm:$0xff] %v7633_v30  ;;  %v7868_v30 = vld [vmem:[%s14599_s8 + $0x268] sm:$0xff]  ;;  %v8173_v25 = vld [vmem:[%s14599_s8 + $0x450] sm:$0xff]  ;;  %v8178_v24 = vld [vmem:[%s14599_s8 + $0x458] sm:$0xff] }
  0x21   :  { %14650 = vst [vmem:[#allocation40_spill] sm:$0xff] %v7638_v31  ;;  %v7863_v31 = vld [vmem:[%s14599_s8 + $0x260] sm:$0xff] }
  0x22   :  { %14651 = vst [vmem:[#allocation41_spill] sm:$0xff] %v7643_v32  ;;  %v8198_v32 = vld [vmem:[%s14599_s8 + $0x478] sm:$0xff] }
  0x23   :  { %14652 = vst [vmem:[#allocation42_spill] sm:$0xff] %v7648_v33  ;;  %v8193_v33 = vld [vmem:[%s14599_s8 + $0x470] sm:$0xff] }
  0x24   :  { %14653 = vst [vmem:[#allocation43_spill] sm:$0xff] %v7653_v34  ;;  %v8188_v34 = vld [vmem:[%s14599_s8 + $0x468] sm:$0xff] }
  0x25   :  { %14654 = vst [vmem:[#allocation44_spill] sm:$0xff] %v7658_v35  ;;  %v8183_v35 = vld [vmem:[%s14599_s8 + $0x460] sm:$0xff] }
  0x26   :  { %14655 = vst [vmem:[#allocation45_spill] sm:$0xff] %v7663_v36  ;;  %v7898_v36 = vld [vmem:[%s14599_s8 + $0x298] sm:$0xff] }
  0x27   :  { %14656 = vst [vmem:[#allocation46_spill] sm:$0xff] %v7668_v37  ;;  %v7893_v37 = vld [vmem:[%s14599_s8 + $0x290] sm:$0xff] }
  0x28   :  { %14657 = vst [vmem:[#allocation47_spill] sm:$0xff] %v7673_v38  ;;  %v7888_v38 = vld [vmem:[%s14599_s8 + $0x288] sm:$0xff] }
  0x29   :  { %14658 = vst [vmem:[#allocation48_spill] sm:$0xff] %v7678_v39  ;;  %v7883_v39 = vld [vmem:[%s14599_s8 + $0x280] sm:$0xff] }
  0x2a   :  { %14659 = vst [vmem:[#allocation49_spill] sm:$0xff] %v7683_v40  ;;  %v8218_v40 = vld [vmem:[%s14599_s8 + $0x498] sm:$0xff] }
  0x2b   :  { %14660 = vst [vmem:[#allocation50_spill] sm:$0xff] %v7688_v41  ;;  %v8213_v41 = vld [vmem:[%s14599_s8 + $0x490] sm:$0xff] }
  0x2c   :  { %14661 = vst [vmem:[#allocation51_spill] sm:$0xff] %v7693_v42  ;;  %v8208_v42 = vld [vmem:[%s14599_s8 + $0x488] sm:$0xff] }
  0x2d   :  { %14662 = vst [vmem:[#allocation52_spill] sm:$0xff] %v7698_v43  ;;  %v8203_v43 = vld [vmem:[%s14599_s8 + $0x480] sm:$0xff] }
  0x2e   :  { %14663 = vst [vmem:[#allocation53_spill] sm:$0xff] %v7703_v44  ;;  %v7918_v44 = vld [vmem:[%s14599_s8 + $0x2b8] sm:$0xff] }
  0x2f   :  { %14664 = vst [vmem:[#allocation54_spill] sm:$0xff] %v7708_v45  ;;  %v7913_v45 = vld [vmem:[%s14599_s8 + $0x2b0] sm:$0xff] }
  0x30   :  { %14665 = vst [vmem:[#allocation55_spill] sm:$0xff] %v7713_v46  ;;  %v7908_v46 = vld [vmem:[%s14599_s8 + $0x2a8] sm:$0xff] }
  0x31   :  { %14666 = vst [vmem:[#allocation56_spill] sm:$0xff] %v7718_v47  ;;  %v7903_v47 = vld [vmem:[%s14599_s8 + $0x2a0] sm:$0xff] }
  0x32   :  { %14667 = vst [vmem:[#allocation57_spill] sm:$0xff] %v7723_v48  ;;  %v8238_v48 = vld [vmem:[%s14599_s8 + $0x4b8] sm:$0xff] }
  0x33   :  { %14668 = vst [vmem:[#allocation58_spill] sm:$0xff] %v7728_v49  ;;  %v8233_v49 = vld [vmem:[%s14599_s8 + $0x4b0] sm:$0xff] }
  0x34   :  { %14669 = vst [vmem:[#allocation59_spill] sm:$0xff] %v7733_v50  ;;  %v8228_v50 = vld [vmem:[%s14599_s8 + $0x4a8] sm:$0xff] }
  0x35   :  { %14670 = vst [vmem:[#allocation60_spill] sm:$0xff] %v7738_v51  ;;  %v8223_v51 = vld [vmem:[%s14599_s8 + $0x4a0] sm:$0xff] }
  0x36   :  { %14671 = vst [vmem:[#allocation61_spill] sm:$0xff] %v7743_v52  ;;  %v7938_v52 = vld [vmem:[%s14599_s8 + $0x2d8] sm:$0xff] }
  0x37   :  { %14672 = vst [vmem:[#allocation62_spill] sm:$0xff] %v7748_v53  ;;  %v7933_v53 = vld [vmem:[%s14599_s8 + $0x2d0] sm:$0xff] }
  0x38   :  { %14673 = vst [vmem:[#allocation63_spill] sm:$0xff] %v7753_v54  ;;  %v7928_v54 = vld [vmem:[%s14599_s8 + $0x2c8] sm:$0xff] }
  0x39   :  { %14674 = vst [vmem:[#allocation64_spill] sm:$0xff] %v7758_v55  ;;  %v7923_v55 = vld [vmem:[%s14599_s8 + $0x2c0] sm:$0xff] }
  0x3a   :  { %14675 = vst [vmem:[#allocation65_spill] sm:$0xff] %v7763_v56  ;;  %v8258_v56 = vld [vmem:[%s14599_s8 + $0x4d8] sm:$0xff] }
  0x3b   :  { %14676 = vst [vmem:[#allocation66_spill] sm:$0xff] %v7768_v57  ;;  %v8253_v57 = vld [vmem:[%s14599_s8 + $0x4d0] sm:$0xff] }
  0x3c   :  { %14677 = vst [vmem:[#allocation67_spill] sm:$0xff] %v7773_v58  ;;  %v8248_v58 = vld [vmem:[%s14599_s8 + $0x4c8] sm:$0xff] }
  0x3d   :  { %14678 = vst [vmem:[#allocation68_spill] sm:$0xff] %v7778_v59  ;;  %v8243_v59 = vld [vmem:[%s14599_s8 + $0x4c0] sm:$0xff] }
  0x3e   :  { %14679 = vst [vmem:[#allocation69_spill] sm:$0xff] %v7783_v60  ;;  %v7958_v60 = vld [vmem:[%s14599_s8 + $0x2f8] sm:$0xff] }
  0x3f   :  { %14680 = vst [vmem:[#allocation70_spill] sm:$0xff] %v7788_v61  ;;  %v7953_v61 = vld [vmem:[%s14599_s8 + $0x2f0] sm:$0xff] }
  0x40   :  { %14681 = vst [vmem:[#allocation71_spill] sm:$0xff] %v7793_v62  ;;  %v7948_v62 = vld [vmem:[%s14599_s8 + $0x2e8] sm:$0xff] }
  0x41   :  { %14682 = vst [vmem:[#allocation72_spill] sm:$0xff] %v7798_v63  ;;  %v7943_v63 = vld [vmem:[%s14599_s8 + $0x2e0] sm:$0xff] }
  0x42   :  { %14683 = vst [vmem:[#allocation73_spill] sm:$0xff] %v7803_v7  ;;  %v8278_v7 = vld [vmem:[%s14599_s8 + $0x4f8] sm:$0xff] }
  0x43   :  { %14684 = vst [vmem:[#allocation74_spill] sm:$0xff] %v7808_v6  ;;  %v8273_v6 = vld [vmem:[%s14599_s8 + $0x4f0] sm:$0xff] }
  0x44   :  { %14685 = vst [vmem:[#allocation75_spill] sm:$0xff] %v7813_v5  ;;  %v8268_v5 = vld [vmem:[%s14599_s8 + $0x4e8] sm:$0xff] }
  0x45   :  { %14686 = vst [vmem:[#allocation76_spill] sm:$0xff] %v7818_v4  ;;  %v8263_v4 = vld [vmem:[%s14599_s8 + $0x4e0] sm:$0xff] }
  0x46   :  { %14687 = vst [vmem:[#allocation77_spill] sm:$0xff] %v7823_v15  ;;  %v7978_v15 = vld [vmem:[%s14599_s8 + $0x318] sm:$0xff] }
  0x47   :  { %14688 = vst [vmem:[#allocation78_spill] sm:$0xff] %v7828_v14  ;;  %v7973_v14 = vld [vmem:[%s14599_s8 + $0x310] sm:$0xff] }
  0x48   :  { %14689 = vst [vmem:[#allocation79_spill] sm:$0xff] %v7833_v13  ;;  %v7968_v13 = vld [vmem:[%s14599_s8 + $0x308] sm:$0xff] }
  0x49   :  { %14690 = vst [vmem:[#allocation80_spill] sm:$0xff] %v7838_v12  ;;  %v7963_v12 = vld [vmem:[%s14599_s8 + $0x300] sm:$0xff] }
  0x4a   :  { %14691 = vst [vmem:[#allocation81_spill] sm:$0xff] %v7843_v23  ;;  %v8298_v23 = vld [vmem:[%s14599_s8 + $0x518] sm:$0xff] }
  0x4b   :  { %14692 = vst [vmem:[#allocation82_spill] sm:$0xff] %v7848_v22  ;;  %v8293_v22 = vld [vmem:[%s14599_s8 + $0x510] sm:$0xff] }
  0x4c   :  { %14693 = vst [vmem:[#allocation83_spill] sm:$0xff] %v7853_v21  ;;  %v8288_v21 = vld [vmem:[%s14599_s8 + $0x508] sm:$0xff] }
  0x4d   :  { %14694 = vst [vmem:[#allocation84_spill] sm:$0xff] %v7858_v20  ;;  %v8283_v20 = vld [vmem:[%s14599_s8 + $0x500] sm:$0xff] }
  0x4e   :  { %14695 = vst [vmem:[#allocation85_spill] sm:$0xff] %v7863_v31  ;;  %v7998_v31 = vld [vmem:[%s14599_s8 + $0x338] sm:$0xff] }
  0x4f   :  { %14696 = vst [vmem:[#allocation86_spill] sm:$0xff] %v7868_v30  ;;  %v7993_v30 = vld [vmem:[%s14599_s8 + $0x330] sm:$0xff] }
  0x50   :  { %14697 = vst [vmem:[#allocation87_spill] sm:$0xff] %v7873_v29  ;;  %v7988_v29 = vld [vmem:[%s14599_s8 + $0x328] sm:$0xff] }
  0x51   :  { %14698 = vst [vmem:[#allocation88_spill] sm:$0xff] %v7878_v28  ;;  %v7983_v28 = vld [vmem:[%s14599_s8 + $0x320] sm:$0xff] }
  0x52   :  { %14699 = vst [vmem:[#allocation89_spill] sm:$0xff] %v7883_v39  ;;  %v8318_v39 = vld [vmem:[%s14599_s8 + $0x538] sm:$0xff] }
  0x53   :  { %14700 = vst [vmem:[#allocation90_spill] sm:$0xff] %v7888_v38  ;;  %v8313_v38 = vld [vmem:[%s14599_s8 + $0x530] sm:$0xff] }
  0x54   :  { %14701 = vst [vmem:[#allocation91_spill] sm:$0xff] %v7893_v37  ;;  %v8308_v37 = vld [vmem:[%s14599_s8 + $0x528] sm:$0xff] }
  0x55   :  { %14702 = vst [vmem:[#allocation92_spill] sm:$0xff] %v7898_v36  ;;  %v8303_v36 = vld [vmem:[%s14599_s8 + $0x520] sm:$0xff] }
  0x56   :  { %14703 = vst [vmem:[#allocation93_spill] sm:$0xff] %v7903_v47  ;;  %v8018_v47 = vld [vmem:[%s14599_s8 + $0x358] sm:$0xff] }
  0x57   :  { %14704 = vst [vmem:[#allocation94_spill] sm:$0xff] %v7908_v46  ;;  %v8013_v46 = vld [vmem:[%s14599_s8 + $0x350] sm:$0xff] }
  0x58   :  { %14705 = vst [vmem:[#allocation95_spill] sm:$0xff] %v7913_v45  ;;  %v8008_v45 = vld [vmem:[%s14599_s8 + $0x348] sm:$0xff] }
  0x59   :  { %14706 = vst [vmem:[#allocation96_spill] sm:$0xff] %v7918_v44  ;;  %v8003_v44 = vld [vmem:[%s14599_s8 + $0x340] sm:$0xff] }
  0x5a   :  { %14707 = vst [vmem:[#allocation97_spill] sm:$0xff] %v7923_v55  ;;  %v8338_v55 = vld [vmem:[%s14599_s8 + $0x558] sm:$0xff] }
  0x5b   :  { %14708 = vst [vmem:[#allocation98_spill] sm:$0xff] %v7928_v54  ;;  %v8333_v54 = vld [vmem:[%s14599_s8 + $0x550] sm:$0xff] }
  0x5c   :  { %14709 = vst [vmem:[#allocation99_spill] sm:$0xff] %v7933_v53  ;;  %v8328_v53 = vld [vmem:[%s14599_s8 + $0x548] sm:$0xff] }
  0x5d   :  { %14710 = vst [vmem:[#allocation100_spill] sm:$0xff] %v7938_v52  ;;  %v8323_v52 = vld [vmem:[%s14599_s8 + $0x540] sm:$0xff] }
  0x5e   :  { %14711 = vst [vmem:[#allocation101_spill] sm:$0xff] %v7943_v63  ;;  %v8038_v63 = vld [vmem:[%s14599_s8 + $0x378] sm:$0xff] }
  0x5f   :  { %14712 = vst [vmem:[#allocation102_spill] sm:$0xff] %v7948_v62  ;;  %v8033_v62 = vld [vmem:[%s14599_s8 + $0x370] sm:$0xff] }
  0x60   :  { %14713 = vst [vmem:[#allocation103_spill] sm:$0xff] %v7953_v61  ;;  %v8028_v61 = vld [vmem:[%s14599_s8 + $0x368] sm:$0xff] }
  0x61   :  { %14714 = vst [vmem:[#allocation104_spill] sm:$0xff] %v7958_v60  ;;  %v8023_v60 = vld [vmem:[%s14599_s8 + $0x360] sm:$0xff] }
  0x62   :  { %14715 = vst [vmem:[#allocation105_spill] sm:$0xff] %v7963_v12  ;;  %v8358_v12 = vld [vmem:[%s14599_s8 + $0x578] sm:$0xff] }
  0x63   :  { %14716 = vst [vmem:[#allocation106_spill] sm:$0xff] %v7968_v13  ;;  %v8353_v13 = vld [vmem:[%s14599_s8 + $0x570] sm:$0xff] }
  0x64   :  { %14717 = vst [vmem:[#allocation107_spill] sm:$0xff] %v7973_v14  ;;  %v8348_v14 = vld [vmem:[%s14599_s8 + $0x568] sm:$0xff] }
  0x65   :  { %14718 = vst [vmem:[#allocation108_spill] sm:$0xff] %v7978_v15  ;;  %v8343_v15 = vld [vmem:[%s14599_s8 + $0x560] sm:$0xff] }
  0x66   :  { %14719 = vst [vmem:[#allocation109_spill] sm:$0xff] %v7983_v28  ;;  %v8058_v28 = vld [vmem:[%s14599_s8 + $0x398] sm:$0xff] }
  0x67   :  { %14720 = vst [vmem:[#allocation110_spill] sm:$0xff] %v7988_v29  ;;  %v8053_v29 = vld [vmem:[%s14599_s8 + $0x390] sm:$0xff] }
  0x68   :  { %14721 = vst [vmem:[#allocation111_spill] sm:$0xff] %v7993_v30  ;;  %v8048_v30 = vld [vmem:[%s14599_s8 + $0x388] sm:$0xff] }
  0x69   :  { %14722 = vst [vmem:[#allocation112_spill] sm:$0xff] %v7998_v31  ;;  %v8043_v31 = vld [vmem:[%s14599_s8 + $0x380] sm:$0xff] }
  0x6a   :  { %14723 = vst [vmem:[#allocation113_spill] sm:$0xff] %v8003_v44  ;;  %v8378_v44 = vld [vmem:[%s14599_s8 + $0x598] sm:$0xff] }
  0x6b   :  { %14724 = vst [vmem:[#allocation114_spill] sm:$0xff] %v8008_v45  ;;  %v8373_v45 = vld [vmem:[%s14599_s8 + $0x590] sm:$0xff] }
  0x6c   :  { %14725 = vst [vmem:[#allocation115_spill] sm:$0xff] %v8013_v46  ;;  %v8368_v46 = vld [vmem:[%s14599_s8 + $0x588] sm:$0xff] }
  0x6d   :  { %14726 = vst [vmem:[#allocation116_spill] sm:$0xff] %v8018_v47  ;;  %v8363_v47 = vld [vmem:[%s14599_s8 + $0x580] sm:$0xff] }
  0x6e   :  { %14727 = vst [vmem:[#allocation117_spill] sm:$0xff] %v8023_v60  ;;  %v8078_v60 = vld [vmem:[%s14599_s8 + $0x3b8] sm:$0xff] }
  0x6f   :  { %14728 = vst [vmem:[#allocation118_spill] sm:$0xff] %v8028_v61  ;;  %v8073_v61 = vld [vmem:[%s14599_s8 + $0x3b0] sm:$0xff] }
  0x70   :  { %14729 = vst [vmem:[#allocation119_spill] sm:$0xff] %v8033_v62  ;;  %v8068_v62 = vld [vmem:[%s14599_s8 + $0x3a8] sm:$0xff] }
  0x71   :  { %14730 = vst [vmem:[#allocation120_spill] sm:$0xff] %v8038_v63  ;;  %v8063_v63 = vld [vmem:[%s14599_s8 + $0x3a0] sm:$0xff] }
  0x72   :  { %14731 = vst [vmem:[#allocation121_spill] sm:$0xff] %v8043_v31  ;;  %v8398_v31 = vld [vmem:[%s14599_s8 + $0x5b8] sm:$0xff] }
  0x73   :  { %14732 = vst [vmem:[#allocation122_spill] sm:$0xff] %v8048_v30  ;;  %v8393_v30 = vld [vmem:[%s14599_s8 + $0x5b0] sm:$0xff] }
  0x74   :  { %14733 = vst [vmem:[#allocation123_spill] sm:$0xff] %v8053_v29  ;;  %v8388_v29 = vld [vmem:[%s14599_s8 + $0x5a8] sm:$0xff] }
  0x75   :  { %14734 = vst [vmem:[#allocation124_spill] sm:$0xff] %v8058_v28  ;;  %v8383_v28 = vld [vmem:[%s14599_s8 + $0x5a0] sm:$0xff] }
  0x76   :  { %14735 = vst [vmem:[#allocation125_spill] sm:$0xff] %v8063_v63  ;;  %v8088_v63 = vld [vmem:[%s14599_s8 + $0x3c8] sm:$0xff] }
  0x77   :  { %14736 = vst [vmem:[#allocation126_spill] sm:$0xff] %v8068_v62  ;;  %v8093_v62 = vld [vmem:[%s14599_s8 + $0x3d0] sm:$0xff] }
  0x78   :  { %14737 = vst [vmem:[#allocation127_spill] sm:$0xff] %v8073_v61  ;;  %v8098_v61 = vld [vmem:[%s14599_s8 + $0x3d8] sm:$0xff] }
  0x79   :  { %14738 = vst [vmem:[#allocation128_spill] sm:$0xff] %v8078_v60  ;;  %v8103_v60 = vld [vmem:[%s14599_s8 + $0x3e0] sm:$0xff] }
  0x7a   :  { %14739 = vst [vmem:[#allocation129_spill] sm:$0xff] %v8083_v3 }
  0x7b   :  { %14740 = vst [vmem:[#allocation130_spill] sm:$0xff] %v8088_v63 }
  0x7c   :  { %14741 = vst [vmem:[#allocation131_spill] sm:$0xff] %v8093_v62 }
  0x7d   :  { %14742 = vst [vmem:[#allocation132_spill] sm:$0xff] %v8098_v61  ;;  %v8683_v61 = vld [vmem:[%s14599_s8 + $0x780] sm:$0xff] }
  0x7e   :  { %14743 = vst [vmem:[#allocation133_spill] sm:$0xff] %v8103_v60  ;;  %v8418_v60 = vld [vmem:[%s14599_s8 + $0x5d8] sm:$0xff] }
  0x7f   :  { %14744 = vst [vmem:[#allocation134_spill] sm:$0xff] %v8108_v2  ;;  %v8413_v2 = vld [vmem:[%s14599_s8 + $0x5d0] sm:$0xff] }
  0x80   :  { %14745 = vst [vmem:[#allocation135_spill] sm:$0xff] %v8113_v1  ;;  %v8408_v1 = vld [vmem:[%s14599_s8 + $0x5c8] sm:$0xff] }
  0x81   :  { %14746 = vst [vmem:[#allocation136_spill] sm:$0xff] %v8118_v0  ;;  %v8403_v0 = vld [vmem:[%s14599_s8 + $0x5c0] sm:$0xff] }
  0x82   :  { %14747 = vst [vmem:[#allocation137_spill] sm:$0xff] %v8123_v11 }
  0x83   :  { %14748 = vst [vmem:[#allocation138_spill] sm:$0xff] %v8128_v10 }
  0x84   :  { %14749 = vst [vmem:[#allocation139_spill] sm:$0xff] %v8133_v9 }
  0x85   :  { %14750 = vst [vmem:[#allocation140_spill] sm:$0xff] %v8138_v8 }
  0x86   :  { %14751 = vst [vmem:[#allocation141_spill] sm:$0xff] %v8143_v19  ;;  %v8438_v19 = vld [vmem:[%s14599_s8 + $0x5f8] sm:$0xff] }
  0x87   :  { %14752 = vst [vmem:[#allocation142_spill] sm:$0xff] %v8148_v18  ;;  %v8433_v18 = vld [vmem:[%s14599_s8 + $0x5f0] sm:$0xff] }
  0x88   :  { %14753 = vst [vmem:[#allocation143_spill] sm:$0xff] %v8153_v17  ;;  %v8428_v17 = vld [vmem:[%s14599_s8 + $0x5e8] sm:$0xff] }
  0x89   :  { %14754 = vst [vmem:[#allocation144_spill] sm:$0xff] %v8158_v16  ;;  %v8423_v16 = vld [vmem:[%s14599_s8 + $0x5e0] sm:$0xff] }
  0x8a   :  { %14755 = vst [vmem:[#allocation145_spill] sm:$0xff] %v8163_v27 }
  0x8b   :  { %14756 = vst [vmem:[#allocation146_spill] sm:$0xff] %v8168_v26 }
  0x8c   :  { %14757 = vst [vmem:[#allocation147_spill] sm:$0xff] %v8173_v25 }
  0x8d   :  { %14758 = vst [vmem:[#allocation148_spill] sm:$0xff] %v8178_v24 }
  0x8e   :  { %14759 = vst [vmem:[#allocation149_spill] sm:$0xff] %v8183_v35  ;;  %v8458_v35 = vld [vmem:[%s14599_s8 + $0x618] sm:$0xff] }
  0x8f   :  { %14760 = vst [vmem:[#allocation150_spill] sm:$0xff] %v8188_v34  ;;  %v8453_v34 = vld [vmem:[%s14599_s8 + $0x610] sm:$0xff] }
  0x90   :  { %14761 = vst [vmem:[#allocation151_spill] sm:$0xff] %v8193_v33  ;;  %v8448_v33 = vld [vmem:[%s14599_s8 + $0x608] sm:$0xff] }
  0x91   :  { %14762 = vst [vmem:[#allocation152_spill] sm:$0xff] %v8198_v32  ;;  %v8443_v32 = vld [vmem:[%s14599_s8 + $0x600] sm:$0xff] }
  0x92   :  { %14763 = vst [vmem:[#allocation153_spill] sm:$0xff] %v8203_v43 }
  0x93   :  { %14764 = vst [vmem:[#allocation154_spill] sm:$0xff] %v8208_v42 }
  0x94   :  { %14765 = vst [vmem:[#allocation155_spill] sm:$0xff] %v8213_v41 }
  0x95   :  { %14766 = vst [vmem:[#allocation156_spill] sm:$0xff] %v8218_v40 }
  0x96   :  { %14767 = vst [vmem:[#allocation157_spill] sm:$0xff] %v8223_v51  ;;  %v8478_v51 = vld [vmem:[%s14599_s8 + $0x638] sm:$0xff] }
  0x97   :  { %14768 = vst [vmem:[#allocation158_spill] sm:$0xff] %v8228_v50  ;;  %v8473_v50 = vld [vmem:[%s14599_s8 + $0x630] sm:$0xff] }
  0x98   :  { %14769 = vst [vmem:[#allocation159_spill] sm:$0xff] %v8233_v49  ;;  %v8468_v49 = vld [vmem:[%s14599_s8 + $0x628] sm:$0xff] }
  0x99   :  { %14770 = vst [vmem:[#allocation160_spill] sm:$0xff] %v8238_v48  ;;  %v8463_v48 = vld [vmem:[%s14599_s8 + $0x620] sm:$0xff] }
  0x9a   :  { %14771 = vst [vmem:[#allocation161_spill] sm:$0xff] %v8243_v59 }
  0x9b   :  { %14772 = vst [vmem:[#allocation162_spill] sm:$0xff] %v8248_v58 }
  0x9c   :  { %14773 = vst [vmem:[#allocation163_spill] sm:$0xff] %v8253_v57 }
  0x9d   :  { %14774 = vst [vmem:[#allocation164_spill] sm:$0xff] %v8258_v56 }
  0x9e   :  { %14775 = vst [vmem:[#allocation165_spill] sm:$0xff] %v8263_v4  ;;  %v8498_v4 = vld [vmem:[%s14599_s8 + $0x658] sm:$0xff] }
  0x9f   :  { %14776 = vst [vmem:[#allocation166_spill] sm:$0xff] %v8268_v5  ;;  %v8493_v5 = vld [vmem:[%s14599_s8 + $0x650] sm:$0xff] }
  0xa0   :  { %14777 = vst [vmem:[#allocation167_spill] sm:$0xff] %v8273_v6  ;;  %v8488_v6 = vld [vmem:[%s14599_s8 + $0x648] sm:$0xff] }
  0xa1   :  { %14778 = vst [vmem:[#allocation168_spill] sm:$0xff] %v8278_v7  ;;  %v8483_v7 = vld [vmem:[%s14599_s8 + $0x640] sm:$0xff] }
  0xa2   :  { %14779 = vst [vmem:[#allocation169_spill] sm:$0xff] %v8283_v20 }
  0xa3   :  { %14780 = vst [vmem:[#allocation170_spill] sm:$0xff] %v8288_v21 }
  0xa4   :  { %14781 = vst [vmem:[#allocation171_spill] sm:$0xff] %v8293_v22 }
  0xa5   :  { %14782 = vst [vmem:[#allocation172_spill] sm:$0xff] %v8298_v23 }
  0xa6   :  { %14783 = vst [vmem:[#allocation173_spill] sm:$0xff] %v8303_v36  ;;  %v8518_v36 = vld [vmem:[%s14599_s8 + $0x678] sm:$0xff] }
  0xa7   :  { %14784 = vst [vmem:[#allocation174_spill] sm:$0xff] %v8308_v37  ;;  %v8513_v37 = vld [vmem:[%s14599_s8 + $0x670] sm:$0xff] }
  0xa8   :  { %14785 = vst [vmem:[#allocation175_spill] sm:$0xff] %v8313_v38  ;;  %v8508_v38 = vld [vmem:[%s14599_s8 + $0x668] sm:$0xff] }
  0xa9   :  { %14786 = vst [vmem:[#allocation176_spill] sm:$0xff] %v8318_v39  ;;  %v8503_v39 = vld [vmem:[%s14599_s8 + $0x660] sm:$0xff] }
  0xaa   :  { %14787 = vst [vmem:[#allocation177_spill] sm:$0xff] %v8323_v52 }
  0xab   :  { %14788 = vst [vmem:[#allocation178_spill] sm:$0xff] %v8328_v53 }
  0xac   :  { %14789 = vst [vmem:[#allocation179_spill] sm:$0xff] %v8333_v54 }
  0xad   :  { %14790 = vst [vmem:[#allocation180_spill] sm:$0xff] %v8338_v55 }
  0xae   :  { %14791 = vst [vmem:[#allocation181_spill] sm:$0xff] %v8343_v15  ;;  %v8538_v15 = vld [vmem:[%s14599_s8 + $0x698] sm:$0xff] }
  0xaf   :  { %14792 = vst [vmem:[#allocation182_spill] sm:$0xff] %v8348_v14  ;;  %v8533_v14 = vld [vmem:[%s14599_s8 + $0x690] sm:$0xff] }
  0xb0   :  { %14793 = vst [vmem:[#allocation183_spill] sm:$0xff] %v8353_v13  ;;  %v8528_v13 = vld [vmem:[%s14599_s8 + $0x688] sm:$0xff] }
  0xb1   :  { %14794 = vst [vmem:[#allocation184_spill] sm:$0xff] %v8358_v12  ;;  %v8523_v12 = vld [vmem:[%s14599_s8 + $0x680] sm:$0xff] }
  0xb2   :  { %14795 = vst [vmem:[#allocation185_spill] sm:$0xff] %v8363_v47 }
  0xb3   :  { %14796 = vst [vmem:[#allocation186_spill] sm:$0xff] %v8368_v46 }
  0xb4   :  { %14797 = vst [vmem:[#allocation187_spill] sm:$0xff] %v8373_v45 }
  0xb5   :  { %14798 = vst [vmem:[#allocation188_spill] sm:$0xff] %v8378_v44 }
  0xb6   :  { %14799 = vst [vmem:[#allocation189_spill] sm:$0xff] %v8383_v28  ;;  %v8558_v28 = vld [vmem:[%s14599_s8 + $0x6b8] sm:$0xff] }
  0xb7   :  { %14800 = vst [vmem:[#allocation190_spill] sm:$0xff] %v8388_v29  ;;  %v8553_v29 = vld [vmem:[%s14599_s8 + $0x6b0] sm:$0xff] }
  0xb8   :  { %14801 = vst [vmem:[#allocation191_spill] sm:$0xff] %v8393_v30  ;;  %v8548_v30 = vld [vmem:[%s14599_s8 + $0x6a8] sm:$0xff] }
  0xb9   :  { %14802 = vst [vmem:[#allocation192_spill] sm:$0xff] %v8398_v31  ;;  %v8543_v31 = vld [vmem:[%s14599_s8 + $0x6a0] sm:$0xff] }
  0xba   :  { %14803 = vst [vmem:[#allocation193_spill] sm:$0xff] %v8403_v0 }
  0xbb   :  { %14804 = vst [vmem:[#allocation194_spill] sm:$0xff] %v8408_v1 }
  0xbc   :  { %14805 = vst [vmem:[#allocation195_spill] sm:$0xff] %v8413_v2 }
  0xbd   :  { %14806 = vst [vmem:[#allocation196_spill] sm:$0xff] %v8418_v60 }
  0xbe   :  { %14807 = vst [vmem:[#allocation197_spill] sm:$0xff] %v8423_v16  ;;  %v8578_v16 = vld [vmem:[%s14599_s8 + $0x6d8] sm:$0xff] }
  0xbf   :  { %14808 = vst [vmem:[#allocation198_spill] sm:$0xff] %v8428_v17  ;;  %v8573_v17 = vld [vmem:[%s14599_s8 + $0x6d0] sm:$0xff] }
  0xc0   :  { %14809 = vst [vmem:[#allocation199_spill] sm:$0xff] %v8433_v18  ;;  %v8568_v18 = vld [vmem:[%s14599_s8 + $0x6c8] sm:$0xff] }
  0xc1   :  { %14810 = vst [vmem:[#allocation200_spill] sm:$0xff] %v8438_v19  ;;  %v8563_v19 = vld [vmem:[%s14599_s8 + $0x6c0] sm:$0xff] }
  0xc2   :  { %14811 = vst [vmem:[#allocation201_spill] sm:$0xff] %v8443_v32 }
  0xc3   :  { %14812 = vst [vmem:[#allocation202_spill] sm:$0xff] %v8448_v33 }
  0xc4   :  { %14813 = vst [vmem:[#allocation203_spill] sm:$0xff] %v8453_v34 }
  0xc5   :  { %14814 = vst [vmem:[#allocation204_spill] sm:$0xff] %v8458_v35 }
  0xc6   :  { %14815 = vst [vmem:[#allocation205_spill] sm:$0xff] %v8463_v48  ;;  %v8598_v48 = vld [vmem:[%s14599_s8 + $0x6f8] sm:$0xff] }
  0xc7   :  { %14816 = vst [vmem:[#allocation206_spill] sm:$0xff] %v8468_v49  ;;  %v8593_v49 = vld [vmem:[%s14599_s8 + $0x6f0] sm:$0xff] }
  0xc8   :  { %14817 = vst [vmem:[#allocation207_spill] sm:$0xff] %v8473_v50  ;;  %v8588_v50 = vld [vmem:[%s14599_s8 + $0x6e8] sm:$0xff] }
  0xc9   :  { %14818 = vst [vmem:[#allocation208_spill] sm:$0xff] %v8478_v51  ;;  %v8583_v51 = vld [vmem:[%s14599_s8 + $0x6e0] sm:$0xff] }
  0xca   :  { %14819 = vst [vmem:[#allocation209_spill] sm:$0xff] %v8483_v7 }
  0xcb   :  { %14820 = vst [vmem:[#allocation210_spill] sm:$0xff] %v8488_v6 }
  0xcc   :  { %14821 = vst [vmem:[#allocation211_spill] sm:$0xff] %v8493_v5 }
  0xcd   :  { %14822 = vst [vmem:[#allocation212_spill] sm:$0xff] %v8498_v4 }
  0xce   :  { %14823 = vst [vmem:[#allocation213_spill] sm:$0xff] %v8503_v39  ;;  %v8618_v39 = vld [vmem:[%s14599_s8 + $0x718] sm:$0xff] }
  0xcf   :  { %14824 = vst [vmem:[#allocation214_spill] sm:$0xff] %v8508_v38  ;;  %v8613_v38 = vld [vmem:[%s14599_s8 + $0x710] sm:$0xff] }
  0xd0   :  { %14825 = vst [vmem:[#allocation215_spill] sm:$0xff] %v8513_v37  ;;  %v8608_v37 = vld [vmem:[%s14599_s8 + $0x708] sm:$0xff] }
  0xd1   :  { %14826 = vst [vmem:[#allocation216_spill] sm:$0xff] %v8518_v36  ;;  %v8603_v36 = vld [vmem:[%s14599_s8 + $0x700] sm:$0xff] }
  0xd2   :  { %14827 = vst [vmem:[#allocation217_spill] sm:$0xff] %v8523_v12 }
  0xd3   :  { %14828 = vst [vmem:[#allocation218_spill] sm:$0xff] %v8528_v13 }
  0xd4   :  { %14829 = vst [vmem:[#allocation219_spill] sm:$0xff] %v8533_v14 }
  0xd5   :  { %14830 = vst [vmem:[#allocation220_spill] sm:$0xff] %v8538_v15 }
  0xd6   :  { %14831 = vst [vmem:[#allocation221_spill] sm:$0xff] %v8543_v31  ;;  %v8638_v31 = vld [vmem:[%s14599_s8 + $0x738] sm:$0xff] }
  0xd7   :  { %14832 = vst [vmem:[#allocation222_spill] sm:$0xff] %v8548_v30  ;;  %v8633_v30 = vld [vmem:[%s14599_s8 + $0x730] sm:$0xff] }
  0xd8   :  { %14833 = vst [vmem:[#allocation223_spill] sm:$0xff] %v8553_v29  ;;  %v8628_v29 = vld [vmem:[%s14599_s8 + $0x728] sm:$0xff] }
  0xd9   :  { %14834 = vst [vmem:[#allocation224_spill] sm:$0xff] %v8558_v28  ;;  %v8623_v28 = vld [vmem:[%s14599_s8 + $0x720] sm:$0xff] }
  0xda   :  { %14835 = vst [vmem:[#allocation225_spill] sm:$0xff] %v8563_v19 }
  0xdb   :  { %14836 = vst [vmem:[#allocation226_spill] sm:$0xff] %v8568_v18 }
  0xdc   :  { %14837 = vst [vmem:[#allocation227_spill] sm:$0xff] %v8573_v17 }
  0xdd   :  { %14838 = vst [vmem:[#allocation228_spill] sm:$0xff] %v8578_v16 }
  0xde   :  { %14839 = vst [vmem:[#allocation229_spill] sm:$0xff] %v8583_v51  ;;  %v8658_v51 = vld [vmem:[%s14599_s8 + $0x758] sm:$0xff] }
  0xdf   :  { %14840 = vst [vmem:[#allocation230_spill] sm:$0xff] %v8588_v50  ;;  %v8653_v50 = vld [vmem:[%s14599_s8 + $0x750] sm:$0xff] }
  0xe0   :  { %14841 = vst [vmem:[#allocation231_spill] sm:$0xff] %v8593_v49  ;;  %v8648_v49 = vld [vmem:[%s14599_s8 + $0x748] sm:$0xff] }
  0xe1   :  { %14842 = vst [vmem:[#allocation232_spill] sm:$0xff] %v8598_v48  ;;  %v8643_v48 = vld [vmem:[%s14599_s8 + $0x740] sm:$0xff] }
  0xe2   :  { %14843 = vst [vmem:[#allocation233_spill] sm:$0xff] %v8603_v36 }
  0xe3   :  { %14844 = vst [vmem:[#allocation234_spill] sm:$0xff] %v8608_v37 }
  0xe4   :  { %14845 = vst [vmem:[#allocation235_spill] sm:$0xff] %v8613_v38 }
  0xe5   :  { %14846 = vst [vmem:[#allocation236_spill] sm:$0xff] %v8618_v39 }
  0xe6   :  { %14847 = vst [vmem:[#allocation237_spill] sm:$0xff] %v8623_v28  ;;  %v8678_v28 = vld [vmem:[%s14599_s8 + $0x778] sm:$0xff] }
  0xe7   :  { %14848 = vst [vmem:[#allocation238_spill] sm:$0xff] %v8628_v29  ;;  %v8673_v29 = vld [vmem:[%s14599_s8 + $0x770] sm:$0xff] }
  0xe8   :  { %14849 = vst [vmem:[#allocation239_spill] sm:$0xff] %v8633_v30  ;;  %v8668_v30 = vld [vmem:[%s14599_s8 + $0x768] sm:$0xff] }
  0xe9   :  { %14850 = vst [vmem:[#allocation240_spill] sm:$0xff] %v8638_v31  ;;  %v8663_v31 = vld [vmem:[%s14599_s8 + $0x760] sm:$0xff] }
  0xea   :  { %14851 = vst [vmem:[#allocation241_spill] sm:$0xff] %v8643_v48 }
  0xeb   :  { %14852 = vst [vmem:[#allocation242_spill] sm:$0xff] %v8648_v49 }
  0xec   :  { %14853 = vst [vmem:[#allocation243_spill] sm:$0xff] %v8653_v50 }
  0xed   :  { %14854 = vst [vmem:[#allocation244_spill] sm:$0xff] %v8658_v51 }
  0xee   :  { %14855 = vst [vmem:[#allocation245_spill] sm:$0xff] %v8663_v31  ;;  %v8688_v31 = vld [vmem:[%s14599_s8 + $0x788] sm:$0xff] }
  0xef   :  { %14856 = vst [vmem:[#allocation246_spill] sm:$0xff] %v8668_v30  ;;  %v8693_v30 = vld [vmem:[%s14599_s8 + $0x790] sm:$0xff] }
  0xf0   :  { %14857 = vst [vmem:[#allocation247_spill] sm:$0xff] %v8673_v29  ;;  %v8698_v29 = vld [vmem:[%s14599_s8 + $0x798] sm:$0xff] }
  0xf1   :  { %14858 = vst [vmem:[#allocation248_spill] sm:$0xff] %v8678_v28  ;;  %v8703_v28 = vld [vmem:[%s14599_s8 + $0x7a0] sm:$0xff] }
  0xf2   :  { %14859 = vst [vmem:[#allocation249_spill] sm:$0xff] %v8683_v61  ;;  %v8708_v61 = vld [vmem:[%s14599_s8 + $0x7a8] sm:$0xff] }
  0xf3   :  { %14860 = vst [vmem:[#allocation250_spill] sm:$0xff] %v8688_v31  ;;  %v8713_v31 = vld [vmem:[%s14599_s8 + $0x7b0] sm:$0xff] }
  0xf4   :  { %14861 = vst [vmem:[#allocation251_spill] sm:$0xff] %v8693_v30  ;;  %v8718_v30 = vld [vmem:[%s14599_s8 + $0x7b8] sm:$0xff] }
  0xf5   :  { %14862 = vst [vmem:[#allocation252_spill] sm:$0xff] %v8698_v29  ;;  %v8723_v29 = vld [vmem:[%s14599_s8 + $0x7c0] sm:$0xff] }
  0xf6   :  { %14863 = vst [vmem:[#allocation253_spill] sm:$0xff] %v8703_v28  ;;  %v8728_v28 = vld [vmem:[%s14599_s8 + $0x7c8] sm:$0xff] }
  0xf7   :  { %14864 = vst [vmem:[#allocation254_spill] sm:$0xff] %v8708_v61  ;;  %v8733_v61 = vld [vmem:[%s14599_s8 + $0x7d0] sm:$0xff] }
  0xf8   :  { %14865 = vst [vmem:[#allocation255_spill] sm:$0xff] %v8713_v31  ;;  %v8738_v31 = vld [vmem:[%s14599_s8 + $0x7d8] sm:$0xff] }
  0xf9   :  { %14866 = vst [vmem:[#allocation256_spill] sm:$0xff] %v8718_v30  ;;  %v8743_v30 = vld [vmem:[%s14599_s8 + $0x7e0] sm:$0xff] }
  0xfa   :  { %14867 = vst [vmem:[#allocation257_spill] sm:$0xff] %v8723_v29  ;;  %v8748_v29 = vld [vmem:[%s14599_s8 + $0x7e8] sm:$0xff] }
  0xfb   :  { %14868 = vst [vmem:[#allocation258_spill] sm:$0xff] %v8728_v28  ;;  %v8753_v28 = vld [vmem:[%s14599_s8 + $0x7f0] sm:$0xff] }
  0xfc   :  { %14869 = vst [vmem:[#allocation259_spill] sm:$0xff] %v8733_v61  ;;  %v8758_v61 = vld [vmem:[%s14599_s8 + $0x7f8] sm:$0xff] }
  0xfd   :  { %14870 = vst [vmem:[#allocation260_spill] sm:$0xff] %v8738_v31  ;;  %v8763_v31 = vld [vmem:[%s14599_s8 + $0x800] sm:$0xff] }
  0xfe   :  { %14871 = vst [vmem:[#allocation261_spill] sm:$0xff] %v8743_v30  ;;  %v8768_v30 = vld [vmem:[%s14599_s8 + $0x808] sm:$0xff] }
  0xff   :  { %14872 = vst [vmem:[#allocation262_spill] sm:$0xff] %v8748_v29  ;;  %v8773_v29 = vld [vmem:[%s14599_s8 + $0x810] sm:$0xff] }
 0x100   :  { %14873 = vst [vmem:[#allocation263_spill] sm:$0xff] %v8753_v28  ;;  %v8778_v28 = vld [vmem:[%s14599_s8 + $0x818] sm:$0xff] }
 0x101   :  { %14874 = vst [vmem:[#allocation264_spill] sm:$0xff] %v8758_v61  ;;  %v8783_v61 = vld [vmem:[%s14599_s8 + $0x820] sm:$0xff] }
 0x102   :  { %14875 = vst [vmem:[#allocation265_spill] sm:$0xff] %v8763_v31  ;;  %v8788_v31 = vld [vmem:[%s14599_s8 + $0x828] sm:$0xff] }
 0x103   :  { %14876 = vst [vmem:[#allocation266_spill] sm:$0xff] %v8768_v30  ;;  %v8793_v30 = vld [vmem:[%s14599_s8 + $0x830] sm:$0xff] }
 0x104   :  { %14877 = vst [vmem:[#allocation267_spill] sm:$0xff] %v8773_v29  ;;  %v8798_v29 = vld [vmem:[%s14599_s8 + $0x838] sm:$0xff] }
 0x105   :  { %14878 = vst [vmem:[#allocation268_spill] sm:$0xff] %v8778_v28  ;;  %v8803_v28 = vld [vmem:[%s14599_s8 + $0x840] sm:$0xff] }
 0x106   :  { %14879 = vst [vmem:[#allocation269_spill] sm:$0xff] %v8783_v61  ;;  %v8808_v61 = vld [vmem:[%s14599_s8 + $0x848] sm:$0xff] }
 0x107   :  { %14880 = vst [vmem:[#allocation270_spill] sm:$0xff] %v8788_v31  ;;  %v8813_v31 = vld [vmem:[%s14599_s8 + $0x850] sm:$0xff] }
 0x108   :  { %14881 = vst [vmem:[#allocation271_spill] sm:$0xff] %v8793_v30  ;;  %v8818_v30 = vld [vmem:[%s14599_s8 + $0x858] sm:$0xff] }
 0x109   :  { %14882 = vst [vmem:[#allocation272_spill] sm:$0xff] %v8798_v29  ;;  %v8823_v29 = vld [vmem:[%s14599_s8 + $0x860] sm:$0xff] }
 0x10a   :  { %14883 = vst [vmem:[#allocation273_spill] sm:$0xff] %v8803_v28  ;;  %v8828_v28 = vld [vmem:[%s14599_s8 + $0x868] sm:$0xff] }
 0x10b   :  { %14884 = vst [vmem:[#allocation274_spill] sm:$0xff] %v8808_v61  ;;  %v8833_v61 = vld [vmem:[%s14599_s8 + $0x870] sm:$0xff] }
 0x10c   :  { %14885 = vst [vmem:[#allocation275_spill] sm:$0xff] %v8813_v31  ;;  %v8838_v31 = vld [vmem:[%s14599_s8 + $0x878] sm:$0xff] }
 0x10d   :  { %14886 = vst [vmem:[#allocation276_spill] sm:$0xff] %v8818_v30  ;;  %v8843_v30 = vld [vmem:[%s14599_s8 + $0x880] sm:$0xff] }
 0x10e   :  { %14887 = vst [vmem:[#allocation277_spill] sm:$0xff] %v8823_v29  ;;  %v8848_v29 = vld [vmem:[%s14599_s8 + $0x888] sm:$0xff] }
 0x10f   :  { %14888 = vst [vmem:[#allocation278_spill] sm:$0xff] %v8828_v28  ;;  %v8853_v28 = vld [vmem:[%s14599_s8 + $0x890] sm:$0xff] }
 0x110   :  { %14889 = vst [vmem:[#allocation279_spill] sm:$0xff] %v8833_v61  ;;  %v8858_v61 = vld [vmem:[%s14599_s8 + $0x898] sm:$0xff] }
 0x111   :  { %14890 = vst [vmem:[#allocation280_spill] sm:$0xff] %v8838_v31  ;;  %v8863_v31 = vld [vmem:[%s14599_s8 + $0x8a0] sm:$0xff] }
 0x112   :  { %14891 = vst [vmem:[#allocation281_spill] sm:$0xff] %v8843_v30  ;;  %v8868_v30 = vld [vmem:[%s14599_s8 + $0x8a8] sm:$0xff] }
 0x113   :  { %14892 = vst [vmem:[#allocation282_spill] sm:$0xff] %v8848_v29  ;;  %v8873_v29 = vld [vmem:[%s14599_s8 + $0x8b0] sm:$0xff] }
 0x114   :  { %14893 = vst [vmem:[#allocation283_spill] sm:$0xff] %v8853_v28  ;;  %v8878_v28 = vld [vmem:[%s14599_s8 + $0x8b8] sm:$0xff] }
 0x115   :  { %14894 = vst [vmem:[#allocation284_spill] sm:$0xff] %v8858_v61  ;;  %v8883_v61 = vld [vmem:[%s14599_s8 + $0x8c0] sm:$0xff] }
 0x116   :  { %14895 = vst [vmem:[#allocation285_spill] sm:$0xff] %v8863_v31  ;;  %v8888_v31 = vld [vmem:[%s14599_s8 + $0x8c8] sm:$0xff] }
 0x117   :  { %14896 = vst [vmem:[#allocation286_spill] sm:$0xff] %v8868_v30  ;;  %v8893_v30 = vld [vmem:[%s14599_s8 + $0x8d0] sm:$0xff] }
 0x118   :  { %14897 = vst [vmem:[#allocation287_spill] sm:$0xff] %v8873_v29  ;;  %v8898_v29 = vld [vmem:[%s14599_s8 + $0x8d8] sm:$0xff] }
 0x119   :  { %14898 = vst [vmem:[#allocation288_spill] sm:$0xff] %v8878_v28  ;;  %v8903_v28 = vld [vmem:[%s14599_s8 + $0x8e0] sm:$0xff] }
 0x11a   :  { %14899 = vst [vmem:[#allocation289_spill] sm:$0xff] %v8883_v61  ;;  %v8908_v61 = vld [vmem:[%s14599_s8 + $0x8e8] sm:$0xff] }
 0x11b   :  { %14900 = vst [vmem:[#allocation290_spill] sm:$0xff] %v8888_v31  ;;  %v8913_v31 = vld [vmem:[%s14599_s8 + $0x8f0] sm:$0xff] }
 0x11c   :  { %14901 = vst [vmem:[#allocation291_spill] sm:$0xff] %v8893_v30  ;;  %v8918_v30 = vld [vmem:[%s14599_s8 + $0x8f8] sm:$0xff] }
 0x11d   :  { %14902 = vst [vmem:[#allocation292_spill] sm:$0xff] %v8898_v29  ;;  %v8923_v29 = vld [vmem:[%s14599_s8 + $0x900] sm:$0xff] }
 0x11e   :  { %14903 = vst [vmem:[#allocation293_spill] sm:$0xff] %v8903_v28  ;;  %v8928_v28 = vld [vmem:[%s14599_s8 + $0x908] sm:$0xff] }
 0x11f   :  { %14904 = vst [vmem:[#allocation294_spill] sm:$0xff] %v8908_v61  ;;  %v8933_v61 = vld [vmem:[%s14599_s8 + $0x910] sm:$0xff] }
 0x120   :  { %14905 = vst [vmem:[#allocation295_spill] sm:$0xff] %v8913_v31  ;;  %v8938_v31 = vld [vmem:[%s14599_s8 + $0x918] sm:$0xff] }
 0x121   :  { %14906 = vst [vmem:[#allocation296_spill] sm:$0xff] %v8918_v30  ;;  %v8943_v30 = vld [vmem:[%s14599_s8 + $0x920] sm:$0xff] }
 0x122   :  { %14907 = vst [vmem:[#allocation297_spill] sm:$0xff] %v8923_v29  ;;  %v8948_v29 = vld [vmem:[%s14599_s8 + $0x928] sm:$0xff] }
 0x123   :  { %14908 = vst [vmem:[#allocation298_spill] sm:$0xff] %v8928_v28  ;;  %v8953_v28 = vld [vmem:[%s14599_s8 + $0x930] sm:$0xff] }
 0x124   :  { %14909 = vst [vmem:[#allocation299_spill] sm:$0xff] %v8933_v61  ;;  %v8958_v61 = vld [vmem:[%s14599_s8 + $0x938] sm:$0xff] }
 0x125   :  { %14910 = vst [vmem:[#allocation300_spill] sm:$0xff] %v8938_v31  ;;  %v8963_v31 = vld [vmem:[%s14599_s8 + $0x940] sm:$0xff] }
 0x126   :  { %14911 = vst [vmem:[#allocation301_spill] sm:$0xff] %v8943_v30  ;;  %v8968_v30 = vld [vmem:[%s14599_s8 + $0x948] sm:$0xff] }
 0x127   :  { %14912 = vst [vmem:[#allocation302_spill] sm:$0xff] %v8948_v29  ;;  %v8973_v29 = vld [vmem:[%s14599_s8 + $0x950] sm:$0xff] }
 0x128   :  { %14913 = vst [vmem:[#allocation303_spill] sm:$0xff] %v8953_v28  ;;  %v8978_v28 = vld [vmem:[%s14599_s8 + $0x958] sm:$0xff] }
 0x129   :  { %14914 = vst [vmem:[#allocation304_spill] sm:$0xff] %v8958_v61  ;;  %v8983_v61 = vld [vmem:[%s14599_s8 + $0x960] sm:$0xff] }
 0x12a   :  { %14915 = vst [vmem:[#allocation305_spill] sm:$0xff] %v8963_v31  ;;  %v8988_v31 = vld [vmem:[%s14599_s8 + $0x968] sm:$0xff] }
 0x12b   :  { %14916 = vst [vmem:[#allocation306_spill] sm:$0xff] %v8968_v30  ;;  %v8993_v30 = vld [vmem:[%s14599_s8 + $0x970] sm:$0xff] }
 0x12c   :  { %14917 = vst [vmem:[#allocation307_spill] sm:$0xff] %v8973_v29  ;;  %v8998_v29 = vld [vmem:[%s14599_s8 + $0x978] sm:$0xff] }
 0x12d   :  { %14918 = vst [vmem:[#allocation308_spill] sm:$0xff] %v8978_v28  ;;  %v9003_v28 = vld [vmem:[%s14599_s8 + $0x980] sm:$0xff] }
 0x12e   :  { %14919 = vst [vmem:[#allocation309_spill] sm:$0xff] %v8983_v61  ;;  %v9008_v61 = vld [vmem:[%s14599_s8 + $0x988] sm:$0xff] }
 0x12f   :  { %14920 = vst [vmem:[#allocation310_spill] sm:$0xff] %v8988_v31  ;;  %v9013_v31 = vld [vmem:[%s14599_s8 + $0x990] sm:$0xff] }
 0x130   :  { %14921 = vst [vmem:[#allocation311_spill] sm:$0xff] %v8993_v30  ;;  %v9018_v30 = vld [vmem:[%s14599_s8 + $0x998] sm:$0xff] }
 0x131   :  { %14922 = vst [vmem:[#allocation312_spill] sm:$0xff] %v8998_v29  ;;  %v9023_v29 = vld [vmem:[%s14599_s8 + $0x9a0] sm:$0xff] }
 0x132   :  { %14923 = vst [vmem:[#allocation313_spill] sm:$0xff] %v9003_v28  ;;  %v9028_v28 = vld [vmem:[%s14599_s8 + $0x9a8] sm:$0xff] }
 0x133   :  { %14924 = vst [vmem:[#allocation314_spill] sm:$0xff] %v9008_v61  ;;  %v9033_v61 = vld [vmem:[%s14599_s8 + $0x9b0] sm:$0xff] }
 0x134   :  { %14925 = vst [vmem:[#allocation315_spill] sm:$0xff] %v9013_v31  ;;  %v9038_v31 = vld [vmem:[%s14599_s8 + $0x9b8] sm:$0xff] }
 0x135   :  { %14926 = vst [vmem:[#allocation316_spill] sm:$0xff] %v9018_v30  ;;  %v9043_v30 = vld [vmem:[%s14599_s8 + $0x9c0] sm:$0xff] }
 0x136   :  { %14927 = vst [vmem:[#allocation317_spill] sm:$0xff] %v9023_v29  ;;  %v9048_v29 = vld [vmem:[%s14599_s8 + $0x9c8] sm:$0xff] }
 0x137   :  { %14928 = vst [vmem:[#allocation318_spill] sm:$0xff] %v9028_v28  ;;  %v9053_v28 = vld [vmem:[%s14599_s8 + $0x9d0] sm:$0xff] }
 0x138   :  { %14929 = vst [vmem:[#allocation319_spill] sm:$0xff] %v9033_v61  ;;  %v9058_v61 = vld [vmem:[%s14599_s8 + $0x9d8] sm:$0xff] }
 0x139   :  { %14930 = vst [vmem:[#allocation320_spill] sm:$0xff] %v9038_v31  ;;  %v9063_v31 = vld [vmem:[%s14599_s8 + $0x9e0] sm:$0xff] }
 0x13a   :  { %14931 = vst [vmem:[#allocation321_spill] sm:$0xff] %v9043_v30  ;;  %v9068_v30 = vld [vmem:[%s14599_s8 + $0x9e8] sm:$0xff] }
 0x13b   :  { %14932 = vst [vmem:[#allocation322_spill] sm:$0xff] %v9048_v29  ;;  %v9073_v29 = vld [vmem:[%s14599_s8 + $0x9f0] sm:$0xff] }
 0x13c   :  { %14933 = vst [vmem:[#allocation323_spill] sm:$0xff] %v9053_v28  ;;  %v9078_v28 = vld [vmem:[%s14599_s8 + $0x9f8] sm:$0xff] }
 0x13d   :  { %14934 = vst [vmem:[#allocation324_spill] sm:$0xff] %v9058_v61  ;;  %v9083_v61 = vld [vmem:[%s14599_s8 + $0xa00] sm:$0xff] }
 0x13e   :  { %14935 = vst [vmem:[#allocation325_spill] sm:$0xff] %v9063_v31  ;;  %v9088_v31 = vld [vmem:[%s14599_s8 + $0xa08] sm:$0xff] }
 0x13f   :  { %14936 = vst [vmem:[#allocation326_spill] sm:$0xff] %v9068_v30  ;;  %v9093_v30 = vld [vmem:[%s14599_s8 + $0xa10] sm:$0xff] }
 0x140   :  { %14937 = vst [vmem:[#allocation327_spill] sm:$0xff] %v9073_v29  ;;  %v9098_v29 = vld [vmem:[%s14599_s8 + $0xa18] sm:$0xff] }
 0x141   :  { %14938 = vst [vmem:[#allocation328_spill] sm:$0xff] %v9078_v28  ;;  %v9103_v28 = vld [vmem:[%s14599_s8 + $0xa20] sm:$0xff] }
 0x142   :  { %14939 = vst [vmem:[#allocation329_spill] sm:$0xff] %v9083_v61  ;;  %v9108_v61 = vld [vmem:[%s14599_s8 + $0xa28] sm:$0xff] }
 0x143   :  { %14940 = vst [vmem:[#allocation330_spill] sm:$0xff] %v9088_v31  ;;  %v9113_v31 = vld [vmem:[%s14599_s8 + $0xa30] sm:$0xff] }
 0x144   :  { %14941 = vst [vmem:[#allocation331_spill] sm:$0xff] %v9093_v30  ;;  %v9118_v30 = vld [vmem:[%s14599_s8 + $0xa38] sm:$0xff] }
 0x145   :  { %14942 = vst [vmem:[#allocation332_spill] sm:$0xff] %v9098_v29  ;;  %v9123_v29 = vld [vmem:[%s14599_s8 + $0xa40] sm:$0xff] }
 0x146   :  { %14943 = vst [vmem:[#allocation333_spill] sm:$0xff] %v9103_v28  ;;  %v9128_v28 = vld [vmem:[%s14599_s8 + $0xa48] sm:$0xff] }
 0x147   :  { %14944 = vst [vmem:[#allocation334_spill] sm:$0xff] %v9108_v61  ;;  %v9133_v61 = vld [vmem:[%s14599_s8 + $0xa50] sm:$0xff] }
 0x148   :  { %14945 = vst [vmem:[#allocation335_spill] sm:$0xff] %v9113_v31  ;;  %v9138_v31 = vld [vmem:[%s14599_s8 + $0xa58] sm:$0xff] }
 0x149   :  { %14946 = vst [vmem:[#allocation336_spill] sm:$0xff] %v9118_v30  ;;  %v9143_v30 = vld [vmem:[%s14599_s8 + $0xa60] sm:$0xff] }
 0x14a   :  { %14947 = vst [vmem:[#allocation337_spill] sm:$0xff] %v9123_v29  ;;  %v9148_v29 = vld [vmem:[%s14599_s8 + $0xa68] sm:$0xff] }
 0x14b   :  { %14948 = vst [vmem:[#allocation338_spill] sm:$0xff] %v9128_v28  ;;  %v9153_v28 = vld [vmem:[%s14599_s8 + $0xa70] sm:$0xff] }
 0x14c   :  { %14949 = vst [vmem:[#allocation339_spill] sm:$0xff] %v9133_v61  ;;  %v9158_v61 = vld [vmem:[%s14599_s8 + $0xa78] sm:$0xff] }
 0x14d   :  { %14950 = vst [vmem:[#allocation340_spill] sm:$0xff] %v9138_v31  ;;  %v9163_v31 = vld [vmem:[%s14599_s8 + $0xa80] sm:$0xff] }
 0x14e   :  { %14951 = vst [vmem:[#allocation341_spill] sm:$0xff] %v9143_v30  ;;  %v9168_v30 = vld [vmem:[%s14599_s8 + $0xa88] sm:$0xff] }
 0x14f   :  { %14952 = vst [vmem:[#allocation342_spill] sm:$0xff] %v9148_v29  ;;  %v9173_v29 = vld [vmem:[%s14599_s8 + $0xa90] sm:$0xff] }
 0x150   :  { %14953 = vst [vmem:[#allocation343_spill] sm:$0xff] %v9153_v28  ;;  %v9178_v28 = vld [vmem:[%s14599_s8 + $0xa98] sm:$0xff] }
 0x151   :  { %14954 = vst [vmem:[#allocation344_spill] sm:$0xff] %v9158_v61  ;;  %v9183_v61 = vld [vmem:[%s14599_s8 + $0xaa0] sm:$0xff] }
 0x152   :  { %14955 = vst [vmem:[#allocation345_spill] sm:$0xff] %v9163_v31  ;;  %v9188_v31 = vld [vmem:[%s14599_s8 + $0xaa8] sm:$0xff] }
 0x153   :  { %14956 = vst [vmem:[#allocation346_spill] sm:$0xff] %v9168_v30  ;;  %v9193_v30 = vld [vmem:[%s14599_s8 + $0xab0] sm:$0xff] }
 0x154   :  { %14957 = vst [vmem:[#allocation347_spill] sm:$0xff] %v9173_v29  ;;  %v9198_v29 = vld [vmem:[%s14599_s8 + $0xab8] sm:$0xff] }
 0x155   :  { %14958 = vst [vmem:[#allocation348_spill] sm:$0xff] %v9178_v28  ;;  %v9203_v28 = vld [vmem:[%s14599_s8 + $0xac0] sm:$0xff] }
 0x156   :  { %14959 = vst [vmem:[#allocation349_spill] sm:$0xff] %v9183_v61  ;;  %v9208_v61 = vld [vmem:[%s14599_s8 + $0xac8] sm:$0xff] }
 0x157   :  { %14960 = vst [vmem:[#allocation350_spill] sm:$0xff] %v9188_v31  ;;  %v9213_v31 = vld [vmem:[%s14599_s8 + $0xad0] sm:$0xff] }
 0x158   :  { %14961 = vst [vmem:[#allocation351_spill] sm:$0xff] %v9193_v30  ;;  %v9218_v30 = vld [vmem:[%s14599_s8 + $0xad8] sm:$0xff] }
 0x159   :  { %14962 = vst [vmem:[#allocation352_spill] sm:$0xff] %v9198_v29  ;;  %v9223_v29 = vld [vmem:[%s14599_s8 + $0xae0] sm:$0xff] }
 0x15a   :  { %14963 = vst [vmem:[#allocation353_spill] sm:$0xff] %v9203_v28  ;;  %v9228_v28 = vld [vmem:[%s14599_s8 + $0xae8] sm:$0xff] }
 0x15b   :  { %14964 = vst [vmem:[#allocation354_spill] sm:$0xff] %v9208_v61  ;;  %v9233_v61 = vld [vmem:[%s14599_s8 + $0xaf0] sm:$0xff] }
 0x15c   :  { %14965 = vst [vmem:[#allocation355_spill] sm:$0xff] %v9213_v31  ;;  %v9238_v31 = vld [vmem:[%s14599_s8 + $0xaf8] sm:$0xff] }
 0x15d   :  { %14966 = vst [vmem:[#allocation356_spill] sm:$0xff] %v9218_v30  ;;  %v9243_v30 = vld [vmem:[%s14599_s8 + $0xb00] sm:$0xff] }
 0x15e   :  { %14967 = vst [vmem:[#allocation357_spill] sm:$0xff] %v9223_v29  ;;  %v9248_v29 = vld [vmem:[%s14599_s8 + $0xb08] sm:$0xff] }
 0x15f   :  { %14968 = vst [vmem:[#allocation358_spill] sm:$0xff] %v9228_v28  ;;  %v9253_v28 = vld [vmem:[%s14599_s8 + $0xb10] sm:$0xff] }
 0x160   :  { %14969 = vst [vmem:[#allocation359_spill] sm:$0xff] %v9233_v61  ;;  %v9258_v61 = vld [vmem:[%s14599_s8 + $0xb18] sm:$0xff] }
 0x161   :  { %14970 = vst [vmem:[#allocation360_spill] sm:$0xff] %v9238_v31  ;;  %v9263_v31 = vld [vmem:[%s14599_s8 + $0xb20] sm:$0xff] }
 0x162   :  { %14971 = vst [vmem:[#allocation361_spill] sm:$0xff] %v9243_v30  ;;  %v9268_v30 = vld [vmem:[%s14599_s8 + $0xb28] sm:$0xff] }
 0x163   :  { %14972 = vst [vmem:[#allocation362_spill] sm:$0xff] %v9248_v29  ;;  %v9273_v29 = vld [vmem:[%s14599_s8 + $0xb30] sm:$0xff] }
 0x164   :  { %14973 = vst [vmem:[#allocation363_spill] sm:$0xff] %v9253_v28  ;;  %v9278_v28 = vld [vmem:[%s14599_s8 + $0xb38] sm:$0xff] }
 0x165   :  { %14974 = vst [vmem:[#allocation364_spill] sm:$0xff] %v9258_v61  ;;  %v9283_v61 = vld [vmem:[%s14599_s8 + $0xb40] sm:$0xff] }
 0x166   :  { %14975 = vst [vmem:[#allocation365_spill] sm:$0xff] %v9263_v31  ;;  %v9288_v31 = vld [vmem:[%s14599_s8 + $0xb48] sm:$0xff] }
 0x167   :  { %14976 = vst [vmem:[#allocation366_spill] sm:$0xff] %v9268_v30  ;;  %v9293_v30 = vld [vmem:[%s14599_s8 + $0xb50] sm:$0xff] }
 0x168   :  { %14977 = vst [vmem:[#allocation367_spill] sm:$0xff] %v9273_v29  ;;  %v9298_v29 = vld [vmem:[%s14599_s8 + $0xb58] sm:$0xff] }
 0x169   :  { %14978 = vst [vmem:[#allocation368_spill] sm:$0xff] %v9278_v28  ;;  %v9303_v28 = vld [vmem:[%s14599_s8 + $0xb60] sm:$0xff] }
 0x16a   :  { %14979 = vst [vmem:[#allocation369_spill] sm:$0xff] %v9283_v61  ;;  %v9308_v61 = vld [vmem:[%s14599_s8 + $0xb68] sm:$0xff] }
 0x16b   :  { %14980 = vst [vmem:[#allocation370_spill] sm:$0xff] %v9288_v31  ;;  %v9313_v31 = vld [vmem:[%s14599_s8 + $0xb70] sm:$0xff] }
 0x16c   :  { %14981 = vst [vmem:[#allocation371_spill] sm:$0xff] %v9293_v30  ;;  %v9318_v30 = vld [vmem:[%s14599_s8 + $0xb78] sm:$0xff] }
 0x16d   :  { %14982 = vst [vmem:[#allocation372_spill] sm:$0xff] %v9298_v29  ;;  %v9323_v29 = vld [vmem:[%s14599_s8 + $0xb80] sm:$0xff] }
 0x16e   :  { %14983 = vst [vmem:[#allocation373_spill] sm:$0xff] %v9303_v28  ;;  %v9328_v28 = vld [vmem:[%s14599_s8 + $0xb88] sm:$0xff] }
 0x16f   :  { %14984 = vst [vmem:[#allocation374_spill] sm:$0xff] %v9308_v61  ;;  %v9333_v61 = vld [vmem:[%s14599_s8 + $0xb90] sm:$0xff] }
 0x170   :  { %14985 = vst [vmem:[#allocation375_spill] sm:$0xff] %v9313_v31  ;;  %v9338_v31 = vld [vmem:[%s14599_s8 + $0xb98] sm:$0xff] }
 0x171   :  { %14986 = vst [vmem:[#allocation376_spill] sm:$0xff] %v9318_v30  ;;  %v9343_v30 = vld [vmem:[%s14599_s8 + $0xba0] sm:$0xff] }
 0x172   :  { %14987 = vst [vmem:[#allocation377_spill] sm:$0xff] %v9323_v29  ;;  %v9348_v29 = vld [vmem:[%s14599_s8 + $0xba8] sm:$0xff] }
 0x173   :  { %14988 = vst [vmem:[#allocation378_spill] sm:$0xff] %v9328_v28  ;;  %v9353_v28 = vld [vmem:[%s14599_s8 + $0xbb0] sm:$0xff] }
 0x174   :  { %14989 = vst [vmem:[#allocation379_spill] sm:$0xff] %v9333_v61  ;;  %v9358_v61 = vld [vmem:[%s14599_s8 + $0xbb8] sm:$0xff] }
 0x175   :  { %14990 = vst [vmem:[#allocation380_spill] sm:$0xff] %v9338_v31  ;;  %v9363_v31 = vld [vmem:[%s14599_s8 + $0xbc0] sm:$0xff] }
 0x176   :  { %14991 = vst [vmem:[#allocation381_spill] sm:$0xff] %v9343_v30  ;;  %v9368_v30 = vld [vmem:[%s14599_s8 + $0xbc8] sm:$0xff] }
 0x177   :  { %14992 = vst [vmem:[#allocation382_spill] sm:$0xff] %v9348_v29  ;;  %v9373_v29 = vld [vmem:[%s14599_s8 + $0xbd0] sm:$0xff] }
 0x178   :  { %14993 = vst [vmem:[#allocation383_spill] sm:$0xff] %v9353_v28  ;;  %v9378_v28 = vld [vmem:[%s14599_s8 + $0xbd8] sm:$0xff] }
 0x179   :  { %14994 = vst [vmem:[#allocation384_spill] sm:$0xff] %v9358_v61  ;;  %v9383_v61 = vld [vmem:[%s14599_s8 + $0xbe0] sm:$0xff] }
 0x17a   :  { %14995 = vst [vmem:[#allocation385_spill] sm:$0xff] %v9363_v31  ;;  %v9388_v31 = vld [vmem:[%s14599_s8 + $0xbe8] sm:$0xff] }
 0x17b   :  { %14996 = vst [vmem:[#allocation386_spill] sm:$0xff] %v9368_v30  ;;  %v9393_v30 = vld [vmem:[%s14599_s8 + $0xbf0] sm:$0xff] }
 0x17c   :  { %14997 = vst [vmem:[#allocation387_spill] sm:$0xff] %v9373_v29  ;;  %v9398_v29 = vld [vmem:[%s14599_s8 + $0xbf8] sm:$0xff] }
 0x17d   :  { %14998 = vst [vmem:[#allocation388_spill] sm:$0xff] %v9378_v28  ;;  %v9403_v28 = vld [vmem:[%s14599_s8 + $0xc00] sm:$0xff] }
 0x17e   :  { %14999 = vst [vmem:[#allocation389_spill] sm:$0xff] %v9383_v61  ;;  %v9408_v61 = vld [vmem:[%s14599_s8 + $0xc08] sm:$0xff] }
 0x17f   :  { %15000 = vst [vmem:[#allocation390_spill] sm:$0xff] %v9388_v31  ;;  %v9413_v31 = vld [vmem:[%s14599_s8 + $0xc10] sm:$0xff] }
 0x180   :  { %15001 = vst [vmem:[#allocation391_spill] sm:$0xff] %v9393_v30  ;;  %v9418_v30 = vld [vmem:[%s14599_s8 + $0xc18] sm:$0xff] }
 0x181   :  { %15002 = vst [vmem:[#allocation392_spill] sm:$0xff] %v9398_v29  ;;  %v9423_v29 = vld [vmem:[%s14599_s8 + $0xc20] sm:$0xff] }
 0x182   :  { %15003 = vst [vmem:[#allocation393_spill] sm:$0xff] %v9403_v28  ;;  %v9428_v28 = vld [vmem:[%s14599_s8 + $0xc28] sm:$0xff] }
 0x183   :  { %15004 = vst [vmem:[#allocation394_spill] sm:$0xff] %v9408_v61  ;;  %v9433_v61 = vld [vmem:[%s14599_s8 + $0xc30] sm:$0xff] }
 0x184   :  { %15005 = vst [vmem:[#allocation395_spill] sm:$0xff] %v9413_v31  ;;  %v9438_v31 = vld [vmem:[%s14599_s8 + $0xc38] sm:$0xff] }
 0x185   :  { %15006 = vst [vmem:[#allocation396_spill] sm:$0xff] %v9418_v30  ;;  %v9443_v30 = vld [vmem:[%s14599_s8 + $0xc40] sm:$0xff] }
 0x186   :  { %15007 = vst [vmem:[#allocation397_spill] sm:$0xff] %v9423_v29  ;;  %v9448_v29 = vld [vmem:[%s14599_s8 + $0xc48] sm:$0xff] }
 0x187   :  { %15008 = vst [vmem:[#allocation398_spill] sm:$0xff] %v9428_v28  ;;  %v9453_v28 = vld [vmem:[%s14599_s8 + $0xc50] sm:$0xff] }
 0x188   :  { %15009 = vst [vmem:[#allocation399_spill] sm:$0xff] %v9433_v61  ;;  %v9458_v61 = vld [vmem:[%s14599_s8 + $0xc58] sm:$0xff] }
 0x189   :  { %15010 = vst [vmem:[#allocation400_spill] sm:$0xff] %v9438_v31  ;;  %v9463_v31 = vld [vmem:[%s14599_s8 + $0xc60] sm:$0xff] }
 0x18a   :  { %15011 = vst [vmem:[#allocation401_spill] sm:$0xff] %v9443_v30  ;;  %v9468_v30 = vld [vmem:[%s14599_s8 + $0xc68] sm:$0xff] }
 0x18b   :  { %15012 = vst [vmem:[#allocation402_spill] sm:$0xff] %v9448_v29  ;;  %v9473_v29 = vld [vmem:[%s14599_s8 + $0xc70] sm:$0xff] }
 0x18c   :  { %15013 = vst [vmem:[#allocation403_spill] sm:$0xff] %v9453_v28  ;;  %v9478_v28 = vld [vmem:[%s14599_s8 + $0xc78] sm:$0xff] }
 0x18d   :  { %15014 = vst [vmem:[#allocation404_spill] sm:$0xff] %v9458_v61  ;;  %v9483_v61 = vld [vmem:[%s14599_s8 + $0xc80] sm:$0xff] }
 0x18e   :  { %15015 = vst [vmem:[#allocation405_spill] sm:$0xff] %v9463_v31  ;;  %v9488_v31 = vld [vmem:[%s14599_s8 + $0xc88] sm:$0xff] }
 0x18f   :  { %15016 = vst [vmem:[#allocation406_spill] sm:$0xff] %v9468_v30  ;;  %v9493_v30 = vld [vmem:[%s14599_s8 + $0xc90] sm:$0xff] }
 0x190   :  { %15017 = vst [vmem:[#allocation407_spill] sm:$0xff] %v9473_v29  ;;  %v9498_v29 = vld [vmem:[%s14599_s8 + $0xc98] sm:$0xff] }
 0x191   :  { %15018 = vst [vmem:[#allocation408_spill] sm:$0xff] %v9478_v28  ;;  %v9503_v28 = vld [vmem:[%s14599_s8 + $0xca0] sm:$0xff] }
 0x192   :  { %15019 = vst [vmem:[#allocation409_spill] sm:$0xff] %v9483_v61  ;;  %v9508_v61 = vld [vmem:[%s14599_s8 + $0xca8] sm:$0xff] }
 0x193   :  { %15020 = vst [vmem:[#allocation410_spill] sm:$0xff] %v9488_v31  ;;  %v9513_v31 = vld [vmem:[%s14599_s8 + $0xcb0] sm:$0xff] }
 0x194   :  { %15021 = vst [vmem:[#allocation411_spill] sm:$0xff] %v9493_v30  ;;  %v9518_v30 = vld [vmem:[%s14599_s8 + $0xcb8] sm:$0xff] }
 0x195   :  { %15022 = vst [vmem:[#allocation412_spill] sm:$0xff] %v9498_v29  ;;  %v9523_v29 = vld [vmem:[%s14599_s8 + $0xcc0] sm:$0xff] }
 0x196   :  { %15023 = vst [vmem:[#allocation413_spill] sm:$0xff] %v9503_v28  ;;  %v9528_v28 = vld [vmem:[%s14599_s8 + $0xcc8] sm:$0xff] }
 0x197   :  { %15024 = vst [vmem:[#allocation414_spill] sm:$0xff] %v9508_v61  ;;  %v9533_v61 = vld [vmem:[%s14599_s8 + $0xcd0] sm:$0xff] }
 0x198   :  { %15025 = vst [vmem:[#allocation415_spill] sm:$0xff] %v9513_v31  ;;  %v9538_v31 = vld [vmem:[%s14599_s8 + $0xcd8] sm:$0xff] }
 0x199   :  { %15026 = vst [vmem:[#allocation416_spill] sm:$0xff] %v9518_v30  ;;  %v9543_v30 = vld [vmem:[%s14599_s8 + $0xce0] sm:$0xff] }
 0x19a   :  { %15027 = vst [vmem:[#allocation417_spill] sm:$0xff] %v9523_v29  ;;  %v9548_v29 = vld [vmem:[%s14599_s8 + $0xce8] sm:$0xff] }
 0x19b   :  { %15028 = vst [vmem:[#allocation418_spill] sm:$0xff] %v9528_v28  ;;  %v9553_v28 = vld [vmem:[%s14599_s8 + $0xcf0] sm:$0xff] }
 0x19c   :  { %15029 = vst [vmem:[#allocation419_spill] sm:$0xff] %v9533_v61  ;;  %v9558_v61 = vld [vmem:[%s14599_s8 + $0xcf8] sm:$0xff] }
 0x19d   :  { %15030 = vst [vmem:[#allocation420_spill] sm:$0xff] %v9538_v31  ;;  %v9563_v31 = vld [vmem:[%s14599_s8 + $0xd00] sm:$0xff] }
 0x19e   :  { %15031 = vst [vmem:[#allocation421_spill] sm:$0xff] %v9543_v30  ;;  %v9568_v30 = vld [vmem:[%s14599_s8 + $0xd08] sm:$0xff] }
 0x19f   :  { %15032 = vst [vmem:[#allocation422_spill] sm:$0xff] %v9548_v29  ;;  %v9573_v29 = vld [vmem:[%s14599_s8 + $0xd10] sm:$0xff] }
 0x1a0   :  { %15033 = vst [vmem:[#allocation423_spill] sm:$0xff] %v9553_v28  ;;  %v9578_v28 = vld [vmem:[%s14599_s8 + $0xd18] sm:$0xff] }
 0x1a1   :  { %15034 = vst [vmem:[#allocation424_spill] sm:$0xff] %v9558_v61  ;;  %v9583_v61 = vld [vmem:[%s14599_s8 + $0xd20] sm:$0xff] }
 0x1a2   :  { %15035 = vst [vmem:[#allocation425_spill] sm:$0xff] %v9563_v31  ;;  %v9588_v31 = vld [vmem:[%s14599_s8 + $0xd28] sm:$0xff] }
 0x1a3   :  { %15036 = vst [vmem:[#allocation426_spill] sm:$0xff] %v9568_v30  ;;  %v9593_v30 = vld [vmem:[%s14599_s8 + $0xd30] sm:$0xff] }
 0x1a4   :  { %15037 = vst [vmem:[#allocation427_spill] sm:$0xff] %v9573_v29  ;;  %v9598_v29 = vld [vmem:[%s14599_s8 + $0xd38] sm:$0xff] }
 0x1a5   :  { %15038 = vst [vmem:[#allocation428_spill] sm:$0xff] %v9578_v28  ;;  %v9603_v28 = vld [vmem:[%s14599_s8 + $0xd40] sm:$0xff] }
 0x1a6   :  { %15039 = vst [vmem:[#allocation429_spill] sm:$0xff] %v9583_v61  ;;  %v9608_v61 = vld [vmem:[%s14599_s8 + $0xd48] sm:$0xff] }
 0x1a7   :  { %15040 = vst [vmem:[#allocation430_spill] sm:$0xff] %v9588_v31  ;;  %v9613_v31 = vld [vmem:[%s14599_s8 + $0xd50] sm:$0xff] }
 0x1a8   :  { %15041 = vst [vmem:[#allocation431_spill] sm:$0xff] %v9593_v30  ;;  %v9618_v30 = vld [vmem:[%s14599_s8 + $0xd58] sm:$0xff] }
 0x1a9   :  { %15042 = vst [vmem:[#allocation432_spill] sm:$0xff] %v9598_v29  ;;  %v9623_v29 = vld [vmem:[%s14599_s8 + $0xd60] sm:$0xff] }
 0x1aa   :  { %15043 = vst [vmem:[#allocation433_spill] sm:$0xff] %v9603_v28  ;;  %v9628_v28 = vld [vmem:[%s14599_s8 + $0xd68] sm:$0xff] }
 0x1ab   :  { %15044 = vst [vmem:[#allocation434_spill] sm:$0xff] %v9608_v61  ;;  %v9633_v61 = vld [vmem:[%s14599_s8 + $0xd70] sm:$0xff] }
 0x1ac   :  { %15045 = vst [vmem:[#allocation435_spill] sm:$0xff] %v9613_v31  ;;  %v9638_v31 = vld [vmem:[%s14599_s8 + $0xd78] sm:$0xff] }
 0x1ad   :  { %15046 = vst [vmem:[#allocation436_spill] sm:$0xff] %v9618_v30  ;;  %v9643_v30 = vld [vmem:[%s14599_s8 + $0xd80] sm:$0xff] }
 0x1ae   :  { %15047 = vst [vmem:[#allocation437_spill] sm:$0xff] %v9623_v29  ;;  %v9648_v29 = vld [vmem:[%s14599_s8 + $0xd88] sm:$0xff] }
 0x1af   :  { %15048 = vst [vmem:[#allocation438_spill] sm:$0xff] %v9628_v28  ;;  %v9653_v28 = vld [vmem:[%s14599_s8 + $0xd90] sm:$0xff] }
 0x1b0   :  { %15049 = vst [vmem:[#allocation439_spill] sm:$0xff] %v9633_v61  ;;  %v9658_v61 = vld [vmem:[%s14599_s8 + $0xd98] sm:$0xff] }
 0x1b1   :  { %15050 = vst [vmem:[#allocation440_spill] sm:$0xff] %v9638_v31  ;;  %v9663_v31 = vld [vmem:[%s14599_s8 + $0xda0] sm:$0xff] }
 0x1b2   :  { %15051 = vst [vmem:[#allocation441_spill] sm:$0xff] %v9643_v30  ;;  %v9668_v30 = vld [vmem:[%s14599_s8 + $0xda8] sm:$0xff] }
 0x1b3   :  { %15052 = vst [vmem:[#allocation442_spill] sm:$0xff] %v9648_v29  ;;  %v9673_v29 = vld [vmem:[%s14599_s8 + $0xdb0] sm:$0xff] }
 0x1b4   :  { %15053 = vst [vmem:[#allocation443_spill] sm:$0xff] %v9653_v28  ;;  %v9678_v28 = vld [vmem:[%s14599_s8 + $0xdb8] sm:$0xff] }
 0x1b5   :  { %15054 = vst [vmem:[#allocation444_spill] sm:$0xff] %v9658_v61  ;;  %v9683_v61 = vld [vmem:[%s14599_s8 + $0xdc0] sm:$0xff] }
 0x1b6   :  { %15055 = vst [vmem:[#allocation445_spill] sm:$0xff] %v9663_v31  ;;  %v9688_v31 = vld [vmem:[%s14599_s8 + $0xdc8] sm:$0xff] }
 0x1b7   :  { %15056 = vst [vmem:[#allocation446_spill] sm:$0xff] %v9668_v30  ;;  %v9693_v30 = vld [vmem:[%s14599_s8 + $0xdd0] sm:$0xff] }
 0x1b8   :  { %15057 = vst [vmem:[#allocation447_spill] sm:$0xff] %v9673_v29  ;;  %v9698_v29 = vld [vmem:[%s14599_s8 + $0xdd8] sm:$0xff] }
 0x1b9   :  { %15058 = vst [vmem:[#allocation448_spill] sm:$0xff] %v9678_v28  ;;  %v9703_v28 = vld [vmem:[%s14599_s8 + $0xde0] sm:$0xff] }
 0x1ba   :  { %15059 = vst [vmem:[#allocation449_spill] sm:$0xff] %v9683_v61  ;;  %v9708_v61 = vld [vmem:[%s14599_s8 + $0xde8] sm:$0xff] }
 0x1bb   :  { %15060 = vst [vmem:[#allocation450_spill] sm:$0xff] %v9688_v31  ;;  %v9713_v31 = vld [vmem:[%s14599_s8 + $0xdf0] sm:$0xff] }
 0x1bc   :  { %15061 = vst [vmem:[#allocation451_spill] sm:$0xff] %v9693_v30  ;;  %v9718_v30 = vld [vmem:[%s14599_s8 + $0xdf8] sm:$0xff] }
 0x1bd   :  { %15062 = vst [vmem:[#allocation452_spill] sm:$0xff] %v9698_v29  ;;  %v9723_v29 = vld [vmem:[%s14599_s8 + $0xe00] sm:$0xff] }
 0x1be   :  { %15063 = vst [vmem:[#allocation453_spill] sm:$0xff] %v9703_v28  ;;  %v9728_v28 = vld [vmem:[%s14599_s8 + $0xe08] sm:$0xff] }
 0x1bf   :  { %15064 = vst [vmem:[#allocation454_spill] sm:$0xff] %v9708_v61  ;;  %v9733_v61 = vld [vmem:[%s14599_s8 + $0xe10] sm:$0xff] }
 0x1c0   :  { %15065 = vst [vmem:[#allocation455_spill] sm:$0xff] %v9713_v31  ;;  %v9738_v31 = vld [vmem:[%s14599_s8 + $0xe18] sm:$0xff] }
 0x1c1   :  { %15066 = vst [vmem:[#allocation456_spill] sm:$0xff] %v9718_v30  ;;  %v9743_v30 = vld [vmem:[%s14599_s8 + $0xe20] sm:$0xff] }
 0x1c2   :  { %15067 = vst [vmem:[#allocation457_spill] sm:$0xff] %v9723_v29  ;;  %v9748_v29 = vld [vmem:[%s14599_s8 + $0xe28] sm:$0xff] }
 0x1c3   :  { %15068 = vst [vmem:[#allocation458_spill] sm:$0xff] %v9728_v28  ;;  %v9753_v28 = vld [vmem:[%s14599_s8 + $0xe30] sm:$0xff] }
 0x1c4   :  { %15069 = vst [vmem:[#allocation459_spill] sm:$0xff] %v9733_v61  ;;  %v9758_v61 = vld [vmem:[%s14599_s8 + $0xe38] sm:$0xff] }
 0x1c5   :  { %15070 = vst [vmem:[#allocation460_spill] sm:$0xff] %v9738_v31  ;;  %v9763_v31 = vld [vmem:[%s14599_s8 + $0xe40] sm:$0xff] }
 0x1c6   :  { %15071 = vst [vmem:[#allocation461_spill] sm:$0xff] %v9743_v30  ;;  %v9768_v30 = vld [vmem:[%s14599_s8 + $0xe48] sm:$0xff] }
 0x1c7   :  { %15072 = vst [vmem:[#allocation462_spill] sm:$0xff] %v9748_v29  ;;  %v9773_v29 = vld [vmem:[%s14599_s8 + $0xe50] sm:$0xff] }
 0x1c8   :  { %15073 = vst [vmem:[#allocation463_spill] sm:$0xff] %v9753_v28  ;;  %v9778_v28 = vld [vmem:[%s14599_s8 + $0xe58] sm:$0xff] }
 0x1c9   :  { %15074 = vst [vmem:[#allocation464_spill] sm:$0xff] %v9758_v61  ;;  %v9783_v61 = vld [vmem:[%s14599_s8 + $0xe60] sm:$0xff] }
 0x1ca   :  { %15075 = vst [vmem:[#allocation465_spill] sm:$0xff] %v9763_v31  ;;  %v9788_v31 = vld [vmem:[%s14599_s8 + $0xe68] sm:$0xff] }
 0x1cb   :  { %15076 = vst [vmem:[#allocation466_spill] sm:$0xff] %v9768_v30  ;;  %v9793_v30 = vld [vmem:[%s14599_s8 + $0xe70] sm:$0xff] }
 0x1cc   :  { %15077 = vst [vmem:[#allocation467_spill] sm:$0xff] %v9773_v29  ;;  %v9798_v29 = vld [vmem:[%s14599_s8 + $0xe78] sm:$0xff] }
 0x1cd   :  { %15078 = vst [vmem:[#allocation468_spill] sm:$0xff] %v9778_v28  ;;  %v9803_v28 = vld [vmem:[%s14599_s8 + $0xe80] sm:$0xff] }
 0x1ce   :  { %15079 = vst [vmem:[#allocation469_spill] sm:$0xff] %v9783_v61  ;;  %v9808_v61 = vld [vmem:[%s14599_s8 + $0xe88] sm:$0xff] }
 0x1cf   :  { %15080 = vst [vmem:[#allocation470_spill] sm:$0xff] %v9788_v31  ;;  %v9813_v31 = vld [vmem:[%s14599_s8 + $0xe90] sm:$0xff] }
 0x1d0   :  { %15081 = vst [vmem:[#allocation471_spill] sm:$0xff] %v9793_v30  ;;  %v9818_v30 = vld [vmem:[%s14599_s8 + $0xe98] sm:$0xff] }
 0x1d1   :  { %15082 = vst [vmem:[#allocation472_spill] sm:$0xff] %v9798_v29  ;;  %v9823_v29 = vld [vmem:[%s14599_s8 + $0xea0] sm:$0xff] }
 0x1d2   :  { %15083 = vst [vmem:[#allocation473_spill] sm:$0xff] %v9803_v28  ;;  %v9828_v28 = vld [vmem:[%s14599_s8 + $0xea8] sm:$0xff] }
 0x1d3   :  { %15084 = vst [vmem:[#allocation474_spill] sm:$0xff] %v9808_v61  ;;  %v9833_v61 = vld [vmem:[%s14599_s8 + $0xeb0] sm:$0xff] }
 0x1d4   :  { %15085 = vst [vmem:[#allocation475_spill] sm:$0xff] %v9813_v31  ;;  %v9838_v31 = vld [vmem:[%s14599_s8 + $0xeb8] sm:$0xff] }
 0x1d5   :  { %15086 = vst [vmem:[#allocation476_spill] sm:$0xff] %v9818_v30  ;;  %v9843_v30 = vld [vmem:[%s14599_s8 + $0xec0] sm:$0xff] }
 0x1d6   :  { %15087 = vst [vmem:[#allocation477_spill] sm:$0xff] %v9823_v29  ;;  %v9848_v29 = vld [vmem:[%s14599_s8 + $0xec8] sm:$0xff] }
 0x1d7   :  { %15088 = vst [vmem:[#allocation478_spill] sm:$0xff] %v9828_v28  ;;  %v9853_v28 = vld [vmem:[%s14599_s8 + $0xed0] sm:$0xff] }
 0x1d8   :  { %15089 = vst [vmem:[#allocation479_spill] sm:$0xff] %v9833_v61  ;;  %v9858_v61 = vld [vmem:[%s14599_s8 + $0xed8] sm:$0xff] }
 0x1d9   :  { %15090 = vst [vmem:[#allocation480_spill] sm:$0xff] %v9838_v31  ;;  %v9863_v31 = vld [vmem:[%s14599_s8 + $0xee0] sm:$0xff] }
 0x1da   :  { %15091 = vst [vmem:[#allocation481_spill] sm:$0xff] %v9843_v30  ;;  %v9868_v30 = vld [vmem:[%s14599_s8 + $0xee8] sm:$0xff] }
 0x1db   :  { %15092 = vst [vmem:[#allocation482_spill] sm:$0xff] %v9848_v29  ;;  %v9873_v29 = vld [vmem:[%s14599_s8 + $0xef0] sm:$0xff] }
 0x1dc   :  { %15093 = vst [vmem:[#allocation483_spill] sm:$0xff] %v9853_v28  ;;  %v9878_v28 = vld [vmem:[%s14599_s8 + $0xef8] sm:$0xff] }
 0x1dd   :  { %15094 = vst [vmem:[#allocation484_spill] sm:$0xff] %v9858_v61 }
 0x1de   :  { %15095 = vst [vmem:[#allocation485_spill] sm:$0xff] %v9863_v31 }
 0x1df   :  { %15096 = vst [vmem:[#allocation486_spill] sm:$0xff] %v9868_v30 }
 0x1e0   :  { %15097 = vst [vmem:[#allocation487_spill] sm:$0xff] %v9873_v29 }
 0x1e1   :  { %15098 = vst [vmem:[#allocation488_spill] sm:$0xff] %v9878_v28 }
 0x1e2   :  { %1006 = vsyncadd [#allocation3], 61440  ;;  %v6486_v31 = vld [vmem:[%s14592_s1 + $0x70] sm:$0xf]  ;;  %vm1225_vm0 = vcmask 1043456   ;;  %v6484_v30 = vld [vmem:[%s14592_s1 + $0x60] sm:$0xff] }
 0x1e3   :  { %6488 = vmatpush.msk.msra.mxu0 %vm1225_vm0, %v6486_v31  ;;  %v6487_v29 = vld [vmem:[%s14592_s1 + $0x78] sm:$0xf]  ;;  %v1069_v28 = vld [vmem:[%s14592_s1 + $0x30] sm:$0xf]  ;;  %v6485_v31 = vld [vmem:[%s14592_s1 + $0x68] sm:$0xff]  ;;  %vm1080_vm1 = vcmask 228352  }
 0x1e4   :  { %v1070_v61 = vld [vmem:[%s14592_s1 + $0x38] sm:$0xf]  ;;  %6537 = vmatpush.msk.msra.mxu1 %vm1225_vm0, %v6487_v29  ;;  %6586 = vmatpush.msk.msra.mxu2 %vm1225_vm0, %v1069_v28  ;;  %v1067_v62 = vld [vmem:[%s14592_s1 + $0x20] sm:$0xff]  ;;  %v1068_v63 = vld [vmem:[%s14592_s1 + $0x28] sm:$0xff]  ;;  %s7427_s13 = smov 8   ;;  %vm3595_vm2 = vcmask 64512  }
 0x1e5   :  { %6635 = vmatpush.msk.msra.mxu3 %vm1225_vm0, %v1070_v61  ;;  %1245 = vmatpush.msra.mxu0 %v6484_v30  ;;  %v6482_v29 = vld [vmem:[%s14592_s1 + $0x50] sm:$0xff]  ;;  %v6483_v28 = vld [vmem:[%s14592_s1 + $0x58] sm:$0xff]  ;;  %v6480_v30 = vld [vmem:[%s14592_s1 + $0x40] sm:$0xff]  ;;  %vm3729_vm3 = vcmask 982016  }
 0x1e6   :  { %v1065_v3 = vld [vmem:[%s14592_s1 + $0x10] sm:$0xff]  ;;  %1406 = vmatpush.msra.mxu1 %v6485_v31  ;;  %1579 = vmatpush.msra.mxu2 %v1067_v62  ;;  %v1066_v8 = vld [vmem:[%s14592_s1 + $0x18] sm:$0xff]  ;;  %v6481_v61 = vld [vmem:[%s14592_s1 + $0x48] sm:$0xff] }
 0x1e7   :  { %1740 = vmatpush.msra.mxu3 %v1068_v63  ;;  %1246 = vmatpush.msra.mxu0 %v6482_v29  ;;  %v1063_v9 = vld [vmem:[%s14592_s1] sm:$0xff]  ;;  %v1064_v62 = vld [vmem:[%s14592_s1 + $0x8] sm:$0xff]  ;;  %v1009_v31 = vld [vmem:[%s14591_s0 + $0x10] sm:$0xff] }
 0x1e8   :  { %1407 = vmatpush.msra.mxu1 %v6483_v28  ;;  %1580 = vmatpush.msra.mxu2 %v1065_v3  ;;  %v1007_v63 = vld [vmem:[%s14591_s0] sm:$0xff]  ;;  %v6690_v3 = vld [vmem:[%s14592_s1 + $0xb0] sm:$0xf]  ;;  %v6691_v29 = vld [vmem:[%s14592_s1 + $0xb8] sm:$0xf] }
 0x1e9   :  { %1741 = vmatpush.msra.mxu3 %v1066_v8  ;;  %1247 = vmatpush.msra.mxu0 %v6480_v30  ;;  %v1010_v8 = vld [vmem:[%s14591_s0 + $0x18] sm:$0xff]  ;;  %v9963_v28 = vld [vmem:[%s14591_s0 + $0x20] sm:$0xff]  ;;  %v9974_v30 = vld [vmem:[%s14591_s0 + $0x28] sm:$0xff] }
 0x1ea   :  { %1408 = vmatpush.msra.mxu1 %v6481_v61  ;;  %1581 = vmatpush.msra.mxu2 %v1063_v9  ;;  %v1008_v9 = vld [vmem:[%s14591_s0 + $0x8] sm:$0xff]  ;;  %v9985_v61 = vld [vmem:[%s14591_s0 + $0x30] sm:$0xff]  ;;  %v10108_v11 = vld [vmem:[%s14591_s0 + $0x78] sm:$0xff] }
 0x1eb   :  { %1742 = vmatpush.msra.mxu3 %v1064_v62  ;;  %6489 = vmatmul.msk.f32.vlgmr.msra.gmra.mxu0 %vm1080_vm1, %v1009_v31  ;;  %v9998_v62 = vld [vmem:[%s14591_s0 + $0x38] sm:$0xff]  ;;  %v10095_v10 = vld [vmem:[%s14591_s0 + $0x70] sm:$0xff]  ;;  %v10121_v24 = vld [vmem:[%s14591_s0 + $0x80] sm:$0xff] }
 0x1ec   :  { %6538 = vmatmul.msk.f32.vlgmr.msra.gmra.mxu1 %vm1080_vm1, %v1009_v31  ;;  %6587 = vmatmul.msk.f32.vlgmr.msra.gmra.mxu2 %vm1080_vm1, %v1007_v63  ;;  %v10134_v25 = vld [vmem:[%s14591_s0 + $0x88] sm:$0xff]  ;;  %v10147_v27 = vld [vmem:[%s14591_s0 + $0x90] sm:$0xff]  ;;  %v10162_v57 = vld [vmem:[%s14591_s0 + $0x98] sm:$0xff] }
 0x1ed   :  { %6636 = vmatmul.msk.f32.vlgmr.msra.gmra.mxu3 %vm1080_vm1, %v1007_v63  ;;  %6692 = vmatpush.msk.msrb.mxu0 %vm1225_vm0, %v6690_v3  ;;  %v10024_v63 = vld [vmem:[%s14591_s0 + $0x48] sm:$0xff]  ;;  %v10037_v3 = vld [vmem:[%s14591_s0 + $0x50] sm:$0xff]  ;;  %v10236_v47 = vld [vmem:[%s14591_s0 + $0xb8] sm:$0xff] }
 0x1ee   :  { %6741 = vmatpush.msk.msrb.mxu1 %vm1225_vm0, %v6691_v29  ;;  %v6688_v29 = vld [vmem:[%s14592_s1 + $0xa0] sm:$0xff] }
 0x1ef   :  { %1922 = vmatpush.msrb.mxu0 %v6688_v29  ;;  %v10069_v29 = vld [vmem:[%s14591_s0 + $0x60] sm:$0xff] }
 0x1f3   :  { %6490 = vmatmul.msk.f32.gmra.mxu0 %vm1080_vm1, %v1010_v8 }
 0x1f4   :  { %6539 = vmatmul.msk.f32.gmra.mxu1 %vm1080_vm1, %v1010_v8  ;;  %6588 = vmatmul.msk.f32.gmra.mxu2 %vm1080_vm1, %v1008_v9 }
 0x1f5   :  { %6637 = vmatmul.msk.f32.gmra.mxu3 %vm1080_vm1, %v1008_v9  ;;  %v10056_v9 = vld [vmem:[%s14591_s0 + $0x58] sm:$0xff] }
 0x1fb   :  { %6491 = vmatmul.msk.f32.gmra.mxu0 %vm1080_vm1, %v9963_v28 }
 0x1fc   :  { %6540 = vmatmul.msk.f32.gmra.mxu1 %vm1080_vm1, %v9963_v28  ;;  %6589 = vmatmul.msk.f32.gmra.mxu2 %vm1080_vm1, %v1009_v31 }
 0x1fd   :  { %6638 = vmatmul.msk.f32.gmra.mxu3 %vm1080_vm1, %v1009_v31  ;;  %v10011_v31 = vld [vmem:[%s14591_s0 + $0x40] sm:$0xff] }
 0x203   :  { %6492 = vmatmul.msk.f32.gmra.mxu0 %vm1080_vm1, %v9974_v30 }
 0x204   :  { %6541 = vmatmul.msk.f32.gmra.mxu1 %vm1080_vm1, %v9974_v30  ;;  %6590 = vmatmul.msk.f32.gmra.mxu2 %vm1080_vm1, %v1010_v8 }
 0x205   :  { %6639 = vmatmul.msk.f32.gmra.mxu3 %vm1080_vm1, %v1010_v8  ;;  %v6689_v8 = vld [vmem:[%s14592_s1 + $0xa8] sm:$0xff] }
 0x206   :  { %2083 = vmatpush.msrb.mxu1 %v6689_v8  ;;  %v10082_v8 = vld [vmem:[%s14591_s0 + $0x68] sm:$0xff] }
 0x20b   :  { %6493 = vmatmul.msk.f32.gmra.mxu0 %vm1080_vm1, %v9985_v61 }
 0x20c   :  { %6542 = vmatmul.msk.f32.gmra.mxu1 %vm1080_vm1, %v9985_v61  ;;  %6591 = vmatmul.msk.f32.gmra.mxu2 %vm1080_vm1, %v9963_v28 }
 0x20d   :  { %6640 = vmatmul.msk.f32.gmra.mxu3 %vm1080_vm1, %v9963_v28 }
 0x213   :  { %6494 = vmatmul.msk.f32.gmra.mxu0 %vm1080_vm1, %v9998_v62 }
 0x214   :  { %6543 = vmatmul.msk.f32.gmra.mxu1 %vm1080_vm1, %v9998_v62  ;;  %6592 = vmatmul.msk.f32.gmra.mxu2 %vm1080_vm1, %v9974_v30 }
 0x215   :  { %6641 = vmatmul.msk.f32.gmra.mxu3 %vm1080_vm1, %v9974_v30 }
 0x21b   :  { %6495 = vmatmul.msk.f32.gmra.mxu0 %vm1080_vm1, %v10011_v31 }
 0x21c   :  { %6544 = vmatmul.msk.f32.gmra.mxu1 %vm1080_vm1, %v10011_v31  ;;  %6593 = vmatmul.msk.f32.gmra.mxu2 %vm1080_vm1, %v9985_v61 }
 0x21d   :  { %6642 = vmatmul.msk.f32.gmra.mxu3 %vm1080_vm1, %v9985_v61 }
 0x223   :  { %6496 = vmatmul.msk.f32.gmra.mxu0 %vm1080_vm1, %v10024_v63 }
 0x224   :  { %6545 = vmatmul.msk.f32.gmra.mxu1 %vm1080_vm1, %v10024_v63  ;;  %6594 = vmatmul.msk.f32.gmra.mxu2 %vm1080_vm1, %v9998_v62 }
 0x225   :  { %6643 = vmatmul.msk.f32.gmra.mxu3 %vm1080_vm1, %v9998_v62 }
 0x22b   :  { %6497 = vmatmul.msk.f32.gmra.mxu0 %vm1080_vm1, %v10037_v3 }
 0x22c   :  { %6546 = vmatmul.msk.f32.gmra.mxu1 %vm1080_vm1, %v10037_v3  ;;  %6595 = vmatmul.msk.f32.gmra.mxu2 %vm1080_vm1, %v10011_v31 }
 0x22d   :  { %6644 = vmatmul.msk.f32.gmra.mxu3 %vm1080_vm1, %v10011_v31 }
 0x233   :  { %6498 = vmatmul.msk.f32.gmra.mxu0 %vm1080_vm1, %v10056_v9 }
 0x234   :  { %6547 = vmatmul.msk.f32.gmra.mxu1 %vm1080_vm1, %v10056_v9  ;;  %6596 = vmatmul.msk.f32.gmra.mxu2 %vm1080_vm1, %v10024_v63 }
 0x235   :  { %6645 = vmatmul.msk.f32.gmra.mxu3 %vm1080_vm1, %v10024_v63 }
 0x23b   :  { %6499 = vmatmul.msk.f32.gmra.mxu0 %vm1080_vm1, %v10069_v29 }
 0x23c   :  { %6548 = vmatmul.msk.f32.gmra.mxu1 %vm1080_vm1, %v10069_v29  ;;  %6597 = vmatmul.msk.f32.gmra.mxu2 %vm1080_vm1, %v10037_v3 }
 0x23d   :  { %6646 = vmatmul.msk.f32.gmra.mxu3 %vm1080_vm1, %v10037_v3 }
 0x243   :  { %6500 = vmatmul.msk.f32.gmra.mxu0 %vm1080_vm1, %v10082_v8 }
 0x244   :  { %6549 = vmatmul.msk.f32.gmra.mxu1 %vm1080_vm1, %v10082_v8  ;;  %6598 = vmatmul.msk.f32.gmra.mxu2 %vm1080_vm1, %v10056_v9 }
 0x245   :  { %6647 = vmatmul.msk.f32.gmra.mxu3 %vm1080_vm1, %v10056_v9 }
 0x24b   :  { %6501 = vmatmul.msk.f32.gmra.mxu0 %vm1080_vm1, %v10095_v10 }
 0x24c   :  { %6550 = vmatmul.msk.f32.gmra.mxu1 %vm1080_vm1, %v10095_v10  ;;  %6599 = vmatmul.msk.f32.gmra.mxu2 %vm1080_vm1, %v10069_v29 }
 0x24d   :  { %6648 = vmatmul.msk.f32.gmra.mxu3 %vm1080_vm1, %v10069_v29 }
 0x253   :  { %6502 = vmatmul.msk.f32.gmra.mxu0 %vm1080_vm1, %v10108_v11 }
 0x254   :  { %6551 = vmatmul.msk.f32.gmra.mxu1 %vm1080_vm1, %v10108_v11  ;;  %6600 = vmatmul.msk.f32.gmra.mxu2 %vm1080_vm1, %v10082_v8 }
 0x255   :  { %6649 = vmatmul.msk.f32.gmra.mxu3 %vm1080_vm1, %v10082_v8 }
 0x25b   :  { %6503 = vmatmul.msk.f32.gmra.mxu0 %vm1080_vm1, %v10121_v24 }
 0x25c   :  { %6552 = vmatmul.msk.f32.gmra.mxu1 %vm1080_vm1, %v10121_v24  ;;  %6601 = vmatmul.msk.f32.gmra.mxu2 %vm1080_vm1, %v10095_v10 }
 0x25d   :  { %6650 = vmatmul.msk.f32.gmra.mxu3 %vm1080_vm1, %v10095_v10 }
 0x263   :  { %6504 = vmatmul.msk.f32.gmra.mxu0 %vm1080_vm1, %v10134_v25 }
 0x264   :  { %6553 = vmatmul.msk.f32.gmra.mxu1 %vm1080_vm1, %v10134_v25  ;;  %6602 = vmatmul.msk.f32.gmra.mxu2 %vm1080_vm1, %v10108_v11 }
 0x265   :  { %6651 = vmatmul.msk.f32.gmra.mxu3 %vm1080_vm1, %v10108_v11 }
 0x268   :  { %v1249_v26 = vpop.f32.mrf.mxu0 }
 0x269   :  { %v1410_v40 = vpop.f32.mrf.mxu1 }
 0x26b   :  { %6505 = vmatmul.msk.f32.gmra.mxu0 %vm1080_vm1, %v10147_v27 }
 0x26c   :  { %6554 = vmatmul.msk.f32.gmra.mxu1 %vm1080_vm1, %v10147_v27  ;;  %6603 = vmatmul.msk.f32.gmra.mxu2 %vm1080_vm1, %v10121_v24 }
 0x26d   :  { %6652 = vmatmul.msk.f32.gmra.mxu3 %vm1080_vm1, %v10121_v24 }
 0x26f   :  { %v1583_v41 = vpop.f32.mrf.mxu2 }
 0x270   :  { %v10157_v42 = vadd.f32 %v1583_v41, %v1249_v26  ;;  %v1744_v43 = vpop.f32.mrf.mxu3  ;;  %v1252_v56 = vpop.f32.mrf.mxu0 }
 0x271   :  { %v10164_v58 = vadd.f32 %v1744_v43, %v1410_v40  ;;  %v1413_v59 = vpop.f32.mrf.mxu1  ;;  %v10179_v40 = vld [vmem:[%s14591_s0 + $0xa0] sm:$0xff] }
 0x273   :  { %6506 = vmatmul.msk.f32.gmra.mxu0 %vm1080_vm1, %v10162_v57 }
 0x274   :  { %6555 = vmatmul.msk.f32.gmra.mxu1 %vm1080_vm1, %v10162_v57  ;;  %6604 = vmatmul.msk.f32.gmra.mxu2 %vm1080_vm1, %v10134_v25 }
 0x275   :  { %6653 = vmatmul.msk.f32.gmra.mxu3 %vm1080_vm1, %v10134_v25 }
 0x277   :  { %v1586_v26 = vpop.f32.mrf.mxu2 }
 0x278   :  { %v10174_v41 = vadd.f32 %v1586_v26, %v1252_v56  ;;  %v1747_v23 = vpop.f32.mrf.mxu3  ;;  %v1255_v22 = vpop.f32.mrf.mxu0 }
 0x279   :  { %v10181_v43 = vadd.f32 %v1747_v23, %v1413_v59  ;;  %v1416_v21 = vpop.f32.mrf.mxu1  ;;  %v10196_v23 = vld [vmem:[%s14591_s0 + $0xa8] sm:$0xff] }
 0x27b   :  { %6507 = vmatmul.msk.f32.gmra.mxu0 %vm1080_vm1, %v10179_v40 }
 0x27c   :  { %6556 = vmatmul.msk.f32.gmra.mxu1 %vm1080_vm1, %v10179_v40  ;;  %6605 = vmatmul.msk.f32.gmra.mxu2 %vm1080_vm1, %v10147_v27 }
 0x27d   :  { %6654 = vmatmul.msk.f32.gmra.mxu3 %vm1080_vm1, %v10147_v27 }
 0x27f   :  { %v1589_v56 = vpop.f32.mrf.mxu2 }
 0x280   :  { %v10191_v26 = vadd.f32 %v1589_v56, %v1255_v22  ;;  %v1750_v20 = vpop.f32.mrf.mxu3  ;;  %v1258_v55 = vpop.f32.mrf.mxu0 }
 0x281   :  { %v10198_v59 = vadd.f32 %v1750_v20, %v1416_v21  ;;  %v1419_v54 = vpop.f32.mrf.mxu1  ;;  %v10213_v20 = vld [vmem:[%s14591_s0 + $0xb0] sm:$0xff] }
 0x283   :  { %6508 = vmatmul.msk.f32.gmra.mxu0 %vm1080_vm1, %v10196_v23 }
 0x284   :  { %6557 = vmatmul.msk.f32.gmra.mxu1 %vm1080_vm1, %v10196_v23  ;;  %6606 = vmatmul.msk.f32.gmra.mxu2 %vm1080_vm1, %v10162_v57 }
 0x285   :  { %6655 = vmatmul.msk.f32.gmra.mxu3 %vm1080_vm1, %v10162_v57 }
 0x287   :  { %v1592_v22 = vpop.f32.mrf.mxu2 }
 0x288   :  { %v10208_v56 = vadd.f32 %v1592_v22, %v1258_v55  ;;  %v1753_v53 = vpop.f32.mrf.mxu3  ;;  %v1261_v52 = vpop.f32.mrf.mxu0  ;;  %v6686_v55 = vld [vmem:[%s14592_s1 + $0x90] sm:$0xff] }
 0x289   :  { %v10215_v21 = vadd.f32 %v1753_v53, %v1419_v54  ;;  %v1422_v44 = vpop.f32.mrf.mxu1  ;;  %v6687_v53 = vld [vmem:[%s14592_s1 + $0x98] sm:$0xff]  ;;  %1923 = vmatpush.msrb.mxu0 %v6686_v55 }
 0x28a   :  { %2084 = vmatpush.msrb.mxu1 %v6687_v53 }
 0x28b   :  { %6509 = vmatmul.msk.f32.gmra.mxu0 %vm1080_vm1, %v10213_v20 }
 0x28c   :  { %6558 = vmatmul.msk.f32.gmra.mxu1 %vm1080_vm1, %v10213_v20  ;;  %6607 = vmatmul.msk.f32.gmra.mxu2 %vm1080_vm1, %v10179_v40 }
 0x28d   :  { %6656 = vmatmul.msk.f32.gmra.mxu3 %vm1080_vm1, %v10179_v40 }
 0x28f   :  { %v1595_v54 = vpop.f32.mrf.mxu2 }
 0x290   :  { %v10231_v22 = vadd.f32 %v1595_v54, %v1261_v52  ;;  %v1756_v45 = vpop.f32.mrf.mxu3  ;;  %v1264_v46 = vpop.f32.mrf.mxu0 }
 0x291   :  { %v10238_v60 = vadd.f32 %v1756_v45, %v1422_v44  ;;  %v1425_v2 = vpop.f32.mrf.mxu1  ;;  %v10253_v44 = vld [vmem:[%s14591_s0 + $0xc0] sm:$0xff] }
 0x293   :  { %6510 = vmatmul.msk.f32.gmra.mxu0 %vm1080_vm1, %v10236_v47 }
 0x294   :  { %6559 = vmatmul.msk.f32.gmra.mxu1 %vm1080_vm1, %v10236_v47  ;;  %6608 = vmatmul.msk.f32.gmra.mxu2 %vm1080_vm1, %v10196_v23 }
 0x295   :  { %6657 = vmatmul.msk.f32.gmra.mxu3 %vm1080_vm1, %v10196_v23 }
 0x297   :  { %v1598_v52 = vpop.f32.mrf.mxu2 }
 0x298   :  { %v10248_v55 = vadd.f32 %v1598_v52, %v1264_v46  ;;  %v1759_v53 = vpop.f32.mrf.mxu3  ;;  %v1267_v54 = vpop.f32.mrf.mxu0 }
 0x299   :  { %v10255_v45 = vadd.f32 %v1759_v53, %v1425_v2  ;;  %v1428_v1 = vpop.f32.mrf.mxu1  ;;  %v10270_v2 = vld [vmem:[%s14591_s0 + $0xc8] sm:$0xff] }
 0x29b   :  { %6511 = vmatmul.msk.f32.gmra.mxu0 %vm1080_vm1, %v10253_v44 }
 0x29c   :  { %6560 = vmatmul.msk.f32.gmra.mxu1 %vm1080_vm1, %v10253_v44  ;;  %6609 = vmatmul.msk.f32.gmra.mxu2 %vm1080_vm1, %v10213_v20 }
 0x29d   :  { %6658 = vmatmul.msk.f32.gmra.mxu3 %vm1080_vm1, %v10213_v20 }
 0x29f   :  { %v1601_v46 = vpop.f32.mrf.mxu2 }
 0x2a0   :  { %v10265_v52 = vadd.f32 %v1601_v46, %v1267_v54  ;;  %v1762_v0 = vpop.f32.mrf.mxu3  ;;  %v1270_v35 = vpop.f32.mrf.mxu0 }
 0x2a1   :  { %v10272_v53 = vadd.f32 %v1762_v0, %v1428_v1  ;;  %v1431_v34 = vpop.f32.mrf.mxu1  ;;  %v10287_v0 = vld [vmem:[%s14591_s0 + $0xd0] sm:$0xff] }
 0x2a3   :  { %6512 = vmatmul.msk.f32.gmra.mxu0 %vm1080_vm1, %v10270_v2 }
 0x2a4   :  { %6561 = vmatmul.msk.f32.gmra.mxu1 %vm1080_vm1, %v10270_v2  ;;  %6610 = vmatmul.msk.f32.gmra.mxu2 %vm1080_vm1, %v10236_v47 }
 0x2a5   :  { %6659 = vmatmul.msk.f32.gmra.mxu3 %vm1080_vm1, %v10236_v47 }
 0x2a7   :  { %v1604_v54 = vpop.f32.mrf.mxu2 }
 0x2a8   :  { %v10282_v46 = vadd.f32 %v1604_v54, %v1270_v35  ;;  %v1765_v33 = vpop.f32.mrf.mxu3  ;;  %v1273_v32 = vpop.f32.mrf.mxu0 }
 0x2a9   :  { %v10289_v1 = vadd.f32 %v1765_v33, %v1431_v34  ;;  %v1434_v4 = vpop.f32.mrf.mxu1  ;;  %v10304_v33 = vld [vmem:[%s14591_s0 + $0xd8] sm:$0xff] }
 0x2ab   :  { %6513 = vmatmul.msk.f32.gmra.mxu0 %vm1080_vm1, %v10287_v0 }
 0x2ac   :  { %6562 = vmatmul.msk.f32.gmra.mxu1 %vm1080_vm1, %v10287_v0  ;;  %6611 = vmatmul.msk.f32.gmra.mxu2 %vm1080_vm1, %v10253_v44 }
 0x2ad   :  { %6660 = vmatmul.msk.f32.gmra.mxu3 %vm1080_vm1, %v10253_v44 }
 0x2af   :  { %v1607_v35 = vpop.f32.mrf.mxu2 }
 0x2b0   :  { %v10299_v54 = vadd.f32 %v1607_v35, %v1273_v32  ;;  %v1768_v5 = vpop.f32.mrf.mxu3  ;;  %v1276_v6 = vpop.f32.mrf.mxu0 }
 0x2b1   :  { %v10306_v34 = vadd.f32 %v1768_v5, %v1434_v4  ;;  %v1437_v7 = vpop.f32.mrf.mxu1  ;;  %v10321_v4 = vld [vmem:[%s14591_s0 + $0xe0] sm:$0xff] }
 0x2b3   :  { %6514 = vmatmul.msk.f32.gmra.mxu0 %vm1080_vm1, %v10304_v33 }
 0x2b4   :  { %6563 = vmatmul.msk.f32.gmra.mxu1 %vm1080_vm1, %v10304_v33  ;;  %6612 = vmatmul.msk.f32.gmra.mxu2 %vm1080_vm1, %v10270_v2 }
 0x2b5   :  { %6661 = vmatmul.msk.f32.gmra.mxu3 %vm1080_vm1, %v10270_v2 }
 0x2b7   :  { %v1610_v32 = vpop.f32.mrf.mxu2 }
 0x2b8   :  { %v10316_v35 = vadd.f32 %v1610_v32, %v1276_v6  ;;  %v1771_v15 = vpop.f32.mrf.mxu3  ;;  %v1279_v14 = vpop.f32.mrf.mxu0 }
 0x2b9   :  { %v10323_v5 = vadd.f32 %v1771_v15, %v1437_v7  ;;  %v1440_v13 = vpop.f32.mrf.mxu1  ;;  %v10338_v7 = vld [vmem:[%s14591_s0 + $0xe8] sm:$0xff] }
 0x2bb   :  { %6515 = vmatmul.msk.f32.gmra.mxu0 %vm1080_vm1, %v10321_v4 }
 0x2bc   :  { %6564 = vmatmul.msk.f32.gmra.mxu1 %vm1080_vm1, %v10321_v4  ;;  %6613 = vmatmul.msk.f32.gmra.mxu2 %vm1080_vm1, %v10287_v0 }
 0x2bd   :  { %6662 = vmatmul.msk.f32.gmra.mxu3 %vm1080_vm1, %v10287_v0 }
 0x2bf   :  { %v1613_v6 = vpop.f32.mrf.mxu2 }
 0x2c0   :  { %v10333_v32 = vadd.f32 %v1613_v6, %v1279_v14  ;;  %v1774_v12 = vpop.f32.mrf.mxu3  ;;  %v1282_v16 = vpop.f32.mrf.mxu0 }
 0x2c1   :  { %v10340_v15 = vadd.f32 %v1774_v12, %v1440_v13  ;;  %v1443_v17 = vpop.f32.mrf.mxu1  ;;  %v1037_v12 = vld [vmem:[%s14591_s0 + $0xf0] sm:$0xff] }
 0x2c3   :  { %6516 = vmatmul.msk.f32.gmra.mxu0 %vm1080_vm1, %v10338_v7 }
 0x2c4   :  { %6565 = vmatmul.msk.f32.gmra.mxu1 %vm1080_vm1, %v10338_v7  ;;  %6614 = vmatmul.msk.f32.gmra.mxu2 %vm1080_vm1, %v10304_v33 }
 0x2c5   :  { %6663 = vmatmul.msk.f32.gmra.mxu3 %vm1080_vm1, %v10304_v33 }
 0x2c7   :  { %v1616_v14 = vpop.f32.mrf.mxu2 }
 0x2c8   :  { %v10350_v6 = vadd.f32 %v1616_v14, %v1282_v16  ;;  %v1777_v18 = vpop.f32.mrf.mxu3  ;;  %v1285_v19 = vpop.f32.mrf.mxu0 }
 0x2c9   :  { %v10355_v13 = vadd.f32 %v1777_v18, %v1443_v17  ;;  %v1446_v39 = vpop.f32.mrf.mxu1  ;;  %v1038_v17 = vld [vmem:[%s14591_s0 + $0xf8] sm:$0xff] }
 0x2cb   :  { %6517 = vmatmul.msk.f32.gmra.mxu0 %vm1080_vm1, %v1037_v12 }
 0x2cc   :  { %6566 = vmatmul.msk.f32.gmra.mxu1 %vm1080_vm1, %v1037_v12  ;;  %6615 = vmatmul.msk.f32.gmra.mxu2 %vm1080_vm1, %v10321_v4 }
 0x2cd   :  { %6664 = vmatmul.msk.f32.gmra.mxu3 %vm1080_vm1, %v10321_v4 }
 0x2cf   :  { %v1619_v16 = vpop.f32.mrf.mxu2 }
 0x2d0   :  { %v10363_v14 = vadd.f32 %v1619_v16, %v1285_v19  ;;  %v1780_v38 = vpop.f32.mrf.mxu3  ;;  %v1288_v37 = vpop.f32.mrf.mxu0 }
 0x2d1   :  { %v10368_v18 = vadd.f32 %v1780_v38, %v1446_v39  ;;  %v1449_v36 = vpop.f32.mrf.mxu1  ;;  %v1039_v38 = vld [vmem:[%s14591_s0 + $0x100] sm:$0xff] }
 0x2d2   :  { %15099 = vst [vmem:[#allocation489_spill] sm:$0xff] %v10363_v14  ;;  %v6792_v14 = vld [vmem:[%s14592_s1 + $0xd0] sm:$0xff] }
 0x2d3   :  { %15100 = vst [vmem:[#allocation490_spill] sm:$0xff] %v10368_v18  ;;  %6518 = vmatmul.msk.f32.gmra.mxu0 %vm1080_vm1, %v1038_v17  ;;  %v1040_v18 = vld [vmem:[%s14591_s0 + $0x108] sm:$0xff] }
 0x2d4   :  { %6567 = vmatmul.msk.f32.gmra.mxu1 %vm1080_vm1, %v1038_v17  ;;  %6616 = vmatmul.msk.f32.gmra.mxu2 %vm1080_vm1, %v10338_v7 }
 0x2d5   :  { %6665 = vmatmul.msk.f32.gmra.mxu3 %vm1080_vm1, %v10338_v7 }
 0x2d7   :  { %v1622_v19 = vpop.f32.mrf.mxu2 }
 0x2d8   :  { %v10376_v16 = vadd.f32 %v1622_v19, %v1288_v37  ;;  %v1783_v51 = vpop.f32.mrf.mxu3  ;;  %v1291_v50 = vpop.f32.mrf.mxu0 }
 0x2d9   :  { %v10381_v39 = vadd.f32 %v1783_v51, %v1449_v36  ;;  %v1452_v49 = vpop.f32.mrf.mxu1 }
 0x2da   :  { %15101 = vst [vmem:[#allocation491_spill] sm:$0xff] %v10376_v16 }
 0x2db   :  { %15102 = vst [vmem:[#allocation492_spill] sm:$0xff] %v10381_v39  ;;  %6519 = vmatmul.msk.f32.gmra.mxu0 %vm1080_vm1, %v1039_v38  ;;  %v1041_v39 = vld [vmem:[%s14591_s0 + $0x110] sm:$0xff] }
 0x2dc   :  { %6568 = vmatmul.msk.f32.gmra.mxu1 %vm1080_vm1, %v1039_v38  ;;  %6617 = vmatmul.msk.f32.gmra.mxu2 %vm1080_vm1, %v1037_v12 }
 0x2dd   :  { %6666 = vmatmul.msk.f32.gmra.mxu3 %vm1080_vm1, %v1037_v12 }
 0x2df   :  { %v1625_v48 = vpop.f32.mrf.mxu2 }
 0x2e0   :  { %v10387_v37 = vadd.f32 %v1625_v48, %v1291_v50  ;;  %v1786_v19 = vpop.f32.mrf.mxu3  ;;  %v1294_v16 = vpop.f32.mrf.mxu0 }
 0x2e1   :  { %v10392_v36 = vadd.f32 %v1786_v19, %v1452_v49  ;;  %v1455_v51 = vpop.f32.mrf.mxu1 }
 0x2e2   :  { %15103 = vst [vmem:[#allocation493_spill] sm:$0xff] %v10387_v37 }
 0x2e3   :  { %15104 = vst [vmem:[#allocation494_spill] sm:$0xff] %v10392_v36  ;;  %6520 = vmatmul.msk.f32.gmra.mxu0 %vm1080_vm1, %v1040_v18 }
 0x2e4   :  { %6569 = vmatmul.msk.f32.gmra.mxu1 %vm1080_vm1, %v1040_v18  ;;  %6618 = vmatmul.msk.f32.gmra.mxu2 %vm1080_vm1, %v1038_v17 }
 0x2e5   :  { %6667 = vmatmul.msk.f32.gmra.mxu3 %vm1080_vm1, %v1038_v17  ;;  %v6684_v17 = vld [vmem:[%s14592_s1 + $0x80] sm:$0xff] }
 0x2e6   :  { %1924 = vmatpush.msrb.mxu0 %v6684_v17 }
 0x2e7   :  { %v1628_v12 = vpop.f32.mrf.mxu2 }
 0x2e8   :  { %v10398_v48 = vadd.f32 %v1628_v12, %v1294_v16  ;;  %v1789_v50 = vpop.f32.mrf.mxu3  ;;  %v1297_v37 = vpop.f32.mrf.mxu0  ;;  %v6685_v16 = vld [vmem:[%s14592_s1 + $0x88] sm:$0xff] }
 0x2e9   :  { %v10403_v49 = vadd.f32 %v1789_v50, %v1455_v51  ;;  %v1458_v19 = vpop.f32.mrf.mxu1  ;;  %2085 = vmatpush.msrb.mxu1 %v6685_v16 }
 0x2ea   :  { %15105 = vst [vmem:[#allocation495_spill] sm:$0xff] %v10398_v48  ;;  %v1042_v48 = vld [vmem:[%s14591_s0 + $0x118] sm:$0xff] }
 0x2eb   :  { %15106 = vst [vmem:[#allocation496_spill] sm:$0xff] %v10403_v49  ;;  %6521 = vmatmul.msk.f32.gmra.mxu0 %vm1080_vm1, %v1041_v39 }
 0x2ec   :  { %6570 = vmatmul.msk.f32.gmra.mxu1 %vm1080_vm1, %v1041_v39  ;;  %6619 = vmatmul.msk.f32.gmra.mxu2 %vm1080_vm1, %v1039_v38 }
 0x2ed   :  { %6668 = vmatmul.msk.f32.gmra.mxu3 %vm1080_vm1, %v1039_v38 }
 0x2ef   :  { %v1631_v51 = vpop.f32.mrf.mxu2 }
 0x2f0   :  { %v10415_v12 = vadd.f32 %v1631_v51, %v1297_v37  ;;  %v1792_v50 = vpop.f32.mrf.mxu3  ;;  %v1300_v49 = vpop.f32.mrf.mxu0 }
 0x2f1   :  { %v10420_v38 = vadd.f32 %v1792_v50, %v1458_v19  ;;  %v1461_v36 = vpop.f32.mrf.mxu1 }
 0x2f2   :  { %15107 = vst [vmem:[#allocation497_spill] sm:$0xff] %v10415_v12  ;;  %v1043_v12 = vld [vmem:[%s14591_s0 + $0x120] sm:$0xff] }
 0x2f3   :  { %15108 = vst [vmem:[#allocation498_spill] sm:$0xff] %v10420_v38  ;;  %6522 = vmatmul.msk.f32.gmra.mxu0 %vm1080_vm1, %v1042_v48  ;;  %v1044_v38 = vld [vmem:[%s14591_s0 + $0x128] sm:$0xff] }
 0x2f4   :  { %6571 = vmatmul.msk.f32.gmra.mxu1 %vm1080_vm1, %v1042_v48  ;;  %6620 = vmatmul.msk.f32.gmra.mxu2 %vm1080_vm1, %v1040_v18 }
 0x2f5   :  { %6669 = vmatmul.msk.f32.gmra.mxu3 %vm1080_vm1, %v1040_v18 }
 0x2f7   :  { %v1634_v17 = vpop.f32.mrf.mxu2 }
 0x2f8   :  { %v10426_v37 = vadd.f32 %v1634_v17, %v1300_v49  ;;  %v1795_v16 = vpop.f32.mrf.mxu3  ;;  %v1303_v51 = vpop.f32.mrf.mxu0 }
 0x2f9   :  { %v10431_v19 = vadd.f32 %v1795_v16, %v1461_v36  ;;  %v1464_v50 = vpop.f32.mrf.mxu1 }
 0x2fa   :  { %15109 = vst [vmem:[#allocation499_spill] sm:$0xff] %v10426_v37 }
 0x2fb   :  { %15110 = vst [vmem:[#allocation500_spill] sm:$0xff] %v10431_v19  ;;  %6523 = vmatmul.msk.f32.gmra.mxu0 %vm1080_vm1, %v1043_v12  ;;  %v1045_v19 = vld [vmem:[%s14591_s0 + $0x130] sm:$0xff] }
 0x2fc   :  { %6572 = vmatmul.msk.f32.gmra.mxu1 %vm1080_vm1, %v1043_v12  ;;  %6621 = vmatmul.msk.f32.gmra.mxu2 %vm1080_vm1, %v1041_v39 }
 0x2fd   :  { %6670 = vmatmul.msk.f32.gmra.mxu3 %vm1080_vm1, %v1041_v39 }
 0x2ff   :  { %v1637_v18 = vpop.f32.mrf.mxu2 }
 0x300   :  { %v10437_v49 = vadd.f32 %v1637_v18, %v1303_v51  ;;  %v1798_v17 = vpop.f32.mrf.mxu3  ;;  %v1306_v37 = vpop.f32.mrf.mxu0 }
 0x301   :  { %v10442_v36 = vadd.f32 %v1798_v17, %v1464_v50  ;;  %v1467_v16 = vpop.f32.mrf.mxu1 }
 0x302   :  { %15111 = vst [vmem:[#allocation501_spill] sm:$0xff] %v10437_v49 }
 0x303   :  { %15112 = vst [vmem:[#allocation502_spill] sm:$0xff] %v10442_v36  ;;  %6524 = vmatmul.msk.f32.gmra.mxu0 %vm1080_vm1, %v1044_v38  ;;  %v1046_v36 = vld [vmem:[%s14591_s0 + $0x138] sm:$0xff] }
 0x304   :  { %6573 = vmatmul.msk.f32.gmra.mxu1 %vm1080_vm1, %v1044_v38  ;;  %6622 = vmatmul.msk.f32.gmra.mxu2 %vm1080_vm1, %v1042_v48 }
 0x305   :  { %6671 = vmatmul.msk.f32.gmra.mxu3 %vm1080_vm1, %v1042_v48 }
 0x307   :  { %v1640_v39 = vpop.f32.mrf.mxu2 }
 0x308   :  { %v10448_v51 = vadd.f32 %v1640_v39, %v1306_v37  ;;  %v1801_v18 = vpop.f32.mrf.mxu3  ;;  %v1309_v49 = vpop.f32.mrf.mxu0 }
 0x309   :  { %v10453_v50 = vadd.f32 %v1801_v18, %v1467_v16  ;;  %v1470_v17 = vpop.f32.mrf.mxu1 }
 0x30a   :  { %15113 = vst [vmem:[#allocation503_spill] sm:$0xff] %v10448_v51 }
 0x30b   :  { %15114 = vst [vmem:[#allocation504_spill] sm:$0xff] %v10453_v50  ;;  %6525 = vmatmul.msk.f32.gmra.mxu0 %vm1080_vm1, %v1045_v19  ;;  %v1047_v50 = vld [vmem:[%s14591_s0 + $0x140] sm:$0xff] }
 0x30c   :  { %6574 = vmatmul.msk.f32.gmra.mxu1 %vm1080_vm1, %v1045_v19  ;;  %6623 = vmatmul.msk.f32.gmra.mxu2 %vm1080_vm1, %v1043_v12 }
 0x30d   :  { %6672 = vmatmul.msk.f32.gmra.mxu3 %vm1080_vm1, %v1043_v12 }
 0x30f   :  { %v1643_v48 = vpop.f32.mrf.mxu2 }
 0x310   :  { %v10459_v37 = vadd.f32 %v1643_v48, %v1309_v49  ;;  %v1804_v39 = vpop.f32.mrf.mxu3  ;;  %v1312_v51 = vpop.f32.mrf.mxu0 }
 0x311   :  { %v10464_v16 = vadd.f32 %v1804_v39, %v1470_v17  ;;  %v1473_v18 = vpop.f32.mrf.mxu1 }
 0x312   :  { %15115 = vst [vmem:[#allocation505_spill] sm:$0xff] %v10459_v37 }
 0x313   :  { %15116 = vst [vmem:[#allocation506_spill] sm:$0xff] %v10464_v16  ;;  %6526 = vmatmul.msk.f32.gmra.mxu0 %vm1080_vm1, %v1046_v36  ;;  %v1048_v16 = vld [vmem:[%s14591_s0 + $0x148] sm:$0xff] }
 0x314   :  { %6575 = vmatmul.msk.f32.gmra.mxu1 %vm1080_vm1, %v1046_v36  ;;  %6624 = vmatmul.msk.f32.gmra.mxu2 %vm1080_vm1, %v1044_v38 }
 0x315   :  { %6673 = vmatmul.msk.f32.gmra.mxu3 %vm1080_vm1, %v1044_v38 }
 0x317   :  { %v1646_v12 = vpop.f32.mrf.mxu2 }
 0x318   :  { %v10470_v49 = vadd.f32 %v1646_v12, %v1312_v51  ;;  %v1807_v48 = vpop.f32.mrf.mxu3  ;;  %v1315_v37 = vpop.f32.mrf.mxu0 }
 0x319   :  { %v10475_v17 = vadd.f32 %v1807_v48, %v1473_v18  ;;  %v1476_v39 = vpop.f32.mrf.mxu1 }
 0x31a   :  { %15117 = vst [vmem:[#allocation507_spill] sm:$0xff] %v10470_v49 }
 0x31b   :  { %15118 = vst [vmem:[#allocation508_spill] sm:$0xff] %v10475_v17  ;;  %6527 = vmatmul.msk.f32.gmra.mxu0 %vm1080_vm1, %v1047_v50  ;;  %v1049_v17 = vld [vmem:[%s14591_s0 + $0x150] sm:$0xff] }
 0x31c   :  { %6576 = vmatmul.msk.f32.gmra.mxu1 %vm1080_vm1, %v1047_v50  ;;  %6625 = vmatmul.msk.f32.gmra.mxu2 %vm1080_vm1, %v1045_v19 }
 0x31d   :  { %6674 = vmatmul.msk.f32.gmra.mxu3 %vm1080_vm1, %v1045_v19 }
 0x31f   :  { %v1649_v38 = vpop.f32.mrf.mxu2 }
 0x320   :  { %v10481_v51 = vadd.f32 %v1649_v38, %v1315_v37  ;;  %v1810_v12 = vpop.f32.mrf.mxu3  ;;  %v1318_v49 = vpop.f32.mrf.mxu0 }
 0x321   :  { %v10486_v18 = vadd.f32 %v1810_v12, %v1476_v39  ;;  %v1479_v48 = vpop.f32.mrf.mxu1 }
 0x322   :  { %15119 = vst [vmem:[#allocation509_spill] sm:$0xff] %v10481_v51 }
 0x323   :  { %15120 = vst [vmem:[#allocation510_spill] sm:$0xff] %v10486_v18  ;;  %6528 = vmatmul.msk.f32.gmra.mxu0 %vm1080_vm1, %v1048_v16  ;;  %v1050_v18 = vld [vmem:[%s14591_s0 + $0x158] sm:$0xff] }
 0x324   :  { %6577 = vmatmul.msk.f32.gmra.mxu1 %vm1080_vm1, %v1048_v16  ;;  %6626 = vmatmul.msk.f32.gmra.mxu2 %vm1080_vm1, %v1046_v36 }
 0x325   :  { %6675 = vmatmul.msk.f32.gmra.mxu3 %vm1080_vm1, %v1046_v36 }
 0x327   :  { %v1652_v19 = vpop.f32.mrf.mxu2 }
 0x328   :  { %v10492_v37 = vadd.f32 %v1652_v19, %v1318_v49  ;;  %v1813_v38 = vpop.f32.mrf.mxu3  ;;  %v1321_v51 = vpop.f32.mrf.mxu0 }
 0x329   :  { %v10497_v39 = vadd.f32 %v1813_v38, %v1479_v48  ;;  %v1482_v12 = vpop.f32.mrf.mxu1 }
 0x32a   :  { %15121 = vst [vmem:[#allocation511_spill] sm:$0xff] %v10492_v37 }
 0x32b   :  { %15122 = vst [vmem:[#allocation512_spill] sm:$0xff] %v10497_v39  ;;  %6529 = vmatmul.msk.f32.gmra.mxu0 %vm1080_vm1, %v1049_v17  ;;  %v1051_v39 = vld [vmem:[%s14591_s0 + $0x160] sm:$0xff] }
 0x32c   :  { %6578 = vmatmul.msk.f32.gmra.mxu1 %vm1080_vm1, %v1049_v17  ;;  %6627 = vmatmul.msk.f32.gmra.mxu2 %vm1080_vm1, %v1047_v50 }
 0x32d   :  { %6676 = vmatmul.msk.f32.gmra.mxu3 %vm1080_vm1, %v1047_v50 }
 0x32f   :  { %v1655_v36 = vpop.f32.mrf.mxu2 }
 0x330   :  { %v10503_v49 = vadd.f32 %v1655_v36, %v1321_v51  ;;  %v1816_v19 = vpop.f32.mrf.mxu3  ;;  %v1324_v37 = vpop.f32.mrf.mxu0 }
 0x331   :  { %v10508_v48 = vadd.f32 %v1816_v19, %v1482_v12  ;;  %v1485_v38 = vpop.f32.mrf.mxu1 }
 0x332   :  { %15123 = vst [vmem:[#allocation513_spill] sm:$0xff] %v10503_v49 }
 0x333   :  { %15124 = vst [vmem:[#allocation514_spill] sm:$0xff] %v10508_v48  ;;  %6530 = vmatmul.msk.f32.gmra.mxu0 %vm1080_vm1, %v1050_v18  ;;  %v1052_v48 = vld [vmem:[%s14591_s0 + $0x168] sm:$0xff] }
 0x334   :  { %6579 = vmatmul.msk.f32.gmra.mxu1 %vm1080_vm1, %v1050_v18  ;;  %6628 = vmatmul.msk.f32.gmra.mxu2 %vm1080_vm1, %v1048_v16 }
 0x335   :  { %6677 = vmatmul.msk.f32.gmra.mxu3 %vm1080_vm1, %v1048_v16 }
 0x337   :  { %v1658_v50 = vpop.f32.mrf.mxu2 }
 0x338   :  { %v10514_v51 = vadd.f32 %v1658_v50, %v1324_v37  ;;  %v1819_v36 = vpop.f32.mrf.mxu3  ;;  %v1327_v49 = vpop.f32.mrf.mxu0 }
 0x339   :  { %v10519_v12 = vadd.f32 %v1819_v36, %v1485_v38  ;;  %v1488_v19 = vpop.f32.mrf.mxu1 }
 0x33a   :  { %15125 = vst [vmem:[#allocation515_spill] sm:$0xff] %v10514_v51 }
 0x33b   :  { %15126 = vst [vmem:[#allocation516_spill] sm:$0xff] %v10519_v12  ;;  %6531 = vmatmul.msk.f32.gmra.mxu0 %vm1080_vm1, %v1051_v39 }
 0x33c   :  { %6580 = vmatmul.msk.f32.gmra.mxu1 %vm1080_vm1, %v1051_v39  ;;  %6629 = vmatmul.msk.f32.gmra.mxu2 %vm1080_vm1, %v1049_v17 }
 0x33d   :  { %6678 = vmatmul.msk.f32.gmra.mxu3 %vm1080_vm1, %v1049_v17  ;;  %v6796_v17 = vld [vmem:[%s14592_s1 + $0xf0] sm:$0xf] }
 0x33e   :  { %6798 = vmatpush.msk.msrb.mxu2 %vm1225_vm0, %v6796_v17 }
 0x33f   :  { %v1661_v16 = vpop.f32.mrf.mxu2 }
 0x340   :  { %v10525_v37 = vadd.f32 %v1661_v16, %v1327_v49  ;;  %v1822_v50 = vpop.f32.mrf.mxu3  ;;  %v1330_v51 = vpop.f32.mrf.mxu0  ;;  %v6797_v49 = vld [vmem:[%s14592_s1 + $0xf8] sm:$0xf]  ;;  %v6794_v16 = vld [vmem:[%s14592_s1 + $0xe0] sm:$0xff] }
 0x341   :  { %v10530_v38 = vadd.f32 %v1822_v50, %v1488_v19  ;;  %v1491_v36 = vpop.f32.mrf.mxu1  ;;  %6847 = vmatpush.msk.msrb.mxu3 %vm1225_vm0, %v6797_v49  ;;  %2361 = vmatpush.msrb.mxu2 %v6794_v16 }
 0x342   :  { %15127 = vst [vmem:[#allocation517_spill] sm:$0xff] %v10525_v37  ;;  %v1053_v37 = vld [vmem:[%s14591_s0 + $0x170] sm:$0xff] }
 0x343   :  { %15128 = vst [vmem:[#allocation518_spill] sm:$0xff] %v10530_v38  ;;  %6532 = vmatmul.msk.f32.gmra.mxu0 %vm1080_vm1, %v1052_v48  ;;  %2362 = vmatpush.msrb.mxu2 %v6792_v14  ;;  %v6902_v14 = vld [vmem:[%s14592_s1 + $0x130] sm:$0xf] }
 0x344   :  { %6581 = vmatmul.msk.f32.gmra.mxu1 %vm1080_vm1, %v1052_v48  ;;  %6630 = vmatmul.msk.f32.gmra.mxu2 %vm1080_vm1, %v1050_v18 }
 0x345   :  { %6679 = vmatmul.msk.f32.gmra.mxu3 %vm1080_vm1, %v1050_v18  ;;  %v6795_v18 = vld [vmem:[%s14592_s1 + $0xe8] sm:$0xff]  ;;  %6904 = vmatpush.msk.msra.mxu0 %vm1225_vm0, %v6902_v14 }
 0x346   :  { %2522 = vmatpush.msrb.mxu3 %v6795_v18 }
 0x347   :  { %v1664_v19 = vpop.f32.mrf.mxu2 }
 0x348   :  { %v10550_v50 = vadd.f32 %v1664_v19, %v1330_v51  ;;  %v1825_v12 = vpop.f32.mrf.mxu3  ;;  %v1333_v38 = vpop.f32.mrf.mxu0  ;;  %v6793_v51 = vld [vmem:[%s14592_s1 + $0xd8] sm:$0xff]  ;;  %v6790_v19 = vld [vmem:[%s14592_s1 + $0xc0] sm:$0xff] }
 0x349   :  { %v10555_v17 = vadd.f32 %v1825_v12, %v1491_v36  ;;  %v1494_v49 = vpop.f32.mrf.mxu1  ;;  %2523 = vmatpush.msrb.mxu3 %v6793_v51  ;;  %v6791_v12 = vld [vmem:[%s14592_s1 + $0xc8] sm:$0xff]  ;;  %2363 = vmatpush.msrb.mxu2 %v6790_v19  ;;  %v6903_v36 = vld [vmem:[%s14592_s1 + $0x138] sm:$0xf] }
 0x34a   :  { %15129 = vst [vmem:[#allocation519_spill] sm:$0xff] %v10550_v50  ;;  %6953 = vmatpush.msk.msra.mxu1 %vm1225_vm0, %v6903_v36 }
 0x34b   :  { %15130 = vst [vmem:[#allocation520_spill] sm:$0xff] %v10555_v17  ;;  %6533 = vmatmul.msk.f32.gmra.mxu0 %vm1080_vm1, %v1053_v37  ;;  %2524 = vmatpush.msrb.mxu3 %v6791_v12 }
 0x34c   :  { %6582 = vmatmul.msk.f32.gmra.mxu1 %vm1080_vm1, %v1053_v37  ;;  %6631 = vmatmul.msk.f32.gmra.mxu2 %vm1080_vm1, %v1051_v39 }
 0x34d   :  { %6680 = vmatmul.msk.f32.gmra.mxu3 %vm1080_vm1, %v1051_v39  ;;  %v10586_v39 = vld [vmem:[%s14591_s0 + $0x178] sm:$0xff] }
 0x34f   :  { %v1667_v16 = vpop.f32.mrf.mxu2 }
 0x350   :  { %v10581_v18 = vadd.f32 %v1667_v16, %v1333_v38  ;;  %v1828_v51 = vpop.f32.mrf.mxu3  ;;  %v1336_v17 = vpop.f32.mrf.mxu0 }
 0x351   :  { %v10588_v19 = vadd.f32 %v1828_v51, %v1494_v49  ;;  %v1497_v50 = vpop.f32.mrf.mxu1  ;;  %v10601_v49 = vld [vmem:[%s14591_s0 + $0x180] sm:$0xff] }
 0x352   :  { %15131 = vst [vmem:[#allocation521_spill] sm:$0xff] %v10581_v18 }
 0x353   :  { %15132 = vst [vmem:[#allocation522_spill] sm:$0xff] %v10588_v19  ;;  %6534 = vmatmul.msk.f32.gmra.mxu0 %vm1080_vm1, %v10586_v39 }
 0x354   :  { %6583 = vmatmul.msk.f32.gmra.mxu1 %vm1080_vm1, %v10586_v39  ;;  %6632 = vmatmul.msk.f32.gmra.mxu2 %vm1080_vm1, %v1052_v48 }
 0x355   :  { %6681 = vmatmul.msk.f32.gmra.mxu3 %vm1080_vm1, %v1052_v48 }
 0x357   :  { %v1670_v38 = vpop.f32.mrf.mxu2 }
 0x358   :  { %v10596_v12 = vadd.f32 %v1670_v38, %v1336_v17  ;;  %v1831_v14 = vpop.f32.mrf.mxu3  ;;  %v1339_v36 = vpop.f32.mrf.mxu0 }
 0x359   :  { %v10603_v16 = vadd.f32 %v1831_v14, %v1497_v50  ;;  %v1500_v51 = vpop.f32.mrf.mxu1  ;;  %v10616_v50 = vld [vmem:[%s14591_s0 + $0x188] sm:$0xff] }
 0x35a   :  { %15133 = vst [vmem:[#allocation523_spill] sm:$0xff] %v10596_v12 }
 0x35b   :  { %15134 = vst [vmem:[#allocation524_spill] sm:$0xff] %v10603_v16  ;;  %6535 = vmatmul.msk.f32.gmra.mxu0 %vm1080_vm1, %v10601_v49 }
 0x35c   :  { %6584 = vmatmul.msk.f32.gmra.mxu1 %vm1080_vm1, %v10601_v49  ;;  %6633 = vmatmul.msk.f32.gmra.mxu2 %vm1080_vm1, %v1053_v37 }
 0x35d   :  { %6682 = vmatmul.msk.f32.gmra.mxu3 %vm1080_vm1, %v1053_v37 }
 0x35f   :  { %v1673_v48 = vpop.f32.mrf.mxu2 }
 0x360   :  { %v10611_v17 = vadd.f32 %v1673_v48, %v1339_v36  ;;  %v1834_v38 = vpop.f32.mrf.mxu3  ;;  %v1342_v12 = vpop.f32.mrf.mxu0 }
 0x361   :  { %v10618_v14 = vadd.f32 %v1834_v38, %v1500_v51  ;;  %v1503_v16 = vpop.f32.mrf.mxu1 }
 0x362   :  { %15135 = vst [vmem:[#allocation525_spill] sm:$0xff] %v10611_v17 }
 0x363   :  { %15136 = vst [vmem:[#allocation526_spill] sm:$0xff] %v10618_v14  ;;  %6536 = vmatmul.msk.f32.gmra.mxu0 %vm1080_vm1, %v10616_v50 }
 0x364   :  { %6585 = vmatmul.msk.f32.gmra.mxu1 %vm1080_vm1, %v10616_v50  ;;  %6634 = vmatmul.msk.f32.gmra.mxu2 %vm1080_vm1, %v10586_v39 }
 0x365   :  { %6683 = vmatmul.msk.f32.gmra.mxu3 %vm1080_vm1, %v10586_v39 }
 0x367   :  { %v1676_v37 = vpop.f32.mrf.mxu2 }
 0x368   :  { %v10628_v36 = vadd.f32 %v1676_v37, %v1342_v12  ;;  %v1837_v48 = vpop.f32.mrf.mxu3  ;;  %v1345_v17 = vpop.f32.mrf.mxu0 }
 0x369   :  { %v10630_v51 = vadd.f32 %v1837_v48, %v1503_v16  ;;  %v1506_v38 = vpop.f32.mrf.mxu1 }
 0x36a   :  { %15137 = vst [vmem:[#allocation527_spill] sm:$0xff] %v10628_v36 }
 0x36b   :  { %15138 = vst [vmem:[#allocation528_spill] sm:$0xff] %v10630_v51  ;;  %6693 = vmatmul.msk.f32.vlgmr.msrb.gmra.mxu0 %vm1080_vm1, %v9963_v28 }
 0x36c   :  { %6742 = vmatmul.msk.f32.vlgmr.msrb.gmra.mxu1 %vm1080_vm1, %v9963_v28  ;;  %6799 = vmatmul.msk.f32.vlgmr.msrb.gmra.mxu2 %vm1080_vm1, %v9985_v61 }
 0x36d   :  { %6848 = vmatmul.msk.f32.vlgmr.msrb.gmra.mxu3 %vm1080_vm1, %v9985_v61 }
 0x36f   :  { %v1679_v14 = vpop.f32.mrf.mxu2 }
 0x370   :  { %v10640_v12 = vadd.f32 %v1679_v14, %v1345_v17  ;;  %v1840_v37 = vpop.f32.mrf.mxu3  ;;  %v1348_v36 = vpop.f32.mrf.mxu0 }
 0x371   :  { %v10642_v16 = vadd.f32 %v1840_v37, %v1506_v38  ;;  %v1509_v48 = vpop.f32.mrf.mxu1 }
 0x372   :  { %15139 = vst [vmem:[#allocation529_spill] sm:$0xff] %v10640_v12 }
 0x373   :  { %15140 = vst [vmem:[#allocation530_spill] sm:$0xff] %v10642_v16  ;;  %6694 = vmatmul.msk.f32.gmra.mxu0 %vm1080_vm1, %v9974_v30 }
 0x374   :  { %6743 = vmatmul.msk.f32.gmra.mxu1 %vm1080_vm1, %v9974_v30  ;;  %6800 = vmatmul.msk.f32.gmra.mxu2 %vm1080_vm1, %v9998_v62 }
 0x375   :  { %6849 = vmatmul.msk.f32.gmra.mxu3 %vm1080_vm1, %v9998_v62 }
 0x377   :  { %v1682_v28 = vpop.f32.mrf.mxu2 }
 0x378   :  { %v10652_v17 = vadd.f32 %v1682_v28, %v1348_v36  ;;  %v1843_v14 = vpop.f32.mrf.mxu3  ;;  %v1351_v12 = vpop.f32.mrf.mxu0 }
 0x379   :  { %v10654_v38 = vadd.f32 %v1843_v14, %v1509_v48  ;;  %v1512_v37 = vpop.f32.mrf.mxu1 }
 0x37a   :  { %15141 = vst [vmem:[#allocation531_spill] sm:$0xff] %v10652_v17 }
 0x37b   :  { %15142 = vst [vmem:[#allocation532_spill] sm:$0xff] %v10654_v38  ;;  %6695 = vmatmul.msk.f32.gmra.mxu0 %vm1080_vm1, %v9985_v61 }
 0x37c   :  { %6744 = vmatmul.msk.f32.gmra.mxu1 %vm1080_vm1, %v9985_v61  ;;  %6801 = vmatmul.msk.f32.gmra.mxu2 %vm1080_vm1, %v10011_v31 }
 0x37d   :  { %6850 = vmatmul.msk.f32.gmra.mxu3 %vm1080_vm1, %v10011_v31 }
 0x37f   :  { %v1685_v30 = vpop.f32.mrf.mxu2 }
 0x380   :  { %v10664_v36 = vadd.f32 %v1685_v30, %v1351_v12  ;;  %v1846_v28 = vpop.f32.mrf.mxu3  ;;  %v1354_v17 = vpop.f32.mrf.mxu0 }
 0x381   :  { %v10666_v48 = vadd.f32 %v1846_v28, %v1512_v37  ;;  %v1515_v14 = vpop.f32.mrf.mxu1 }
 0x382   :  { %15143 = vst [vmem:[#allocation533_spill] sm:$0xff] %v10664_v36 }
 0x383   :  { %15144 = vst [vmem:[#allocation534_spill] sm:$0xff] %v10666_v48  ;;  %6696 = vmatmul.msk.f32.gmra.mxu0 %vm1080_vm1, %v9998_v62 }
 0x384   :  { %6745 = vmatmul.msk.f32.gmra.mxu1 %vm1080_vm1, %v9998_v62  ;;  %6802 = vmatmul.msk.f32.gmra.mxu2 %vm1080_vm1, %v10024_v63 }
 0x385   :  { %6851 = vmatmul.msk.f32.gmra.mxu3 %vm1080_vm1, %v10024_v63 }
 0x387   :  { %v1688_v61 = vpop.f32.mrf.mxu2 }
 0x388   :  { %v10676_v12 = vadd.f32 %v1688_v61, %v1354_v17  ;;  %v1849_v30 = vpop.f32.mrf.mxu3  ;;  %v1357_v38 = vpop.f32.mrf.mxu0 }
 0x389   :  { %v10678_v37 = vadd.f32 %v1849_v30, %v1515_v14  ;;  %v1518_v28 = vpop.f32.mrf.mxu1 }
 0x38a   :  { %15145 = vst [vmem:[#allocation535_spill] sm:$0xff] %v10676_v12 }
 0x38b   :  { %15146 = vst [vmem:[#allocation536_spill] sm:$0xff] %v10678_v37  ;;  %6697 = vmatmul.msk.f32.gmra.mxu0 %vm1080_vm1, %v10011_v31 }
 0x38c   :  { %6746 = vmatmul.msk.f32.gmra.mxu1 %vm1080_vm1, %v10011_v31  ;;  %6803 = vmatmul.msk.f32.gmra.mxu2 %vm1080_vm1, %v10037_v3 }
 0x38d   :  { %6852 = vmatmul.msk.f32.gmra.mxu3 %vm1080_vm1, %v10037_v3 }
 0x38f   :  { %v1691_v62 = vpop.f32.mrf.mxu2 }
 0x390   :  { %v10688_v17 = vadd.f32 %v1691_v62, %v1357_v38  ;;  %v1852_v61 = vpop.f32.mrf.mxu3  ;;  %v1360_v12 = vpop.f32.mrf.mxu0 }
 0x391   :  { %v10690_v14 = vadd.f32 %v1852_v61, %v1518_v28  ;;  %v1521_v30 = vpop.f32.mrf.mxu1 }
 0x392   :  { %15147 = vst [vmem:[#allocation537_spill] sm:$0xff] %v10688_v17 }
 0x393   :  { %15148 = vst [vmem:[#allocation538_spill] sm:$0xff] %v10690_v14  ;;  %6698 = vmatmul.msk.f32.gmra.mxu0 %vm1080_vm1, %v10024_v63 }
 0x394   :  { %6747 = vmatmul.msk.f32.gmra.mxu1 %vm1080_vm1, %v10024_v63  ;;  %6804 = vmatmul.msk.f32.gmra.mxu2 %vm1080_vm1, %v10056_v9 }
 0x395   :  { %6853 = vmatmul.msk.f32.gmra.mxu3 %vm1080_vm1, %v10056_v9 }
 0x397   :  { %v1694_v31 = vpop.f32.mrf.mxu2 }
 0x398   :  { %v10700_v38 = vadd.f32 %v1694_v31, %v1360_v12  ;;  %v1855_v62 = vpop.f32.mrf.mxu3  ;;  %v1363_v17 = vpop.f32.mrf.mxu0 }
 0x399   :  { %v10702_v28 = vadd.f32 %v1855_v62, %v1521_v30  ;;  %v1524_v61 = vpop.f32.mrf.mxu1 }
 0x39a   :  { %15149 = vst [vmem:[#allocation539_spill] sm:$0xff] %v10700_v38 }
 0x39b   :  { %15150 = vst [vmem:[#allocation540_spill] sm:$0xff] %v10702_v28  ;;  %6699 = vmatmul.msk.f32.gmra.mxu0 %vm1080_vm1, %v10037_v3 }
 0x39c   :  { %6748 = vmatmul.msk.f32.gmra.mxu1 %vm1080_vm1, %v10037_v3  ;;  %6805 = vmatmul.msk.f32.gmra.mxu2 %vm1080_vm1, %v10069_v29 }
 0x39d   :  { %6854 = vmatmul.msk.f32.gmra.mxu3 %vm1080_vm1, %v10069_v29 }
 0x39f   :  { %v1697_v63 = vpop.f32.mrf.mxu2 }
 0x3a0   :  { %v10712_v12 = vadd.f32 %v1697_v63, %v1363_v17  ;;  %v1858_v31 = vpop.f32.mrf.mxu3  ;;  %v1366_v38 = vpop.f32.mrf.mxu0 }
 0x3a1   :  { %v10714_v30 = vadd.f32 %v1858_v31, %v1524_v61  ;;  %v1527_v62 = vpop.f32.mrf.mxu1 }
 0x3a2   :  { %15151 = vst [vmem:[#allocation541_spill] sm:$0xff] %v10712_v12 }
 0x3a3   :  { %15152 = vst [vmem:[#allocation542_spill] sm:$0xff] %v10714_v30  ;;  %6700 = vmatmul.msk.f32.gmra.mxu0 %vm1080_vm1, %v10056_v9 }
 0x3a4   :  { %6749 = vmatmul.msk.f32.gmra.mxu1 %vm1080_vm1, %v10056_v9  ;;  %6806 = vmatmul.msk.f32.gmra.mxu2 %vm1080_vm1, %v10082_v8  ;;  %v6900_v9 = vld [vmem:[%s14592_s1 + $0x120] sm:$0xff] }
 0x3a5   :  { %6855 = vmatmul.msk.f32.gmra.mxu3 %vm1080_vm1, %v10082_v8  ;;  %2800 = vmatpush.msra.mxu0 %v6900_v9 }
 0x3a7   :  { %v1700_v3 = vpop.f32.mrf.mxu2 }
 0x3a8   :  { %v10724_v17 = vadd.f32 %v1700_v3, %v1366_v38  ;;  %v1861_v63 = vpop.f32.mrf.mxu3  ;;  %v1369_v28 = vpop.f32.mrf.mxu0  ;;  %v6901_v38 = vld [vmem:[%s14592_s1 + $0x128] sm:$0xff] }
 0x3a9   :  { %v10726_v61 = vadd.f32 %v1861_v63, %v1527_v62  ;;  %v1530_v31 = vpop.f32.mrf.mxu1  ;;  %2961 = vmatpush.msra.mxu1 %v6901_v38 }
 0x3aa   :  { %15153 = vst [vmem:[#allocation543_spill] sm:$0xff] %v10724_v17 }
 0x3ab   :  { %15154 = vst [vmem:[#allocation544_spill] sm:$0xff] %v10726_v61  ;;  %6701 = vmatmul.msk.f32.gmra.mxu0 %vm1080_vm1, %v10069_v29 }
 0x3ac   :  { %6750 = vmatmul.msk.f32.gmra.mxu1 %vm1080_vm1, %v10069_v29  ;;  %6807 = vmatmul.msk.f32.gmra.mxu2 %vm1080_vm1, %v10095_v10 }
 0x3ad   :  { %6856 = vmatmul.msk.f32.gmra.mxu3 %vm1080_vm1, %v10095_v10 }
 0x3af   :  { %v1703_v62 = vpop.f32.mrf.mxu2 }
 0x3b0   :  { %v10742_v3 = vadd.f32 %v1703_v62, %v1369_v28  ;;  %v1864_v29 = vpop.f32.mrf.mxu3  ;;  %v1372_v63 = vpop.f32.mrf.mxu0 }
 0x3b1   :  { %v10744_v61 = vadd.f32 %v1864_v29, %v1530_v31  ;;  %v1533_v17 = vpop.f32.mrf.mxu1 }
 0x3b2   :  { %15155 = vst [vmem:[#allocation545_spill] sm:$0xff] %v10742_v3 }
 0x3b3   :  { %15156 = vst [vmem:[#allocation546_spill] sm:$0xff] %v10744_v61  ;;  %6702 = vmatmul.msk.f32.gmra.mxu0 %vm1080_vm1, %v10082_v8  ;;  %v10959_v61 = vld [vmem:[%s14591_s0 + $0xc8] sm:$0xff] }
 0x3b4   :  { %6751 = vmatmul.msk.f32.gmra.mxu1 %vm1080_vm1, %v10082_v8  ;;  %6808 = vmatmul.msk.f32.gmra.mxu2 %vm1080_vm1, %v10108_v11 }
 0x3b5   :  { %6857 = vmatmul.msk.f32.gmra.mxu3 %vm1080_vm1, %v10108_v11 }
 0x3b7   :  { %v1706_v9 = vpop.f32.mrf.mxu2 }
 0x3b8   :  { %v10754_v28 = vadd.f32 %v1706_v9, %v1372_v63  ;;  %v1867_v38 = vpop.f32.mrf.mxu3  ;;  %v1375_v62 = vpop.f32.mrf.mxu0 }
 0x3b9   :  { %v10756_v31 = vadd.f32 %v1867_v38, %v1533_v17  ;;  %v1536_v29 = vpop.f32.mrf.mxu1 }
 0x3ba   :  { %15157 = vst [vmem:[#allocation547_spill] sm:$0xff] %v10754_v28 }
 0x3bb   :  { %15158 = vst [vmem:[#allocation548_spill] sm:$0xff] %v10756_v31  ;;  %6703 = vmatmul.msk.f32.gmra.mxu0 %vm1080_vm1, %v10095_v10  ;;  %v10790_v31 = vld [vmem:[%s14591_s0 + $0x80] sm:$0xff] }
 0x3bc   :  { %6752 = vmatmul.msk.f32.gmra.mxu1 %vm1080_vm1, %v10095_v10  ;;  %6809 = vmatmul.msk.f32.gmra.mxu2 %vm1080_vm1, %v10121_v24  ;;  %v10775_v10 = vld [vmem:[%s14591_s0 + $0x78] sm:$0xff] }
 0x3bd   :  { %6858 = vmatmul.msk.f32.gmra.mxu3 %vm1080_vm1, %v10121_v24 }
 0x3bf   :  { %v1709_v8 = vpop.f32.mrf.mxu2 }
 0x3c0   :  { %v10766_v63 = vadd.f32 %v1709_v8, %v1375_v62  ;;  %v1870_v9 = vpop.f32.mrf.mxu3  ;;  %v1378_v28 = vpop.f32.mrf.mxu0 }
 0x3c1   :  { %v10768_v17 = vadd.f32 %v1870_v9, %v1536_v29  ;;  %v1539_v38 = vpop.f32.mrf.mxu1 }
 0x3c2   :  { %15159 = vst [vmem:[#allocation549_spill] sm:$0xff] %v10766_v63  ;;  %v10877_v63 = vld [vmem:[%s14591_s0 + $0xa8] sm:$0xff] }
 0x3c3   :  { %15160 = vst [vmem:[#allocation550_spill] sm:$0xff] %v10768_v17  ;;  %6704 = vmatmul.msk.f32.gmra.mxu0 %vm1080_vm1, %v10108_v11 }
 0x3c4   :  { %6753 = vmatmul.msk.f32.gmra.mxu1 %vm1080_vm1, %v10775_v10  ;;  %6810 = vmatmul.msk.f32.gmra.mxu2 %vm1080_vm1, %v10134_v25 }
 0x3c5   :  { %6859 = vmatmul.msk.f32.gmra.mxu3 %vm1080_vm1, %v10134_v25 }
 0x3c7   :  { %v1712_v24 = vpop.f32.mrf.mxu2 }
 0x3c8   :  { %v10783_v62 = vadd.f32 %v1712_v24, %v1378_v28  ;;  %v1873_v29 = vpop.f32.mrf.mxu3  ;;  %v1381_v8 = vpop.f32.mrf.mxu0 }
 0x3c9   :  { %v10785_v11 = vadd.f32 %v1873_v29, %v1539_v38  ;;  %v1542_v9 = vpop.f32.mrf.mxu1 }
 0x3ca   :  { %15161 = vst [vmem:[#allocation551_spill] sm:$0xff] %v10783_v62  ;;  %v10807_v62 = vld [vmem:[%s14591_s0 + $0x88] sm:$0xff] }
 0x3cb   :  { %15162 = vst [vmem:[#allocation552_spill] sm:$0xff] %v10785_v11  ;;  %6705 = vmatmul.msk.f32.gmra.mxu0 %vm1080_vm1, %v10790_v31 }
 0x3cc   :  { %6754 = vmatmul.msk.f32.gmra.mxu1 %vm1080_vm1, %v10790_v31  ;;  %6811 = vmatmul.msk.f32.gmra.mxu2 %vm1080_vm1, %v10147_v27 }
 0x3cd   :  { %6860 = vmatmul.msk.f32.gmra.mxu3 %vm1080_vm1, %v10147_v27 }
 0x3cf   :  { %v1715_v25 = vpop.f32.mrf.mxu2 }
 0x3d0   :  { %v10800_v28 = vadd.f32 %v1715_v25, %v1381_v8  ;;  %v1876_v38 = vpop.f32.mrf.mxu3  ;;  %v1384_v24 = vpop.f32.mrf.mxu0 }
 0x3d1   :  { %v10802_v29 = vadd.f32 %v1876_v38, %v1542_v9  ;;  %v1545_v11 = vpop.f32.mrf.mxu1 }
 0x3d2   :  { %15163 = vst [vmem:[#allocation553_spill] sm:$0xff] %v10800_v28  ;;  %v10824_v28 = vld [vmem:[%s14591_s0 + $0x90] sm:$0xff] }
 0x3d3   :  { %15164 = vst [vmem:[#allocation554_spill] sm:$0xff] %v10802_v29  ;;  %6706 = vmatmul.msk.f32.gmra.mxu0 %vm1080_vm1, %v10807_v62 }
 0x3d4   :  { %6755 = vmatmul.msk.f32.gmra.mxu1 %vm1080_vm1, %v10807_v62  ;;  %6812 = vmatmul.msk.f32.gmra.mxu2 %vm1080_vm1, %v10162_v57 }
 0x3d5   :  { %6861 = vmatmul.msk.f32.gmra.mxu3 %vm1080_vm1, %v10162_v57 }
 0x3d7   :  { %v1718_v27 = vpop.f32.mrf.mxu2 }
 0x3d8   :  { %v10817_v8 = vadd.f32 %v1718_v27, %v1384_v24  ;;  %v1879_v9 = vpop.f32.mrf.mxu3  ;;  %v1387_v25 = vpop.f32.mrf.mxu0 }
 0x3d9   :  { %v10819_v38 = vadd.f32 %v1879_v9, %v1545_v11  ;;  %v1548_v29 = vpop.f32.mrf.mxu1 }
 0x3da   :  { %15165 = vst [vmem:[#allocation555_spill] sm:$0xff] %v10817_v8  ;;  %v10841_v8 = vld [vmem:[%s14591_s0 + $0x98] sm:$0xff] }
 0x3db   :  { %15166 = vst [vmem:[#allocation556_spill] sm:$0xff] %v10819_v38  ;;  %6707 = vmatmul.msk.f32.gmra.mxu0 %vm1080_vm1, %v10824_v28 }
 0x3dc   :  { %6756 = vmatmul.msk.f32.gmra.mxu1 %vm1080_vm1, %v10824_v28  ;;  %6813 = vmatmul.msk.f32.gmra.mxu2 %vm1080_vm1, %v10179_v40 }
 0x3dd   :  { %6862 = vmatmul.msk.f32.gmra.mxu3 %vm1080_vm1, %v10179_v40 }
 0x3df   :  { %v1721_v57 = vpop.f32.mrf.mxu2 }
 0x3e0   :  { %v10834_v11 = vadd.f32 %v1721_v57, %v1387_v25  ;;  %v1882_v24 = vpop.f32.mrf.mxu3  ;;  %v1390_v27 = vpop.f32.mrf.mxu0 }
 0x3e1   :  { %v10836_v9 = vadd.f32 %v1882_v24, %v1548_v29  ;;  %v1551_v38 = vpop.f32.mrf.mxu1 }
 0x3e2   :  { %15167 = vst [vmem:[#allocation557_spill] sm:$0xff] %v10834_v11  ;;  %v10858_v11 = vld [vmem:[%s14591_s0 + $0xa0] sm:$0xff] }
 0x3e3   :  { %15168 = vst [vmem:[#allocation558_spill] sm:$0xff] %v10836_v9  ;;  %6708 = vmatmul.msk.f32.gmra.mxu0 %vm1080_vm1, %v10841_v8 }
 0x3e4   :  { %6757 = vmatmul.msk.f32.gmra.mxu1 %vm1080_vm1, %v10841_v8  ;;  %6814 = vmatmul.msk.f32.gmra.mxu2 %vm1080_vm1, %v10196_v23 }
 0x3e5   :  { %6863 = vmatmul.msk.f32.gmra.mxu3 %vm1080_vm1, %v10196_v23 }
 0x3e7   :  { %v1724_v40 = vpop.f32.mrf.mxu2 }
 0x3e8   :  { %v10851_v29 = vadd.f32 %v1724_v40, %v1390_v27  ;;  %v1885_v25 = vpop.f32.mrf.mxu3  ;;  %v1926_v57 = vpop.f32.mrf.mxu0 }
 0x3e9   :  { %v10853_v24 = vadd.f32 %v1885_v25, %v1551_v38  ;;  %v2087_v9 = vpop.f32.mrf.mxu1  ;;  %v2231_v23 = vadd.f32 %v1926_v57, %v10157_v42 }
 0x3ea   :  { %15169 = vst [vmem:[#allocation559_spill] sm:$0xff] %v10851_v29  ;;  %v2232_v38 = vadd.f32 %v2087_v9, %v10164_v58 }
 0x3eb   :  { %15170 = vst [vmem:[#allocation560_spill] sm:$0xff] %v10853_v24  ;;  %6709 = vmatmul.msk.f32.gmra.mxu0 %vm1080_vm1, %v10858_v11 }
 0x3ec   :  { %6758 = vmatmul.msk.f32.gmra.mxu1 %vm1080_vm1, %v10858_v11  ;;  %6815 = vmatmul.msk.f32.gmra.mxu2 %vm1080_vm1, %v10213_v20 }
 0x3ed   :  { %6864 = vmatmul.msk.f32.gmra.mxu3 %vm1080_vm1, %v10213_v20 }
 0x3ef   :  { %v2365_v27 = vpop.f32.mrf.mxu2 }
 0x3f0   :  { %v10870_v40 = vadd.f32 %v2365_v27, %v2231_v23  ;;  %v2526_v25 = vpop.f32.mrf.mxu3  ;;  %v1929_v24 = vpop.f32.mrf.mxu0 }
 0x3f1   :  { %v10872_v29 = vadd.f32 %v2526_v25, %v2232_v38  ;;  %v2090_v17 = vpop.f32.mrf.mxu1  ;;  %v2233_v42 = vadd.f32 %v1929_v24, %v10174_v41  ;;  %v10896_v25 = vld [vmem:[%s14591_s0 + $0xb0] sm:$0xff] }
 0x3f2   :  { %v2234_v58 = vadd.f32 %v2090_v17, %v10181_v43 }
 0x3f3   :  { %6710 = vmatmul.msk.f32.gmra.mxu0 %vm1080_vm1, %v10877_v63 }
 0x3f4   :  { %6759 = vmatmul.msk.f32.gmra.mxu1 %vm1080_vm1, %v10877_v63  ;;  %6816 = vmatmul.msk.f32.gmra.mxu2 %vm1080_vm1, %v10236_v47 }
 0x3f5   :  { %6865 = vmatmul.msk.f32.gmra.mxu3 %vm1080_vm1, %v10236_v47 }
 0x3f7   :  { %v2368_v20 = vpop.f32.mrf.mxu2 }
 0x3f8   :  { %v10889_v9 = vadd.f32 %v2368_v20, %v2233_v42  ;;  %v2529_v57 = vpop.f32.mrf.mxu3  ;;  %v1932_v23 = vpop.f32.mrf.mxu0 }
 0x3f9   :  { %v10891_v38 = vadd.f32 %v2529_v57, %v2234_v58  ;;  %v2093_v27 = vpop.f32.mrf.mxu1  ;;  %v2235_v47 = vadd.f32 %v1932_v23, %v10191_v26  ;;  %v10915_v57 = vld [vmem:[%s14591_s0 + $0xb8] sm:$0xff] }
 0x3fa   :  { %v2236_v41 = vadd.f32 %v2093_v27, %v10198_v59 }
 0x3fb   :  { %6711 = vmatmul.msk.f32.gmra.mxu0 %vm1080_vm1, %v10896_v25 }
 0x3fc   :  { %6760 = vmatmul.msk.f32.gmra.mxu1 %vm1080_vm1, %v10896_v25  ;;  %6817 = vmatmul.msk.f32.gmra.mxu2 %vm1080_vm1, %v10253_v44 }
 0x3fd   :  { %6866 = vmatmul.msk.f32.gmra.mxu3 %vm1080_vm1, %v10253_v44 }
 0x3ff   :  { %v2371_v43 = vpop.f32.mrf.mxu2 }
 0x400   :  { %v10908_v17 = vadd.f32 %v2371_v43, %v2235_v47  ;;  %v2532_v24 = vpop.f32.mrf.mxu3  ;;  %v1935_v42 = vpop.f32.mrf.mxu0 }
 0x401   :  { %v10910_v58 = vadd.f32 %v2532_v24, %v2236_v41  ;;  %v2096_v20 = vpop.f32.mrf.mxu1  ;;  %v2237_v26 = vadd.f32 %v1935_v42, %v10208_v56  ;;  %v10934_v24 = vld [vmem:[%s14591_s0 + $0xc0] sm:$0xff]  ;;  %v6898_v56 = vld [vmem:[%s14592_s1 + $0x110] sm:$0xff] }
 0x402   :  { %v2238_v59 = vadd.f32 %v2096_v20, %v10215_v21  ;;  %v6899_v21 = vld [vmem:[%s14592_s1 + $0x118] sm:$0xff]  ;;  %2801 = vmatpush.msra.mxu0 %v6898_v56 }
 0x403   :  { %6712 = vmatmul.msk.f32.gmra.mxu0 %vm1080_vm1, %v10915_v57  ;;  %2962 = vmatpush.msra.mxu1 %v6899_v21 }
 0x404   :  { %6761 = vmatmul.msk.f32.gmra.mxu1 %vm1080_vm1, %v10915_v57  ;;  %6818 = vmatmul.msk.f32.gmra.mxu2 %vm1080_vm1, %v10270_v2 }
 0x405   :  { %6867 = vmatmul.msk.f32.gmra.mxu3 %vm1080_vm1, %v10270_v2 }
 0x407   :  { %v2374_v44 = vpop.f32.mrf.mxu2 }
 0x408   :  { %v10927_v23 = vadd.f32 %v2374_v44, %v2237_v26  ;;  %v2535_v27 = vpop.f32.mrf.mxu3  ;;  %v1938_v47 = vpop.f32.mrf.mxu0 }
 0x409   :  { %v10929_v41 = vadd.f32 %v2535_v27, %v2238_v59  ;;  %v2099_v43 = vpop.f32.mrf.mxu1  ;;  %v2239_v2 = vadd.f32 %v1938_v47, %v10231_v22 }
 0x40a   :  { %v2240_v42 = vadd.f32 %v2099_v43, %v10238_v60 }
 0x40b   :  { %6713 = vmatmul.msk.f32.gmra.mxu0 %vm1080_vm1, %v10934_v24 }
 0x40c   :  { %6762 = vmatmul.msk.f32.gmra.mxu1 %vm1080_vm1, %v10934_v24  ;;  %6819 = vmatmul.msk.f32.gmra.mxu2 %vm1080_vm1, %v10287_v0 }
 0x40d   :  { %6868 = vmatmul.msk.f32.gmra.mxu3 %vm1080_vm1, %v10287_v0 }
 0x40f   :  { %v2377_v20 = vpop.f32.mrf.mxu2 }
 0x410   :  { %v10952_v26 = vadd.f32 %v2377_v20, %v2239_v2  ;;  %v2538_v59 = vpop.f32.mrf.mxu3  ;;  %v1941_v44 = vpop.f32.mrf.mxu0  ;;  %v10978_v20 = vld [vmem:[%s14591_s0 + $0xd0] sm:$0xff] }
 0x411   :  { %v10954_v0 = vadd.f32 %v2538_v59, %v2240_v42  ;;  %v2102_v27 = vpop.f32.mrf.mxu1  ;;  %v2241_v60 = vadd.f32 %v1941_v44, %v10248_v55 }
 0x412   :  { %v2242_v22 = vadd.f32 %v2102_v27, %v10255_v45 }
 0x413   :  { %6714 = vmatmul.msk.f32.gmra.mxu0 %vm1080_vm1, %v10959_v61 }
 0x414   :  { %6763 = vmatmul.msk.f32.gmra.mxu1 %vm1080_vm1, %v10959_v61  ;;  %6820 = vmatmul.msk.f32.gmra.mxu2 %vm1080_vm1, %v10304_v33 }
 0x415   :  { %6869 = vmatmul.msk.f32.gmra.mxu3 %vm1080_vm1, %v10304_v33 }
 0x417   :  { %v2380_v47 = vpop.f32.mrf.mxu2 }
 0x418   :  { %v10971_v43 = vadd.f32 %v2380_v47, %v2241_v60  ;;  %v2541_v56 = vpop.f32.mrf.mxu3  ;;  %v1944_v21 = vpop.f32.mrf.mxu0  ;;  %v10997_v47 = vld [vmem:[%s14591_s0 + $0xd8] sm:$0xff] }
 0x419   :  { %v10973_v2 = vadd.f32 %v2541_v56, %v2242_v22  ;;  %v2105_v42 = vpop.f32.mrf.mxu1  ;;  %v2243_v55 = vadd.f32 %v1944_v21, %v10265_v52  ;;  %v11008_v52 = vld [vmem:[%s14591_s0 + $0xe8] sm:$0xff] }
 0x41a   :  { %v2244_v45 = vadd.f32 %v2105_v42, %v10272_v53 }
 0x41b   :  { %6715 = vmatmul.msk.f32.gmra.mxu0 %vm1080_vm1, %v10978_v20 }
 0x41c   :  { %6764 = vmatmul.msk.f32.gmra.mxu1 %vm1080_vm1, %v10978_v20  ;;  %6821 = vmatmul.msk.f32.gmra.mxu2 %vm1080_vm1, %v10321_v4 }
 0x41d   :  { %6870 = vmatmul.msk.f32.gmra.mxu3 %vm1080_vm1, %v10321_v4 }
 0x41f   :  { %v2383_v33 = vpop.f32.mrf.mxu2 }
 0x420   :  { %v10990_v59 = vadd.f32 %v2383_v33, %v2243_v55  ;;  %v2544_v44 = vpop.f32.mrf.mxu3  ;;  %v1947_v27 = vpop.f32.mrf.mxu0  ;;  %v11021_v33 = vld [vmem:[%s14591_s0 + $0xe0] sm:$0xff] }
 0x421   :  { %v10992_v60 = vadd.f32 %v2544_v44, %v2244_v45  ;;  %v2108_v22 = vpop.f32.mrf.mxu1  ;;  %v2245_v53 = vadd.f32 %v1947_v27, %v10282_v46  ;;  %v11030_v46 = vld [vmem:[%s14591_s0 + $0xf0] sm:$0xff] }
 0x422   :  { %v2246_v4 = vadd.f32 %v2108_v22, %v10289_v1 }
 0x423   :  { %6716 = vmatmul.msk.f32.gmra.mxu0 %vm1080_vm1, %v10997_v47 }
 0x424   :  { %6765 = vmatmul.msk.f32.gmra.mxu1 %vm1080_vm1, %v10997_v47  ;;  %6822 = vmatmul.msk.f32.gmra.mxu2 %vm1080_vm1, %v10338_v7 }
 0x425   :  { %6871 = vmatmul.msk.f32.gmra.mxu3 %vm1080_vm1, %v11008_v52 }
 0x427   :  { %v2386_v56 = vpop.f32.mrf.mxu2 }
 0x428   :  { %v11014_v21 = vadd.f32 %v2386_v56, %v2245_v53  ;;  %v2547_v42 = vpop.f32.mrf.mxu3  ;;  %v1950_v55 = vpop.f32.mrf.mxu0 }
 0x429   :  { %v11016_v45 = vadd.f32 %v2547_v42, %v2246_v4  ;;  %v2111_v7 = vpop.f32.mrf.mxu1  ;;  %v2247_v1 = vadd.f32 %v1950_v55, %v10299_v54  ;;  %v11049_v54 = vld [vmem:[%s14591_s0 + $0xf8] sm:$0xff] }
 0x42a   :  { %v2248_v44 = vadd.f32 %v2111_v7, %v10306_v34 }
 0x42b   :  { %6717 = vmatmul.msk.f32.gmra.mxu0 %vm1080_vm1, %v11021_v33 }
 0x42c   :  { %6766 = vmatmul.msk.f32.gmra.mxu1 %vm1080_vm1, %v11021_v33  ;;  %6823 = vmatmul.msk.f32.gmra.mxu2 %vm1080_vm1, %v11030_v46 }
 0x42d   :  { %6872 = vmatmul.msk.f32.gmra.mxu3 %vm1080_vm1, %v11030_v46 }
 0x42f   :  { %v2389_v27 = vpop.f32.mrf.mxu2 }
 0x430   :  { %v11038_v22 = vadd.f32 %v2389_v27, %v2247_v1  ;;  %v2550_v53 = vpop.f32.mrf.mxu3  ;;  %v1953_v4 = vpop.f32.mrf.mxu0 }
 0x431   :  { %v11040_v56 = vadd.f32 %v2550_v53, %v2248_v44  ;;  %v2114_v42 = vpop.f32.mrf.mxu1  ;;  %v2249_v34 = vadd.f32 %v1953_v4, %v10316_v35  ;;  %v11068_v35 = vld [vmem:[%s14591_s0 + $0x100] sm:$0xff] }
 0x432   :  { %v2250_v55 = vadd.f32 %v2114_v42, %v10323_v5 }
 0x433   :  { %6718 = vmatmul.msk.f32.gmra.mxu0 %vm1080_vm1, %v11008_v52 }
 0x434   :  { %6767 = vmatmul.msk.f32.gmra.mxu1 %vm1080_vm1, %v11008_v52  ;;  %6824 = vmatmul.msk.f32.gmra.mxu2 %vm1080_vm1, %v11049_v54 }
 0x435   :  { %6873 = vmatmul.msk.f32.gmra.mxu3 %vm1080_vm1, %v11049_v54 }
 0x437   :  { %v2392_v7 = vpop.f32.mrf.mxu2 }
 0x438   :  { %v11057_v1 = vadd.f32 %v2392_v7, %v2249_v34  ;;  %v2553_v44 = vpop.f32.mrf.mxu3  ;;  %v1956_v27 = vpop.f32.mrf.mxu0 }
 0x439   :  { %v11059_v53 = vadd.f32 %v2553_v44, %v2250_v55  ;;  %v2117_v3 = vpop.f32.mrf.mxu1  ;;  %v2251_v5 = vadd.f32 %v1956_v27, %v10333_v32  ;;  %v11087_v32 = vld [vmem:[%s14591_s0 + $0x108] sm:$0xff] }
 0x43a   :  { %v2252_v4 = vadd.f32 %v2117_v3, %v10340_v15 }
 0x43b   :  { %6719 = vmatmul.msk.f32.gmra.mxu0 %vm1080_vm1, %v11030_v46 }
 0x43c   :  { %6768 = vmatmul.msk.f32.gmra.mxu1 %vm1080_vm1, %v11030_v46  ;;  %6825 = vmatmul.msk.f32.gmra.mxu2 %vm1080_vm1, %v11068_v35 }
 0x43d   :  { %6874 = vmatmul.msk.f32.gmra.mxu3 %vm1080_vm1, %v11068_v35 }
 0x43f   :  { %v2395_v42 = vpop.f32.mrf.mxu2 }
 0x440   :  { %v11076_v34 = vadd.f32 %v2395_v42, %v2251_v5  ;;  %v2556_v55 = vpop.f32.mrf.mxu3  ;;  %v1959_v7 = vpop.f32.mrf.mxu0 }
 0x441   :  { %v11078_v44 = vadd.f32 %v2556_v55, %v2252_v4  ;;  %v2120_v30 = vpop.f32.mrf.mxu1  ;;  %v2253_v15 = vadd.f32 %v1959_v7, %v10350_v6  ;;  %v11106_v6 = vld [vmem:[%s14591_s0 + $0x110] sm:$0xff]  ;;  %v15172_v7 = vld [vmem:[#allocation490_spill] sm:$0xff] }
 0x442   :  { %v2254_v3 = vadd.f32 %v2120_v30, %v10355_v13  ;;  %v15171_v13 = vld [vmem:[#allocation489_spill] sm:$0xff] }
 0x443   :  { %6720 = vmatmul.msk.f32.gmra.mxu0 %vm1080_vm1, %v11049_v54 }
 0x444   :  { %6769 = vmatmul.msk.f32.gmra.mxu1 %vm1080_vm1, %v11049_v54  ;;  %6826 = vmatmul.msk.f32.gmra.mxu2 %vm1080_vm1, %v11087_v32 }
 0x445   :  { %6875 = vmatmul.msk.f32.gmra.mxu3 %vm1080_vm1, %v11087_v32 }
 0x447   :  { %v2398_v27 = vpop.f32.mrf.mxu2 }
 0x448   :  { %v11095_v5 = vadd.f32 %v2398_v27, %v2253_v15  ;;  %v2559_v4 = vpop.f32.mrf.mxu3  ;;  %v1962_v42 = vpop.f32.mrf.mxu0 }
 0x449   :  { %v11097_v55 = vadd.f32 %v2559_v4, %v2254_v3  ;;  %v2123_v12 = vpop.f32.mrf.mxu1  ;;  %v2255_v30 = vadd.f32 %v1962_v42, %v15171_v13  ;;  %v11125_v42 = vld [vmem:[%s14591_s0 + $0x118] sm:$0xff] }
 0x44a   :  { %v2256_v15 = vadd.f32 %v2123_v12, %v15172_v7  ;;  %v15175_v12 = vld [vmem:[#allocation491_spill] sm:$0xff] }
 0x44b   :  { %6721 = vmatmul.msk.f32.gmra.mxu0 %vm1080_vm1, %v11068_v35 }
 0x44c   :  { %6770 = vmatmul.msk.f32.gmra.mxu1 %vm1080_vm1, %v11068_v35  ;;  %6827 = vmatmul.msk.f32.gmra.mxu2 %vm1080_vm1, %v11106_v6 }
 0x44d   :  { %6876 = vmatmul.msk.f32.gmra.mxu3 %vm1080_vm1, %v11106_v6 }
 0x44f   :  { %v2401_v3 = vpop.f32.mrf.mxu2 }
 0x450   :  { %v11114_v27 = vadd.f32 %v2401_v3, %v2255_v30  ;;  %v2562_v4 = vpop.f32.mrf.mxu3  ;;  %v1965_v14 = vpop.f32.mrf.mxu0  ;;  %v15176_v30 = vld [vmem:[#allocation492_spill] sm:$0xff] }
 0x451   :  { %v11116_v37 = vadd.f32 %v2562_v4, %v2256_v15  ;;  %v2126_v48 = vpop.f32.mrf.mxu1  ;;  %v2257_v13 = vadd.f32 %v1965_v14, %v15175_v12  ;;  %v11144_v14 = vld [vmem:[%s14591_s0 + $0x120] sm:$0xff] }
 0x452   :  { %15173 = vst [vmem:[#allocation489_spill] sm:$0xff] %v11114_v27  ;;  %v2258_v7 = vadd.f32 %v2126_v48, %v15176_v30  ;;  %v15180_v48 = vld [vmem:[#allocation493_spill] sm:$0xff] }
 0x453   :  { %15174 = vst [vmem:[#allocation490_spill] sm:$0xff] %v11116_v37  ;;  %6722 = vmatmul.msk.f32.gmra.mxu0 %vm1080_vm1, %v11087_v32 }
 0x454   :  { %6771 = vmatmul.msk.f32.gmra.mxu1 %vm1080_vm1, %v11087_v32  ;;  %6828 = vmatmul.msk.f32.gmra.mxu2 %vm1080_vm1, %v11125_v42  ;;  %15179 = vst [vmem:[#allocation561_spill] sm:$0xff] %v11144_v14 }
 0x455   :  { %6877 = vmatmul.msk.f32.gmra.mxu3 %vm1080_vm1, %v11125_v42 }
 0x457   :  { %v2404_v15 = vpop.f32.mrf.mxu2 }
 0x458   :  { %v11133_v3 = vadd.f32 %v2404_v15, %v2257_v13  ;;  %v2565_v4 = vpop.f32.mrf.mxu3  ;;  %v1968_v36 = vpop.f32.mrf.mxu0  ;;  %v15181_v13 = vld [vmem:[#allocation494_spill] sm:$0xff] }
 0x459   :  { %v11135_v16 = vadd.f32 %v2565_v4, %v2258_v7  ;;  %v2129_v51 = vpop.f32.mrf.mxu1  ;;  %v2259_v12 = vadd.f32 %v1968_v36, %v15180_v48  ;;  %v11163_v36 = vld [vmem:[%s14591_s0 + $0x128] sm:$0xff] }
 0x45a   :  { %15177 = vst [vmem:[#allocation491_spill] sm:$0xff] %v11133_v3  ;;  %v2260_v30 = vadd.f32 %v2129_v51, %v15181_v13  ;;  %v15184_v51 = vld [vmem:[#allocation495_spill] sm:$0xff] }
 0x45b   :  { %15178 = vst [vmem:[#allocation492_spill] sm:$0xff] %v11135_v16  ;;  %6723 = vmatmul.msk.f32.gmra.mxu0 %vm1080_vm1, %v11106_v6 }
 0x45c   :  { %6772 = vmatmul.msk.f32.gmra.mxu1 %vm1080_vm1, %v11106_v6  ;;  %6829 = vmatmul.msk.f32.gmra.mxu2 %vm1080_vm1, %v11144_v14 }
 0x45d   :  { %6878 = vmatmul.msk.f32.gmra.mxu3 %vm1080_vm1, %v11144_v14 }
 0x45f   :  { %v2407_v7 = vpop.f32.mrf.mxu2 }
 0x460   :  { %v11152_v15 = vadd.f32 %v2407_v7, %v2259_v12  ;;  %v2568_v4 = vpop.f32.mrf.mxu3  ;;  %v1971_v19 = vpop.f32.mrf.mxu0  ;;  %v15185_v12 = vld [vmem:[#allocation496_spill] sm:$0xff] }
 0x461   :  { %v11154_v18 = vadd.f32 %v2568_v4, %v2260_v30  ;;  %v2132_v16 = vpop.f32.mrf.mxu1  ;;  %v2261_v48 = vadd.f32 %v1971_v19, %v15184_v51  ;;  %v11182_v19 = vld [vmem:[%s14591_s0 + $0x130] sm:$0xff]  ;;  %v6897_v51 = vld [vmem:[%s14592_s1 + $0x108] sm:$0xff] }
 0x462   :  { %15182 = vst [vmem:[#allocation493_spill] sm:$0xff] %v11152_v15  ;;  %v2262_v13 = vadd.f32 %v2132_v16, %v15185_v12  ;;  %v6896_v16 = vld [vmem:[%s14592_s1 + $0x100] sm:$0xff]  ;;  %2963 = vmatpush.msra.mxu1 %v6897_v51 }
 0x463   :  { %15183 = vst [vmem:[#allocation494_spill] sm:$0xff] %v11154_v18  ;;  %6724 = vmatmul.msk.f32.gmra.mxu0 %vm1080_vm1, %v11125_v42 }
 0x464   :  { %6773 = vmatmul.msk.f32.gmra.mxu1 %vm1080_vm1, %v11125_v42  ;;  %6830 = vmatmul.msk.f32.gmra.mxu2 %vm1080_vm1, %v11163_v36 }
 0x465   :  { %6879 = vmatmul.msk.f32.gmra.mxu3 %vm1080_vm1, %v11163_v36  ;;  %2802 = vmatpush.msra.mxu0 %v6896_v16  ;;  %v15194_v16 = vld [vmem:[#allocation500_spill] sm:$0xff] }
 0x467   :  { %v2410_v30 = vpop.f32.mrf.mxu2 }
 0x468   :  { %v11171_v7 = vadd.f32 %v2410_v30, %v2261_v48  ;;  %v2571_v4 = vpop.f32.mrf.mxu3  ;;  %v1974_v3 = vpop.f32.mrf.mxu0  ;;  %v15188_v48 = vld [vmem:[#allocation497_spill] sm:$0xff] }
 0x469   :  { %v11173_v18 = vadd.f32 %v2571_v4, %v2262_v13  ;;  %v2135_v15 = vpop.f32.mrf.mxu1  ;;  %v2263_v12 = vadd.f32 %v1974_v3, %v15188_v48  ;;  %v15189_v13 = vld [vmem:[#allocation498_spill] sm:$0xff] }
 0x46a   :  { %15186 = vst [vmem:[#allocation495_spill] sm:$0xff] %v11171_v7  ;;  %v2264_v30 = vadd.f32 %v2135_v15, %v15189_v13  ;;  %v11207_v3 = vld [vmem:[%s14591_s0 + $0x138] sm:$0xff]  ;;  %v15193_v15 = vld [vmem:[#allocation499_spill] sm:$0xff] }
 0x46b   :  { %15187 = vst [vmem:[#allocation496_spill] sm:$0xff] %v11173_v18  ;;  %6725 = vmatmul.msk.f32.gmra.mxu0 %vm1080_vm1, %v11144_v14 }
 0x46c   :  { %6774 = vmatmul.msk.f32.gmra.mxu1 %vm1080_vm1, %v11144_v14  ;;  %6831 = vmatmul.msk.f32.gmra.mxu2 %vm1080_vm1, %v11182_v19  ;;  %15192 = vst [vmem:[#allocation562_spill] sm:$0xff] %v11207_v3 }
 0x46d   :  { %6880 = vmatmul.msk.f32.gmra.mxu3 %vm1080_vm1, %v11182_v19 }
 0x46f   :  { %v2413_v4 = vpop.f32.mrf.mxu2 }
 0x470   :  { %v11196_v18 = vadd.f32 %v2413_v4, %v2263_v12  ;;  %v2574_v7 = vpop.f32.mrf.mxu3  ;;  %v1977_v37 = vpop.f32.mrf.mxu0 }
 0x471   :  { %v11198_v27 = vadd.f32 %v2574_v7, %v2264_v30  ;;  %v2138_v14 = vpop.f32.mrf.mxu1  ;;  %v2265_v7 = vadd.f32 %v1977_v37, %v15193_v15  ;;  %v11226_v37 = vld [vmem:[%s14591_s0 + $0x140] sm:$0xff] }
 0x472   :  { %15190 = vst [vmem:[#allocation497_spill] sm:$0xff] %v11196_v18  ;;  %v2266_v51 = vadd.f32 %v2138_v14, %v15194_v16  ;;  %v15198_v14 = vld [vmem:[#allocation501_spill] sm:$0xff] }
 0x473   :  { %15191 = vst [vmem:[#allocation498_spill] sm:$0xff] %v11198_v27  ;;  %6726 = vmatmul.msk.f32.gmra.mxu0 %vm1080_vm1, %v11163_v36 }
 0x474   :  { %6775 = vmatmul.msk.f32.gmra.mxu1 %vm1080_vm1, %v11163_v36  ;;  %6832 = vmatmul.msk.f32.gmra.mxu2 %vm1080_vm1, %v11207_v3  ;;  %15197 = vst [vmem:[#allocation563_spill] sm:$0xff] %v11226_v37 }
 0x475   :  { %6881 = vmatmul.msk.f32.gmra.mxu3 %vm1080_vm1, %v11207_v3 }
 0x477   :  { %v2416_v48 = vpop.f32.mrf.mxu2 }
 0x478   :  { %v11215_v12 = vadd.f32 %v2416_v48, %v2265_v7  ;;  %v2577_v13 = vpop.f32.mrf.mxu3  ;;  %v1980_v30 = vpop.f32.mrf.mxu0  ;;  %v15199_v7 = vld [vmem:[#allocation502_spill] sm:$0xff] }
 0x479   :  { %v11217_v4 = vadd.f32 %v2577_v13, %v2266_v51  ;;  %v2141_v27 = vpop.f32.mrf.mxu1  ;;  %v2267_v15 = vadd.f32 %v1980_v30, %v15198_v14  ;;  %v11245_v30 = vld [vmem:[%s14591_s0 + $0x148] sm:$0xff] }
 0x47a   :  { %15195 = vst [vmem:[#allocation499_spill] sm:$0xff] %v11215_v12  ;;  %v2268_v16 = vadd.f32 %v2141_v27, %v15199_v7  ;;  %v15203_v27 = vld [vmem:[#allocation503_spill] sm:$0xff] }
 0x47b   :  { %15196 = vst [vmem:[#allocation500_spill] sm:$0xff] %v11217_v4  ;;  %6727 = vmatmul.msk.f32.gmra.mxu0 %vm1080_vm1, %v11182_v19 }
 0x47c   :  { %6776 = vmatmul.msk.f32.gmra.mxu1 %vm1080_vm1, %v11182_v19  ;;  %6833 = vmatmul.msk.f32.gmra.mxu2 %vm1080_vm1, %v11226_v37  ;;  %15202 = vst [vmem:[#allocation564_spill] sm:$0xff] %v11245_v30 }
 0x47d   :  { %6882 = vmatmul.msk.f32.gmra.mxu3 %vm1080_vm1, %v11226_v37 }
 0x47f   :  { %v2419_v51 = vpop.f32.mrf.mxu2 }
 0x480   :  { %v11234_v48 = vadd.f32 %v2419_v51, %v2267_v15  ;;  %v2580_v13 = vpop.f32.mrf.mxu3  ;;  %v1983_v4 = vpop.f32.mrf.mxu0  ;;  %v15204_v15 = vld [vmem:[#allocation504_spill] sm:$0xff] }
 0x481   :  { %v11236_v12 = vadd.f32 %v2580_v13, %v2268_v16  ;;  %v2144_v18 = vpop.f32.mrf.mxu1  ;;  %v2269_v14 = vadd.f32 %v1983_v4, %v15203_v27  ;;  %v11264_v4 = vld [vmem:[%s14591_s0 + $0x150] sm:$0xff] }
 0x482   :  { %15200 = vst [vmem:[#allocation501_spill] sm:$0xff] %v11234_v48  ;;  %v2270_v7 = vadd.f32 %v2144_v18, %v15204_v15  ;;  %v15208_v18 = vld [vmem:[#allocation505_spill] sm:$0xff] }
 0x483   :  { %15201 = vst [vmem:[#allocation502_spill] sm:$0xff] %v11236_v12  ;;  %6728 = vmatmul.msk.f32.gmra.mxu0 %vm1080_vm1, %v11207_v3 }
 0x484   :  { %6777 = vmatmul.msk.f32.gmra.mxu1 %vm1080_vm1, %v11207_v3  ;;  %6834 = vmatmul.msk.f32.gmra.mxu2 %vm1080_vm1, %v11245_v30  ;;  %15207 = vst [vmem:[#allocation565_spill] sm:$0xff] %v11264_v4 }
 0x485   :  { %6883 = vmatmul.msk.f32.gmra.mxu3 %vm1080_vm1, %v11245_v30 }
 0x487   :  { %v2422_v16 = vpop.f32.mrf.mxu2 }
 0x488   :  { %v11253_v51 = vadd.f32 %v2422_v16, %v2269_v14  ;;  %v2583_v13 = vpop.f32.mrf.mxu3  ;;  %v1986_v12 = vpop.f32.mrf.mxu0  ;;  %v15209_v14 = vld [vmem:[#allocation506_spill] sm:$0xff] }
 0x489   :  { %v11255_v48 = vadd.f32 %v2583_v13, %v2270_v7  ;;  %v2147_v3 = vpop.f32.mrf.mxu1  ;;  %v2271_v27 = vadd.f32 %v1986_v12, %v15208_v18  ;;  %v11283_v12 = vld [vmem:[%s14591_s0 + $0x158] sm:$0xff] }
 0x48a   :  { %15205 = vst [vmem:[#allocation503_spill] sm:$0xff] %v11253_v51  ;;  %v2272_v15 = vadd.f32 %v2147_v3, %v15209_v14  ;;  %v15213_v3 = vld [vmem:[#allocation507_spill] sm:$0xff] }
 0x48b   :  { %15206 = vst [vmem:[#allocation504_spill] sm:$0xff] %v11255_v48  ;;  %6729 = vmatmul.msk.f32.gmra.mxu0 %vm1080_vm1, %v11226_v37 }
 0x48c   :  { %6778 = vmatmul.msk.f32.gmra.mxu1 %vm1080_vm1, %v11226_v37  ;;  %6835 = vmatmul.msk.f32.gmra.mxu2 %vm1080_vm1, %v11264_v4  ;;  %15212 = vst [vmem:[#allocation566_spill] sm:$0xff] %v11283_v12 }
 0x48d   :  { %6884 = vmatmul.msk.f32.gmra.mxu3 %vm1080_vm1, %v11264_v4 }
 0x48f   :  { %v2425_v7 = vpop.f32.mrf.mxu2 }
 0x490   :  { %v11272_v16 = vadd.f32 %v2425_v7, %v2271_v27  ;;  %v2586_v13 = vpop.f32.mrf.mxu3  ;;  %v1989_v48 = vpop.f32.mrf.mxu0  ;;  %v15214_v27 = vld [vmem:[#allocation508_spill] sm:$0xff] }
 0x491   :  { %v11274_v51 = vadd.f32 %v2586_v13, %v2272_v15  ;;  %v2150_v37 = vpop.f32.mrf.mxu1  ;;  %v2273_v18 = vadd.f32 %v1989_v48, %v15213_v3  ;;  %v11302_v48 = vld [vmem:[%s14591_s0 + $0x160] sm:$0xff] }
 0x492   :  { %15210 = vst [vmem:[#allocation505_spill] sm:$0xff] %v11272_v16  ;;  %v2274_v14 = vadd.f32 %v2150_v37, %v15214_v27  ;;  %v15217_v37 = vld [vmem:[#allocation509_spill] sm:$0xff] }
 0x493   :  { %15211 = vst [vmem:[#allocation506_spill] sm:$0xff] %v11274_v51  ;;  %6730 = vmatmul.msk.f32.gmra.mxu0 %vm1080_vm1, %v11245_v30 }
 0x494   :  { %6779 = vmatmul.msk.f32.gmra.mxu1 %vm1080_vm1, %v11245_v30  ;;  %6836 = vmatmul.msk.f32.gmra.mxu2 %vm1080_vm1, %v11283_v12 }
 0x495   :  { %6885 = vmatmul.msk.f32.gmra.mxu3 %vm1080_vm1, %v11283_v12 }
 0x497   :  { %v2428_v15 = vpop.f32.mrf.mxu2 }
 0x498   :  { %v11291_v7 = vadd.f32 %v2428_v15, %v2273_v18  ;;  %v2589_v13 = vpop.f32.mrf.mxu3  ;;  %v1992_v51 = vpop.f32.mrf.mxu0  ;;  %v15218_v18 = vld [vmem:[#allocation510_spill] sm:$0xff] }
 0x499   :  { %v11293_v16 = vadd.f32 %v2589_v13, %v2274_v14  ;;  %v2153_v30 = vpop.f32.mrf.mxu1  ;;  %v2275_v3 = vadd.f32 %v1992_v51, %v15217_v37  ;;  %v11321_v51 = vld [vmem:[%s14591_s0 + $0x168] sm:$0xff] }
 0x49a   :  { %15215 = vst [vmem:[#allocation507_spill] sm:$0xff] %v11291_v7  ;;  %v2276_v27 = vadd.f32 %v2153_v30, %v15218_v18  ;;  %v15221_v30 = vld [vmem:[#allocation511_spill] sm:$0xff] }
 0x49b   :  { %15216 = vst [vmem:[#allocation508_spill] sm:$0xff] %v11293_v16  ;;  %6731 = vmatmul.msk.f32.gmra.mxu0 %vm1080_vm1, %v11264_v4 }
 0x49c   :  { %6780 = vmatmul.msk.f32.gmra.mxu1 %vm1080_vm1, %v11264_v4  ;;  %6837 = vmatmul.msk.f32.gmra.mxu2 %vm1080_vm1, %v11302_v48 }
 0x49d   :  { %6886 = vmatmul.msk.f32.gmra.mxu3 %vm1080_vm1, %v11302_v48 }
 0x49f   :  { %v2431_v14 = vpop.f32.mrf.mxu2 }
 0x4a0   :  { %v11310_v15 = vadd.f32 %v2431_v14, %v2275_v3  ;;  %v2592_v13 = vpop.f32.mrf.mxu3  ;;  %v1995_v16 = vpop.f32.mrf.mxu0  ;;  %v15222_v3 = vld [vmem:[#allocation512_spill] sm:$0xff] }
 0x4a1   :  { %v11312_v7 = vadd.f32 %v2592_v13, %v2276_v27  ;;  %v2156_v4 = vpop.f32.mrf.mxu1  ;;  %v2277_v37 = vadd.f32 %v1995_v16, %v15221_v30 }
 0x4a2   :  { %15219 = vst [vmem:[#allocation509_spill] sm:$0xff] %v11310_v15  ;;  %v2278_v18 = vadd.f32 %v2156_v4, %v15222_v3  ;;  %v11344_v4 = vld [vmem:[%s14591_s0 + $0x170] sm:$0xff] }
 0x4a3   :  { %15220 = vst [vmem:[#allocation510_spill] sm:$0xff] %v11312_v7  ;;  %6732 = vmatmul.msk.f32.gmra.mxu0 %vm1080_vm1, %v11283_v12 }
 0x4a4   :  { %6781 = vmatmul.msk.f32.gmra.mxu1 %vm1080_vm1, %v11283_v12  ;;  %6838 = vmatmul.msk.f32.gmra.mxu2 %vm1080_vm1, %v11321_v51 }
 0x4a5   :  { %6887 = vmatmul.msk.f32.gmra.mxu3 %vm1080_vm1, %v11321_v51 }
 0x4a7   :  { %v2434_v27 = vpop.f32.mrf.mxu2 }
 0x4a8   :  { %v11329_v14 = vadd.f32 %v2434_v27, %v2277_v37  ;;  %v2595_v13 = vpop.f32.mrf.mxu3  ;;  %v11331_v7 = vpop.f32.mrf.mxu0 }
 0x4a9   :  { %v11333_v15 = vadd.f32 %v2595_v13, %v2278_v18  ;;  %v11335_v12 = vpop.f32.mrf.mxu1 }
 0x4ab   :  { %6733 = vmatmul.msk.f32.gmra.mxu0 %vm1080_vm1, %v11302_v48 }
 0x4ac   :  { %6782 = vmatmul.msk.f32.gmra.mxu1 %vm1080_vm1, %v11302_v48  ;;  %6839 = vmatmul.msk.f32.gmra.mxu2 %vm1080_vm1, %v11344_v4 }
 0x4ad   :  { %6888 = vmatmul.msk.f32.gmra.mxu3 %vm1080_vm1, %v11344_v4 }
 0x4b0   :  { %v11350_v16 = vpop.f32.mrf.mxu0 }
 0x4b1   :  { %15223 = vst [vmem:[#allocation511_spill] sm:$0xff] %v11350_v16  ;;  %v11352_v30 = vpop.f32.mrf.mxu1 }
 0x4b2   :  { %15224 = vst [vmem:[#allocation512_spill] sm:$0xff] %v11352_v30 }
 0x4b3   :  { %6734 = vmatmul.msk.f32.gmra.mxu0 %vm1080_vm1, %v11321_v51 }
 0x4b4   :  { %6783 = vmatmul.msk.f32.gmra.mxu1 %vm1080_vm1, %v11321_v51  ;;  %6840 = vmatmul.msk.f32.gmra.mxu2 %vm1080_vm1, %v10586_v39 }
 0x4b5   :  { %6889 = vmatmul.msk.f32.gmra.mxu3 %vm1080_vm1, %v10586_v39  ;;  %v11381_v39 = vld [vmem:[%s14591_s0 + $0x178] sm:$0xff] }
 0x4b8   :  { %v11362_v37 = vpop.f32.mrf.mxu0 }
 0x4b9   :  { %v11364_v3 = vpop.f32.mrf.mxu1 }
 0x4ba   :  { %15225 = vst [vmem:[#allocation567_spill] sm:$0xff] %v11364_v3 }
 0x4bb   :  { %6735 = vmatmul.msk.f32.gmra.mxu0 %vm1080_vm1, %v11344_v4 }
 0x4bc   :  { %6784 = vmatmul.msk.f32.gmra.mxu1 %vm1080_vm1, %v11344_v4  ;;  %6841 = vmatmul.msk.f32.gmra.mxu2 %vm1080_vm1, %v10601_v49 }
 0x4bd   :  { %6890 = vmatmul.msk.f32.gmra.mxu3 %vm1080_vm1, %v10601_v49 }
 0x4c0   :  { %v11374_v18 = vpop.f32.mrf.mxu0 }
 0x4c1   :  { %15226 = vst [vmem:[#allocation568_spill] sm:$0xff] %v11374_v18  ;;  %v11376_v27 = vpop.f32.mrf.mxu1  ;;  %v1057_v18 = vld [vmem:[%s14591_s0 + $0x190] sm:$0xff] }
 0x4c2   :  { %15227 = vst [vmem:[#allocation569_spill] sm:$0xff] %v11376_v27 }
 0x4c3   :  { %6736 = vmatmul.msk.f32.gmra.mxu0 %vm1080_vm1, %v11381_v39 }
 0x4c4   :  { %6785 = vmatmul.msk.f32.gmra.mxu1 %vm1080_vm1, %v11381_v39  ;;  %6842 = vmatmul.msk.f32.gmra.mxu2 %vm1080_vm1, %v10616_v50 }
 0x4c5   :  { %6891 = vmatmul.msk.f32.gmra.mxu3 %vm1080_vm1, %v10616_v50 }
 0x4c8   :  { %v11391_v13 = vpop.f32.mrf.mxu0 }
 0x4c9   :  { %15228 = vst [vmem:[#allocation570_spill] sm:$0xff] %v11391_v13  ;;  %v11393_v27 = vpop.f32.mrf.mxu1 }
 0x4ca   :  { %15229 = vst [vmem:[#allocation571_spill] sm:$0xff] %v11393_v27  ;;  %v1058_v27 = vld [vmem:[%s14591_s0 + $0x198] sm:$0xff] }
 0x4cb   :  { %6737 = vmatmul.msk.f32.gmra.mxu0 %vm1080_vm1, %v10601_v49 }
 0x4cc   :  { %6786 = vmatmul.msk.f32.gmra.mxu1 %vm1080_vm1, %v10601_v49  ;;  %6843 = vmatmul.msk.f32.gmra.mxu2 %vm1080_vm1, %v1057_v18 }
 0x4cd   :  { %6892 = vmatmul.msk.f32.gmra.mxu3 %vm1080_vm1, %v1057_v18 }
 0x4d0   :  { %v11404_v30 = vpop.f32.mrf.mxu0 }
 0x4d1   :  { %15230 = vst [vmem:[#allocation572_spill] sm:$0xff] %v11404_v30  ;;  %v11406_v16 = vpop.f32.mrf.mxu1 }
 0x4d2   :  { %15231 = vst [vmem:[#allocation573_spill] sm:$0xff] %v11406_v16  ;;  %v1059_v16 = vld [vmem:[%s14591_s0 + $0x1a0] sm:$0xff] }
 0x4d3   :  { %6738 = vmatmul.msk.f32.gmra.mxu0 %vm1080_vm1, %v10616_v50 }
 0x4d4   :  { %6787 = vmatmul.msk.f32.gmra.mxu1 %vm1080_vm1, %v10616_v50  ;;  %6844 = vmatmul.msk.f32.gmra.mxu2 %vm1080_vm1, %v1058_v27 }
 0x4d5   :  { %6893 = vmatmul.msk.f32.gmra.mxu3 %vm1080_vm1, %v1058_v27 }
 0x4d8   :  { %v11417_v49 = vpop.f32.mrf.mxu0 }
 0x4d9   :  { %15232 = vst [vmem:[#allocation574_spill] sm:$0xff] %v11417_v49  ;;  %v11419_v13 = vpop.f32.mrf.mxu1 }
 0x4da   :  { %15233 = vst [vmem:[#allocation575_spill] sm:$0xff] %v11419_v13  ;;  %v1060_v13 = vld [vmem:[%s14591_s0 + $0x1a8] sm:$0xff] }
 0x4db   :  { %6739 = vmatmul.msk.f32.gmra.mxu0 %vm1080_vm1, %v1057_v18 }
 0x4dc   :  { %6788 = vmatmul.msk.f32.gmra.mxu1 %vm1080_vm1, %v1057_v18  ;;  %6845 = vmatmul.msk.f32.gmra.mxu2 %vm1080_vm1, %v1059_v16 }
 0x4dd   :  { %6894 = vmatmul.msk.f32.gmra.mxu3 %vm1080_vm1, %v1059_v16  ;;  %v7030_v16 = vld [vmem:[%s14594_s3 + $0x1d0] sm:$0xff] }
 0x4de   :  { %3779 = vmatpush.msra.mxu2 %v7030_v16 }
 0x4e0   :  { %v11428_v50 = vpop.f32.mrf.mxu0 }
 0x4e1   :  { %15234 = vst [vmem:[#allocation576_spill] sm:$0xff] %v11428_v50  ;;  %v11430_v30 = vpop.f32.mrf.mxu1 }
 0x4e2   :  { %15235 = vst [vmem:[#allocation577_spill] sm:$0xff] %v11430_v30  ;;  %v7031_v30 = vld [vmem:[%s14594_s3 + $0x1d8] sm:$0xff] }
 0x4e3   :  { %6740 = vmatmul.msk.f32.gmra.mxu0 %vm1080_vm1, %v1058_v27  ;;  %3844 = vmatpush.msra.mxu3 %v7031_v30 }
 0x4e4   :  { %6789 = vmatmul.msk.f32.gmra.mxu1 %vm1080_vm1, %v1058_v27  ;;  %6846 = vmatmul.msk.f32.gmra.mxu2 %vm1080_vm1, %v1060_v13  ;;  %v7385_v27 = vld [vmem:[%s14591_s0 + $0x40] sm:$0xff] }
 0x4e5   :  { %6895 = vmatmul.msk.f32.gmra.mxu3 %vm1080_vm1, %v1060_v13 }
 0x4e8   :  { %v11439_v18 = vpop.f32.mrf.mxu0 }
 0x4e9   :  { %15236 = vst [vmem:[#allocation578_spill] sm:$0xff] %v11439_v18  ;;  %v11441_v49 = vpop.f32.mrf.mxu1  ;;  %v7386_v18 = vld [vmem:[%s14591_s0 + $0x48] sm:$0xff] }
 0x4ea   :  { %15237 = vst [vmem:[#allocation579_spill] sm:$0xff] %v11441_v49 }
 0x4eb   :  { %6905 = vmatmul.msk.f32.vlgmr.msra.gmra.mxu0 %vm1080_vm1, %v7385_v27 }
 0x4ec   :  { %6954 = vmatmul.msk.f32.vlgmr.msra.gmra.mxu1 %vm1080_vm1, %v7385_v27  ;;  %v7387_v27 = vld [vmem:[%s14591_s0 + $0x50] sm:$0xff] }
 0x4f0   :  { %v11454_v13 = vpop.f32.mrf.mxu0 }
 0x4f1   :  { %15238 = vst [vmem:[#allocation580_spill] sm:$0xff] %v11454_v13  ;;  %v11456_v49 = vpop.f32.mrf.mxu1 }
 0x4f2   :  { %15239 = vst [vmem:[#allocation581_spill] sm:$0xff] %v11456_v49 }
 0x4f3   :  { %6906 = vmatmul.msk.f32.gmra.mxu0 %vm1080_vm1, %v7386_v18 }
 0x4f4   :  { %6955 = vmatmul.msk.f32.gmra.mxu1 %vm1080_vm1, %v7386_v18  ;;  %v7028_v18 = vld [vmem:[%s14594_s3 + $0x1c0] sm:$0xff] }
 0x4f5   :  { %3780 = vmatpush.msra.mxu2 %v7028_v18 }
 0x4f8   :  { %v11463_v30 = vpop.f32.mrf.mxu0 }
 0x4f9   :  { %15240 = vst [vmem:[#allocation582_spill] sm:$0xff] %v11463_v30  ;;  %v11465_v16 = vpop.f32.mrf.mxu1  ;;  %v7388_v30 = vld [vmem:[%s14591_s0 + $0x58] sm:$0xff] }
 0x4fa   :  { %15241 = vst [vmem:[#allocation583_spill] sm:$0xff] %v11465_v16  ;;  %v7029_v16 = vld [vmem:[%s14594_s3 + $0x1c8] sm:$0xff] }
 0x4fb   :  { %6907 = vmatmul.msk.f32.gmra.mxu0 %vm1080_vm1, %v7387_v27  ;;  %3845 = vmatpush.msra.mxu3 %v7029_v16 }
 0x4fc   :  { %6956 = vmatmul.msk.f32.gmra.mxu1 %vm1080_vm1, %v7387_v27 }
 0x500   :  { %v11472_v49 = vpop.f32.mrf.mxu0 }
 0x501   :  { %15242 = vst [vmem:[#allocation584_spill] sm:$0xff] %v11472_v49  ;;  %v11474_v13 = vpop.f32.mrf.mxu1  ;;  %v7389_v49 = vld [vmem:[%s14591_s0 + $0x60] sm:$0xff] }
 0x502   :  { %15243 = vst [vmem:[#allocation585_spill] sm:$0xff] %v11474_v13 }
 0x503   :  { %6908 = vmatmul.msk.f32.gmra.mxu0 %vm1080_vm1, %v7388_v30 }
 0x504   :  { %6957 = vmatmul.msk.f32.gmra.mxu1 %vm1080_vm1, %v7388_v30  ;;  %v7390_v30 = vld [vmem:[%s14591_s0 + $0x68] sm:$0xff] }
 0x508   :  { %v11487_v27 = vpop.f32.mrf.mxu0 }
 0x509   :  { %v11489_v13 = vpop.f32.mrf.mxu1 }
 0x50b   :  { %6909 = vmatmul.msk.f32.gmra.mxu0 %vm1080_vm1, %v7389_v49 }
 0x50c   :  { %6958 = vmatmul.msk.f32.gmra.mxu1 %vm1080_vm1, %v7389_v49  ;;  %v7391_v49 = vld [vmem:[%s14591_s0 + $0x70] sm:$0xff] }
 0x510   :  { %v11496_v50 = vpop.f32.mrf.mxu0 }
 0x511   :  { %15244 = vst [vmem:[#allocation586_spill] sm:$0xff] %v11496_v50  ;;  %v11498_v3 = vpop.f32.mrf.mxu1 }
 0x512   :  { %15245 = vst [vmem:[#allocation587_spill] sm:$0xff] %v11498_v3  ;;  %v7026_v3 = vld [vmem:[%s14594_s3 + $0x1b0] sm:$0xff] }
 0x513   :  { %6910 = vmatmul.msk.f32.gmra.mxu0 %vm1080_vm1, %v7390_v30  ;;  %3781 = vmatpush.msra.mxu2 %v7026_v3 }
 0x514   :  { %6959 = vmatmul.msk.f32.gmra.mxu1 %vm1080_vm1, %v7390_v30  ;;  %v7027_v30 = vld [vmem:[%s14594_s3 + $0x1b8] sm:$0xff] }
 0x515   :  { %3846 = vmatpush.msra.mxu3 %v7027_v30 }
 0x518   :  { %v11505_v16 = vpop.f32.mrf.mxu0 }
 0x519   :  { %15246 = vst [vmem:[#allocation588_spill] sm:$0xff] %v11505_v16  ;;  %v11507_v18 = vpop.f32.mrf.mxu1 }
 0x51a   :  { %15247 = vst [vmem:[#allocation589_spill] sm:$0xff] %v11507_v18 }
 0x51b   :  { %6911 = vmatmul.msk.f32.gmra.mxu0 %vm1080_vm1, %v7391_v49 }
 0x51c   :  { %6960 = vmatmul.msk.f32.gmra.mxu1 %vm1080_vm1, %v7391_v49 }
 0x520   :  { %v11520_v50 = vpop.f32.mrf.mxu0 }
 0x521   :  { %v11522_v18 = vpop.f32.mrf.mxu1 }
 0x522   :  { %15248 = vst [vmem:[#allocation590_spill] sm:$0xff] %v11522_v18 }
 0x523   :  { %6912 = vmatmul.msk.f32.gmra.mxu0 %vm1080_vm1, %v10775_v10 }
 0x524   :  { %6961 = vmatmul.msk.f32.gmra.mxu1 %vm1080_vm1, %v10775_v10  ;;  %v7024_v10 = vld [vmem:[%s14594_s3 + $0x1a0] sm:$0xff] }
 0x525   :  { %3782 = vmatpush.msra.mxu2 %v7024_v10 }
 0x528   :  { %v11528_v49 = vpop.f32.mrf.mxu0 }
 0x529   :  { %15249 = vst [vmem:[#allocation591_spill] sm:$0xff] %v11528_v49  ;;  %v11530_v16 = vpop.f32.mrf.mxu1 }
 0x52a   :  { %15250 = vst [vmem:[#allocation592_spill] sm:$0xff] %v11530_v16  ;;  %v7025_v16 = vld [vmem:[%s14594_s3 + $0x1a8] sm:$0xff] }
 0x52b   :  { %6913 = vmatmul.msk.f32.gmra.mxu0 %vm1080_vm1, %v10790_v31  ;;  %3847 = vmatpush.msra.mxu3 %v7025_v16 }
 0x52c   :  { %6962 = vmatmul.msk.f32.gmra.mxu1 %vm1080_vm1, %v10790_v31 }
 0x530   :  { %v11536_v3 = vpop.f32.mrf.mxu0 }
 0x531   :  { %15251 = vst [vmem:[#allocation593_spill] sm:$0xff] %v11536_v3  ;;  %v11538_v30 = vpop.f32.mrf.mxu1 }
 0x532   :  { %15252 = vst [vmem:[#allocation594_spill] sm:$0xff] %v11538_v30 }
 0x533   :  { %6914 = vmatmul.msk.f32.gmra.mxu0 %vm1080_vm1, %v10807_v62 }
 0x534   :  { %6963 = vmatmul.msk.f32.gmra.mxu1 %vm1080_vm1, %v10807_v62 }
 0x538   :  { %v11550_v31 = vpop.f32.mrf.mxu0 }
 0x539   :  { %15253 = vst [vmem:[#allocation595_spill] sm:$0xff] %v11550_v31  ;;  %v11552_v3 = vpop.f32.mrf.mxu1 }
 0x53a   :  { %15254 = vst [vmem:[#allocation596_spill] sm:$0xff] %v11552_v3 }
 0x53b   :  { %6915 = vmatmul.msk.f32.gmra.mxu0 %vm1080_vm1, %v10824_v28 }
 0x53c   :  { %6964 = vmatmul.msk.f32.gmra.mxu1 %vm1080_vm1, %v10824_v28  ;;  %v7022_v28 = vld [vmem:[%s14594_s3 + $0x190] sm:$0xff] }
 0x53d   :  { %3783 = vmatpush.msra.mxu2 %v7022_v28 }
 0x540   :  { %v11558_v62 = vpop.f32.mrf.mxu0 }
 0x541   :  { %15255 = vst [vmem:[#allocation597_spill] sm:$0xff] %v11558_v62  ;;  %v11560_v30 = vpop.f32.mrf.mxu1 }
 0x542   :  { %15256 = vst [vmem:[#allocation598_spill] sm:$0xff] %v11560_v30  ;;  %v7023_v30 = vld [vmem:[%s14594_s3 + $0x198] sm:$0xff] }
 0x543   :  { %6916 = vmatmul.msk.f32.gmra.mxu0 %vm1080_vm1, %v10841_v8  ;;  %3848 = vmatpush.msra.mxu3 %v7023_v30 }
 0x544   :  { %6965 = vmatmul.msk.f32.gmra.mxu1 %vm1080_vm1, %v10841_v8 }
 0x548   :  { %v11566_v16 = vpop.f32.mrf.mxu0 }
 0x549   :  { %15257 = vst [vmem:[#allocation599_spill] sm:$0xff] %v11566_v16  ;;  %v11568_v10 = vpop.f32.mrf.mxu1 }
 0x54a   :  { %15258 = vst [vmem:[#allocation600_spill] sm:$0xff] %v11568_v10 }
 0x54b   :  { %6917 = vmatmul.msk.f32.gmra.mxu0 %vm1080_vm1, %v10858_v11 }
 0x54c   :  { %6966 = vmatmul.msk.f32.gmra.mxu1 %vm1080_vm1, %v10858_v11 }
 0x550   :  { %v11580_v8 = vpop.f32.mrf.mxu0 }
 0x551   :  { %15259 = vst [vmem:[#allocation601_spill] sm:$0xff] %v11580_v8  ;;  %v11582_v16 = vpop.f32.mrf.mxu1  ;;  %v3205_v8 = vld [vmem:[%s14593_s2] sm:$0x3] }
 0x552   :  { %15260 = vst [vmem:[#allocation602_spill] sm:$0xff] %v11582_v16  ;;  %v7021_v16 = vld [vmem:[%s14594_s3 + $0x188] sm:$0xff] }
 0x553   :  { %6918 = vmatmul.msk.f32.gmra.mxu0 %vm1080_vm1, %v10877_v63  ;;  %3849 = vmatpush.msra.mxu3 %v7021_v16 }
 0x554   :  { %6967 = vmatmul.msk.f32.gmra.mxu1 %vm1080_vm1, %v10877_v63  ;;  %v7020_v63 = vld [vmem:[%s14594_s3 + $0x180] sm:$0xff] }
 0x555   :  { %3784 = vmatpush.msra.mxu2 %v7020_v63  ;;  %v11622_v63 = vperm.slane %v3205_v8, 0 }
 0x558   :  { %v11588_v11 = vpop.f32.mrf.mxu0 }
 0x559   :  { %15261 = vst [vmem:[#allocation603_spill] sm:$0xff] %v11588_v11  ;;  %v11590_v10 = vpop.f32.mrf.mxu1  ;;  %v11625_v11 = vperm.slane %v3205_v8, 1 }
 0x55a   :  { %15262 = vst [vmem:[#allocation604_spill] sm:$0xff] %v11590_v10 }
 0x55b   :  { %6919 = vmatmul.msk.f32.gmra.mxu0 %vm1080_vm1, %v10896_v25 }
 0x55c   :  { %6968 = vmatmul.msk.f32.gmra.mxu1 %vm1080_vm1, %v10896_v25 }
 0x560   :  { %v11596_v30 = vpop.f32.mrf.mxu0 }
 0x561   :  { %15263 = vst [vmem:[#allocation605_spill] sm:$0xff] %v11596_v30  ;;  %v11598_v28 = vpop.f32.mrf.mxu1 }
 0x562   :  { %15264 = vst [vmem:[#allocation606_spill] sm:$0xff] %v11598_v28 }
 0x563   :  { %6920 = vmatmul.msk.f32.gmra.mxu0 %vm1080_vm1, %v10915_v57 }
 0x564   :  { %6969 = vmatmul.msk.f32.gmra.mxu1 %vm1080_vm1, %v10915_v57 }
 0x568   :  { %v2804_v25 = vpop.f32.mrf.mxu0 }
 0x569   :  { %v2965_v30 = vpop.f32.mrf.mxu1  ;;  %v3109_v16 = vadd.f32 %v2804_v25, %v10870_v40 }
 0x56a   :  { %v3110_v10 = vadd.f32 %v2965_v30, %v10872_v29 }
 0x56b   :  { %6921 = vmatmul.msk.f32.gmra.mxu0 %vm1080_vm1, %v10934_v24  ;;  %v3211_v62 = vadd.f32 %v11622_v63, %v3109_v16 }
 0x56c   :  { %6970 = vmatmul.msk.f32.gmra.mxu1 %vm1080_vm1, %v10934_v24  ;;  %v3212_v49 = vadd.f32 %v11625_v11, %v3110_v10 }
 0x56d   :  { %v3307_v29 = vmax.f32 %v3211_v62, 0.0 }
 0x570   :  { %v2807_v28 = vpop.f32.mrf.mxu0 }
 0x571   :  { %v2968_v57 = vpop.f32.mrf.mxu1  ;;  %v3111_v8 = vadd.f32 %v2807_v28, %v10889_v9 }
 0x572   :  { %v3112_v25 = vadd.f32 %v2968_v57, %v10891_v38 }
 0x573   :  { %6922 = vmatmul.msk.f32.gmra.mxu0 %vm1080_vm1, %v10959_v61 }
 0x574   :  { %6971 = vmatmul.msk.f32.gmra.mxu1 %vm1080_vm1, %v10959_v61 }
 0x578   :  { %v2810_v24 = vpop.f32.mrf.mxu0 }
 0x579   :  { %v3113_v3 = vadd.f32 %v2810_v24, %v10908_v17  ;;  %v2971_v31 = vpop.f32.mrf.mxu1  ;;  %v3308_v17 = vmax.f32 %v3212_v49, 0.0 }
 0x57a   :  { %v3114_v18 = vadd.f32 %v2971_v31, %v10910_v58  ;;  %v3213_v31 = vadd.f32 %v11622_v63, %v3111_v8 }
 0x57b   :  { %v3215_v61 = vadd.f32 %v11622_v63, %v3113_v3  ;;  %6923 = vmatmul.msk.f32.gmra.mxu0 %vm1080_vm1, %v10978_v20 }
 0x57c   :  { %v3216_v40 = vadd.f32 %v11625_v11, %v3114_v18  ;;  %6972 = vmatmul.msk.f32.gmra.mxu1 %vm1080_vm1, %v10978_v20  ;;  %v3214_v20 = vadd.f32 %v11625_v11, %v3112_v25  ;;  %v3309_v49 = vmax.f32 %v3213_v31, 0.0 }
 0x57d   :  { %v3311_v30 = vmax.f32 %v3215_v61, 0.0 }
 0x57e   :  { %v3312_v10 = vmax.f32 %v3216_v40, 0.0  ;;  %v3310_v57 = vmax.f32 %v3214_v20, 0.0 }
 0x57f   :  { %v11639_v16 = vmax.f32 %v3307_v29, %v3311_v30 }
 0x580   :  { %v2813_v58 = vpop.f32.mrf.mxu0  ;;  %v11641_v3 = vmax.f32 %v3308_v17, %v3312_v10 }
 0x581   :  { %v3115_v18 = vadd.f32 %v2813_v58, %v10927_v23  ;;  %v2974_v24 = vpop.f32.mrf.mxu1  ;;  %v7018_v23 = vld [vmem:[%s14594_s3 + $0x170] sm:$0xff] }
 0x582   :  { %v3116_v62 = vadd.f32 %v2974_v24, %v10929_v41  ;;  %v7019_v41 = vld [vmem:[%s14594_s3 + $0x178] sm:$0xff]  ;;  %3785 = vmatpush.msra.mxu2 %v7018_v23 }
 0x583   :  { %v3217_v9 = vadd.f32 %v11622_v63, %v3115_v18  ;;  %6924 = vmatmul.msk.f32.gmra.mxu0 %vm1080_vm1, %v10997_v47  ;;  %3850 = vmatpush.msra.mxu3 %v7019_v41 }
 0x584   :  { %v3218_v38 = vadd.f32 %v11625_v11, %v3116_v62  ;;  %6973 = vmatmul.msk.f32.gmra.mxu1 %vm1080_vm1, %v10997_v47 }
 0x585   :  { %v3313_v28 = vmax.f32 %v3217_v9, 0.0 }
 0x586   :  { %v3314_v61 = vmax.f32 %v3218_v38, 0.0 }
 0x587   :  { %v11659_v40 = vmax.f32 %v3309_v49, %v3313_v28  ;;  %v7017_v28 = vld [vmem:[%s14594_s3 + $0x168] sm:$0xff] }
 0x588   :  { %v2816_v29 = vpop.f32.mrf.mxu0  ;;  %v11661_v8 = vmax.f32 %v3310_v57, %v3314_v61  ;;  %3851 = vmatpush.msra.mxu3 %v7017_v28 }
 0x589   :  { %v2977_v47 = vpop.f32.mrf.mxu1  ;;  %v3117_v25 = vadd.f32 %v2816_v29, %v10952_v26 }
 0x58a   :  { %v3118_v10 = vadd.f32 %v2977_v47, %v10954_v0 }
 0x58b   :  { %6925 = vmatmul.msk.f32.gmra.mxu0 %vm1080_vm1, %v11021_v33  ;;  %v3219_v31 = vadd.f32 %v11622_v63, %v3117_v25 }
 0x58c   :  { %6974 = vmatmul.msk.f32.gmra.mxu1 %vm1080_vm1, %v11021_v33  ;;  %v3220_v33 = vadd.f32 %v11625_v11, %v3118_v10 }
 0x58d   :  { %v3315_v0 = vmax.f32 %v3219_v31, 0.0 }
 0x590   :  { %v2819_v30 = vpop.f32.mrf.mxu0 }
 0x591   :  { %v2980_v17 = vpop.f32.mrf.mxu1  ;;  %v3119_v26 = vadd.f32 %v2819_v30, %v10971_v43 }
 0x592   :  { %v3120_v38 = vadd.f32 %v2980_v17, %v10973_v2 }
 0x593   :  { %6926 = vmatmul.msk.f32.gmra.mxu0 %vm1080_vm1, %v11008_v52  ;;  %v3221_v61 = vadd.f32 %v11622_v63, %v3119_v26 }
 0x594   :  { %6975 = vmatmul.msk.f32.gmra.mxu1 %vm1080_vm1, %v11008_v52  ;;  %v3222_v41 = vadd.f32 %v11625_v11, %v3120_v38 }
 0x596   :  { %v3318_v25 = vmax.f32 %v3222_v41, 0.0 }
 0x598   :  { %v2822_v58 = vpop.f32.mrf.mxu0 }
 0x599   :  { %v3121_v18 = vadd.f32 %v2822_v58, %v10990_v59  ;;  %v2983_v24 = vpop.f32.mrf.mxu1  ;;  %v3316_v59 = vmax.f32 %v3220_v33, 0.0 }
 0x59a   :  { %v3122_v20 = vadd.f32 %v2983_v24, %v10992_v60  ;;  %v7016_v60 = vld [vmem:[%s14594_s3 + $0x160] sm:$0xff] }
 0x59b   :  { %v3223_v62 = vadd.f32 %v11622_v63, %v3121_v18  ;;  %6927 = vmatmul.msk.f32.gmra.mxu0 %vm1080_vm1, %v11030_v46  ;;  %3786 = vmatpush.msra.mxu2 %v7016_v60 }
 0x59c   :  { %v3224_v52 = vadd.f32 %v11625_v11, %v3122_v20  ;;  %6976 = vmatmul.msk.f32.gmra.mxu1 %vm1080_vm1, %v11030_v46 }
 0x59d   :  { %v3319_v9 = vmax.f32 %v3223_v62, 0.0  ;;  %v7014_v62 = vld [vmem:[%s14594_s3 + $0x150] sm:$0xff] }
 0x59e   :  { %v3320_v49 = vmax.f32 %v3224_v52, 0.0  ;;  %3787 = vmatpush.msra.mxu2 %v7014_v62 }
 0x59f   :  { %v11691_v57 = vmax.f32 %v3315_v0, %v3319_v9 }
 0x5a0   :  { %v2825_v46 = vpop.f32.mrf.mxu0  ;;  %v3408_v43 = vmax.f32 %v3316_v59, %v3320_v49 }
 0x5a1   :  { %v3123_v23 = vadd.f32 %v2825_v46, %v11014_v21  ;;  %v2986_v2 = vpop.f32.mrf.mxu1  ;;  %3507 = vrot.lane.b32.xlu0 %v11691_v57, %s7427_s13  ;;  %v3317_v21 = vmax.f32 %v3221_v61, 0.0 }
 0x5a2   :  { %v3124_v29 = vadd.f32 %v2986_v2, %v11016_v45 }
 0x5a3   :  { %v3225_v47 = vadd.f32 %v11622_v63, %v3123_v23  ;;  %6928 = vmatmul.msk.f32.gmra.mxu0 %vm1080_vm1, %v11049_v54 }
 0x5a4   :  { %v3226_v30 = vadd.f32 %v11625_v11, %v3124_v29  ;;  %6977 = vmatmul.msk.f32.gmra.mxu1 %vm1080_vm1, %v11049_v54 }
 0x5a5   :  { %v3321_v17 = vmax.f32 %v3225_v47, 0.0 }
 0x5a6   :  { %v3322_v10 = vmax.f32 %v3226_v30, 0.0 }
 0x5a7   :  { %v11705_v58 = vmax.f32 %v3317_v21, %v3321_v17 }
 0x5a8   :  { %v2828_v31 = vpop.f32.mrf.mxu0  ;;  %v3410_v18 = vmax.f32 %v3318_v25, %v3322_v10 }
 0x5a9   :  { %v2989_v24 = vpop.f32.mrf.mxu1  ;;  %3511 = vrot.lane.b32.xlu1 %v11705_v58, %s7427_s13  ;;  %3509 = vrot.lane.b32.xlu0 %v3408_v43, %s7427_s13  ;;  %v3125_v33 = vadd.f32 %v2828_v31, %v11038_v22 }
 0x5aa   :  { %v3126_v20 = vadd.f32 %v2989_v24, %v11040_v56 }
 0x5ab   :  { %6929 = vmatmul.msk.f32.gmra.mxu0 %vm1080_vm1, %v11068_v35  ;;  %v3227_v26 = vadd.f32 %v11622_v63, %v3125_v33 }
 0x5ac   :  { %6978 = vmatmul.msk.f32.gmra.mxu1 %vm1080_vm1, %v11068_v35  ;;  %v7015_v35 = vld [vmem:[%s14594_s3 + $0x158] sm:$0xff]  ;;  %v3228_v22 = vadd.f32 %v11625_v11, %v3126_v20 }
 0x5ad   :  { %3852 = vmatpush.msra.mxu3 %v7015_v35  ;;  %v3323_v49 = vmax.f32 %v3227_v26, 0.0  ;;  %v15267_v20 = vld [vmem:[#allocation490_spill] sm:$0xff]  ;;  %v15268_v26 = vld [vmem:[#allocation493_spill] sm:$0xff] }
 0x5b0   :  { %v2831_v45 = vpop.f32.mrf.mxu0 }
 0x5b1   :  { %v2992_v54 = vpop.f32.mrf.mxu1  ;;  %3513 = vrot.lane.b32.xlu1 %v3410_v18, %s7427_s13  ;;  %v3127_v38 = vadd.f32 %v2831_v45, %v11057_v1  ;;  %v7013_v18 = vld [vmem:[%s14594_s3 + $0x148] sm:$0xff] }
 0x5b2   :  { %v3128_v28 = vadd.f32 %v2992_v54, %v11059_v53  ;;  %3853 = vmatpush.msra.mxu3 %v7013_v18  ;;  %v15266_v54 = vld [vmem:[#allocation489_spill] sm:$0xff] }
 0x5b3   :  { %6930 = vmatmul.msk.f32.gmra.mxu0 %vm1080_vm1, %v11087_v32  ;;  %v3229_v23 = vadd.f32 %v11622_v63, %v3127_v38  ;;  %v7010_v18 = vld [vmem:[%s14594_s3 + $0x130] sm:$0xff] }
 0x5b4   :  { %6979 = vmatmul.msk.f32.gmra.mxu1 %vm1080_vm1, %v11087_v32  ;;  %v3230_v1 = vadd.f32 %v11625_v11, %v3128_v28 }
 0x5b5   :  { %v3325_v47 = vmax.f32 %v3229_v23, 0.0 }
 0x5b6   :  { %v3326_v30 = vmax.f32 %v3230_v1, 0.0 }
 0x5b8   :  { %v2834_v52 = vpop.f32.mrf.mxu0 }
 0x5b9   :  { %v3129_v0 = vadd.f32 %v2834_v52, %v11076_v34  ;;  %v2995_v32 = vpop.f32.mrf.mxu1  ;;  %v3324_v34 = vmax.f32 %v3228_v22, 0.0 }
 0x5ba   :  { %v3130_v56 = vadd.f32 %v2995_v32, %v11078_v44 }
 0x5bb   :  { %v3231_v9 = vadd.f32 %v11622_v63, %v3129_v0  ;;  %6931 = vmatmul.msk.f32.gmra.mxu0 %vm1080_vm1, %v11106_v6 }
 0x5bc   :  { %v3232_v59 = vadd.f32 %v11625_v11, %v3130_v56  ;;  %6980 = vmatmul.msk.f32.gmra.mxu1 %vm1080_vm1, %v11106_v6  ;;  %v15269_v56 = vld [vmem:[#allocation494_spill] sm:$0xff] }
 0x5bd   :  { %v3327_v60 = vmax.f32 %v3231_v9, 0.0 }
 0x5be   :  { %v3328_v46 = vmax.f32 %v3232_v59, 0.0 }
 0x5bf   :  { %v11739_v43 = vmax.f32 %v3323_v49, %v3327_v60  ;;  %v15270_v49 = vld [vmem:[#allocation491_spill] sm:$0xff] }
 0x5c0   :  { %v2837_v44 = vpop.f32.mrf.mxu0  ;;  %v3412_v61 = vmax.f32 %v3324_v34, %v3328_v46  ;;  %v15271_v46 = vld [vmem:[#allocation492_spill] sm:$0xff] }
 0x5c1   :  { %v3131_v2 = vadd.f32 %v2837_v44, %v11095_v5  ;;  %v2998_v41 = vpop.f32.mrf.mxu1  ;;  %3515 = vrot.lane.b32.xlu2 %v11739_v43, %s7427_s13 }
 0x5c2   :  { %v3132_v6 = vadd.f32 %v2998_v41, %v11097_v55  ;;  %v15265_v55 = vld [vmem:[#allocation561_spill] sm:$0xff] }
 0x5c3   :  { %v3233_v29 = vadd.f32 %v11622_v63, %v3131_v2  ;;  %6932 = vmatmul.msk.f32.gmra.mxu0 %vm1080_vm1, %v11125_v42 }
 0x5c4   :  { %v3234_v53 = vadd.f32 %v11625_v11, %v3132_v6  ;;  %6981 = vmatmul.msk.f32.gmra.mxu1 %vm1080_vm1, %v11125_v42  ;;  %v7012_v42 = vld [vmem:[%s14594_s3 + $0x140] sm:$0xff] }
 0x5c5   :  { %v3329_v5 = vmax.f32 %v3233_v29, 0.0  ;;  %3788 = vmatpush.msra.mxu2 %v7012_v42  ;;  %v15272_v6 = vld [vmem:[#allocation495_spill] sm:$0xff] }
 0x5c6   :  { %v3330_v21 = vmax.f32 %v3234_v53, 0.0 }
 0x5c7   :  { %v11753_v17 = vmax.f32 %v3325_v47, %v3329_v5  ;;  %v15273_v47 = vld [vmem:[#allocation496_spill] sm:$0xff]  ;;  %3789 = vmatpush.msra.mxu2 %v7010_v18 }
 0x5c8   :  { %v2840_v25 = vpop.f32.mrf.mxu0  ;;  %v3414_v10 = vmax.f32 %v3326_v30, %v3330_v21  ;;  %v15274_v21 = vld [vmem:[#allocation562_spill] sm:$0xff] }
 0x5c9   :  { %v3001_v31 = vpop.f32.mrf.mxu1  ;;  %3517 = vrot.lane.b32.xlu2 %v3412_v61, %s7427_s13  ;;  %3519 = vrot.lane.b32.xlu0 %v11753_v17, %s7427_s13  ;;  %v3133_v33 = vadd.f32 %v2840_v25, %v15266_v54 }
 0x5ca   :  { %3521 = vrot.lane.b32.xlu1 %v3414_v10, %s7427_s13  ;;  %v3134_v62 = vadd.f32 %v3001_v31, %v15267_v20 }
 0x5cb   :  { %6933 = vmatmul.msk.f32.gmra.mxu0 %vm1080_vm1, %v15265_v55  ;;  %v3235_v52 = vadd.f32 %v11622_v63, %v3133_v33 }
 0x5cc   :  { %6982 = vmatmul.msk.f32.gmra.mxu1 %vm1080_vm1, %v15265_v55  ;;  %v3236_v22 = vadd.f32 %v11625_v11, %v3134_v62  ;;  %v15275_v62 = vld [vmem:[#allocation563_spill] sm:$0xff] }
 0x5cd   :  { %v3331_v38 = vmax.f32 %v3235_v52, 0.0 }
 0x5ce   :  { %v3332_v28 = vmax.f32 %v3236_v22, 0.0  ;;  %v15277_v22 = vld [vmem:[#allocation497_spill] sm:$0xff] }
 0x5d0   :  { %v2843_v24 = vpop.f32.mrf.mxu0 }
 0x5d1   :  { %v3004_v45 = vpop.f32.mrf.mxu1  ;;  %v3135_v60 = vadd.f32 %v2843_v24, %v15270_v49  ;;  %v7011_v24 = vld [vmem:[%s14594_s3 + $0x138] sm:$0xff]  ;;  %v15279_v49 = vld [vmem:[#allocation501_spill] sm:$0xff] }
 0x5d2   :  { %v3136_v44 = vadd.f32 %v3004_v45, %v15271_v46  ;;  %3854 = vmatpush.msra.mxu3 %v7011_v24  ;;  %v7009_v46 = vld [vmem:[%s14594_s3 + $0x128] sm:$0xff]  ;;  %v7002_v24 = vld [vmem:[%s14594_s3 + $0xf0] sm:$0xff] }
 0x5d3   :  { %6934 = vmatmul.msk.f32.gmra.mxu0 %vm1080_vm1, %v11163_v36  ;;  %v3237_v1 = vadd.f32 %v11622_v63, %v3135_v60 }
 0x5d4   :  { %6983 = vmatmul.msk.f32.gmra.mxu1 %vm1080_vm1, %v11163_v36  ;;  %3855 = vmatpush.msra.mxu3 %v7009_v46 }
 0x5d5   :  { %v3333_v10 = vmax.f32 %v3237_v1, 0.0  ;;  %v15281_v1 = vld [vmem:[#allocation565_spill] sm:$0xff] }
 0x5d8   :  { %v2846_v35 = vpop.f32.mrf.mxu0 }
 0x5d9   :  { %v3137_v0 = vadd.f32 %v2846_v35, %v15268_v26  ;;  %v3007_v32 = vpop.f32.mrf.mxu1  ;;  %v15276_v26 = vld [vmem:[#allocation564_spill] sm:$0xff] }
 0x5da   :  { %v3138_v9 = vadd.f32 %v3007_v32, %v15269_v56  ;;  %v11823_v32 = vpop.f32.mrf.mxu3 }
 0x5db   :  { %v3239_v59 = vadd.f32 %v11622_v63, %v3137_v0  ;;  %6935 = vmatmul.msk.f32.gmra.mxu0 %vm1080_vm1, %v11182_v19  ;;  %v11819_v0 = vpop.f32.mrf.mxu2 }
 0x5dc   :  { %v3240_v36 = vadd.f32 %v11625_v11, %v3138_v9  ;;  %6984 = vmatmul.msk.f32.gmra.mxu1 %vm1080_vm1, %v11182_v19  ;;  %v3238_v19 = vadd.f32 %v11625_v11, %v3136_v44  ;;  %v15278_v9 = vld [vmem:[#allocation498_spill] sm:$0xff] }
 0x5dd   :  { %v3335_v34 = vmax.f32 %v3239_v59, 0.0 }
 0x5de   :  { %v3336_v61 = vmax.f32 %v3240_v36, 0.0  ;;  %v3334_v55 = vmax.f32 %v3238_v19, 0.0 }
 0x5df   :  { %v11787_v23 = vmax.f32 %v3331_v38, %v3335_v34 }
 0x5e0   :  { %v2849_v2 = vpop.f32.mrf.mxu0  ;;  %v3416_v41 = vmax.f32 %v3332_v28, %v3336_v61  ;;  %v7008_v28 = vld [vmem:[%s14594_s3 + $0x120] sm:$0xff]  ;;  %v15280_v61 = vld [vmem:[#allocation502_spill] sm:$0xff] }
 0x5e1   :  { %v3139_v29 = vadd.f32 %v2849_v2, %v15272_v6  ;;  %v3010_v53 = vpop.f32.mrf.mxu1  ;;  %3523 = vrot.lane.b32.xlu2 %v11787_v23, %s7427_s13  ;;  %3790 = vmatpush.msra.mxu2 %v7008_v28  ;;  %v7006_v6 = vld [vmem:[%s14594_s3 + $0x110] sm:$0xff] }
 0x5e2   :  { %v3140_v5 = vadd.f32 %v3010_v53, %v15273_v47  ;;  %3525 = vrot.lane.b32.xlu0 %v3416_v41, %s7427_s13  ;;  %v15282_v47 = vld [vmem:[#allocation499_spill] sm:$0xff] }
 0x5e3   :  { %v3241_v30 = vadd.f32 %v11622_v63, %v3139_v29  ;;  %6936 = vmatmul.msk.f32.gmra.mxu0 %vm1080_vm1, %v15274_v21  ;;  %v7007_v29 = vld [vmem:[%s14594_s3 + $0x118] sm:$0xff]  ;;  %3791 = vmatpush.msra.mxu2 %v7006_v6 }
 0x5e4   :  { %v3242_v25 = vadd.f32 %v11625_v11, %v3140_v5  ;;  %6985 = vmatmul.msk.f32.gmra.mxu1 %vm1080_vm1, %v15274_v21  ;;  %3856 = vmatpush.msra.mxu3 %v7007_v29  ;;  %v7004_v21 = vld [vmem:[%s14594_s3 + $0x100] sm:$0xff] }
 0x5e5   :  { %v3337_v31 = vmax.f32 %v3241_v30, 0.0  ;;  %3792 = vmatpush.msra.mxu2 %v7004_v21  ;;  %v15287_v21 = vld [vmem:[#allocation505_spill] sm:$0xff] }
 0x5e6   :  { %v3338_v42 = vmax.f32 %v3242_v25, 0.0  ;;  %v7005_v25 = vld [vmem:[%s14594_s3 + $0x108] sm:$0xff] }
 0x5e7   :  { %v11808_v45 = vmax.f32 %v3333_v10, %v3337_v31  ;;  %v11856_v10 = vpop.f32.mrf.mxu2  ;;  %3857 = vmatpush.msra.mxu3 %v7005_v25  ;;  %3793 = vmatpush.msra.mxu2 %v7002_v24 }
 0x5e8   :  { %v2852_v54 = vpop.f32.mrf.mxu0  ;;  %v3418_v33 = vmax.f32 %v3334_v55, %v3338_v42  ;;  %v15283_v55 = vld [vmem:[#allocation500_spill] sm:$0xff] }
 0x5e9   :  { %v3013_v20 = vpop.f32.mrf.mxu1  ;;  %3527 = vrot.lane.b32.xlu1 %v11808_v45, %s7427_s13  ;;  %v3141_v56 = vadd.f32 %v2852_v54, %v15277_v22  ;;  %v7003_v54 = vld [vmem:[%s14594_s3 + $0xf8] sm:$0xff] }
 0x5ea   :  { %3529 = vrot.lane.b32.xlu2 %v3418_v33, %s7427_s13  ;;  %v3142_v59 = vadd.f32 %v3013_v20, %v15278_v9  ;;  %v11865_v33 = vpop.f32.mrf.mxu3  ;;  %3858 = vmatpush.msra.mxu3 %v7003_v54 }
 0x5eb   :  { %6937 = vmatmul.msk.f32.gmra.mxu0 %vm1080_vm1, %v15275_v62  ;;  %v3243_v38 = vadd.f32 %v11622_v63, %v3141_v56 }
 0x5ec   :  { %6986 = vmatmul.msk.f32.gmra.mxu1 %vm1080_vm1, %v15275_v62  ;;  %v3244_v44 = vadd.f32 %v11625_v11, %v3142_v59  ;;  %v15285_v59 = vld [vmem:[#allocation504_spill] sm:$0xff] }
 0x5ed   :  { %v3339_v19 = vmax.f32 %v3243_v38, 0.0 }
 0x5ee   :  { %v3340_v31 = vmax.f32 %v3244_v44, 0.0 }
 0x5f0   :  { %v2855_v35 = vpop.f32.mrf.mxu0 }
 0x5f1   :  { %v3016_v52 = vpop.f32.mrf.mxu1  ;;  %v3143_v5 = vadd.f32 %v2855_v35, %v15282_v47 }
 0x5f2   :  { %v3144_v42 = vadd.f32 %v3016_v52, %v15283_v55  ;;  %v11886_v6 = vpop.f32.mrf.mxu3 }
 0x5f3   :  { %6938 = vmatmul.msk.f32.gmra.mxu0 %vm1080_vm1, %v15276_v26  ;;  %v3245_v52 = vadd.f32 %v11622_v63, %v3143_v5 }
 0x5f4   :  { %6987 = vmatmul.msk.f32.gmra.mxu1 %vm1080_vm1, %v15276_v26  ;;  %v15284_v26 = vld [vmem:[#allocation503_spill] sm:$0xff]  ;;  %v3246_v9 = vadd.f32 %v11625_v11, %v3144_v42 }
 0x5f6   :  { %v3342_v46 = vmax.f32 %v3246_v9, 0.0 }
 0x5f8   :  { %v2858_v36 = vpop.f32.mrf.mxu0 }
 0x5f9   :  { %v3145_v60 = vadd.f32 %v2858_v36, %v15279_v49  ;;  %v3019_v34 = vpop.f32.mrf.mxu1  ;;  %v15286_v49 = vld [vmem:[#allocation566_spill] sm:$0xff] }
 0x5fa   :  { %v3146_v2 = vadd.f32 %v3019_v34, %v15280_v61  ;;  %v3341_v34 = vmax.f32 %v3245_v52, 0.0  ;;  %v11897_v5 = vpop.f32.mrf.mxu3 }
 0x5fb   :  { %v3247_v41 = vadd.f32 %v11622_v63, %v3145_v60  ;;  %6939 = vmatmul.msk.f32.gmra.mxu0 %vm1080_vm1, %v15281_v1 }
 0x5fc   :  { %v3248_v53 = vadd.f32 %v11625_v11, %v3146_v2  ;;  %6988 = vmatmul.msk.f32.gmra.mxu1 %vm1080_vm1, %v15281_v1  ;;  %v11884_v2 = vpop.f32.mrf.mxu2 }
 0x5fd   :  { %v3343_v30 = vmax.f32 %v3247_v41, 0.0 }
 0x5fe   :  { %v3344_v18 = vmax.f32 %v3248_v53, 0.0 }
 0x5ff   :  { %v11867_v20 = vmax.f32 %v3339_v19, %v3343_v30 }
 0x600   :  { %v2861_v62 = vpop.f32.mrf.mxu0  ;;  %v3420_v35 = vmax.f32 %v3340_v31, %v3344_v18  ;;  %v15288_v31 = vld [vmem:[#allocation506_spill] sm:$0xff]  ;;  %v15289_v18 = vld [vmem:[#allocation509_spill] sm:$0xff] }
 0x601   :  { %v3147_v22 = vadd.f32 %v2861_v62, %v15284_v26  ;;  %v3022_v56 = vpop.f32.mrf.mxu1  ;;  %3531 = vrot.lane.b32.xlu0 %v11867_v20, %s7427_s13 }
 0x602   :  { %v3148_v36 = vadd.f32 %v3022_v56, %v15285_v59  ;;  %3533 = vrot.lane.b32.xlu1 %v3420_v35, %s7427_s13  ;;  %v15290_v35 = vld [vmem:[#allocation510_spill] sm:$0xff]  ;;  %v11917_v59 = vpop.f32.mrf.mxu3 }
 0x603   :  { %v3249_v38 = vadd.f32 %v11622_v63, %v3147_v22  ;;  %6940 = vmatmul.msk.f32.gmra.mxu0 %vm1080_vm1, %v15286_v49 }
 0x604   :  { %v3250_v60 = vadd.f32 %v11625_v11, %v3148_v36  ;;  %6989 = vmatmul.msk.f32.gmra.mxu1 %vm1080_vm1, %v15286_v49  ;;  %v11895_v47 = vpop.f32.mrf.mxu2 }
 0x605   :  { %v3345_v28 = vmax.f32 %v3249_v38, 0.0  ;;  %v15291_v38 = vld [vmem:[#allocation507_spill] sm:$0xff] }
 0x606   :  { %v3346_v44 = vmax.f32 %v3250_v60, 0.0 }
 0x607   :  { %v11882_v61 = vmax.f32 %v3341_v34, %v3345_v28 }
 0x608   :  { %v2864_v41 = vpop.f32.mrf.mxu0  ;;  %v3422_v1 = vmax.f32 %v3342_v46, %v3346_v44  ;;  %v15292_v46 = vld [vmem:[#allocation508_spill] sm:$0xff] }
 0x609   :  { %v3025_v29 = vpop.f32.mrf.mxu1  ;;  %3535 = vrot.lane.b32.xlu2 %v11882_v61, %s7427_s13  ;;  %v3149_v25 = vadd.f32 %v2864_v41, %v15287_v21 }
 0x60a   :  { %3537 = vrot.lane.b32.xlu0 %v3422_v1, %s7427_s13  ;;  %v3150_v55 = vadd.f32 %v3025_v29, %v15288_v31 }
 0x60b   :  { %6941 = vmatmul.msk.f32.gmra.mxu0 %vm1080_vm1, %v11302_v48 }
 0x60c   :  { %6990 = vmatmul.msk.f32.gmra.mxu1 %vm1080_vm1, %v11302_v48  ;;  %v3251_v48 = vadd.f32 %v11622_v63, %v3149_v25  ;;  %v3252_v62 = vadd.f32 %v11625_v11, %v3150_v55  ;;  %v11915_v9 = vpop.f32.mrf.mxu2 }
 0x60e   :  { %v3347_v36 = vmax.f32 %v3251_v48, 0.0  ;;  %v3348_v28 = vmax.f32 %v3252_v62, 0.0 }
 0x610   :  { %v2867_v53 = vpop.f32.mrf.mxu0 }
 0x611   :  { %v3028_v19 = vpop.f32.mrf.mxu1  ;;  %v3151_v49 = vadd.f32 %v2867_v53, %v15291_v38 }
 0x612   :  { %v3152_v44 = vadd.f32 %v3028_v19, %v15292_v46 }
 0x613   :  { %6942 = vmatmul.msk.f32.gmra.mxu0 %vm1080_vm1, %v11321_v51  ;;  %v3508_v30 = vpop.permute.xlu0 %3507 }
 0x614   :  { %6991 = vmatmul.msk.f32.gmra.mxu1 %vm1080_vm1, %v11321_v51 }
 0x618   :  { %v2870_v42 = vpop.f32.mrf.mxu0 }
 0x619   :  { %v3153_v24 = vadd.f32 %v2870_v42, %v15289_v18  ;;  %v3031_v54 = vpop.f32.mrf.mxu1 }
 0x61a   :  { %v3154_v52 = vadd.f32 %v3031_v54, %v15290_v35  ;;  %v11948_v35 = vpop.f32.mrf.mxu2 }
 0x61b   :  { %v3255_v26 = vadd.f32 %v11622_v63, %v3153_v24  ;;  %6943 = vmatmul.msk.f32.gmra.mxu0 %vm1080_vm1, %v11344_v4  ;;  %v3512_v51 = vpop.permute.xlu1 %3511  ;;  %v3510_v56 = vpop.permute.xlu0 %3509 }
 0x61c   :  { %v3256_v22 = vadd.f32 %v11625_v11, %v3154_v52  ;;  %6992 = vmatmul.msk.f32.gmra.mxu1 %vm1080_vm1, %v11344_v4  ;;  %v3598_v34 = vsel %vm3595_vm2, %v3508_v30, %v3510_v56  ;;  %v3516_v1 = vpop.permute.xlu2 %3515  ;;  %v3253_v30 = vadd.f32 %v11622_v63, %v3151_v49  ;;  %v11950_v52 = vpop.f32.mrf.mxu3  ;;  %v7186_v49 = vld [vmem:[%s14594_s3 + $0x3b0] sm:$0xff] }
 0x61d   :  { %v3351_v60 = vmax.f32 %v3255_v26, 0.0  ;;  %v11923_v29 = vmax.f32 %v11691_v57, %v3598_v34  ;;  %v3254_v57 = vadd.f32 %v11625_v11, %v3152_v44  ;;  %4281 = vmatpush.msrb.mxu0 %v7186_v49  ;;  %v15301_v49 = vld [vmem:[#allocation512_spill] sm:$0xff] }
 0x61e   :  { %v3352_v41 = vmax.f32 %v3256_v22, 0.0  ;;  %v3349_v18 = vmax.f32 %v3253_v30, 0.0 }
 0x61f   :  { %v11925_v4 = vmax.f32 %v3347_v36, %v3351_v60  ;;  %7032 = vmatmul.msk.f32.vlgmr.msra.gmra.mxu2 %vm3729_vm3, %v11923_v29  ;;  %7048 = vmatmul.msk.f32.vlgmr.msra.gmra.mxu3 %vm3729_vm3, %v11923_v29  ;;  %v7392_v36 = vld [vmem:[%s14591_s0 + $0x180] sm:$0xff]  ;;  %v7187_v60 = vld [vmem:[%s14594_s3 + $0x3b8] sm:$0xff] }
 0x620   :  { %v2873_v53 = vpop.f32.mrf.mxu0  ;;  %v3424_v21 = vmax.f32 %v3348_v28, %v3352_v41  ;;  %4346 = vmatpush.msrb.mxu1 %v7187_v60  ;;  %v15293_v28 = vld [vmem:[#allocation513_spill] sm:$0xff]  ;;  %v7184_v41 = vld [vmem:[%s14594_s3 + $0x3a0] sm:$0xff] }
 0x621   :  { %v3155_v25 = vadd.f32 %v2873_v53, %v11329_v14  ;;  %v3034_v19 = vpop.f32.mrf.mxu1  ;;  %3539 = vrot.lane.b32.xlu1 %v11925_v4, %s7427_s13  ;;  %v15294_v53 = vld [vmem:[#allocation514_spill] sm:$0xff]  ;;  %4282 = vmatpush.msrb.mxu0 %v7184_v41 }
 0x622   :  { %v3156_v31 = vadd.f32 %v3034_v19, %v11333_v15  ;;  %3541 = vrot.lane.b32.xlu2 %v3424_v21, %s7427_s13  ;;  %v3350_v15 = vmax.f32 %v3254_v57, 0.0  ;;  %v11982_v46 = vpop.f32.mrf.mxu2  ;;  %v2280_v21 = vadd.f32 %v11335_v12, %v15294_v53  ;;  %v7182_v19 = vld [vmem:[%s14594_s3 + $0x390] sm:$0xff]  ;;  %v7183_v12 = vld [vmem:[%s14594_s3 + $0x398] sm:$0xff] }
 0x623   :  { %v3257_v55 = vadd.f32 %v11622_v63, %v3155_v25  ;;  %6944 = vmatmul.msk.f32.gmra.mxu0 %vm1080_vm1, %v11381_v39  ;;  %v3514_v42 = vpop.permute.xlu1 %3513  ;;  %v7393_v25 = vld [vmem:[%s14591_s0 + $0x188] sm:$0xff] }
 0x624   :  { %v3258_v48 = vadd.f32 %v11625_v11, %v3156_v31  ;;  %6993 = vmatmul.msk.f32.gmra.mxu1 %vm1080_vm1, %v11381_v39  ;;  %v3599_v14 = vsel %vm3595_vm2, %v3512_v51, %v3514_v42  ;;  %v3518_v22 = vpop.permute.xlu2 %3517  ;;  %v11994_v30 = vpop.f32.mrf.mxu3  ;;  %v2719_v57 = vadd.f32 %v11823_v32, %v2280_v21  ;;  %4283 = vmatpush.msrb.mxu0 %v7182_v19  ;;  %v7180_v42 = vld [vmem:[%s14594_s3 + $0x380] sm:$0xff] }
 0x625   :  { %v3353_v24 = vmax.f32 %v3257_v55, 0.0  ;;  %v11946_v54 = vmax.f32 %v11705_v58, %v3599_v14  ;;  %v3600_v58 = vsel %vm3595_vm2, %v3516_v1, %v3518_v22  ;;  %v7185_v1 = vld [vmem:[%s14594_s3 + $0x3a8] sm:$0xff]  ;;  %v15296_v14 = vld [vmem:[#allocation518_spill] sm:$0xff] }
 0x626   :  { %v3354_v62 = vmax.f32 %v3258_v48, 0.0  ;;  %v11968_v38 = vmax.f32 %v11739_v43, %v3600_v58  ;;  %v2279_v43 = vadd.f32 %v11331_v7, %v15293_v28  ;;  %4347 = vmatpush.msrb.mxu1 %v7185_v1  ;;  %v7181_v48 = vld [vmem:[%s14594_s3 + $0x388] sm:$0xff]  ;;  %4284 = vmatpush.msrb.mxu0 %v7180_v42  ;;  %v15299_v58 = vld [vmem:[#allocation511_spill] sm:$0xff] }
 0x627   :  { %v11952_v26 = vmax.f32 %v3349_v18, %v3353_v24  ;;  %7033 = vmatmul.msk.f32.gmra.mxu2 %vm3729_vm3, %v11946_v54  ;;  %7049 = vmatmul.msk.f32.gmra.mxu3 %vm3729_vm3, %v11946_v54  ;;  %v15297_v18 = vld [vmem:[#allocation567_spill] sm:$0xff]  ;;  %v15304_v42 = vld [vmem:[#allocation520_spill] sm:$0xff] }
 0x628   :  { %v2876_v39 = vpop.f32.mrf.mxu0  ;;  %v3426_v51 = vmax.f32 %v3350_v15, %v3354_v62  ;;  %v2718_v7 = vadd.f32 %v11819_v0, %v2279_v43  ;;  %v15295_v0 = vld [vmem:[#allocation517_spill] sm:$0xff]  ;;  %4348 = vmatpush.msrb.mxu1 %v7183_v12  ;;  %v2284_v24 = vadd.f32 %v15297_v18, %v15296_v14 }
 0x629   :  { %v3037_v56 = vpop.f32.mrf.mxu1  ;;  %3543 = vrot.lane.b32.xlu0 %v11952_v26, %s7427_s13  ;;  %v2283_v31 = vadd.f32 %v11362_v37, %v15295_v0  ;;  %v7178_v15 = vld [vmem:[%s14594_s3 + $0x370] sm:$0xff]  ;;  %v7179_v37 = vld [vmem:[%s14594_s3 + $0x378] sm:$0xff] }
 0x62a   :  { %3545 = vrot.lane.b32.xlu1 %v3426_v51, %s7427_s13  ;;  %v3157_v55 = vadd.f32 %v2876_v39, %v2718_v7  ;;  %v3158_v32 = vadd.f32 %v3037_v56, %v2719_v57  ;;  %4349 = vmatpush.msrb.mxu1 %v7181_v48  ;;  %v2723_v22 = vadd.f32 %v11886_v6, %v2284_v24  ;;  %v15298_v51 = vld [vmem:[#allocation515_spill] sm:$0xff]  ;;  %v15300_v56 = vld [vmem:[#allocation516_spill] sm:$0xff]  ;;  %v7394_v12 = vld [vmem:[%s14591_s0 + $0x190] sm:$0xff] }
 0x62b   :  { %6945 = vmatmul.msk.f32.gmra.mxu0 %vm1080_vm1, %v7392_v36  ;;  %v2722_v62 = vadd.f32 %v11884_v2, %v2283_v31  ;;  %v2282_v60 = vadd.f32 %v15301_v49, %v15300_v56  ;;  %v7176_v2 = vld [vmem:[%s14594_s3 + $0x360] sm:$0xff]  ;;  %v7177_v6 = vld [vmem:[%s14594_s3 + $0x368] sm:$0xff]  ;;  %v7174_v0 = vld [vmem:[%s14594_s3 + $0x350] sm:$0xff] }
 0x62c   :  { %6994 = vmatmul.msk.f32.gmra.mxu1 %vm1080_vm1, %v7392_v36  ;;  %4285 = vmatpush.msrb.mxu0 %v7178_v15  ;;  %v2281_v36 = vadd.f32 %v15299_v58, %v15298_v51  ;;  %v3259_v28 = vadd.f32 %v11622_v63, %v3157_v55  ;;  %v3260_v1 = vadd.f32 %v11625_v11, %v3158_v32  ;;  %v15303_v31 = vld [vmem:[#allocation568_spill] sm:$0xff]  ;;  %v15305_v48 = vld [vmem:[#allocation569_spill] sm:$0xff]  ;;  %v12058_v18 = vpop.f32.mrf.mxu3 }
 0x62d   :  { %4350 = vmatpush.msrb.mxu1 %v7179_v37  ;;  %v2721_v7 = vadd.f32 %v11865_v33, %v2282_v60  ;;  %v15302_v33 = vld [vmem:[#allocation519_spill] sm:$0xff]  ;;  %v2286_v14 = vadd.f32 %v15305_v48, %v15304_v42  ;;  %v7173_v51 = vld [vmem:[%s14594_s3 + $0x348] sm:$0xff] }
 0x62e   :  { %4286 = vmatpush.msrb.mxu0 %v7176_v2  ;;  %v2720_v21 = vadd.f32 %v11856_v10, %v2281_v36  ;;  %v7175_v10 = vld [vmem:[%s14594_s3 + $0x358] sm:$0xff]  ;;  %v2285_v55 = vadd.f32 %v15303_v31, %v15302_v33  ;;  %v3355_v15 = vmax.f32 %v3259_v28, 0.0  ;;  %v3356_v58 = vmax.f32 %v3260_v1, 0.0 }
 0x62f   :  { %7034 = vmatmul.msk.f32.gmra.mxu2 %vm3729_vm3, %v11968_v38  ;;  %7050 = vmatmul.msk.f32.gmra.mxu3 %vm3729_vm3, %v11968_v38 }
 0x630   :  { %v2879_v34 = vpop.f32.mrf.mxu0  ;;  %4351 = vmatpush.msrb.mxu1 %v7177_v6  ;;  %4287 = vmatpush.msrb.mxu0 %v7174_v0  ;;  %v2724_v60 = vadd.f32 %v11895_v47, %v2285_v55  ;;  %v7167_v0 = vld [vmem:[%s14594_s3 + $0x318] sm:$0xff]  ;;  %v7164_v55 = vld [vmem:[%s14594_s3 + $0x300] sm:$0xff] }
 0x631   :  { %v11984_v44 = vpop.f32.mrf.mxu1  ;;  %v3159_v37 = vadd.f32 %v2879_v34, %v2720_v21  ;;  %v7170_v34 = vld [vmem:[%s14594_s3 + $0x330] sm:$0xff]  ;;  %v7169_v21 = vld [vmem:[%s14594_s3 + $0x328] sm:$0xff] }
 0x632   :  { %4352 = vmatpush.msrb.mxu1 %v7175_v10  ;;  %v3160_v36 = vadd.f32 %v11984_v44, %v2721_v7  ;;  %v2725_v44 = vadd.f32 %v11897_v5, %v2286_v14  ;;  %v7168_v5 = vld [vmem:[%s14594_s3 + $0x320] sm:$0xff] }
 0x633   :  { %6946 = vmatmul.msk.f32.gmra.mxu0 %vm1080_vm1, %v7393_v25  ;;  %v3261_v2 = vadd.f32 %v11622_v63, %v3159_v37 }
 0x634   :  { %6995 = vmatmul.msk.f32.gmra.mxu1 %vm1080_vm1, %v7393_v25  ;;  %v12041_v25 = vpop.f32.mrf.mxu2  ;;  %v3262_v1 = vadd.f32 %v11625_v11, %v3160_v36  ;;  %v12116_v42 = vpop.f32.mrf.mxu3  ;;  %v7396_v36 = vld [vmem:[%s14591_s0 + $0x1a0] sm:$0xff] }
 0x635   :  { %4353 = vmatpush.msrb.mxu1 %v7173_v51  ;;  %v3357_v33 = vmax.f32 %v3261_v2, 0.0  ;;  %v7160_v51 = vld [vmem:[%s14594_s3 + $0x2e0] sm:$0xff] }
 0x636   :  { %v3358_v48 = vmax.f32 %v3262_v1, 0.0  ;;  %v15309_v1 = vld [vmem:[#allocation571_spill] sm:$0xff] }
 0x638   :  { %v2882_v39 = vpop.f32.mrf.mxu0 }
 0x639   :  { %v3161_v43 = vadd.f32 %v2882_v39, %v2722_v62  ;;  %v3043_v41 = vpop.f32.mrf.mxu1  ;;  %v7172_v39 = vld [vmem:[%s14594_s3 + $0x340] sm:$0xff] }
 0x63a   :  { %v3162_v53 = vadd.f32 %v3043_v41, %v2723_v22  ;;  %4288 = vmatpush.msrb.mxu0 %v7172_v39 }
 0x63b   :  { %v3263_v19 = vadd.f32 %v11622_v63, %v3161_v43  ;;  %6947 = vmatmul.msk.f32.gmra.mxu0 %vm1080_vm1, %v7394_v12  ;;  %v3520_v57 = vpop.permute.xlu0 %3519  ;;  %v7171_v43 = vld [vmem:[%s14594_s3 + $0x338] sm:$0xff] }
 0x63c   :  { %v3264_v24 = vadd.f32 %v11625_v11, %v3162_v53  ;;  %6996 = vmatmul.msk.f32.gmra.mxu1 %vm1080_vm1, %v7394_v12  ;;  %v3522_v32 = vpop.permute.xlu1 %3521  ;;  %4289 = vmatpush.msrb.mxu0 %v7170_v34  ;;  %v7166_v12 = vld [vmem:[%s14594_s3 + $0x310] sm:$0xff]  ;;  %v12111_v10 = vpop.f32.mrf.mxu2  ;;  %v7159_v34 = vld [vmem:[%s14594_s3 + $0x2d8] sm:$0xff] }
 0x63d   :  { %v3359_v62 = vmax.f32 %v3263_v19, 0.0  ;;  %v3601_v22 = vsel %vm3595_vm2, %v3520_v57, %v3522_v32  ;;  %4354 = vmatpush.msrb.mxu1 %v7171_v43  ;;  %v7395_v19 = vld [vmem:[%s14591_s0 + $0x198] sm:$0xff]  ;;  %v12151_v43 = vpop.f32.mrf.mxu3 }
 0x63e   :  { %v3360_v56 = vmax.f32 %v3264_v24, 0.0  ;;  %v12071_v49 = vmax.f32 %v11753_v17, %v3601_v22  ;;  %4290 = vmatpush.msrb.mxu0 %v7168_v5  ;;  %v7165_v24 = vld [vmem:[%s14594_s3 + $0x308] sm:$0xff]  ;;  %v7163_v22 = vld [vmem:[%s14594_s3 + $0x2f8] sm:$0xff] }
 0x63f   :  { %v12077_v28 = vmax.f32 %v3355_v15, %v3359_v62  ;;  %4355 = vmatpush.msrb.mxu1 %v7169_v21  ;;  %v7162_v15 = vld [vmem:[%s14594_s3 + $0x2f0] sm:$0xff]  ;;  %v15308_v5 = vld [vmem:[#allocation522_spill] sm:$0xff] }
 0x640   :  { %7035 = vmatmul.msk.f32.gmra.mxu2 %vm3729_vm3, %v12071_v49  ;;  %7051 = vmatmul.msk.f32.gmra.mxu3 %vm3729_vm3, %v12071_v49  ;;  %v2885_v17 = vpop.f32.mrf.mxu0  ;;  %v3428_v41 = vmax.f32 %v3356_v58, %v3360_v56  ;;  %v7161_v58 = vld [vmem:[%s14594_s3 + $0x2e8] sm:$0xff]  ;;  %v7158_v56 = vld [vmem:[%s14594_s3 + $0x2d0] sm:$0xff] }
 0x641   :  { %v3163_v47 = vadd.f32 %v2885_v17, %v2724_v60  ;;  %v3046_v6 = vpop.f32.mrf.mxu1  ;;  %3547 = vrot.lane.b32.xlu2 %v12077_v28, %s7427_s13  ;;  %4291 = vmatpush.msrb.mxu0 %v7166_v12  ;;  %v15306_v17 = vld [vmem:[#allocation521_spill] sm:$0xff] }
 0x642   :  { %v3164_v53 = vadd.f32 %v3046_v6, %v2725_v44  ;;  %3549 = vrot.lane.b32.xlu0 %v3428_v41, %s7427_s13  ;;  %4356 = vmatpush.msrb.mxu1 %v7167_v0  ;;  %v15307_v41 = vld [vmem:[#allocation570_spill] sm:$0xff] }
 0x643   :  { %v3265_v7 = vadd.f32 %v11622_v63, %v3163_v47  ;;  %6948 = vmatmul.msk.f32.gmra.mxu0 %vm1080_vm1, %v7395_v19  ;;  %v2287_v2 = vadd.f32 %v15307_v41, %v15306_v17  ;;  %v3524_v47 = vpop.permute.xlu2 %3523  ;;  %v15311_v0 = vld [vmem:[#allocation574_spill] sm:$0xff] }
 0x644   :  { %v3266_v57 = vadd.f32 %v11625_v11, %v3164_v53  ;;  %6997 = vmatmul.msk.f32.gmra.mxu1 %vm1080_vm1, %v7395_v19  ;;  %4292 = vmatpush.msrb.mxu0 %v7164_v55  ;;  %v12149_v60 = vpop.f32.mrf.mxu2  ;;  %v2288_v53 = vadd.f32 %v15309_v1, %v15308_v5 }
 0x645   :  { %v3361_v31 = vmax.f32 %v3265_v7, 0.0  ;;  %4357 = vmatpush.msrb.mxu1 %v7165_v24  ;;  %v2726_v21 = vadd.f32 %v11915_v9, %v2287_v2  ;;  %v7397_v7 = vld [vmem:[%s14591_s0 + $0x1a8] sm:$0xff]  ;;  %v12188_v41 = vpop.f32.mrf.mxu3 }
 0x646   :  { %v3362_v14 = vmax.f32 %v3266_v57, 0.0  ;;  %4293 = vmatpush.msrb.mxu0 %v7162_v15  ;;  %v2727_v19 = vadd.f32 %v11917_v59, %v2288_v53  ;;  %v15310_v57 = vld [vmem:[#allocation525_spill] sm:$0xff] }
 0x647   :  { %v12121_v32 = vmax.f32 %v3357_v33, %v3361_v31  ;;  %4358 = vmatpush.msrb.mxu1 %v7163_v22  ;;  %v2291_v33 = vadd.f32 %v15311_v0, %v15310_v57  ;;  %v1061_v22 = vld [vmem:[%s14591_s0 + $0x1b0] sm:$0xff] }
 0x648   :  { %v2888_v37 = vpop.f32.mrf.mxu0  ;;  %v3430_v62 = vmax.f32 %v3358_v48, %v3362_v14  ;;  %4294 = vmatpush.msrb.mxu0 %v7160_v51  ;;  %v15312_v48 = vld [vmem:[#allocation526_spill] sm:$0xff]  ;;  %v15313_v14 = vld [vmem:[#allocation575_spill] sm:$0xff] }
 0x649   :  { %v3049_v39 = vpop.f32.mrf.mxu1  ;;  %3551 = vrot.lane.b32.xlu1 %v12121_v32, %s7427_s13  ;;  %4359 = vmatpush.msrb.mxu1 %v7161_v58  ;;  %v3165_v31 = vadd.f32 %v2888_v37, %v2726_v21  ;;  %v2292_v9 = vadd.f32 %v15313_v14, %v15312_v48  ;;  %v15314_v51 = vld [vmem:[#allocation523_spill] sm:$0xff]  ;;  %v15320_v14 = vld [vmem:[#allocation528_spill] sm:$0xff] }
 0x64a   :  { %3553 = vrot.lane.b32.xlu2 %v3430_v62, %s7427_s13  ;;  %4295 = vmatpush.msrb.mxu0 %v7158_v56  ;;  %v3166_v24 = vadd.f32 %v3049_v39, %v2727_v19  ;;  %v2730_v62 = vadd.f32 %v11982_v46, %v2291_v33  ;;  %v15315_v39 = vld [vmem:[#allocation572_spill] sm:$0xff]  ;;  %v15318_v19 = vld [vmem:[#allocation527_spill] sm:$0xff] }
 0x64b   :  { %6949 = vmatmul.msk.f32.gmra.mxu0 %vm1080_vm1, %v7396_v36  ;;  %4360 = vmatpush.msrb.mxu1 %v7159_v34  ;;  %v2731_v59 = vadd.f32 %v11994_v30, %v2292_v9  ;;  %v2289_v58 = vadd.f32 %v15315_v39, %v15314_v51  ;;  %v3267_v46 = vadd.f32 %v11622_v63, %v3165_v31  ;;  %v15316_v56 = vld [vmem:[#allocation524_spill] sm:$0xff]  ;;  %v15317_v34 = vld [vmem:[#allocation573_spill] sm:$0xff]  ;;  %v3530_v1 = vpop.permute.xlu2 %3529  ;;  %v1062_v39 = vld [vmem:[%s14591_s0 + $0x1b8] sm:$0xff] }
 0x64c   :  { %6998 = vmatmul.msk.f32.gmra.mxu1 %vm1080_vm1, %v7396_v36  ;;  %v2290_v17 = vadd.f32 %v15317_v34, %v15316_v56  ;;  %v3268_v2 = vadd.f32 %v11625_v11, %v3166_v24  ;;  %v15321_v9 = vld [vmem:[#allocation577_spill] sm:$0xff] }
 0x64d   :  { %v2728_v5 = vadd.f32 %v11948_v35, %v2289_v58  ;;  %v3363_v31 = vmax.f32 %v3267_v46, 0.0  ;;  %v2294_v24 = vadd.f32 %v15321_v9, %v15320_v14  ;;  %v12227_v34 = vpop.f32.mrf.mxu3  ;;  %v15324_v9 = vld [vmem:[#allocation530_spill] sm:$0xff] }
 0x650   :  { %v2891_v44 = vpop.f32.mrf.mxu0 }
 0x651   :  { %v3052_v6 = vpop.f32.mrf.mxu1 }
 0x653   :  { %6950 = vmatmul.msk.f32.gmra.mxu0 %vm1080_vm1, %v7397_v7 }
 0x654   :  { %6999 = vmatmul.msk.f32.gmra.mxu1 %vm1080_vm1, %v7397_v7  ;;  %v3526_v12 = vpop.permute.xlu0 %3525  ;;  %v2729_v7 = vadd.f32 %v11950_v52, %v2290_v17 }
 0x655   :  { %v3602_v55 = vsel %vm3595_vm2, %v3524_v47, %v3526_v12  ;;  %v15319_v12 = vld [vmem:[#allocation576_spill] sm:$0xff] }
 0x656   :  { %v12170_v15 = vmax.f32 %v11787_v23, %v3602_v55  ;;  %v12183_v23 = vpop.f32.mrf.mxu2  ;;  %v2293_v57 = vadd.f32 %v15319_v12, %v15318_v19  ;;  %v3167_v55 = vadd.f32 %v2891_v44, %v2728_v5  ;;  %v3168_v52 = vadd.f32 %v3052_v6, %v2729_v7 }
 0x658   :  { %7036 = vmatmul.msk.f32.gmra.mxu2 %vm3729_vm3, %v12170_v15  ;;  %7052 = vmatmul.msk.f32.gmra.mxu3 %vm3729_vm3, %v12170_v15  ;;  %v2894_v37 = vpop.f32.mrf.mxu0  ;;  %v3269_v6 = vadd.f32 %v11622_v63, %v3167_v55  ;;  %v15323_v55 = vld [vmem:[#allocation578_spill] sm:$0xff] }
 0x659   :  { %v3169_v36 = vadd.f32 %v2894_v37, %v2730_v62  ;;  %v3055_v30 = vpop.f32.mrf.mxu1  ;;  %v3364_v62 = vmax.f32 %v3268_v2, 0.0  ;;  %v2732_v37 = vadd.f32 %v12041_v25, %v2293_v57 }
 0x65a   :  { %v3170_v47 = vadd.f32 %v3055_v30, %v2731_v59  ;;  %v3365_v17 = vmax.f32 %v3269_v6, 0.0 }
 0x65b   :  { %v3271_v53 = vadd.f32 %v11622_v63, %v3169_v36  ;;  %6951 = vmatmul.msk.f32.gmra.mxu0 %vm1080_vm1, %v1061_v22  ;;  %v3528_v21 = vpop.permute.xlu1 %3527 }
 0x65c   :  { %v3272_v0 = vadd.f32 %v11625_v11, %v3170_v47  ;;  %7000 = vmatmul.msk.f32.gmra.mxu1 %vm1080_vm1, %v1061_v22  ;;  %v3603_v33 = vsel %vm3595_vm2, %v3528_v21, %v3530_v1  ;;  %v2733_v22 = vadd.f32 %v12058_v18, %v2294_v24  ;;  %v3270_v18 = vadd.f32 %v11625_v11, %v3168_v52  ;;  %v3696_v1 = vld [vmem:[%s14594_s3 + $0xe0] sm:$0xff] }
 0x65d   :  { %v3367_v35 = vmax.f32 %v3271_v53, 0.0  ;;  %v12201_v48 = vmax.f32 %v11808_v45, %v3603_v33  ;;  %v3697_v53 = vld [vmem:[%s14594_s3 + $0xe8] sm:$0xff]  ;;  %3915 = vmatpush.msrb.mxu2 %v3696_v1  ;;  %v15325_v24 = vld [vmem:[#allocation579_spill] sm:$0xff] }
 0x65e   :  { %v3368_v59 = vmax.f32 %v3272_v0, 0.0  ;;  %v12221_v36 = vpop.f32.mrf.mxu2  ;;  %v3366_v47 = vmax.f32 %v3270_v18, 0.0  ;;  %3980 = vmatpush.msrb.mxu3 %v3697_v53  ;;  %v12246_v0 = vpop.f32.mrf.mxu3  ;;  %v15329_v18 = vld [vmem:[#allocation583_spill] sm:$0xff]  ;;  %v15331_v1 = vld [vmem:[#allocation580_spill] sm:$0xff] }
 0x65f   :  { %v12206_v51 = vmax.f32 %v3363_v31, %v3367_v35  ;;  %v15322_v31 = vld [vmem:[#allocation529_spill] sm:$0xff] }
 0x660   :  { %7037 = vmatmul.msk.f32.gmra.mxu2 %vm3729_vm3, %v12201_v48  ;;  %7053 = vmatmul.msk.f32.gmra.mxu3 %vm3729_vm3, %v12201_v48  ;;  %v2897_v45 = vpop.f32.mrf.mxu0  ;;  %v3432_v44 = vmax.f32 %v3364_v62, %v3368_v59  ;;  %v2295_v35 = vadd.f32 %v15323_v55, %v15322_v31  ;;  %v2296_v62 = vadd.f32 %v15325_v24, %v15324_v9  ;;  %v15332_v31 = vld [vmem:[#allocation532_spill] sm:$0xff]  ;;  %v15333_v55 = vld [vmem:[#allocation581_spill] sm:$0xff] }
 0x661   :  { %v3171_v58 = vadd.f32 %v2897_v45, %v2732_v37  ;;  %v3058_v25 = vpop.f32.mrf.mxu1  ;;  %3555 = vrot.lane.b32.xlu0 %v12206_v51, %s7427_s13  ;;  %v15326_v45 = vld [vmem:[#allocation533_spill] sm:$0xff] }
 0x662   :  { %v3172_v46 = vadd.f32 %v3058_v25, %v2733_v22  ;;  %3557 = vrot.lane.b32.xlu1 %v3432_v44, %s7427_s13  ;;  %v2734_v52 = vadd.f32 %v12111_v10, %v2295_v35  ;;  %v2735_v37 = vadd.f32 %v12116_v42, %v2296_v62  ;;  %v15327_v44 = vld [vmem:[#allocation582_spill] sm:$0xff]  ;;  %v3694_v42 = vld [vmem:[%s14594_s3 + $0xd0] sm:$0xff]  ;;  %v2298_v35 = vadd.f32 %v15333_v55, %v15332_v31 }
 0x663   :  { %v3273_v30 = vadd.f32 %v11622_v63, %v3171_v58  ;;  %6952 = vmatmul.msk.f32.gmra.mxu0 %vm1080_vm1, %v1062_v39  ;;  %v15328_v25 = vld [vmem:[#allocation534_spill] sm:$0xff]  ;;  %3916 = vmatpush.msrb.mxu2 %v3694_v42 }
 0x664   :  { %v3274_v56 = vadd.f32 %v11625_v11, %v3172_v46  ;;  %7001 = vmatmul.msk.f32.gmra.mxu1 %vm1080_vm1, %v1062_v39  ;;  %v2299_v39 = vadd.f32 %v15327_v44, %v15326_v45  ;;  %v2300_v46 = vadd.f32 %v15329_v18, %v15328_v25  ;;  %v15336_v45 = vld [vmem:[#allocation536_spill] sm:$0xff]  ;;  %v15337_v44 = vld [vmem:[#allocation585_spill] sm:$0xff] }
 0x665   :  { %v3369_v2 = vmax.f32 %v3273_v30, 0.0 }
 0x666   :  { %v3370_v5 = vmax.f32 %v3274_v56, 0.0  ;;  %v12244_v57 = vpop.f32.mrf.mxu2  ;;  %v3695_v56 = vld [vmem:[%s14594_s3 + $0xd8] sm:$0xff] }
 0x667   :  { %v12235_v21 = vmax.f32 %v3365_v17, %v3369_v2  ;;  %v2738_v17 = vadd.f32 %v12183_v23, %v2299_v39  ;;  %3981 = vmatpush.msrb.mxu3 %v3695_v56  ;;  %v2302_v39 = vadd.f32 %v15337_v44, %v15336_v45 }
 0x668   :  { %v2900_v7 = vpop.f32.mrf.mxu0  ;;  %v3434_v19 = vmax.f32 %v3366_v47, %v3370_v5  ;;  %v2739_v47 = vadd.f32 %v12188_v41, %v2300_v46  ;;  %v15330_v5 = vld [vmem:[#allocation531_spill] sm:$0xff] }
 0x669   :  { %v3061_v12 = vpop.f32.mrf.mxu1  ;;  %3559 = vrot.lane.b32.xlu2 %v12235_v21, %s7427_s13  ;;  %v3173_v6 = vadd.f32 %v2900_v7, %v2734_v52  ;;  %v2297_v53 = vadd.f32 %v15331_v1, %v15330_v5  ;;  %v12282_v7 = vpop.f32.mrf.mxu3  ;;  %v2737_v52 = vadd.f32 %v12151_v43, %v2298_v35 }
 0x66a   :  { %3561 = vrot.lane.b32.xlu0 %v3434_v19, %s7427_s13  ;;  %v3174_v10 = vadd.f32 %v3061_v12, %v2735_v37  ;;  %v15335_v37 = vld [vmem:[#allocation584_spill] sm:$0xff] }
 0x66b   :  { %7188 = vmatmul.msk.f32.vlgmr.msrb.gmra.mxu0 %vm3729_vm3, %v12170_v15  ;;  %v3275_v23 = vadd.f32 %v11622_v63, %v3173_v6  ;;  %v2736_v24 = vadd.f32 %v12149_v60, %v2297_v53  ;;  %v3536_v6 = vpop.permute.xlu2 %3535 }
 0x66c   :  { %7204 = vmatmul.msk.f32.vlgmr.msrb.gmra.mxu1 %vm3729_vm3, %v12170_v15  ;;  %v3276_v41 = vadd.f32 %v11625_v11, %v3174_v10 }
 0x66d   :  { %v3371_v25 = vmax.f32 %v3275_v23, 0.0 }
 0x66e   :  { %v12273_v2 = vpop.f32.mrf.mxu2  ;;  %v3372_v42 = vmax.f32 %v3276_v41, 0.0 }
 0x670   :  { %v2903_v33 = vpop.f32.mrf.mxu0 }
 0x671   :  { %v3064_v14 = vpop.f32.mrf.mxu1  ;;  %v3175_v18 = vadd.f32 %v2903_v33, %v2736_v24 }
 0x672   :  { %v3176_v43 = vadd.f32 %v3064_v14, %v2737_v52  ;;  %v2741_v14 = vadd.f32 %v12227_v34, %v2302_v39  ;;  %v2640_v34 = vpop.f32.mrf.mxu3  ;;  %v3690_v52 = vld [vmem:[%s14594_s3 + $0xb0] sm:$0xff] }
 0x673   :  { %7189 = vmatmul.msk.f32.gmra.mxu0 %vm3729_vm3, %v12201_v48  ;;  %v3532_v59 = vpop.permute.xlu0 %3531  ;;  %v3277_v23 = vadd.f32 %v11622_v63, %v3175_v18  ;;  %v15338_v18 = vld [vmem:[#allocation537_spill] sm:$0xff] }
 0x674   :  { %v3534_v22 = vpop.permute.xlu1 %3533  ;;  %7205 = vmatmul.msk.f32.gmra.mxu1 %vm3729_vm3, %v12201_v48 }
 0x675   :  { %v3604_v58 = vsel %vm3595_vm2, %v3532_v59, %v3534_v22  ;;  %v15334_v59 = vld [vmem:[#allocation535_spill] sm:$0xff]  ;;  %v3373_v41 = vmax.f32 %v3277_v23, 0.0 }
 0x676   :  { %v12264_v30 = vmax.f32 %v11867_v20, %v3604_v58  ;;  %v2301_v22 = vadd.f32 %v15335_v37, %v15334_v59  ;;  %v2479_v53 = vpop.f32.mrf.mxu2  ;;  %v3691_v59 = vld [vmem:[%s14594_s3 + $0xb8] sm:$0xff] }
 0x678   :  { %7038 = vmatmul.msk.f32.gmra.mxu2 %vm3729_vm3, %v12264_v30  ;;  %7054 = vmatmul.msk.f32.gmra.mxu3 %vm3729_vm3, %v12264_v30  ;;  %v2906_v20 = vpop.f32.mrf.mxu0  ;;  %v2740_v5 = vadd.f32 %v12221_v36, %v2301_v22  ;;  %v3278_v36 = vadd.f32 %v11625_v11, %v3176_v43 }
 0x679   :  { %v3177_v19 = vadd.f32 %v2906_v20, %v2738_v17  ;;  %v3067_v12 = vpop.f32.mrf.mxu1  ;;  %v3693_v20 = vld [vmem:[%s14594_s3 + $0xc8] sm:$0xff] }
 0x67a   :  { %v3178_v9 = vadd.f32 %v3067_v12, %v2739_v47  ;;  %v3692_v47 = vld [vmem:[%s14594_s3 + $0xc0] sm:$0xff]  ;;  %3982 = vmatpush.msrb.mxu3 %v3693_v20  ;;  %v3374_v24 = vmax.f32 %v3278_v36, 0.0 }
 0x67b   :  { %v3279_v62 = vadd.f32 %v11622_v63, %v3177_v19  ;;  %7190 = vmatmul.msk.f32.gmra.mxu0 %vm3729_vm3, %v12264_v30  ;;  %3917 = vmatpush.msrb.mxu2 %v3692_v47 }
 0x67c   :  { %v3280_v58 = vadd.f32 %v11625_v11, %v3178_v9  ;;  %7206 = vmatmul.msk.f32.gmra.mxu1 %vm3729_vm3, %v12264_v30  ;;  %v3538_v60 = vpop.permute.xlu0 %3537  ;;  %3983 = vmatpush.msrb.mxu3 %v3691_v59  ;;  %v3542_v47 = vpop.permute.xlu2 %3541  ;;  %v15346_v59 = vld [vmem:[#allocation540_spill] sm:$0xff] }
 0x67d   :  { %v3375_v46 = vmax.f32 %v3279_v62, 0.0  ;;  %v3605_v10 = vsel %vm3595_vm2, %v3536_v6, %v3538_v60  ;;  %3918 = vmatpush.msrb.mxu2 %v3690_v52  ;;  %v12342_v6 = vpop.f32.mrf.mxu3  ;;  %v3689_v60 = vld [vmem:[%s14594_s3 + $0xa8] sm:$0xff] }
 0x67e   :  { %v3376_v56 = vmax.f32 %v3280_v58, 0.0  ;;  %v12302_v17 = vmax.f32 %v11882_v61, %v3605_v10  ;;  %v2482_v39 = vpop.f32.mrf.mxu2  ;;  %v3688_v58 = vld [vmem:[%s14594_s3 + $0xa0] sm:$0xff]  ;;  %3984 = vmatpush.msrb.mxu3 %v3689_v60 }
 0x67f   :  { %v12311_v33 = vmax.f32 %v3371_v25, %v3375_v46  ;;  %3919 = vmatpush.msrb.mxu2 %v3688_v58  ;;  %v2303_v46 = vadd.f32 %v11487_v27, %v15338_v18 }
 0x680   :  { %7039 = vmatmul.msk.f32.gmra.mxu2 %vm3729_vm3, %v12302_v17  ;;  %7055 = vmatmul.msk.f32.gmra.mxu3 %vm3729_vm3, %v12302_v17  ;;  %v2909_v61 = vpop.f32.mrf.mxu0  ;;  %v3436_v1 = vmax.f32 %v3372_v42, %v3376_v56  ;;  %v15339_v42 = vld [vmem:[#allocation538_spill] sm:$0xff] }
 0x681   :  { %v3179_v19 = vadd.f32 %v2909_v61, %v2740_v5  ;;  %v3070_v12 = vpop.f32.mrf.mxu1  ;;  %3563 = vrot.lane.b32.xlu1 %v12311_v33, %s7427_s13  ;;  %v2304_v43 = vadd.f32 %v11489_v13, %v15339_v42  ;;  %v2742_v56 = vadd.f32 %v12244_v57, %v2303_v46  ;;  %v15341_v61 = vld [vmem:[#allocation588_spill] sm:$0xff]  ;;  %v3686_v57 = vld [vmem:[%s14594_s3 + $0x90] sm:$0xff]  ;;  %v15348_v42 = vld [vmem:[#allocation543_spill] sm:$0xff] }
 0x682   :  { %v3180_v31 = vadd.f32 %v3070_v12, %v2741_v14  ;;  %3565 = vrot.lane.b32.xlu2 %v3436_v1, %s7427_s13  ;;  %v15340_v14 = vld [vmem:[#allocation541_spill] sm:$0xff]  ;;  %3920 = vmatpush.msrb.mxu2 %v3686_v57 }
 0x683   :  { %v3281_v55 = vadd.f32 %v11622_v63, %v3179_v19  ;;  %7191 = vmatmul.msk.f32.gmra.mxu0 %vm3729_vm3, %v12302_v17  ;;  %v2743_v5 = vadd.f32 %v12246_v0, %v2304_v43  ;;  %v15342_v19 = vld [vmem:[#allocation542_spill] sm:$0xff]  ;;  %v15343_v12 = vld [vmem:[#allocation589_spill] sm:$0xff]  ;;  %v2309_v43 = vadd.f32 %v11520_v50, %v15348_v42  ;;  %v3684_v50 = vld [vmem:[%s14594_s3 + $0x80] sm:$0xff] }
 0x684   :  { %v3282_v35 = vadd.f32 %v11625_v11, %v3180_v31  ;;  %7207 = vmatmul.msk.f32.gmra.mxu1 %vm3729_vm3, %v12302_v17  ;;  %v3687_v0 = vld [vmem:[%s14594_s3 + $0x98] sm:$0xff]  ;;  %3921 = vmatpush.msrb.mxu2 %v3684_v50  ;;  %v3680_v42 = vld [vmem:[%s14594_s3 + $0x60] sm:$0xff] }
 0x685   :  { %v3377_v9 = vmax.f32 %v3281_v55, 0.0  ;;  %v12378_v55 = vpop.f32.mrf.mxu3  ;;  %3985 = vmatpush.msrb.mxu3 %v3687_v0 }
 0x686   :  { %v3378_v62 = vmax.f32 %v3282_v35, 0.0  ;;  %v12365_v1 = vpop.f32.mrf.mxu2 }
 0x687   :  { %v12335_v37 = vmax.f32 %v3373_v41, %v3377_v9  ;;  %v15344_v41 = vld [vmem:[#allocation539_spill] sm:$0xff]  ;;  %v15345_v9 = vld [vmem:[#allocation586_spill] sm:$0xff] }
 0x688   :  { %v2912_v22 = vpop.f32.mrf.mxu0  ;;  %v3438_v45 = vmax.f32 %v3374_v24, %v3378_v62  ;;  %v2305_v24 = vadd.f32 %v15345_v9, %v15344_v41 }
 0x689   :  { %v3073_v44 = vpop.f32.mrf.mxu1  ;;  %3567 = vrot.lane.b32.xlu0 %v12335_v37, %s7427_s13  ;;  %v3181_v13 = vadd.f32 %v2912_v22, %v2742_v56  ;;  %v15347_v22 = vld [vmem:[#allocation587_spill] sm:$0xff]  ;;  %v15349_v56 = vld [vmem:[#allocation544_spill] sm:$0xff] }
 0x68a   :  { %3569 = vrot.lane.b32.xlu1 %v3438_v45, %s7427_s13  ;;  %3499 = vrot.lane.b32.xlu2 %v11639_v16, %s7427_s13  ;;  %v3182_v36 = vadd.f32 %v3073_v44, %v2743_v5  ;;  %v2306_v45 = vadd.f32 %v15347_v22, %v15346_v59  ;;  %v2744_v58 = vadd.f32 %v12273_v2, %v2305_v24  ;;  %v3682_v22 = vld [vmem:[%s14594_s3 + $0x70] sm:$0xff] }
 0x68b   :  { %3922 = vmatpush.msrb.mxu2 %v3682_v22 }
 0x68c   :  { %v2745_v46 = vadd.f32 %v12282_v7, %v2306_v45  ;;  %v3685_v7 = vld [vmem:[%s14594_s3 + $0x88] sm:$0xff]  ;;  %v3683_v45 = vld [vmem:[%s14594_s3 + $0x78] sm:$0xff] }
 0x68d   :  { %3986 = vmatpush.msrb.mxu3 %v3685_v7  ;;  %3923 = vmatpush.msrb.mxu2 %v3680_v42  ;;  %v15355_v7 = vld [vmem:[#allocation549_spill] sm:$0xff] }
 0x68e   :  { %v12412_v57 = vpop.f32.mrf.mxu2 }
 0x68f   :  { %3987 = vmatpush.msrb.mxu3 %v3683_v45 }
 0x690   :  { %v2915_v25 = vpop.f32.mrf.mxu0 }
 0x691   :  { %v3076_v10 = vpop.f32.mrf.mxu1  ;;  %3501 = vrot.lane.b32.xlu0 %v11641_v3, %s7427_s13  ;;  %v2307_v3 = vadd.f32 %v15341_v61, %v15340_v14  ;;  %v3183_v61 = vadd.f32 %v2915_v25, %v2744_v58 }
 0x692   :  { %3503 = vrot.lane.b32.xlu1 %v11659_v40, %s7427_s13  ;;  %3505 = vrot.lane.b32.xlu2 %v11661_v8, %s7427_s13  ;;  %v2308_v8 = vadd.f32 %v15343_v12, %v15342_v19  ;;  %v3184_v19 = vadd.f32 %v3076_v10, %v2745_v46 }
 0x693   :  { %v3540_v20 = vpop.permute.xlu1 %3539  ;;  %v2746_v31 = vadd.f32 %v2479_v53, %v2307_v3  ;;  %v3283_v53 = vadd.f32 %v11622_v63, %v3181_v13 }
 0x694   :  { %v3606_v27 = vsel %vm3595_vm2, %v3540_v20, %v3542_v47  ;;  %v15350_v47 = vld [vmem:[#allocation590_spill] sm:$0xff] }
 0x695   :  { %v12368_v23 = vmax.f32 %v11925_v4, %v3606_v27  ;;  %v2747_v4 = vadd.f32 %v2640_v34, %v2308_v8  ;;  %v3284_v34 = vadd.f32 %v11625_v11, %v3182_v36  ;;  %v2310_v20 = vadd.f32 %v15350_v47, %v15349_v56  ;;  %v15351_v47 = vld [vmem:[#allocation545_spill] sm:$0xff] }
 0x696   :  { %v3379_v14 = vmax.f32 %v3283_v53, 0.0  ;;  %v2748_v36 = vadd.f32 %v2482_v39, %v2309_v43  ;;  %v3285_v39 = vadd.f32 %v11622_v63, %v3183_v61  ;;  %v3681_v43 = vld [vmem:[%s14594_s3 + $0x68] sm:$0xff]  ;;  %v15353_v61 = vld [vmem:[#allocation546_spill] sm:$0xff] }
 0x697   :  { %7040 = vmatmul.msk.f32.gmra.mxu2 %vm3729_vm3, %v12368_v23  ;;  %7056 = vmatmul.msk.f32.gmra.mxu3 %vm3729_vm3, %v12368_v23  ;;  %v3380_v2 = vmax.f32 %v3284_v34, 0.0  ;;  %v2749_v10 = vadd.f32 %v12342_v6, %v2310_v20  ;;  %v15352_v20 = vld [vmem:[#allocation591_spill] sm:$0xff] }
 0x698   :  { %7192 = vmatmul.msk.f32.gmra.mxu0 %vm3729_vm3, %v12368_v23  ;;  %7208 = vmatmul.msk.f32.gmra.mxu1 %vm3729_vm3, %v12368_v23  ;;  %v2918_v35 = vpop.f32.mrf.mxu0  ;;  %v3381_v53 = vmax.f32 %v3285_v39, 0.0 }
 0x699   :  { %v3185_v62 = vadd.f32 %v2918_v35, %v2746_v31  ;;  %v3079_v52 = vpop.f32.mrf.mxu1  ;;  %v12421_v31 = vpop.f32.mrf.mxu3  ;;  %v3286_v35 = vadd.f32 %v11625_v11, %v3184_v19  ;;  %3988 = vmatpush.msrb.mxu3 %v3681_v43 }
 0x69a   :  { %v3186_v44 = vadd.f32 %v3079_v52, %v2747_v4 }
 0x69b   :  { %v3287_v60 = vadd.f32 %v11622_v63, %v3185_v62  ;;  %v3544_v18 = vpop.permute.xlu0 %3543  ;;  %v3382_v52 = vmax.f32 %v3286_v35, 0.0 }
 0x69c   :  { %v3288_v5 = vadd.f32 %v11625_v11, %v3186_v44  ;;  %v3546_v27 = vpop.permute.xlu1 %3545 }
 0x69d   :  { %v3383_v3 = vmax.f32 %v3287_v60, 0.0  ;;  %v3607_v13 = vsel %vm3595_vm2, %v3544_v18, %v3546_v27  ;;  %v2491_v60 = vpop.f32.mrf.mxu2  ;;  %v3548_v27 = vpop.permute.xlu2 %3547 }
 0x69e   :  { %v3384_v12 = vmax.f32 %v3288_v5, 0.0  ;;  %v12404_v8 = vmax.f32 %v11952_v26, %v3607_v13  ;;  %v2311_v5 = vadd.f32 %v15352_v20, %v15351_v47 }
 0x69f   :  { %v12414_v25 = vmax.f32 %v3379_v14, %v3383_v3  ;;  %v15354_v3 = vld [vmem:[#allocation592_spill] sm:$0xff] }
 0x6a0   :  { %7041 = vmatmul.msk.f32.gmra.mxu2 %vm3729_vm3, %v12404_v8  ;;  %7057 = vmatmul.msk.f32.gmra.mxu3 %vm3729_vm3, %v12404_v8  ;;  %v2921_v26 = vpop.f32.mrf.mxu0  ;;  %v3440_v0 = vmax.f32 %v3380_v2, %v3384_v12  ;;  %v2312_v13 = vadd.f32 %v15354_v3, %v15353_v61  ;;  %v2750_v2 = vadd.f32 %v12365_v1, %v2311_v5  ;;  %v3678_v1 = vld [vmem:[%s14594_s3 + $0x50] sm:$0xff]  ;;  %v15363_v61 = vld [vmem:[#allocation551_spill] sm:$0xff] }
 0x6a1   :  { %7193 = vmatmul.msk.f32.gmra.mxu0 %vm3729_vm3, %v12404_v8  ;;  %7209 = vmatmul.msk.f32.gmra.mxu1 %vm3729_vm3, %v12404_v8  ;;  %v3187_v4 = vadd.f32 %v2921_v26, %v2748_v36  ;;  %v3082_v6 = vpop.f32.mrf.mxu1  ;;  %v2652_v46 = vpop.f32.mrf.mxu3  ;;  %v15356_v36 = vld [vmem:[#allocation595_spill] sm:$0xff]  ;;  %v15364_v3 = vld [vmem:[#allocation597_spill] sm:$0xff] }
 0x6a2   :  { %v3188_v41 = vadd.f32 %v3082_v6, %v2749_v10  ;;  %3571 = vrot.lane.b32.xlu0 %v12414_v25, %s7427_s13  ;;  %3573 = vrot.lane.b32.xlu1 %v3440_v0, %s7427_s13  ;;  %v2751_v12 = vadd.f32 %v12378_v55, %v2312_v13  ;;  %v2315_v10 = vadd.f32 %v15356_v36, %v15355_v7  ;;  %v15358_v6 = vld [vmem:[#allocation596_spill] sm:$0xff]  ;;  %v3679_v55 = vld [vmem:[%s14594_s3 + $0x58] sm:$0xff] }
 0x6a3   :  { %v3289_v9 = vadd.f32 %v11622_v63, %v3187_v4  ;;  %v15357_v4 = vld [vmem:[#allocation550_spill] sm:$0xff]  ;;  %3924 = vmatpush.msrb.mxu2 %v3678_v1  ;;  %3989 = vmatpush.msrb.mxu3 %v3679_v55  ;;  %v2317_v13 = vadd.f32 %v15364_v3, %v15363_v61  ;;  %v3677_v1 = vld [vmem:[%s14594_s3 + $0x48] sm:$0xff]  ;;  %v3672_v61 = vld [vmem:[%s14594_s3 + $0x20] sm:$0xff] }
 0x6a4   :  { %v3290_v24 = vadd.f32 %v11625_v11, %v3188_v41  ;;  %v2316_v35 = vadd.f32 %v15358_v6, %v15357_v4  ;;  %v3673_v3 = vld [vmem:[%s14594_s3 + $0x28] sm:$0xff] }
 0x6a5   :  { %v3385_v62 = vmax.f32 %v3289_v9, 0.0  ;;  %v2494_v19 = vpop.f32.mrf.mxu2  ;;  %v3554_v47 = vpop.permute.xlu2 %3553  ;;  %3990 = vmatpush.msrb.mxu3 %v3677_v1 }
 0x6a6   :  { %v3386_v59 = vmax.f32 %v3290_v24, 0.0  ;;  %v2754_v24 = vadd.f32 %v2491_v60, %v2315_v10  ;;  %v15362_v60 = vld [vmem:[#allocation594_spill] sm:$0xff]  ;;  %v2756_v55 = vadd.f32 %v2494_v19, %v2317_v13 }
 0x6a7   :  { %v12440_v34 = vmax.f32 %v3381_v53, %v3385_v62  ;;  %v2755_v53 = vadd.f32 %v2652_v46, %v2316_v35  ;;  %v15359_v62 = vld [vmem:[#allocation547_spill] sm:$0xff] }
 0x6a8   :  { %v2924_v44 = vpop.f32.mrf.mxu0  ;;  %v3442_v58 = vmax.f32 %v3382_v52, %v3386_v59  ;;  %v15360_v52 = vld [vmem:[#allocation593_spill] sm:$0xff] }
 0x6a9   :  { %v3085_v18 = vpop.f32.mrf.mxu1  ;;  %3575 = vrot.lane.b32.xlu2 %v12440_v34, %s7427_s13  ;;  %v2655_v26 = vpop.f32.mrf.mxu3  ;;  %v3189_v0 = vadd.f32 %v2924_v44, %v2750_v2  ;;  %v2313_v59 = vadd.f32 %v15360_v52, %v15359_v62 }
 0x6aa   :  { %3577 = vrot.lane.b32.xlu0 %v3442_v58, %s7427_s13  ;;  %v3190_v41 = vadd.f32 %v3085_v18, %v2751_v12  ;;  %v15361_v58 = vld [vmem:[#allocation548_spill] sm:$0xff] }
 0x6ab   :  { %v3291_v22 = vadd.f32 %v11622_v63, %v3189_v0  ;;  %v2314_v18 = vadd.f32 %v15362_v60, %v15361_v58  ;;  %v2752_v43 = vadd.f32 %v12412_v57, %v2313_v59  ;;  %v15365_v57 = vld [vmem:[#allocation552_spill] sm:$0xff] }
 0x6ac   :  { %v3292_v46 = vadd.f32 %v11625_v11, %v3190_v41  ;;  %v3676_v41 = vld [vmem:[%s14594_s3 + $0x40] sm:$0xff] }
 0x6ad   :  { %v3387_v7 = vmax.f32 %v3291_v22, 0.0  ;;  %3925 = vmatpush.msrb.mxu2 %v3676_v41 }
 0x6ae   :  { %v3388_v6 = vmax.f32 %v3292_v46, 0.0  ;;  %v3675_v46 = vld [vmem:[%s14594_s3 + $0x38] sm:$0xff] }
 0x6af   :  { %3991 = vmatpush.msrb.mxu3 %v3675_v46 }
 0x6b0   :  { %v2927_v56 = vpop.f32.mrf.mxu0 }
 0x6b1   :  { %v3088_v14 = vpop.f32.mrf.mxu1  ;;  %v3191_v36 = vadd.f32 %v2927_v56, %v2752_v43  ;;  %v2658_v56 = vpop.f32.mrf.mxu3  ;;  %3992 = vmatpush.msrb.mxu3 %v3673_v3 }
 0x6b4   :  { %v3550_v50 = vpop.permute.xlu0 %3549 }
 0x6b5   :  { %v3608_v39 = vsel %vm3595_vm2, %v3548_v27, %v3550_v50  ;;  %v2753_v27 = vadd.f32 %v12421_v31, %v2314_v18  ;;  %v2497_v50 = vpop.f32.mrf.mxu2  ;;  %v3674_v18 = vld [vmem:[%s14594_s3 + $0x30] sm:$0xff] }
 0x6b6   :  { %v12463_v9 = vmax.f32 %v12077_v28, %v3608_v39  ;;  %v15366_v39 = vld [vmem:[#allocation598_spill] sm:$0xff]  ;;  %3926 = vmatpush.msrb.mxu2 %v3674_v18 }
 0x6b7   :  { %v2318_v4 = vadd.f32 %v15366_v39, %v15365_v57  ;;  %v3192_v35 = vadd.f32 %v3088_v14, %v2753_v27  ;;  %v15369_v57 = vld [vmem:[#allocation554_spill] sm:$0xff]  ;;  %v15370_v39 = vld [vmem:[#allocation600_spill] sm:$0xff] }
 0x6b8   :  { %7042 = vmatmul.msk.f32.gmra.mxu2 %vm3729_vm3, %v12463_v9  ;;  %7058 = vmatmul.msk.f32.gmra.mxu3 %vm3729_vm3, %v12463_v9  ;;  %v2930_v28 = vpop.f32.mrf.mxu0 }
 0x6b9   :  { %7194 = vmatmul.msk.f32.gmra.mxu0 %vm3729_vm3, %v12463_v9  ;;  %7210 = vmatmul.msk.f32.gmra.mxu1 %vm3729_vm3, %v12463_v9  ;;  %v3193_v45 = vadd.f32 %v2930_v28, %v2754_v24  ;;  %v3091_v44 = vpop.f32.mrf.mxu1  ;;  %v3293_v28 = vadd.f32 %v11622_v63, %v3191_v36 }
 0x6ba   :  { %v3194_v42 = vadd.f32 %v3091_v44, %v2755_v53  ;;  %3927 = vmatpush.msrb.mxu2 %v3672_v61 }
 0x6bb   :  { %v3295_v20 = vadd.f32 %v11622_v63, %v3193_v45  ;;  %v3552_v5 = vpop.permute.xlu1 %3551  ;;  %v3389_v45 = vmax.f32 %v3293_v28, 0.0 }
 0x6bc   :  { %v3296_v2 = vadd.f32 %v11625_v11, %v3194_v42  ;;  %v3609_v12 = vsel %vm3595_vm2, %v3552_v5, %v3554_v47  ;;  %v2661_v5 = vpop.f32.mrf.mxu3 }
 0x6bd   :  { %v3391_v10 = vmax.f32 %v3295_v20, 0.0  ;;  %v12493_v0 = vmax.f32 %v12121_v32, %v3609_v12  ;;  %v2757_v32 = vadd.f32 %v2655_v26, %v2318_v4  ;;  %v3294_v26 = vadd.f32 %v11625_v11, %v3192_v35  ;;  %v2500_v42 = vpop.f32.mrf.mxu2  ;;  %v15368_v12 = vld [vmem:[#allocation599_spill] sm:$0xff] }
 0x6be   :  { %v3392_v31 = vmax.f32 %v3296_v2, 0.0  ;;  %v15367_v2 = vld [vmem:[#allocation553_spill] sm:$0xff]  ;;  %v2320_v4 = vadd.f32 %v15370_v39, %v15369_v57  ;;  %v15379_v39 = vld [vmem:[#allocation559_spill] sm:$0xff] }
 0x6bf   :  { %v12503_v24 = vmax.f32 %v3387_v7, %v3391_v10  ;;  %v3390_v58 = vmax.f32 %v3294_v26, 0.0  ;;  %v2319_v7 = vadd.f32 %v15368_v12, %v15367_v2  ;;  %v15373_v26 = vld [vmem:[#allocation558_spill] sm:$0xff] }
 0x6c0   :  { %7043 = vmatmul.msk.f32.gmra.mxu2 %vm3729_vm3, %v12493_v0  ;;  %7059 = vmatmul.msk.f32.gmra.mxu3 %vm3729_vm3, %v12493_v0  ;;  %v2933_v14 = vpop.f32.mrf.mxu0  ;;  %v3444_v53 = vmax.f32 %v3388_v6, %v3392_v31  ;;  %v2759_v41 = vadd.f32 %v2658_v56, %v2320_v4  ;;  %v15380_v4 = vld [vmem:[#allocation605_spill] sm:$0xff] }
 0x6c1   :  { %7195 = vmatmul.msk.f32.gmra.mxu0 %vm3729_vm3, %v12493_v0  ;;  %7211 = vmatmul.msk.f32.gmra.mxu1 %vm3729_vm3, %v12493_v0  ;;  %v3195_v19 = vadd.f32 %v2933_v14, %v2756_v55  ;;  %v3094_v62 = vpop.f32.mrf.mxu1  ;;  %v2758_v6 = vadd.f32 %v2497_v50, %v2319_v7  ;;  %v15371_v55 = vld [vmem:[#allocation557_spill] sm:$0xff]  ;;  %v15374_v50 = vld [vmem:[#allocation604_spill] sm:$0xff] }
 0x6c2   :  { %v3196_v52 = vadd.f32 %v3094_v62, %v2757_v32  ;;  %3579 = vrot.lane.b32.xlu1 %v12503_v24, %s7427_s13  ;;  %3581 = vrot.lane.b32.xlu2 %v3444_v53, %s7427_s13  ;;  %v15372_v32 = vld [vmem:[#allocation603_spill] sm:$0xff]  ;;  %v3671_v62 = vld [vmem:[%s14594_s3 + $0x18] sm:$0xff] }
 0x6c3   :  { %v3297_v59 = vadd.f32 %v11622_v63, %v3195_v19  ;;  %v2323_v14 = vadd.f32 %v15372_v32, %v15371_v55  ;;  %v3670_v19 = vld [vmem:[%s14594_s3 + $0x10] sm:$0xff]  ;;  %3993 = vmatpush.msrb.mxu3 %v3671_v62 }
 0x6c4   :  { %v3298_v22 = vadd.f32 %v11625_v11, %v3196_v52  ;;  %v2664_v35 = vpop.f32.mrf.mxu3  ;;  %v2324_v52 = vadd.f32 %v15374_v50, %v15373_v26  ;;  %3928 = vmatpush.msrb.mxu2 %v3670_v19 }
 0x6c5   :  { %v3393_v44 = vmax.f32 %v3297_v59, 0.0  ;;  %v2503_v36 = vpop.f32.mrf.mxu2 }
 0x6c6   :  { %v3394_v60 = vmax.f32 %v3298_v22, 0.0  ;;  %v2762_v22 = vadd.f32 %v2503_v36, %v2323_v14 }
 0x6c7   :  { %v12526_v43 = vmax.f32 %v3389_v45, %v3393_v44  ;;  %v2763_v45 = vadd.f32 %v2664_v35, %v2324_v52  ;;  %v15381_v35 = vld [vmem:[#allocation560_spill] sm:$0xff] }
 0x6c8   :  { %v2936_v47 = vpop.f32.mrf.mxu0  ;;  %v3446_v20 = vmax.f32 %v3390_v58, %v3394_v60  ;;  %v15375_v58 = vld [vmem:[#allocation555_spill] sm:$0xff]  ;;  %v15376_v60 = vld [vmem:[#allocation601_spill] sm:$0xff] }
 0x6c9   :  { %v3097_v27 = vpop.f32.mrf.mxu1  ;;  %3583 = vrot.lane.b32.xlu0 %v12526_v43, %s7427_s13  ;;  %v3197_v53 = vadd.f32 %v2936_v47, %v2758_v6  ;;  %v2321_v18 = vadd.f32 %v15376_v60, %v15375_v58  ;;  %v2325_v6 = vadd.f32 %v15380_v4, %v15379_v39 }
 0x6ca   :  { %3585 = vrot.lane.b32.xlu1 %v3446_v20, %s7427_s13  ;;  %v3198_v59 = vadd.f32 %v3097_v27, %v2759_v41  ;;  %v15377_v20 = vld [vmem:[#allocation556_spill] sm:$0xff]  ;;  %v15378_v27 = vld [vmem:[#allocation602_spill] sm:$0xff] }
 0x6cb   :  { %v3299_v46 = vadd.f32 %v11622_v63, %v3197_v53  ;;  %v2322_v61 = vadd.f32 %v15378_v27, %v15377_v20  ;;  %v2760_v12 = vadd.f32 %v2500_v42, %v2321_v18 }
 0x6cc   :  { %v3300_v3 = vadd.f32 %v11625_v11, %v3198_v59  ;;  %v2667_v14 = vpop.f32.mrf.mxu3 }
 0x6cd   :  { %v2506_v7 = vpop.f32.mrf.mxu2  ;;  %v2761_v57 = vadd.f32 %v2661_v5, %v2322_v61  ;;  %v3395_v53 = vmax.f32 %v3299_v46, 0.0 }
 0x6ce   :  { %v3396_v62 = vmax.f32 %v3300_v3, 0.0  ;;  %v2764_v52 = vadd.f32 %v2506_v7, %v2325_v6  ;;  %v7124_v7 = vld [vmem:[%s14594_s3 + $0x2c0] sm:$0xff] }
 0x6d0   :  { %v2939_v13 = vpop.f32.mrf.mxu0 }
 0x6d1   :  { %v3100_v10 = vpop.f32.mrf.mxu1 }
 0x6d2   :  { %v3200_v26 = vadd.f32 %v3100_v10, %v2761_v57  ;;  %v3668_v10 = vld [vmem:[%s14594_s3] sm:$0xff] }
 0x6d3   :  { %v3556_v31 = vpop.permute.xlu0 %3555  ;;  %3929 = vmatpush.msrb.mxu2 %v3668_v10 }
 0x6d4   :  { %v3558_v1 = vpop.permute.xlu1 %3557  ;;  %v3302_v18 = vadd.f32 %v11625_v11, %v3200_v26 }
 0x6d5   :  { %v3610_v28 = vsel %vm3595_vm2, %v3556_v31, %v3558_v1  ;;  %v15382_v31 = vld [vmem:[#allocation606_spill] sm:$0xff]  ;;  %v3560_v1 = vpop.permute.xlu2 %3559  ;;  %4082 = vmatpush.msra.mxu2 %v7124_v7 }
 0x6d6   :  { %v12553_v56 = vmax.f32 %v12206_v51, %v3610_v28  ;;  %v2326_v41 = vadd.f32 %v15382_v31, %v15381_v35  ;;  %v3199_v28 = vadd.f32 %v2939_v13, %v2760_v12  ;;  %v3398_v61 = vmax.f32 %v3302_v18, 0.0  ;;  %v7120_v35 = vld [vmem:[%s14594_s3 + $0x2a0] sm:$0xff]  ;;  %v12637_v31 = vpop.f32.mrf.mxu2 }
 0x6d8   :  { %7044 = vmatmul.msk.f32.gmra.mxu2 %vm3729_vm3, %v12553_v56  ;;  %7060 = vmatmul.msk.f32.gmra.mxu3 %vm3729_vm3, %v12553_v56  ;;  %v2942_v44 = vpop.f32.mrf.mxu0 }
 0x6d9   :  { %7196 = vmatmul.msk.f32.gmra.mxu0 %vm3729_vm3, %v12553_v56  ;;  %7212 = vmatmul.msk.f32.gmra.mxu1 %vm3729_vm3, %v12553_v56  ;;  %v3201_v51 = vadd.f32 %v2942_v44, %v2762_v22  ;;  %v3103_v47 = vpop.f32.mrf.mxu1  ;;  %v2765_v22 = vadd.f32 %v2667_v14, %v2326_v41  ;;  %v3301_v44 = vadd.f32 %v11622_v63, %v3199_v28  ;;  %v12639_v41 = vpop.f32.mrf.mxu3  ;;  %v7118_v28 = vld [vmem:[%s14594_s3 + $0x290] sm:$0xff] }
 0x6da   :  { %v3202_v2 = vadd.f32 %v3103_v47, %v2763_v45 }
 0x6db   :  { %v3303_v36 = vadd.f32 %v11622_v63, %v3201_v51  ;;  %v3397_v20 = vmax.f32 %v3301_v44, 0.0 }
 0x6dc   :  { %v3304_v55 = vadd.f32 %v11625_v11, %v3202_v2  ;;  %v3562_v32 = vpop.permute.xlu0 %3561 }
 0x6dd   :  { %v3399_v19 = vmax.f32 %v3303_v36, 0.0  ;;  %v3611_v42 = vsel %vm3595_vm2, %v3560_v1, %v3562_v32  ;;  %v7125_v36 = vld [vmem:[%s14594_s3 + $0x2c8] sm:$0xff]  ;;  %v3566_v57 = vpop.permute.xlu2 %3565 }
 0x6de   :  { %v3400_v50 = vmax.f32 %v3304_v55, 0.0  ;;  %v12577_v5 = vmax.f32 %v12235_v21, %v3611_v42  ;;  %v3669_v21 = vld [vmem:[%s14594_s3 + $0x8] sm:$0xff]  ;;  %v12659_v42 = vpop.f32.mrf.mxu2 }
 0x6df   :  { %v12579_v59 = vmax.f32 %v3395_v53, %v3399_v19  ;;  %3994 = vmatpush.msrb.mxu3 %v3669_v21 }
 0x6e0   :  { %7045 = vmatmul.msk.f32.gmra.mxu2 %vm3729_vm3, %v12577_v5  ;;  %7061 = vmatmul.msk.f32.gmra.mxu3 %vm3729_vm3, %v12577_v5  ;;  %v2945_v13 = vpop.f32.mrf.mxu0  ;;  %v3448_v45 = vmax.f32 %v3396_v62, %v3400_v50 }
 0x6e1   :  { %15383 = vst [vmem:[#allocation561_spill] sm:$0xff] %v12579_v59  ;;  %7197 = vmatmul.msk.f32.gmra.mxu0 %vm3729_vm3, %v12577_v5  ;;  %7213 = vmatmul.msk.f32.gmra.mxu1 %vm3729_vm3, %v12577_v5  ;;  %v3203_v58 = vadd.f32 %v2945_v13, %v2764_v52  ;;  %v3106_v60 = vpop.f32.mrf.mxu1  ;;  %v12661_v62 = vpop.f32.mrf.mxu3  ;;  %v7117_v13 = vld [vmem:[%s14594_s3 + $0x288] sm:$0xff] }
 0x6e2   :  { %v3204_v46 = vadd.f32 %v3106_v60, %v2765_v22  ;;  %3589 = vrot.lane.b32.xlu0 %v3448_v45, %s7427_s13  ;;  %3587 = vrot.lane.b32.xlu2 %v12579_v59, %s7427_s13  ;;  %v7116_v22 = vld [vmem:[%s14594_s3 + $0x280] sm:$0xff]  ;;  %v7115_v60 = vld [vmem:[%s14594_s3 + $0x278] sm:$0xff] }
 0x6e3   :  { %v3305_v51 = vadd.f32 %v11622_v63, %v3203_v58  ;;  %4147 = vmatpush.msra.mxu3 %v7125_v36  ;;  %v7123_v63 = vld [vmem:[%s14594_s3 + $0x2b8] sm:$0xff]  ;;  %v7114_v58 = vld [vmem:[%s14594_s3 + $0x270] sm:$0xff]  ;;  %v7225_v59 = vld [vmem:[%s14594_s3 + $0x3e8] sm:$0xff] }
 0x6e4   :  { %v3306_v47 = vadd.f32 %v11625_v11, %v3204_v46  ;;  %v7122_v11 = vld [vmem:[%s14594_s3 + $0x2b0] sm:$0xff] }
 0x6e5   :  { %v3401_v27 = vmax.f32 %v3305_v51, 0.0  ;;  %4083 = vmatpush.msra.mxu2 %v7122_v11  ;;  %4148 = vmatpush.msra.mxu3 %v7123_v63  ;;  %v3500_v53 = vpop.permute.xlu2 %3499  ;;  %v7111_v11 = vld [vmem:[%s14594_s3 + $0x258] sm:$0xff]  ;;  %v7109_v63 = vld [vmem:[%s14594_s3 + $0x248] sm:$0xff] }
 0x6e6   :  { %v3402_v3 = vmax.f32 %v3306_v47, 0.0  ;;  %v12675_v21 = vpop.f32.mrf.mxu2 }
 0x6e7   :  { %v12602_v2 = vmax.f32 %v3397_v20, %v3401_v27  ;;  %4084 = vmatpush.msra.mxu2 %v7120_v35  ;;  %v7113_v27 = vld [vmem:[%s14594_s3 + $0x268] sm:$0xff] }
 0x6e8   :  { %v3450_v12 = vmax.f32 %v3398_v61, %v3402_v3 }
 0x6e9   :  { %15384 = vst [vmem:[#allocation489_spill] sm:$0xff] %v12602_v2  ;;  %3591 = vrot.lane.b32.xlu1 %v12602_v2, %s7427_s13  ;;  %4085 = vmatpush.msra.mxu2 %v7118_v28  ;;  %v12677_v44 = vpop.f32.mrf.mxu3  ;;  %v7107_v28 = vld [vmem:[%s14594_s3 + $0x238] sm:$0xff]  ;;  %v7226_v2 = vld [vmem:[%s14594_s3 + $0x3f0] sm:$0xff] }
 0x6ea   :  { %3593 = vrot.lane.b32.xlu2 %v3450_v12, %s7427_s13 }
 0x6eb   :  { %4086 = vmatpush.msra.mxu2 %v7116_v22  ;;  %v7104_v22 = vld [vmem:[%s14594_s3 + $0x220] sm:$0xff] }
 0x6ed   :  { %v3506_v45 = vpop.permute.xlu2 %3505  ;;  %4087 = vmatpush.msra.mxu2 %v7114_v58  ;;  %v7100_v58 = vld [vmem:[%s14594_s3 + $0x200] sm:$0xff] }
 0x6ee   :  { %v12691_v47 = vpop.f32.mrf.mxu2 }
 0x6f1   :  { %v12693_v20 = vpop.f32.mrf.mxu3 }
 0x6f3   :  { %v3564_v39 = vpop.permute.xlu1 %3563 }
 0x6f4   :  { %v3612_v4 = vsel %vm3595_vm2, %v3564_v39, %v3566_v57 }
 0x6f5   :  { %v12621_v6 = vmax.f32 %v12311_v33, %v3612_v4  ;;  %v7121_v33 = vld [vmem:[%s14594_s3 + $0x2a8] sm:$0xff] }
 0x6f6   :  { %4149 = vmatpush.msra.mxu3 %v7121_v33  ;;  %v12713_v7 = vpop.f32.mrf.mxu2 }
 0x6f7   :  { %7046 = vmatmul.msk.f32.gmra.mxu2 %vm3729_vm3, %v12621_v6  ;;  %7062 = vmatmul.msk.f32.gmra.mxu3 %vm3729_vm3, %v12621_v6 }
 0x6f8   :  { %7198 = vmatmul.msk.f32.gmra.mxu0 %vm3729_vm3, %v12621_v6  ;;  %7214 = vmatmul.msk.f32.gmra.mxu1 %vm3729_vm3, %v12621_v6 }
 0x6f9   :  { %v12715_v36 = vpop.f32.mrf.mxu3 }
 0x6fb   :  { %v3568_v55 = vpop.permute.xlu0 %3567 }
 0x6fc   :  { %v3570_v1 = vpop.permute.xlu1 %3569 }
 0x6fd   :  { %v3613_v32 = vsel %vm3595_vm2, %v3568_v55, %v3570_v1 }
 0x6fe   :  { %v12643_v14 = vmax.f32 %v12335_v37, %v3613_v32  ;;  %v7119_v37 = vld [vmem:[%s14594_s3 + $0x298] sm:$0xff]  ;;  %v12741_v57 = vpop.f32.mrf.mxu2 }
 0x6ff   :  { %4150 = vmatpush.msra.mxu3 %v7119_v37 }
 0x700   :  { %7047 = vmatmul.msk.f32.gmra.mxu2 %vm3729_vm3, %v12643_v14  ;;  %7063 = vmatmul.msk.f32.gmra.mxu3 %vm3729_vm3, %v12643_v14 }
 0x701   :  { %7199 = vmatmul.msk.f32.gmra.mxu0 %vm3729_vm3, %v12643_v14  ;;  %7215 = vmatmul.msk.f32.gmra.mxu1 %vm3729_vm3, %v12643_v14  ;;  %v12743_v39 = vpop.f32.mrf.mxu3 }
 0x702   :  { %4151 = vmatpush.msra.mxu3 %v7117_v13  ;;  %v7105_v13 = vld [vmem:[%s14594_s3 + $0x228] sm:$0xff] }
 0x703   :  { %v3502_v19 = vpop.permute.xlu0 %3501  ;;  %v3576_v61 = vpop.permute.xlu2 %3575 }
 0x704   :  { %v3596_v26 = vsel %vm3595_vm2, %v3500_v53, %v3502_v19  ;;  %v3504_v52 = vpop.permute.xlu1 %3503  ;;  %4152 = vmatpush.msra.mxu3 %v7115_v60  ;;  %v7106_v53 = vld [vmem:[%s14594_s3 + $0x230] sm:$0xff]  ;;  %v7101_v60 = vld [vmem:[%s14594_s3 + $0x208] sm:$0xff] }
 0x705   :  { %v3644_v50 = vmax.f32 %v11639_v16, %v3596_v26  ;;  %v3597_v10 = vsel %vm3595_vm2, %v3504_v52, %v3506_v45  ;;  %v7103_v45 = vld [vmem:[%s14594_s3 + $0x218] sm:$0xff] }
 0x706   :  { %v3645_v16 = vmax.f32 %v11659_v40, %v3597_v10  ;;  %4153 = vmatpush.msra.mxu3 %v7113_v27  ;;  %v12749_v4 = vpop.f32.mrf.mxu2 }
 0x708   :  { %7064 = vmatmul.msk.f32.vlgmr.msrb.gmra.mxu2 %vm3729_vm3, %v3644_v50  ;;  %7080 = vmatmul.msk.f32.vlgmr.msrb.gmra.mxu3 %vm3729_vm3, %v3644_v50 }
 0x709   :  { %4154 = vmatpush.msra.mxu3 %v7111_v11  ;;  %v12751_v35 = vpop.f32.mrf.mxu3  ;;  %v7097_v11 = vld [vmem:[%s14594_s3 + $0x1e8] sm:$0xff] }
 0x70b   :  { %4155 = vmatpush.msra.mxu3 %v7109_v63 }
 0x70d   :  { %4156 = vmatpush.msra.mxu3 %v7107_v28 }
 0x70f   :  { %4157 = vmatpush.msra.mxu3 %v7105_v13 }
 0x710   :  { %7065 = vmatmul.msk.f32.gmra.mxu2 %vm3729_vm3, %v3645_v16  ;;  %7081 = vmatmul.msk.f32.gmra.mxu3 %vm3729_vm3, %v3645_v16 }
 0x711   :  { %v12773_v37 = vpop.f32.mrf.mxu3  ;;  %4158 = vmatpush.msra.mxu3 %v7103_v45  ;;  %v7243_v45 = vld [vmem:[%s14594_s3 + $0x478] sm:$0xff] }
 0x713   :  { %4159 = vmatpush.msra.mxu3 %v7101_v60 }
 0x714   :  { %v3572_v18 = vpop.permute.xlu0 %3571  ;;  %v3574_v40 = vpop.permute.xlu1 %3573 }
 0x715   :  { %v3614_v46 = vsel %vm3595_vm2, %v3572_v18, %v3574_v40 }
 0x716   :  { %v12689_v51 = vmax.f32 %v12414_v25, %v3614_v46  ;;  %v7112_v25 = vld [vmem:[%s14594_s3 + $0x260] sm:$0xff]  ;;  %v7098_v46 = vld [vmem:[%s14594_s3 + $0x1f0] sm:$0xff] }
 0x717   :  { %4088 = vmatpush.msra.mxu2 %v7112_v25  ;;  %v7099_v25 = vld [vmem:[%s14594_s3 + $0x1f8] sm:$0xff] }
 0x718   :  { %7066 = vmatmul.msk.f32.gmra.mxu2 %vm3729_vm3, %v11923_v29  ;;  %7082 = vmatmul.msk.f32.gmra.mxu3 %vm3729_vm3, %v11923_v29 }
 0x719   :  { %7200 = vmatmul.msk.f32.gmra.mxu0 %vm3729_vm3, %v12689_v51  ;;  %7216 = vmatmul.msk.f32.gmra.mxu1 %vm3729_vm3, %v12689_v51 }
 0x71a   :  { %v12801_v16 = vpop.f32.mrf.mxu3  ;;  %4160 = vmatpush.msra.mxu3 %v7099_v25 }
 0x71c   :  { %v3578_v3 = vpop.permute.xlu0 %3577  ;;  %v3582_v33 = vpop.permute.xlu2 %3581  ;;  %4161 = vmatpush.msra.mxu3 %v7097_v11  ;;  %v7241_v11 = vld [vmem:[%s14594_s3 + $0x468] sm:$0xff] }
 0x71d   :  { %v3615_v29 = vsel %vm3595_vm2, %v3576_v61, %v3578_v3 }
 0x71e   :  { %v12711_v12 = vmax.f32 %v12440_v34, %v3615_v29  ;;  %v7110_v34 = vld [vmem:[%s14594_s3 + $0x250] sm:$0xff] }
 0x71f   :  { %4089 = vmatpush.msra.mxu2 %v7110_v34  ;;  %v7096_v34 = vld [vmem:[%s14594_s3 + $0x1e0] sm:$0xff] }
 0x720   :  { %7067 = vmatmul.msk.f32.gmra.mxu2 %vm3729_vm3, %v11946_v54  ;;  %7083 = vmatmul.msk.f32.gmra.mxu3 %vm3729_vm3, %v11946_v54  ;;  %v7108_v54 = vld [vmem:[%s14594_s3 + $0x240] sm:$0xff] }
 0x721   :  { %7201 = vmatmul.msk.f32.gmra.mxu0 %vm3729_vm3, %v12711_v12  ;;  %7217 = vmatmul.msk.f32.gmra.mxu1 %vm3729_vm3, %v12711_v12 }
 0x722   :  { %4090 = vmatpush.msra.mxu2 %v7108_v54 }
 0x723   :  { %v12815_v40 = vpop.f32.mrf.mxu3 }
 0x724   :  { %4091 = vmatpush.msra.mxu2 %v7106_v53  ;;  %v7247_v53 = vld [vmem:[%s14594_s3 + $0x498] sm:$0xff] }
 0x726   :  { %4092 = vmatpush.msra.mxu2 %v7104_v22 }
 0x728   :  { %7068 = vmatmul.msk.f32.gmra.mxu2 %vm3729_vm3, %v11968_v38  ;;  %7084 = vmatmul.msk.f32.gmra.mxu3 %vm3729_vm3, %v11968_v38 }
 0x730   :  { %7069 = vmatmul.msk.f32.gmra.mxu2 %vm3729_vm3, %v12071_v49  ;;  %7085 = vmatmul.msk.f32.gmra.mxu3 %vm3729_vm3, %v12071_v49 }
 0x734   :  { %v3580_v1 = vpop.permute.xlu1 %3579 }
 0x735   :  { %v3616_v55 = vsel %vm3595_vm2, %v3580_v1, %v3582_v33  ;;  %v7248_v33 = vld [vmem:[%s14594_s3 + $0x4a0] sm:$0xff]  ;;  %v7249_v1 = vld [vmem:[%s14594_s3 + $0x4a8] sm:$0xff] }
 0x736   :  { %v12755_v32 = vmax.f32 %v12503_v24, %v3616_v55  ;;  %v12771_v24 = vpop.f32.mrf.mxu2  ;;  %4545 = vmatpush.msrb.mxu3 %v7249_v1  ;;  %v7246_v55 = vld [vmem:[%s14594_s3 + $0x490] sm:$0xff] }
 0x737   :  { %v7238_v1 = vld [vmem:[%s14594_s3 + $0x450] sm:$0xff] }
 0x738   :  { %15385 = vst [vmem:[#allocation490_spill] sm:$0xff] %v12755_v32  ;;  %7070 = vmatmul.msk.f32.gmra.mxu2 %vm3729_vm3, %v12170_v15  ;;  %7086 = vmatmul.msk.f32.gmra.mxu3 %vm3729_vm3, %v12170_v15 }
 0x739   :  { %7202 = vmatmul.msk.f32.gmra.mxu0 %vm3729_vm3, %v12755_v32  ;;  %7218 = vmatmul.msk.f32.gmra.mxu1 %vm3729_vm3, %v12755_v32 }
 0x73a   :  { %4546 = vmatpush.msrb.mxu3 %v7247_v53 }
 0x73b   :  { %v3584_v19 = vpop.permute.xlu0 %3583  ;;  %v12829_v61 = vpop.f32.mrf.mxu3 }
 0x73c   :  { %v3586_v26 = vpop.permute.xlu1 %3585 }
 0x73d   :  { %v3617_v50 = vsel %vm3595_vm2, %v3584_v19, %v3586_v26  ;;  %v7244_v26 = vld [vmem:[%s14594_s3 + $0x480] sm:$0xff] }
 0x73e   :  { %v12777_v52 = vmax.f32 %v12526_v43, %v3617_v50  ;;  %v7102_v43 = vld [vmem:[%s14594_s3 + $0x210] sm:$0xff]  ;;  %v12799_v10 = vpop.f32.mrf.mxu2  ;;  %v7245_v50 = vld [vmem:[%s14594_s3 + $0x488] sm:$0xff] }
 0x73f   :  { %4093 = vmatpush.msra.mxu2 %v7102_v43  ;;  %4547 = vmatpush.msrb.mxu3 %v7245_v50  ;;  %v7242_v43 = vld [vmem:[%s14594_s3 + $0x470] sm:$0xff]  ;;  %v7237_v50 = vld [vmem:[%s14594_s3 + $0x448] sm:$0xff] }
 0x740   :  { %15386 = vst [vmem:[#allocation493_spill] sm:$0xff] %v12777_v52  ;;  %7071 = vmatmul.msk.f32.gmra.mxu2 %vm3729_vm3, %v12201_v48  ;;  %7087 = vmatmul.msk.f32.gmra.mxu3 %vm3729_vm3, %v12201_v48 }
 0x741   :  { %7203 = vmatmul.msk.f32.gmra.mxu0 %vm3729_vm3, %v12777_v52  ;;  %7219 = vmatmul.msk.f32.gmra.mxu1 %vm3729_vm3, %v12777_v52 }
 0x742   :  { %4094 = vmatpush.msra.mxu2 %v7100_v58  ;;  %4548 = vmatpush.msrb.mxu3 %v7243_v45  ;;  %v7234_v45 = vld [vmem:[%s14594_s3 + $0x430] sm:$0xff] }
 0x743   :  { %v12837_v29 = vpop.f32.mrf.mxu3 }
 0x744   :  { %4095 = vmatpush.msra.mxu2 %v7098_v46  ;;  %15388 = vst [vmem:[#allocation491_spill] sm:$0xff] %v12837_v29  ;;  %4549 = vmatpush.msrb.mxu3 %v7241_v11 }
 0x746   :  { %v12813_v18 = vpop.f32.mrf.mxu2  ;;  %4096 = vmatpush.msra.mxu2 %v7096_v34  ;;  %v7240_v34 = vld [vmem:[%s14594_s3 + $0x460] sm:$0xff] }
 0x748   :  { %7072 = vmatmul.msk.f32.gmra.mxu2 %vm3729_vm3, %v12264_v30  ;;  %7088 = vmatmul.msk.f32.gmra.mxu3 %vm3729_vm3, %v12264_v30 }
 0x749   :  { %4480 = vmatpush.msrb.mxu2 %v7248_v33 }
 0x74b   :  { %4481 = vmatpush.msrb.mxu2 %v7246_v55  ;;  %v7239_v55 = vld [vmem:[%s14594_s3 + $0x458] sm:$0xff] }
 0x74c   :  { %4550 = vmatpush.msrb.mxu3 %v7239_v55  ;;  %v7233_v55 = vld [vmem:[%s14594_s3 + $0x428] sm:$0xff] }
 0x74d   :  { %4482 = vmatpush.msrb.mxu2 %v7244_v26  ;;  %v7236_v26 = vld [vmem:[%s14594_s3 + $0x440] sm:$0xff] }
 0x74e   :  { %v12827_v27 = vpop.f32.mrf.mxu2  ;;  %4551 = vmatpush.msrb.mxu3 %v7237_v50 }
 0x74f   :  { %4483 = vmatpush.msrb.mxu2 %v7242_v43 }
 0x750   :  { %7073 = vmatmul.msk.f32.gmra.mxu2 %vm3729_vm3, %v12302_v17  ;;  %7089 = vmatmul.msk.f32.gmra.mxu3 %vm3729_vm3, %v12302_v17 }
 0x751   :  { %4484 = vmatpush.msrb.mxu2 %v7240_v34  ;;  %v7235_v34 = vld [vmem:[%s14594_s3 + $0x438] sm:$0xff] }
 0x752   :  { %4552 = vmatpush.msrb.mxu3 %v7235_v34  ;;  %v7231_v34 = vld [vmem:[%s14594_s3 + $0x418] sm:$0xff] }
 0x753   :  { %4485 = vmatpush.msrb.mxu2 %v7238_v1  ;;  %v7232_v1 = vld [vmem:[%s14594_s3 + $0x420] sm:$0xff] }
 0x754   :  { %4553 = vmatpush.msrb.mxu3 %v7233_v55 }
 0x755   :  { %4486 = vmatpush.msrb.mxu2 %v7236_v26 }
 0x756   :  { %v12835_v3 = vpop.f32.mrf.mxu2  ;;  %4554 = vmatpush.msrb.mxu3 %v7231_v34 }
 0x757   :  { %15387 = vst [vmem:[#allocation494_spill] sm:$0xff] %v12835_v3  ;;  %4487 = vmatpush.msrb.mxu2 %v7234_v45  ;;  %v7230_v45 = vld [vmem:[%s14594_s3 + $0x410] sm:$0xff] }
 0x758   :  { %7074 = vmatmul.msk.f32.gmra.mxu2 %vm3729_vm3, %v12368_v23  ;;  %7090 = vmatmul.msk.f32.gmra.mxu3 %vm3729_vm3, %v12368_v23 }
 0x759   :  { %4488 = vmatpush.msrb.mxu2 %v7232_v1 }
 0x75b   :  { %v12851_v63 = vpop.f32.mrf.mxu3  ;;  %4489 = vmatpush.msrb.mxu2 %v7230_v45 }
 0x75c   :  { %15390 = vst [vmem:[#allocation495_spill] sm:$0xff] %v12851_v63 }
 0x75e   :  { %v12849_v54 = vpop.f32.mrf.mxu2 }
 0x75f   :  { %15389 = vst [vmem:[#allocation492_spill] sm:$0xff] %v12849_v54 }
 0x760   :  { %7075 = vmatmul.msk.f32.gmra.mxu2 %vm3729_vm3, %v12404_v8  ;;  %7091 = vmatmul.msk.f32.gmra.mxu3 %vm3729_vm3, %v12404_v8 }
 0x763   :  { %v12875_v19 = vpop.f32.mrf.mxu3 }
 0x764   :  { %15392 = vst [vmem:[#allocation562_spill] sm:$0xff] %v12875_v19  ;;  %v7222_v19 = vld [vmem:[%s14594_s3 + $0x3d0] sm:$0xff] }
 0x766   :  { %v12873_v28 = vpop.f32.mrf.mxu2 }
 0x767   :  { %15391 = vst [vmem:[#allocation496_spill] sm:$0xff] %v12873_v28  ;;  %v7223_v28 = vld [vmem:[%s14594_s3 + $0x3d8] sm:$0xff] }
 0x768   :  { %7076 = vmatmul.msk.f32.gmra.mxu2 %vm3729_vm3, %v12463_v9  ;;  %7092 = vmatmul.msk.f32.gmra.mxu3 %vm3729_vm3, %v12463_v9 }
 0x770   :  { %7077 = vmatmul.msk.f32.gmra.mxu2 %vm3729_vm3, %v12493_v0  ;;  %7093 = vmatmul.msk.f32.gmra.mxu3 %vm3729_vm3, %v12493_v0 }
 0x778   :  { %7078 = vmatmul.msk.f32.gmra.mxu2 %vm3729_vm3, %v12553_v56  ;;  %7094 = vmatmul.msk.f32.gmra.mxu3 %vm3729_vm3, %v12553_v56 }
 0x77a   :  { %v12887_v22 = vpop.f32.mrf.mxu2  ;;  %v12889_v13 = vpop.f32.mrf.mxu3 }
 0x77b   :  { %15393 = vst [vmem:[#allocation563_spill] sm:$0xff] %v12887_v22  ;;  %v7224_v22 = vld [vmem:[%s14594_s3 + $0x3e0] sm:$0xff] }
 0x77c   :  { %15394 = vst [vmem:[#allocation564_spill] sm:$0xff] %v12889_v13  ;;  %v7227_v13 = vld [vmem:[%s14594_s3 + $0x3f8] sm:$0xff] }
 0x780   :  { %7079 = vmatmul.msk.f32.gmra.mxu2 %vm3729_vm3, %v12577_v5  ;;  %7095 = vmatmul.msk.f32.gmra.mxu3 %vm3729_vm3, %v12577_v5 }
 0x783   :  { %v12901_v58 = vpop.f32.mrf.mxu2  ;;  %v12903_v60 = vpop.f32.mrf.mxu3 }
 0x784   :  { %15395 = vst [vmem:[#allocation497_spill] sm:$0xff] %v12901_v58  ;;  %v7229_v58 = vld [vmem:[%s14594_s3 + $0x408] sm:$0xff] }
 0x785   :  { %15396 = vst [vmem:[#allocation498_spill] sm:$0xff] %v12903_v60  ;;  %v7228_v60 = vld [vmem:[%s14594_s3 + $0x400] sm:$0xff]  ;;  %4555 = vmatpush.msrb.mxu3 %v7229_v58 }
 0x786   :  { %4490 = vmatpush.msrb.mxu2 %v7228_v60 }
 0x787   :  { %4556 = vmatpush.msrb.mxu3 %v7227_v13 }
 0x788   :  { %7126 = vmatmul.msk.f32.vlgmr.msra.gmra.mxu2 %vm3729_vm3, %v11968_v38  ;;  %7142 = vmatmul.msk.f32.vlgmr.msra.gmra.mxu3 %vm3729_vm3, %v11968_v38 }
 0x789   :  { %4491 = vmatpush.msrb.mxu2 %v7226_v2  ;;  %4557 = vmatpush.msrb.mxu3 %v7225_v59 }
 0x78b   :  { %v12909_v46 = vpop.f32.mrf.mxu2  ;;  %v12911_v25 = vpop.f32.mrf.mxu3  ;;  %4492 = vmatpush.msrb.mxu2 %v7224_v22  ;;  %4558 = vmatpush.msrb.mxu3 %v7223_v28  ;;  %v7220_v28 = vld [vmem:[%s14594_s3 + $0x3c0] sm:$0xff] }
 0x78d   :  { %4493 = vmatpush.msrb.mxu2 %v7222_v19  ;;  %v7221_v19 = vld [vmem:[%s14594_s3 + $0x3c8] sm:$0xff] }
 0x78e   :  { %4559 = vmatpush.msrb.mxu3 %v7221_v19 }
 0x78f   :  { %4494 = vmatpush.msrb.mxu2 %v7220_v28 }
 0x790   :  { %7127 = vmatmul.msk.f32.gmra.mxu2 %vm3729_vm3, %v12071_v49  ;;  %7143 = vmatmul.msk.f32.gmra.mxu3 %vm3729_vm3, %v12071_v49 }
 0x793   :  { %v12923_v38 = vpop.f32.mrf.mxu2  ;;  %v12925_v33 = vpop.f32.mrf.mxu3 }
 0x798   :  { %7128 = vmatmul.msk.f32.gmra.mxu2 %vm3729_vm3, %v12170_v15  ;;  %7144 = vmatmul.msk.f32.gmra.mxu3 %vm3729_vm3, %v12170_v15 }
 0x79b   :  { %v12937_v49 = vpop.f32.mrf.mxu2  ;;  %v12939_v53 = vpop.f32.mrf.mxu3 }
 0x7a0   :  { %7129 = vmatmul.msk.f32.gmra.mxu2 %vm3729_vm3, %v12201_v48  ;;  %7145 = vmatmul.msk.f32.gmra.mxu3 %vm3729_vm3, %v12201_v48 }
 0x7a3   :  { %v12951_v15 = vpop.f32.mrf.mxu2  ;;  %v12953_v43 = vpop.f32.mrf.mxu3 }
 0x7a8   :  { %7130 = vmatmul.msk.f32.gmra.mxu2 %vm3729_vm3, %v12264_v30  ;;  %7146 = vmatmul.msk.f32.gmra.mxu3 %vm3729_vm3, %v12264_v30 }
 0x7ab   :  { %v12965_v48 = vpop.f32.mrf.mxu2  ;;  %v12967_v11 = vpop.f32.mrf.mxu3 }
 0x7b0   :  { %7131 = vmatmul.msk.f32.gmra.mxu2 %vm3729_vm3, %v12302_v17  ;;  %7147 = vmatmul.msk.f32.gmra.mxu3 %vm3729_vm3, %v12302_v17 }
 0x7b3   :  { %v12979_v26 = vpop.f32.mrf.mxu2  ;;  %v12981_v50 = vpop.f32.mrf.mxu3 }
 0x7b8   :  { %7132 = vmatmul.msk.f32.gmra.mxu2 %vm3729_vm3, %v12368_v23  ;;  %7148 = vmatmul.msk.f32.gmra.mxu3 %vm3729_vm3, %v12368_v23 }
 0x7bb   :  { %v12993_v1 = vpop.f32.mrf.mxu2  ;;  %v12995_v55 = vpop.f32.mrf.mxu3 }
 0x7c0   :  { %7133 = vmatmul.msk.f32.gmra.mxu2 %vm3729_vm3, %v12404_v8  ;;  %7149 = vmatmul.msk.f32.gmra.mxu3 %vm3729_vm3, %v12404_v8 }
 0x7c3   :  { %v13007_v45 = vpop.f32.mrf.mxu2  ;;  %v13009_v34 = vpop.f32.mrf.mxu3 }
 0x7c8   :  { %7134 = vmatmul.msk.f32.gmra.mxu2 %vm3729_vm3, %v12463_v9  ;;  %7150 = vmatmul.msk.f32.gmra.mxu3 %vm3729_vm3, %v12463_v9 }
 0x7cb   :  { %v13021_v58 = vpop.f32.mrf.mxu2  ;;  %v13023_v60 = vpop.f32.mrf.mxu3 }
 0x7d0   :  { %7135 = vmatmul.msk.f32.gmra.mxu2 %vm3729_vm3, %v12493_v0  ;;  %7151 = vmatmul.msk.f32.gmra.mxu3 %vm3729_vm3, %v12493_v0 }
 0x7d3   :  { %v13035_v2 = vpop.f32.mrf.mxu2  ;;  %v13037_v13 = vpop.f32.mrf.mxu3 }
 0x7d8   :  { %7136 = vmatmul.msk.f32.gmra.mxu2 %vm3729_vm3, %v12553_v56  ;;  %7152 = vmatmul.msk.f32.gmra.mxu3 %vm3729_vm3, %v12553_v56 }
 0x7db   :  { %v13049_v59 = vpop.f32.mrf.mxu2  ;;  %v13051_v22 = vpop.f32.mrf.mxu3 }
 0x7e0   :  { %7137 = vmatmul.msk.f32.gmra.mxu2 %vm3729_vm3, %v12577_v5  ;;  %7153 = vmatmul.msk.f32.gmra.mxu3 %vm3729_vm3, %v12577_v5 }
 0x7e3   :  { %v13063_v52 = vpop.f32.mrf.mxu2  ;;  %v13065_v63 = vpop.f32.mrf.mxu3 }
 0x7e4   :  { %15397 = vst [vmem:[#allocation501_spill] sm:$0xff] %v13063_v52 }
 0x7e5   :  { %15398 = vst [vmem:[#allocation502_spill] sm:$0xff] %v13065_v63 }
 0x7e8   :  { %7138 = vmatmul.msk.f32.gmra.mxu2 %vm3729_vm3, %v12621_v6  ;;  %7154 = vmatmul.msk.f32.gmra.mxu3 %vm3729_vm3, %v12621_v6 }
 0x7eb   :  { %v13071_v54 = vpop.f32.mrf.mxu2  ;;  %v13073_v32 = vpop.f32.mrf.mxu3 }
 0x7ec   :  { %15399 = vst [vmem:[#allocation565_spill] sm:$0xff] %v13071_v54 }
 0x7ed   :  { %15400 = vst [vmem:[#allocation499_spill] sm:$0xff] %v13073_v32 }
 0x7f0   :  { %7139 = vmatmul.msk.f32.gmra.mxu2 %vm3729_vm3, %v12643_v14  ;;  %7155 = vmatmul.msk.f32.gmra.mxu3 %vm3729_vm3, %v12643_v14 }
 0x7f3   :  { %v13079_v28 = vpop.f32.mrf.mxu2  ;;  %v13081_v19 = vpop.f32.mrf.mxu3 }
 0x7f4   :  { %15401 = vst [vmem:[#allocation500_spill] sm:$0xff] %v13079_v28 }
 0x7f5   :  { %15402 = vst [vmem:[#allocation503_spill] sm:$0xff] %v13081_v19 }
 0x7f8   :  { %7140 = vmatmul.msk.f32.gmra.mxu2 %vm3729_vm3, %v12689_v51  ;;  %7156 = vmatmul.msk.f32.gmra.mxu3 %vm3729_vm3, %v12689_v51 }
 0x7fb   :  { %v13087_v63 = vpop.f32.mrf.mxu2  ;;  %v13089_v54 = vpop.f32.mrf.mxu3 }
 0x7fc   :  { %15403 = vst [vmem:[#allocation504_spill] sm:$0xff] %v13087_v63  ;;  %v3932_v63 = vadd.f32 %v12909_v46, %v12637_v31  ;;  %v4000_v31 = vadd.f32 %v12925_v33, %v12661_v62 }
 0x7fd   :  { %15404 = vst [vmem:[#allocation566_spill] sm:$0xff] %v13089_v54  ;;  %v3997_v54 = vadd.f32 %v12911_v25, %v12639_v41 }
 0x800   :  { %7141 = vmatmul.msk.f32.gmra.mxu2 %vm3729_vm3, %v12711_v12  ;;  %7157 = vmatmul.msk.f32.gmra.mxu3 %vm3729_vm3, %v12711_v12 }
 0x803   :  { %v13095_v32 = vpop.f32.mrf.mxu2  ;;  %v13097_v28 = vpop.f32.mrf.mxu3 }
 0x808   :  { %7250 = vmatmul.msk.f32.vlgmr.msrb.gmra.mxu2 %vm3729_vm3, %v12264_v30  ;;  %7266 = vmatmul.msk.f32.vlgmr.msrb.gmra.mxu3 %vm3729_vm3, %v12264_v30  ;;  %v3935_v30 = vadd.f32 %v12923_v38, %v12659_v42  ;;  %v4003_v42 = vadd.f32 %v12939_v53, %v12677_v44 }
 0x80b   :  { %v4098_v19 = vpop.f32.mrf.mxu2  ;;  %v4163_v29 = vpop.f32.mrf.mxu3 }
 0x80c   :  { %v13107_v52 = vadd.f32 %v4098_v19, %v3932_v63  ;;  %v13109_v3 = vadd.f32 %v4163_v29, %v3997_v54 }
 0x810   :  { %7251 = vmatmul.msk.f32.gmra.mxu2 %vm3729_vm3, %v12302_v17  ;;  %7267 = vmatmul.msk.f32.gmra.mxu3 %vm3729_vm3, %v12302_v17  ;;  %v3938_v17 = vadd.f32 %v12937_v49, %v12675_v21  ;;  %v4006_v21 = vadd.f32 %v12953_v43, %v12693_v20 }
 0x813   :  { %v4101_v46 = vpop.f32.mrf.mxu2  ;;  %v4166_v41 = vpop.f32.mrf.mxu3 }
 0x814   :  { %v13119_v25 = vadd.f32 %v4101_v46, %v3935_v30  ;;  %v13121_v63 = vadd.f32 %v4166_v41, %v4000_v31 }
 0x818   :  { %7252 = vmatmul.msk.f32.gmra.mxu2 %vm3729_vm3, %v12368_v23  ;;  %7268 = vmatmul.msk.f32.gmra.mxu3 %vm3729_vm3, %v12368_v23  ;;  %v3941_v23 = vadd.f32 %v12951_v15, %v12691_v47  ;;  %v4009_v47 = vadd.f32 %v12967_v11, %v12715_v36 }
 0x81b   :  { %v4104_v29 = vpop.f32.mrf.mxu2  ;;  %v4169_v62 = vpop.f32.mrf.mxu3 }
 0x81c   :  { %v13131_v54 = vadd.f32 %v4104_v29, %v3938_v17  ;;  %v13133_v38 = vadd.f32 %v4169_v62, %v4003_v42  ;;  %v15405_v29 = vld [vmem:[#allocation494_spill] sm:$0xff] }
 0x820   :  { %7253 = vmatmul.msk.f32.gmra.mxu2 %vm3729_vm3, %v12404_v8  ;;  %7269 = vmatmul.msk.f32.gmra.mxu3 %vm3729_vm3, %v12404_v8  ;;  %v3944_v8 = vadd.f32 %v12965_v48, %v12713_v7  ;;  %v4012_v7 = vadd.f32 %v12981_v50, %v12743_v39 }
 0x823   :  { %v4107_v33 = vpop.f32.mrf.mxu2  ;;  %v4172_v44 = vpop.f32.mrf.mxu3 }
 0x824   :  { %v13143_v49 = vadd.f32 %v4107_v33, %v3941_v23  ;;  %v13145_v53 = vadd.f32 %v4172_v44, %v4006_v21  ;;  %v15407_v23 = vld [vmem:[#allocation491_spill] sm:$0xff]  ;;  %v15409_v44 = vld [vmem:[#allocation490_spill] sm:$0xff] }
 0x828   :  { %7254 = vmatmul.msk.f32.gmra.mxu2 %vm3729_vm3, %v12463_v9  ;;  %7270 = vmatmul.msk.f32.gmra.mxu3 %vm3729_vm3, %v12463_v9  ;;  %v3947_v9 = vadd.f32 %v12979_v26, %v12741_v57  ;;  %v4015_v57 = vadd.f32 %v12995_v55, %v12751_v35 }
 0x82b   :  { %v4110_v15 = vpop.f32.mrf.mxu2  ;;  %v4175_v20 = vpop.f32.mrf.mxu3 }
 0x82c   :  { %v13155_v43 = vadd.f32 %v4110_v15, %v3944_v8  ;;  %v13157_v19 = vadd.f32 %v4175_v20, %v4009_v47  ;;  %v15410_v8 = vld [vmem:[#allocation492_spill] sm:$0xff]  ;;  %v15412_v15 = vld [vmem:[#allocation495_spill] sm:$0xff] }
 0x82d   :  { %v15413_v20 = vld [vmem:[#allocation499_spill] sm:$0xff] }
 0x830   :  { %7255 = vmatmul.msk.f32.gmra.mxu2 %vm3729_vm3, %v12493_v0  ;;  %7271 = vmatmul.msk.f32.gmra.mxu3 %vm3729_vm3, %v12493_v0  ;;  %v3950_v0 = vadd.f32 %v12993_v1, %v12749_v4  ;;  %v4018_v4 = vadd.f32 %v13009_v34, %v12773_v37 }
 0x833   :  { %v4113_v48 = vpop.f32.mrf.mxu2  ;;  %v4178_v36 = vpop.f32.mrf.mxu3 }
 0x834   :  { %v13167_v11 = vadd.f32 %v4113_v48, %v3947_v9  ;;  %v13169_v30 = vadd.f32 %v4178_v36, %v4012_v7  ;;  %v4033_v9 = vadd.f32 %v15413_v20, %v15412_v15  ;;  %v15424_v15 = vld [vmem:[#allocation489_spill] sm:$0xff] }
 0x838   :  { %7256 = vmatmul.msk.f32.gmra.mxu2 %vm3729_vm3, %v12553_v56  ;;  %7272 = vmatmul.msk.f32.gmra.mxu3 %vm3729_vm3, %v12553_v56  ;;  %v3953_v56 = vadd.f32 %v13007_v45, %v12771_v24  ;;  %v4021_v24 = vadd.f32 %v13023_v60, %v12801_v16 }
 0x83b   :  { %v4116_v26 = vpop.f32.mrf.mxu2  ;;  %v4181_v39 = vpop.f32.mrf.mxu3 }
 0x83c   :  { %v13179_v50 = vadd.f32 %v4116_v26, %v3950_v0  ;;  %v13181_v31 = vadd.f32 %v4181_v39, %v4015_v57  ;;  %v3588_v57 = vpop.permute.xlu2 %3587  ;;  %v3590_v26 = vpop.permute.xlu0 %3589  ;;  %v15414_v39 = vld [vmem:[#allocation493_spill] sm:$0xff] }
 0x840   :  { %7257 = vmatmul.msk.f32.gmra.mxu2 %vm3729_vm3, %v12577_v5  ;;  %7273 = vmatmul.msk.f32.gmra.mxu3 %vm3729_vm3, %v12577_v5  ;;  %v3956_v5 = vadd.f32 %v13021_v58, %v12799_v10  ;;  %v4024_v10 = vadd.f32 %v13037_v13, %v12815_v40 }
 0x843   :  { %v4119_v1 = vpop.f32.mrf.mxu2  ;;  %v4184_v35 = vpop.f32.mrf.mxu3 }
 0x844   :  { %v13191_v55 = vadd.f32 %v4119_v1, %v3953_v56  ;;  %v13193_v46 = vadd.f32 %v4184_v35, %v4018_v4  ;;  %v15415_v56 = vld [vmem:[#allocation496_spill] sm:$0xff]  ;;  %v15417_v35 = vld [vmem:[#allocation562_spill] sm:$0xff] }
 0x845   :  { %v15416_v4 = vld [vmem:[#allocation500_spill] sm:$0xff] }
 0x846   :  { %v3971_v1 = vadd.f32 %v15416_v4, %v15415_v56 }
 0x848   :  { %7258 = vmatmul.msk.f32.gmra.mxu2 %vm3729_vm3, %v12621_v6  ;;  %7274 = vmatmul.msk.f32.gmra.mxu3 %vm3729_vm3, %v12621_v6  ;;  %v3959_v6 = vadd.f32 %v13035_v2, %v12813_v18  ;;  %v4027_v18 = vadd.f32 %v13051_v22, %v12829_v61 }
 0x84b   :  { %v4122_v45 = vpop.f32.mrf.mxu2  ;;  %v4187_v37 = vpop.f32.mrf.mxu3 }
 0x84c   :  { %v13203_v34 = vadd.f32 %v4122_v45, %v3956_v5  ;;  %v13205_v41 = vadd.f32 %v4187_v37, %v4021_v24  ;;  %v15418_v5 = vld [vmem:[#allocation503_spill] sm:$0xff]  ;;  %v3618_v45 = vsel %vm3595_vm2, %v3588_v57, %v3590_v26  ;;  %v15426_v26 = vld [vmem:[#allocation498_spill] sm:$0xff] }
 0x84d   :  { %v4036_v24 = vadd.f32 %v15418_v5, %v15417_v35 }
 0x850   :  { %7259 = vmatmul.msk.f32.gmra.mxu2 %vm3729_vm3, %v12643_v14  ;;  %7275 = vmatmul.msk.f32.gmra.mxu3 %vm3729_vm3, %v12643_v14  ;;  %v3962_v14 = vadd.f32 %v13049_v59, %v12827_v27  ;;  %v15408_v27 = vld [vmem:[#allocation502_spill] sm:$0xff] }
 0x851   :  { %v4030_v59 = vadd.f32 %v15408_v27, %v15407_v23  ;;  %v15422_v27 = vld [vmem:[#allocation564_spill] sm:$0xff] }
 0x853   :  { %v4125_v58 = vpop.f32.mrf.mxu2  ;;  %v4190_v16 = vpop.f32.mrf.mxu3 }
 0x854   :  { %v13215_v60 = vadd.f32 %v4125_v58, %v3959_v6  ;;  %v13217_v17 = vadd.f32 %v4190_v16, %v4024_v10  ;;  %v4297_v16 = vpop.f32.mrf.mxu0 }
 0x858   :  { %7260 = vmatmul.msk.f32.gmra.mxu2 %vm3729_vm3, %v12689_v51  ;;  %7276 = vmatmul.msk.f32.gmra.mxu3 %vm3729_vm3, %v12689_v51  ;;  %v15406_v51 = vld [vmem:[#allocation501_spill] sm:$0xff] }
 0x859   :  { %v3965_v62 = vadd.f32 %v15406_v51, %v15405_v29  ;;  %v3594_v29 = vpop.permute.xlu2 %3593  ;;  %v15420_v51 = vld [vmem:[#allocation563_spill] sm:$0xff] }
 0x85b   :  { %v4128_v2 = vpop.f32.mrf.mxu2  ;;  %v4193_v40 = vpop.f32.mrf.mxu3 }
 0x85c   :  { %v13227_v13 = vadd.f32 %v4128_v2, %v3962_v14  ;;  %v13229_v42 = vadd.f32 %v4193_v40, %v4027_v18  ;;  %v4362_v14 = vpop.f32.mrf.mxu1  ;;  %v15419_v18 = vld [vmem:[#allocation561_spill] sm:$0xff]  ;;  %v3592_v40 = vpop.permute.xlu1 %3591 }
 0x85d   :  { %v3666_v2 = vmax.f32 %v15419_v18, %v3618_v45 }
 0x860   :  { %7261 = vmatmul.msk.f32.gmra.mxu2 %vm3729_vm3, %v12711_v12  ;;  %7277 = vmatmul.msk.f32.gmra.mxu3 %vm3729_vm3, %v12711_v12  ;;  %v15411_v12 = vld [vmem:[#allocation565_spill] sm:$0xff] }
 0x861   :  { %v3968_v47 = vadd.f32 %v15411_v12, %v15410_v8 }
 0x863   :  { %v4131_v21 = vpop.f32.mrf.mxu2  ;;  %v4196_v61 = vpop.f32.mrf.mxu3 }
 0x864   :  { %v13239_v22 = vadd.f32 %v4131_v21, %v3965_v62  ;;  %v13241_v33 = vadd.f32 %v4196_v61, %v4030_v59  ;;  %v15421_v62 = vld [vmem:[#allocation504_spill] sm:$0xff]  ;;  %v15423_v59 = vld [vmem:[#allocation566_spill] sm:$0xff]  ;;  %v3619_v61 = vsel %vm3595_vm2, %v3592_v40, %v3594_v29  ;;  %v4411_v29 = vadd.f32 %v4362_v14, %v13109_v3 }
 0x865   :  { %v3974_v23 = vadd.f32 %v15421_v62, %v15420_v51  ;;  %v4039_v21 = vadd.f32 %v15423_v59, %v15422_v27  ;;  %v3667_v20 = vmax.f32 %v15424_v15, %v3619_v61 }
 0x868   :  { %7262 = vmatmul.msk.f32.gmra.mxu2 %vm3729_vm3, %v15409_v44  ;;  %7278 = vmatmul.msk.f32.gmra.mxu3 %vm3729_vm3, %v15409_v44 }
 0x86b   :  { %v4134_v7 = vpop.f32.mrf.mxu2  ;;  %v4199_v48 = vpop.f32.mrf.mxu3 }
 0x86c   :  { %v13251_v36 = vadd.f32 %v4134_v7, %v3968_v47  ;;  %v13253_v0 = vadd.f32 %v4199_v48, %v4033_v9  ;;  %v4300_v9 = vpop.f32.mrf.mxu0  ;;  %v4365_v7 = vpop.f32.mrf.mxu1  ;;  %v15425_v48 = vld [vmem:[#allocation497_spill] sm:$0xff] }
 0x86d   :  { %v3977_v57 = vadd.f32 %v13095_v32, %v15425_v48  ;;  %v4641_v32 = vld [vmem:[%s14595_s4] sm:$0x3]  ;;  %v4412_v14 = vadd.f32 %v4300_v9, %v13119_v25  ;;  %v4413_v48 = vadd.f32 %v4365_v7, %v13121_v63 }
 0x86e   :  { %v13296_v62 = vperm.slane %v4641_v32, 0  ;;  %v13298_v27 = vperm.slane %v4641_v32, 1 }
 0x870   :  { %7263 = vmatmul.msk.f32.gmra.mxu2 %vm3729_vm3, %v15414_v39  ;;  %7279 = vmatmul.msk.f32.gmra.mxu3 %vm3729_vm3, %v15414_v39  ;;  %v4042_v39 = vadd.f32 %v13097_v28, %v15426_v26  ;;  %v4410_v28 = vadd.f32 %v4297_v16, %v13107_v52 }
 0x873   :  { %v4137_v37 = vpop.f32.mrf.mxu2  ;;  %v4202_v6 = vpop.f32.mrf.mxu3 }
 0x874   :  { %v13264_v10 = vadd.f32 %v4137_v37, %v3971_v1  ;;  %v13266_v58 = vadd.f32 %v4202_v6, %v4036_v24  ;;  %v4303_v5 = vpop.f32.mrf.mxu0  ;;  %v4368_v24 = vpop.f32.mrf.mxu1 }
 0x875   :  { %v4414_v59 = vadd.f32 %v4303_v5, %v13131_v54 }
 0x878   :  { %7264 = vmatmul.msk.f32.gmra.mxu2 %vm3729_vm3, %v3666_v2  ;;  %7280 = vmatmul.msk.f32.gmra.mxu3 %vm3729_vm3, %v3666_v2 }
 0x87b   :  { %v4140_v44 = vpop.f32.mrf.mxu2  ;;  %v4205_v8 = vpop.f32.mrf.mxu3 }
 0x87c   :  { %v13276_v12 = vadd.f32 %v4140_v44, %v3974_v23  ;;  %v13278_v47 = vadd.f32 %v4205_v8, %v4039_v21  ;;  %v4306_v2 = vpop.f32.mrf.mxu0  ;;  %v4371_v40 = vpop.f32.mrf.mxu1  ;;  %v4415_v21 = vadd.f32 %v4368_v24, %v13133_v38 }
 0x87d   :  { %v4416_v24 = vadd.f32 %v4306_v2, %v13143_v49 }
 0x880   :  { %7265 = vmatmul.msk.f32.gmra.mxu2 %vm3729_vm3, %v3667_v20  ;;  %7281 = vmatmul.msk.f32.gmra.mxu3 %vm3729_vm3, %v3667_v20 }
 0x883   :  { %v4143_v56 = vpop.f32.mrf.mxu2  ;;  %v4208_v4 = vpop.f32.mrf.mxu3 }
 0x884   :  { %v13287_v1 = vadd.f32 %v4143_v56, %v3977_v57  ;;  %v13289_v35 = vadd.f32 %v4208_v4, %v4042_v39  ;;  %v4309_v15 = vpop.f32.mrf.mxu0  ;;  %v4374_v20 = vpop.f32.mrf.mxu1 }
 0x88b   :  { %v4496_v45 = vpop.f32.mrf.mxu2  ;;  %v4561_v37 = vpop.f32.mrf.mxu3 }
 0x88c   :  { %v4609_v51 = vadd.f32 %v4496_v45, %v4410_v28  ;;  %v4610_v23 = vadd.f32 %v4561_v37, %v4411_v29  ;;  %v4417_v45 = vadd.f32 %v4371_v40, %v13145_v53  ;;  %v4377_v49 = vpop.f32.mrf.mxu1 }
 0x88e   :  { %v4647_v61 = vadd.f32 %v13296_v62, %v4609_v51  ;;  %v4648_v52 = vadd.f32 %v13298_v27, %v4610_v23 }
 0x890   :  { %v4679_v26 = vmax.f32 %v4647_v61, 0.0  ;;  %v4680_v39 = vmax.f32 %v4648_v52, 0.0 }
 0x893   :  { %v4499_v6 = vpop.f32.mrf.mxu2  ;;  %v4564_v18 = vpop.f32.mrf.mxu3 }
 0x894   :  { %v4611_v38 = vadd.f32 %v4499_v6, %v4412_v14  ;;  %v4612_v56 = vadd.f32 %v4564_v18, %v4413_v48  ;;  %v4312_v6 = vpop.f32.mrf.mxu0  ;;  %v4380_v52 = vpop.f32.mrf.mxu1  ;;  %v4418_v14 = vadd.f32 %v4309_v15, %v13155_v43  ;;  %v4419_v48 = vadd.f32 %v4374_v20, %v13157_v19 }
 0x895   :  { %v4420_v43 = vadd.f32 %v4312_v6, %v13167_v11  ;;  %v4421_v19 = vadd.f32 %v4377_v49, %v13169_v30 }
 0x896   :  { %v4649_v25 = vadd.f32 %v13296_v62, %v4611_v38  ;;  %v4650_v7 = vadd.f32 %v13298_v27, %v4612_v56  ;;  %v4423_v56 = vadd.f32 %v4380_v52, %v13181_v31 }
 0x898   :  { %v4681_v2 = vmax.f32 %v4649_v25, 0.0  ;;  %v4682_v40 = vmax.f32 %v4650_v7, 0.0 }
 0x89b   :  { %v4502_v44 = vpop.f32.mrf.mxu2  ;;  %v4567_v8 = vpop.f32.mrf.mxu3 }
 0x89c   :  { %v4613_v16 = vadd.f32 %v4502_v44, %v4414_v59  ;;  %v4614_v3 = vadd.f32 %v4567_v8, %v4415_v21  ;;  %v4315_v8 = vpop.f32.mrf.mxu0 }
 0x89e   :  { %v4651_v57 = vadd.f32 %v13296_v62, %v4613_v16  ;;  %v4652_v54 = vadd.f32 %v13298_v27, %v4614_v3 }
 0x8a0   :  { %v4683_v4 = vmax.f32 %v4651_v57, 0.0  ;;  %v4684_v5 = vmax.f32 %v4652_v54, 0.0 }
 0x8a2   :  { %v4712_v37 = vmax.f32 %v4680_v39, %v4684_v5  ;;  %v13310_v32 = vmax.f32 %v4679_v26, %v4683_v4  ;;  %v4383_v26 = vpop.f32.mrf.mxu1  ;;  %v4422_v39 = vadd.f32 %v4315_v8, %v13179_v50 }
 0x8a3   :  { %v4505_v63 = vpop.f32.mrf.mxu2  ;;  %v4570_v9 = vpop.f32.mrf.mxu3 }
 0x8a4   :  { %v4615_v28 = vadd.f32 %v4505_v63, %v4416_v24  ;;  %v4616_v29 = vadd.f32 %v4570_v9, %v4417_v45  ;;  %4745 = vrot.lane.b32.xlu1 %v4712_v37, %s7427_s13  ;;  %4743 = vrot.lane.b32.xlu0 %v13310_v32, %s7427_s13  ;;  %v4318_v54 = vpop.f32.mrf.mxu0 }
 0x8a6   :  { %v4653_v53 = vadd.f32 %v13296_v62, %v4615_v28  ;;  %v4654_v18 = vadd.f32 %v13298_v27, %v4616_v29 }
 0x8a8   :  { %v4685_v51 = vmax.f32 %v4653_v53, 0.0  ;;  %v4686_v23 = vmax.f32 %v4654_v18, 0.0  ;;  %v4424_v18 = vadd.f32 %v4318_v54, %v13191_v55 }
 0x8aa   :  { %v4714_v59 = vmax.f32 %v4682_v40, %v4686_v23  ;;  %v13319_v21 = vmax.f32 %v4681_v2, %v4685_v51  ;;  %v4386_v31 = vpop.f32.mrf.mxu1  ;;  %v4425_v2 = vadd.f32 %v4383_v26, %v13193_v46 }
 0x8ab   :  { %v4508_v61 = vpop.f32.mrf.mxu2  ;;  %v4573_v44 = vpop.f32.mrf.mxu3 }
 0x8ac   :  { %4749 = vrot.lane.b32.xlu0 %v4714_v59, %s7427_s13  ;;  %4747 = vrot.lane.b32.xlu2 %v13319_v21, %s7427_s13  ;;  %v4617_v57 = vadd.f32 %v4508_v61, %v4418_v14  ;;  %v4618_v38 = vadd.f32 %v4573_v44, %v4419_v48  ;;  %v4321_v9 = vpop.f32.mrf.mxu0 }
 0x8ae   :  { %v4655_v4 = vadd.f32 %v13296_v62, %v4617_v57  ;;  %v4656_v45 = vadd.f32 %v13298_v27, %v4618_v38 }
 0x8b0   :  { %v4687_v63 = vmax.f32 %v4655_v4, 0.0  ;;  %v4688_v7 = vmax.f32 %v4656_v45, 0.0  ;;  %v4426_v4 = vadd.f32 %v4321_v9, %v13203_v34 }
 0x8b3   :  { %v4511_v16 = vpop.f32.mrf.mxu2  ;;  %v4576_v3 = vpop.f32.mrf.mxu3 }
 0x8b4   :  { %v4619_v50 = vadd.f32 %v4511_v16, %v4420_v43  ;;  %v4620_v28 = vadd.f32 %v4576_v3, %v4421_v19  ;;  %v4324_v16 = vpop.f32.mrf.mxu0  ;;  %v4389_v3 = vpop.f32.mrf.mxu1 }
 0x8b5   :  { %v4428_v34 = vadd.f32 %v4324_v16, %v13215_v60 }
 0x8b6   :  { %v4657_v30 = vadd.f32 %v13296_v62, %v4619_v50  ;;  %v4658_v51 = vadd.f32 %v13298_v27, %v4620_v28 }
 0x8b8   :  { %v4689_v61 = vmax.f32 %v4657_v30, 0.0  ;;  %v4690_v44 = vmax.f32 %v4658_v51, 0.0 }
 0x8bb   :  { %v4514_v5 = vpop.f32.mrf.mxu2  ;;  %v4579_v24 = vpop.f32.mrf.mxu3 }
 0x8bc   :  { %v4621_v37 = vadd.f32 %v4514_v5, %v4422_v39  ;;  %v4622_v25 = vadd.f32 %v4579_v24, %v4423_v56  ;;  %v4327_v26 = vpop.f32.mrf.mxu0  ;;  %v4392_v38 = vpop.f32.mrf.mxu1  ;;  %v4427_v5 = vadd.f32 %v4386_v31, %v13205_v41  ;;  %v4429_v41 = vadd.f32 %v4389_v3, %v13217_v17 }
 0x8be   :  { %v4659_v15 = vadd.f32 %v13296_v62, %v4621_v37  ;;  %v4660_v20 = vadd.f32 %v13298_v27, %v4622_v25  ;;  %v4430_v37 = vadd.f32 %v4327_v26, %v13227_v13  ;;  %v4431_v25 = vadd.f32 %v4392_v38, %v13229_v42 }
 0x8c0   :  { %v4691_v29 = vmax.f32 %v4659_v15, 0.0  ;;  %v4692_v53 = vmax.f32 %v4660_v20, 0.0 }
 0x8c2   :  { %v4716_v40 = vmax.f32 %v4688_v7, %v4692_v53  ;;  %v13336_v11 = vmax.f32 %v4687_v63, %v4691_v29 }
 0x8c3   :  { %v4517_v6 = vpop.f32.mrf.mxu2  ;;  %v4582_v49 = vpop.f32.mrf.mxu3 }
 0x8c4   :  { %v4623_v23 = vadd.f32 %v4517_v6, %v4424_v18  ;;  %v4624_v59 = vadd.f32 %v4582_v49, %v4425_v2  ;;  %4753 = vrot.lane.b32.xlu2 %v4716_v40, %s7427_s13  ;;  %4751 = vrot.lane.b32.xlu1 %v13336_v11, %s7427_s13  ;;  %v4330_v7 = vpop.f32.mrf.mxu0  ;;  %v4395_v28 = vpop.f32.mrf.mxu1 }
 0x8c5   :  { %v4432_v40 = vadd.f32 %v4330_v7, %v13239_v22  ;;  %v4433_v30 = vadd.f32 %v4395_v28, %v13241_v33 }
 0x8c6   :  { %v4661_v55 = vadd.f32 %v13296_v62, %v4623_v23  ;;  %v4662_v46 = vadd.f32 %v13298_v27, %v4624_v59 }
 0x8c8   :  { %v4693_v8 = vmax.f32 %v4661_v55, 0.0  ;;  %v4694_v52 = vmax.f32 %v4662_v46, 0.0 }
 0x8ca   :  { %v4718_v14 = vmax.f32 %v4690_v44, %v4694_v52  ;;  %v13345_v48 = vmax.f32 %v4689_v61, %v4693_v8 }
 0x8cb   :  { %v4520_v57 = vpop.f32.mrf.mxu2  ;;  %v4585_v54 = vpop.f32.mrf.mxu3 }
 0x8cc   :  { %4757 = vrot.lane.b32.xlu1 %v4718_v14, %s7427_s13  ;;  %4755 = vrot.lane.b32.xlu0 %v13345_v48, %s7427_s13  ;;  %v4625_v24 = vadd.f32 %v4520_v57, %v4426_v4  ;;  %v4626_v45 = vadd.f32 %v4585_v54, %v4427_v5  ;;  %v4333_v46 = vpop.f32.mrf.mxu0  ;;  %v4398_v22 = vpop.f32.mrf.mxu1 }
 0x8cd   :  { %v4434_v4 = vadd.f32 %v4333_v46, %v13251_v36  ;;  %v4435_v5 = vadd.f32 %v4398_v22, %v13253_v0 }
 0x8ce   :  { %v4663_v43 = vadd.f32 %v13296_v62, %v4625_v24  ;;  %v4664_v20 = vadd.f32 %v13298_v27, %v4626_v45 }
 0x8d0   :  { %v4695_v31 = vmax.f32 %v4663_v43, 0.0  ;;  %v4696_v29 = vmax.f32 %v4664_v20, 0.0 }
 0x8d3   :  { %v4523_v39 = vpop.f32.mrf.mxu2  ;;  %v4588_v56 = vpop.f32.mrf.mxu3 }
 0x8d4   :  { %v4627_v42 = vadd.f32 %v4523_v39, %v4428_v34  ;;  %v4628_v53 = vadd.f32 %v4588_v56, %v4429_v41  ;;  %v4336_v26 = vpop.f32.mrf.mxu0  ;;  %v4401_v38 = vpop.f32.mrf.mxu1 }
 0x8d5   :  { %v4436_v36 = vadd.f32 %v4336_v26, %v13264_v10  ;;  %v4437_v0 = vadd.f32 %v4401_v38, %v13266_v58 }
 0x8d6   :  { %v4665_v60 = vadd.f32 %v13296_v62, %v4627_v42  ;;  %v4666_v23 = vadd.f32 %v13298_v27, %v4628_v53 }
 0x8d8   :  { %v4697_v44 = vmax.f32 %v4665_v60, 0.0  ;;  %v4698_v8 = vmax.f32 %v4666_v23, 0.0 }
 0x8db   :  { %v4526_v19 = vpop.f32.mrf.mxu2  ;;  %v4591_v15 = vpop.f32.mrf.mxu3 }
 0x8dc   :  { %v4629_v63 = vadd.f32 %v4526_v19, %v4430_v37  ;;  %v4630_v50 = vadd.f32 %v4591_v15, %v4431_v25  ;;  %v4339_v24 = vpop.f32.mrf.mxu0  ;;  %v4404_v45 = vpop.f32.mrf.mxu1 }
 0x8dd   :  { %v4438_v43 = vadd.f32 %v4339_v24, %v13276_v12  ;;  %v4439_v19 = vadd.f32 %v4404_v45, %v13278_v47 }
 0x8de   :  { %v4667_v9 = vadd.f32 %v13296_v62, %v4629_v63  ;;  %v4668_v13 = vadd.f32 %v13298_v27, %v4630_v50 }
 0x8e0   :  { %v4699_v18 = vmax.f32 %v4667_v9, 0.0  ;;  %v4700_v2 = vmax.f32 %v4668_v13, 0.0 }
 0x8e2   :  { %v4720_v6 = vmax.f32 %v4696_v29, %v4700_v2  ;;  %v13362_v49 = vmax.f32 %v4695_v31, %v4699_v18 }
 0x8e3   :  { %v4529_v17 = vpop.f32.mrf.mxu2  ;;  %v4594_v51 = vpop.f32.mrf.mxu3 }
 0x8e4   :  { %v4631_v59 = vadd.f32 %v4529_v17, %v4432_v40  ;;  %v4632_v55 = vadd.f32 %v4594_v51, %v4433_v30  ;;  %4761 = vrot.lane.b32.xlu0 %v4720_v6, %s7427_s13  ;;  %4759 = vrot.lane.b32.xlu2 %v13362_v49, %s7427_s13  ;;  %v4342_v29 = vpop.f32.mrf.mxu0  ;;  %v4407_v53 = vpop.f32.mrf.mxu1 }
 0x8e5   :  { %v4440_v18 = vadd.f32 %v4342_v29, %v13287_v1  ;;  %v4441_v2 = vadd.f32 %v4407_v53, %v13289_v35 }
 0x8e6   :  { %v4669_v33 = vadd.f32 %v13296_v62, %v4631_v59  ;;  %v4670_v61 = vadd.f32 %v13298_v27, %v4632_v55 }
 0x8e8   :  { %v4701_v52 = vmax.f32 %v4669_v33, 0.0  ;;  %v4702_v16 = vmax.f32 %v4670_v61, 0.0 }
 0x8ea   :  { %v4722_v3 = vmax.f32 %v4698_v8, %v4702_v16  ;;  %v13371_v14 = vmax.f32 %v4697_v44, %v4701_v52 }
 0x8eb   :  { %v4532_v57 = vpop.f32.mrf.mxu2  ;;  %v4597_v54 = vpop.f32.mrf.mxu3 }
 0x8ec   :  { %4765 = vrot.lane.b32.xlu2 %v4722_v3, %s7427_s13  ;;  %4763 = vrot.lane.b32.xlu1 %v13371_v14, %s7427_s13  ;;  %v4633_v37 = vadd.f32 %v4532_v57, %v4434_v4  ;;  %v4634_v25 = vadd.f32 %v4597_v54, %v4435_v5 }
 0x8ee   :  { %v4671_v15 = vadd.f32 %v13296_v62, %v4633_v37  ;;  %v4672_v50 = vadd.f32 %v13298_v27, %v4634_v25 }
 0x8f0   :  { %v4703_v9 = vmax.f32 %v4671_v15, 0.0  ;;  %v4704_v13 = vmax.f32 %v4672_v50, 0.0 }
 0x8f3   :  { %v4535_v39 = vpop.f32.mrf.mxu2  ;;  %v4600_v56 = vpop.f32.mrf.mxu3 }
 0x8f4   :  { %v4635_v12 = vadd.f32 %v4535_v39, %v4436_v36  ;;  %v4636_v47 = vadd.f32 %v4600_v56, %v4437_v0  ;;  %v15428_v36 = vld [vmem:[#allocation242_spill] sm:$0xff] }
 0x8f5   :  { %5075 = vmatpush.msra.mxu1 %v15428_v36 }
 0x8f6   :  { %v4673_v58 = vadd.f32 %v13296_v62, %v4635_v12  ;;  %v4674_v60 = vadd.f32 %v13298_v27, %v4636_v47 }
 0x8f8   :  { %v4705_v59 = vmax.f32 %v4673_v58, 0.0  ;;  %v4706_v35 = vmax.f32 %v4674_v60, 0.0 }
 0x8fb   :  { %v4538_v20 = vpop.f32.mrf.mxu2  ;;  %v4603_v63 = vpop.f32.mrf.mxu3 }
 0x8fc   :  { %v4637_v7 = vadd.f32 %v4538_v20, %v4438_v43  ;;  %v4638_v28 = vadd.f32 %v4603_v63, %v4439_v19 }
 0x8fe   :  { %v4675_v34 = vadd.f32 %v13296_v62, %v4637_v7  ;;  %v4676_v41 = vadd.f32 %v13298_v27, %v4638_v28 }
 0x900   :  { %v4707_v31 = vmax.f32 %v4675_v34, 0.0  ;;  %v4708_v42 = vmax.f32 %v4676_v41, 0.0 }
 0x902   :  { %v4724_v40 = vmax.f32 %v4704_v13, %v4708_v42  ;;  %v4723_v10 = vmax.f32 %v4703_v9, %v4707_v31 }
 0x903   :  { %v4541_v30 = vpop.f32.mrf.mxu2  ;;  %v4606_v6 = vpop.f32.mrf.mxu3 }
 0x904   :  { %v4639_v17 = vadd.f32 %v4541_v30, %v4440_v18  ;;  %v4640_v51 = vadd.f32 %v4606_v6, %v4441_v2  ;;  %4769 = vrot.lane.b32.xlu1 %v4724_v40, %s7427_s13  ;;  %4767 = vrot.lane.b32.xlu0 %v4723_v10, %s7427_s13 }
 0x906   :  { %v4677_v23 = vadd.f32 %v13296_v62, %v4639_v17  ;;  %v4678_v1 = vadd.f32 %v13298_v27, %v4640_v51  ;;  %v4748_v62 = vpop.permute.xlu2 %4747 }
 0x908   :  { %v4709_v55 = vmax.f32 %v4677_v23, 0.0  ;;  %v4710_v46 = vmax.f32 %v4678_v1, 0.0 }
 0x90a   :  { %v4726_v22 = vmax.f32 %v4706_v35, %v4710_v46  ;;  %v4725_v33 = vmax.f32 %v4705_v59, %v4709_v55 }
 0x90c   :  { %4773 = vrot.lane.b32.xlu0 %v4726_v22, %s7427_s13  ;;  %4771 = vrot.lane.b32.xlu2 %v4725_v33, %s7427_s13 }
 0x916   :  { %v4746_v61 = vpop.permute.xlu1 %4745  ;;  %v4744_v44 = vpop.permute.xlu0 %4743 }
 0x917   :  { %v4775_v8 = vsel %vm3595_vm2, %v4744_v44, %v4746_v61 }
 0x918   :  { %v13398_v52 = vmax.f32 %v13310_v32, %v4775_v8 }
 0x91e   :  { %v4750_v16 = vpop.permute.xlu0 %4749  ;;  %v4754_v57 = vpop.permute.xlu2 %4753 }
 0x91f   :  { %v4776_v27 = vsel %vm3595_vm2, %v4748_v62, %v4750_v16 }
 0x920   :  { %v13402_v3 = vmax.f32 %v13319_v21, %v4776_v27 }
 0x936   :  { %v4752_v54 = vpop.permute.xlu1 %4751 }
 0x937   :  { %v4777_v26 = vsel %vm3595_vm2, %v4752_v54, %v4754_v57 }
 0x938   :  { %v13406_v38 = vmax.f32 %v13336_v11, %v4777_v26 }
 0x93e   :  { %v4758_v39 = vpop.permute.xlu1 %4757  ;;  %v4756_v56 = vpop.permute.xlu0 %4755 }
 0x93f   :  { %v4778_v4 = vsel %vm3595_vm2, %v4756_v56, %v4758_v39  ;;  %v4760_v5 = vpop.permute.xlu2 %4759 }
 0x940   :  { %v13410_v32 = vmax.f32 %v13345_v48, %v4778_v4 }
 0x947   :  { %v4766_v37 = vpop.permute.xlu2 %4765 }
 0x956   :  { %v4762_v24 = vpop.permute.xlu0 %4761 }
 0x957   :  { %v4779_v45 = vsel %vm3595_vm2, %v4760_v5, %v4762_v24 }
 0x958   :  { %v13414_v21 = vmax.f32 %v13362_v49, %v4779_v45  ;;  %v15427_v49 = vld [vmem:[#allocation241_spill] sm:$0xff] }
 0x959   :  { %5052 = vmatpush.msra.mxu0 %v15427_v49 }
 0x95e   :  { %v4764_v25 = vpop.permute.xlu1 %4763 }
 0x95f   :  { %v4780_v43 = vsel %vm3595_vm2, %v4764_v25, %v4766_v37 }
 0x960   :  { %v13418_v11 = vmax.f32 %v13371_v14, %v4780_v43 }
 0x966   :  { %v4772_v63 = vpop.permute.xlu2 %4771 }
 0x976   :  { %v4770_v19 = vpop.permute.xlu1 %4769  ;;  %v4768_v15 = vpop.permute.xlu0 %4767 }
 0x977   :  { %v4781_v20 = vsel %vm3595_vm2, %v4768_v15, %v4770_v19 }
 0x978   :  { %v13421_v48 = vmax.f32 %v4723_v10, %v4781_v20 }
 0x97e   :  { %v4774_v50 = vpop.permute.xlu0 %4773 }
 0x97f   :  { %v4782_v7 = vsel %vm3595_vm2, %v4772_v63, %v4774_v50 }
 0x980   :  { %v13424_v28 = vmax.f32 %v4725_v33, %v4782_v7 }
 0x981   :  { %7423 = dma.done.wait [#allocation3], 61440 }
 0x982   :  { %7424 = vsyncadd [#allocation3], 4294905856  ;;  %v15429_v14 = vld [vmem:[#allocation243_spill] sm:$0xff]  ;;  %v15430_v0 = vld [vmem:[#allocation244_spill] sm:$0xff]  ;;  %vm6258_vm4 = vcmask 850944   ;;  %vm6449_vm5 = vcmask 80896  }
 0x983   :  { %5098 = vmatpush.msra.mxu2 %v15429_v14  ;;  %5121 = vmatpush.msra.mxu3 %v15430_v0  ;;  %v15431_v34 = vld [vmem:[#allocation233_spill] sm:$0xff]  ;;  %v15432_v41 = vld [vmem:[#allocation234_spill] sm:$0xff]  ;;  %v15433_v9 = vld [vmem:[#allocation235_spill] sm:$0xff]  ;;  %s6458_s10 = sshll.u32 %s14600_s9, 4  ;;  %s7429_s1 = smov 128   ;;  %s6459_s10 = int_to_ptr.hbm [resolvable:$true] %s6458_s10 }
 0x984   :  { %5053 = vmatpush.msra.mxu0 %v15431_v34  ;;  %5076 = vmatpush.msra.mxu1 %v15432_v41  ;;  %v15434_v12 = vld [vmem:[#allocation236_spill] sm:$0xff]  ;;  %v15435_v13 = vld [vmem:[#allocation225_spill] sm:$0xff]  ;;  %v15436_v47 = vld [vmem:[#allocation226_spill] sm:$0xff] }
 0x985   :  { %5099 = vmatpush.msra.mxu2 %v15433_v9  ;;  %5122 = vmatpush.msra.mxu3 %v15434_v12  ;;  %v15437_v31 = vld [vmem:[#allocation227_spill] sm:$0xff]  ;;  %v15438_v42 = vld [vmem:[#allocation228_spill] sm:$0xff]  ;;  %v15439_v29 = vld [vmem:[#allocation217_spill] sm:$0xff] }
 0x986   :  { %5054 = vmatpush.msra.mxu0 %v15435_v13  ;;  %5077 = vmatpush.msra.mxu1 %v15436_v47  ;;  %v15440_v53 = vld [vmem:[#allocation218_spill] sm:$0xff]  ;;  %v15441_v18 = vld [vmem:[#allocation219_spill] sm:$0xff]  ;;  %v15442_v2 = vld [vmem:[#allocation220_spill] sm:$0xff] }
 0x987   :  { %5100 = vmatpush.msra.mxu2 %v15437_v31  ;;  %5123 = vmatpush.msra.mxu3 %v15438_v42  ;;  %v15443_v40 = vld [vmem:[#allocation209_spill] sm:$0xff]  ;;  %v15444_v10 = vld [vmem:[#allocation210_spill] sm:$0xff]  ;;  %v15445_v58 = vld [vmem:[#allocation211_spill] sm:$0xff] }
 0x988   :  { %5055 = vmatpush.msra.mxu0 %v15439_v29  ;;  %5078 = vmatpush.msra.mxu1 %v15440_v53  ;;  %v15446_v30 = vld [vmem:[#allocation212_spill] sm:$0xff]  ;;  %v15447_v6 = vld [vmem:[#allocation201_spill] sm:$0xff]  ;;  %v15448_v60 = vld [vmem:[#allocation202_spill] sm:$0xff] }
 0x989   :  { %5101 = vmatpush.msra.mxu2 %v15441_v18  ;;  %5124 = vmatpush.msra.mxu3 %v15442_v2  ;;  %v15449_v17 = vld [vmem:[#allocation203_spill] sm:$0xff]  ;;  %v15450_v51 = vld [vmem:[#allocation204_spill] sm:$0xff]  ;;  %v15451_v23 = vld [vmem:[#allocation193_spill] sm:$0xff] }
 0x98a   :  { %5056 = vmatpush.msra.mxu0 %v15443_v40  ;;  %5079 = vmatpush.msra.mxu1 %v15444_v10  ;;  %v15452_v1 = vld [vmem:[#allocation194_spill] sm:$0xff]  ;;  %v15453_v59 = vld [vmem:[#allocation195_spill] sm:$0xff]  ;;  %v15454_v35 = vld [vmem:[#allocation196_spill] sm:$0xff] }
 0x98b   :  { %5102 = vmatpush.msra.mxu2 %v15445_v58  ;;  %5125 = vmatpush.msra.mxu3 %v15446_v30  ;;  %v15455_v55 = vld [vmem:[#allocation185_spill] sm:$0xff]  ;;  %v15456_v46 = vld [vmem:[#allocation186_spill] sm:$0xff]  ;;  %v15457_v22 = vld [vmem:[#allocation187_spill] sm:$0xff] }
 0x98c   :  { %5057 = vmatpush.msra.mxu0 %v15447_v6  ;;  %5080 = vmatpush.msra.mxu1 %v15448_v60  ;;  %v15458_v33 = vld [vmem:[#allocation188_spill] sm:$0xff]  ;;  %v15459_v61 = vld [vmem:[#allocation177_spill] sm:$0xff]  ;;  %v15460_v44 = vld [vmem:[#allocation178_spill] sm:$0xff] }
 0x98d   :  { %5103 = vmatpush.msra.mxu2 %v15449_v17  ;;  %5126 = vmatpush.msra.mxu3 %v15450_v51  ;;  %v15461_v8 = vld [vmem:[#allocation179_spill] sm:$0xff]  ;;  %v15462_v62 = vld [vmem:[#allocation180_spill] sm:$0xff]  ;;  %v15463_v16 = vld [vmem:[#allocation169_spill] sm:$0xff] }
 0x98e   :  { %5058 = vmatpush.msra.mxu0 %v15451_v23  ;;  %5081 = vmatpush.msra.mxu1 %v15452_v1  ;;  %v15464_v27 = vld [vmem:[#allocation170_spill] sm:$0xff]  ;;  %v15465_v57 = vld [vmem:[#allocation171_spill] sm:$0xff]  ;;  %v15466_v54 = vld [vmem:[#allocation172_spill] sm:$0xff] }
 0x98f   :  { %5104 = vmatpush.msra.mxu2 %v15453_v59  ;;  %5127 = vmatpush.msra.mxu3 %v15454_v35  ;;  %v15467_v26 = vld [vmem:[#allocation161_spill] sm:$0xff]  ;;  %v15468_v39 = vld [vmem:[#allocation162_spill] sm:$0xff]  ;;  %v15469_v56 = vld [vmem:[#allocation163_spill] sm:$0xff] }
 0x990   :  { %5059 = vmatpush.msra.mxu0 %v15455_v55  ;;  %5082 = vmatpush.msra.mxu1 %v15456_v46  ;;  %v15470_v4 = vld [vmem:[#allocation164_spill] sm:$0xff]  ;;  %v15471_v5 = vld [vmem:[#allocation153_spill] sm:$0xff]  ;;  %v15472_v24 = vld [vmem:[#allocation154_spill] sm:$0xff] }
 0x991   :  { %5105 = vmatpush.msra.mxu2 %v15457_v22  ;;  %5128 = vmatpush.msra.mxu3 %v15458_v33  ;;  %v15473_v45 = vld [vmem:[#allocation155_spill] sm:$0xff]  ;;  %v15474_v37 = vld [vmem:[#allocation156_spill] sm:$0xff]  ;;  %v15475_v25 = vld [vmem:[#allocation145_spill] sm:$0xff] }
 0x992   :  { %5060 = vmatpush.msra.mxu0 %v15459_v61  ;;  %5083 = vmatpush.msra.mxu1 %v15460_v44  ;;  %v15476_v43 = vld [vmem:[#allocation146_spill] sm:$0xff]  ;;  %v15477_v19 = vld [vmem:[#allocation147_spill] sm:$0xff]  ;;  %v15478_v15 = vld [vmem:[#allocation148_spill] sm:$0xff] }
 0x993   :  { %5106 = vmatpush.msra.mxu2 %v15461_v8  ;;  %5129 = vmatpush.msra.mxu3 %v15462_v62  ;;  %v15479_v20 = vld [vmem:[#allocation137_spill] sm:$0xff]  ;;  %v15480_v63 = vld [vmem:[#allocation138_spill] sm:$0xff]  ;;  %v15481_v50 = vld [vmem:[#allocation139_spill] sm:$0xff] }
 0x994   :  { %5061 = vmatpush.msra.mxu0 %v15463_v16  ;;  %5084 = vmatpush.msra.mxu1 %v15464_v27  ;;  %v15482_v7 = vld [vmem:[#allocation140_spill] sm:$0xff]  ;;  %v15483_v49 = vld [vmem:[#allocation129_spill] sm:$0xff]  ;;  %v15484_v36 = vld [vmem:[#allocation130_spill] sm:$0xff] }
 0x995   :  { %5107 = vmatpush.msra.mxu2 %v15465_v57  ;;  %5130 = vmatpush.msra.mxu3 %v15466_v54  ;;  %v15485_v14 = vld [vmem:[#allocation131_spill] sm:$0xff]  ;;  %v15486_v0 = vld [vmem:[#allocation132_spill] sm:$0xff]  ;;  %v15487_v34 = vld [vmem:[#allocation245_spill] sm:$0xff] }
 0x996   :  { %5062 = vmatpush.msra.mxu0 %v15467_v26  ;;  %5085 = vmatpush.msra.mxu1 %v15468_v39  ;;  %v15488_v41 = vld [vmem:[#allocation246_spill] sm:$0xff]  ;;  %v15489_v9 = vld [vmem:[#allocation247_spill] sm:$0xff]  ;;  %v15490_v12 = vld [vmem:[#allocation248_spill] sm:$0xff] }
 0x997   :  { %5108 = vmatpush.msra.mxu2 %v15469_v56  ;;  %5131 = vmatpush.msra.mxu3 %v15470_v4  ;;  %v15491_v13 = vld [vmem:[#allocation237_spill] sm:$0xff]  ;;  %v15492_v47 = vld [vmem:[#allocation238_spill] sm:$0xff]  ;;  %v15493_v31 = vld [vmem:[#allocation239_spill] sm:$0xff] }
 0x998   :  { %5063 = vmatpush.msra.mxu0 %v15471_v5  ;;  %5086 = vmatpush.msra.mxu1 %v15472_v24  ;;  %v15494_v42 = vld [vmem:[#allocation240_spill] sm:$0xff]  ;;  %v15495_v29 = vld [vmem:[#allocation229_spill] sm:$0xff]  ;;  %v15496_v53 = vld [vmem:[#allocation230_spill] sm:$0xff] }
 0x999   :  { %5109 = vmatpush.msra.mxu2 %v15473_v45  ;;  %5132 = vmatpush.msra.mxu3 %v15474_v37  ;;  %v15497_v18 = vld [vmem:[#allocation231_spill] sm:$0xff]  ;;  %v15498_v2 = vld [vmem:[#allocation232_spill] sm:$0xff]  ;;  %v15499_v40 = vld [vmem:[#allocation221_spill] sm:$0xff] }
 0x99a   :  { %5064 = vmatpush.msra.mxu0 %v15475_v25  ;;  %5087 = vmatpush.msra.mxu1 %v15476_v43  ;;  %v15500_v10 = vld [vmem:[#allocation222_spill] sm:$0xff]  ;;  %v15501_v58 = vld [vmem:[#allocation223_spill] sm:$0xff]  ;;  %v15502_v30 = vld [vmem:[#allocation224_spill] sm:$0xff] }
 0x99b   :  { %5110 = vmatpush.msra.mxu2 %v15477_v19  ;;  %5133 = vmatpush.msra.mxu3 %v15478_v15  ;;  %v15503_v6 = vld [vmem:[#allocation213_spill] sm:$0xff]  ;;  %v15504_v60 = vld [vmem:[#allocation214_spill] sm:$0xff]  ;;  %v15505_v17 = vld [vmem:[#allocation215_spill] sm:$0xff] }
 0x99c   :  { %5065 = vmatpush.msra.mxu0 %v15479_v20  ;;  %5088 = vmatpush.msra.mxu1 %v15480_v63  ;;  %v15506_v51 = vld [vmem:[#allocation216_spill] sm:$0xff]  ;;  %v15507_v23 = vld [vmem:[#allocation205_spill] sm:$0xff]  ;;  %v15508_v1 = vld [vmem:[#allocation206_spill] sm:$0xff] }
 0x99d   :  { %5111 = vmatpush.msra.mxu2 %v15481_v50  ;;  %5134 = vmatpush.msra.mxu3 %v15482_v7  ;;  %v15509_v59 = vld [vmem:[#allocation207_spill] sm:$0xff]  ;;  %v15510_v35 = vld [vmem:[#allocation208_spill] sm:$0xff]  ;;  %v15511_v55 = vld [vmem:[#allocation197_spill] sm:$0xff] }
 0x99e   :  { %5066 = vmatpush.msra.mxu0 %v15483_v49  ;;  %5089 = vmatpush.msra.mxu1 %v15484_v36  ;;  %v15512_v46 = vld [vmem:[#allocation198_spill] sm:$0xff]  ;;  %v15513_v22 = vld [vmem:[#allocation199_spill] sm:$0xff]  ;;  %v15514_v33 = vld [vmem:[#allocation200_spill] sm:$0xff] }
 0x99f   :  { %5112 = vmatpush.msra.mxu2 %v15485_v14  ;;  %5135 = vmatpush.msra.mxu3 %v15486_v0  ;;  %v15515_v61 = vld [vmem:[#allocation189_spill] sm:$0xff]  ;;  %v15516_v44 = vld [vmem:[#allocation190_spill] sm:$0xff]  ;;  %v15517_v8 = vld [vmem:[#allocation191_spill] sm:$0xff] }
 0x9a0   :  { %5144 = vmatpush.msrb.mxu0 %v15487_v34  ;;  %5167 = vmatpush.msrb.mxu1 %v15488_v41  ;;  %v15518_v62 = vld [vmem:[#allocation192_spill] sm:$0xff]  ;;  %v15519_v16 = vld [vmem:[#allocation181_spill] sm:$0xff]  ;;  %v15520_v27 = vld [vmem:[#allocation182_spill] sm:$0xff] }
 0x9a1   :  { %5190 = vmatpush.msrb.mxu2 %v15489_v9  ;;  %5213 = vmatpush.msrb.mxu3 %v15490_v12  ;;  %v15521_v57 = vld [vmem:[#allocation183_spill] sm:$0xff]  ;;  %v15522_v54 = vld [vmem:[#allocation184_spill] sm:$0xff]  ;;  %v15523_v26 = vld [vmem:[#allocation173_spill] sm:$0xff] }
 0x9a2   :  { %5145 = vmatpush.msrb.mxu0 %v15491_v13  ;;  %5168 = vmatpush.msrb.mxu1 %v15492_v47  ;;  %v15524_v39 = vld [vmem:[#allocation174_spill] sm:$0xff]  ;;  %v15525_v56 = vld [vmem:[#allocation175_spill] sm:$0xff]  ;;  %v15526_v4 = vld [vmem:[#allocation176_spill] sm:$0xff] }
 0x9a3   :  { %5191 = vmatpush.msrb.mxu2 %v15493_v31  ;;  %5214 = vmatpush.msrb.mxu3 %v15494_v42  ;;  %v15527_v5 = vld [vmem:[#allocation165_spill] sm:$0xff]  ;;  %v15528_v24 = vld [vmem:[#allocation166_spill] sm:$0xff]  ;;  %v15529_v45 = vld [vmem:[#allocation167_spill] sm:$0xff] }
 0x9a4   :  { %5146 = vmatpush.msrb.mxu0 %v15495_v29  ;;  %5169 = vmatpush.msrb.mxu1 %v15496_v53  ;;  %v15530_v37 = vld [vmem:[#allocation168_spill] sm:$0xff]  ;;  %v15531_v25 = vld [vmem:[#allocation157_spill] sm:$0xff]  ;;  %v15532_v43 = vld [vmem:[#allocation158_spill] sm:$0xff] }
 0x9a5   :  { %5192 = vmatpush.msrb.mxu2 %v15497_v18  ;;  %5215 = vmatpush.msrb.mxu3 %v15498_v2  ;;  %v15533_v19 = vld [vmem:[#allocation159_spill] sm:$0xff]  ;;  %v15534_v15 = vld [vmem:[#allocation160_spill] sm:$0xff]  ;;  %v15535_v20 = vld [vmem:[#allocation149_spill] sm:$0xff] }
 0x9a6   :  { %5147 = vmatpush.msrb.mxu0 %v15499_v40  ;;  %5170 = vmatpush.msrb.mxu1 %v15500_v10  ;;  %v15536_v63 = vld [vmem:[#allocation150_spill] sm:$0xff]  ;;  %v15537_v50 = vld [vmem:[#allocation151_spill] sm:$0xff]  ;;  %v15538_v7 = vld [vmem:[#allocation152_spill] sm:$0xff] }
 0x9a7   :  { %5193 = vmatpush.msrb.mxu2 %v15501_v58  ;;  %5216 = vmatpush.msrb.mxu3 %v15502_v30  ;;  %v15539_v49 = vld [vmem:[#allocation141_spill] sm:$0xff]  ;;  %v15540_v36 = vld [vmem:[#allocation142_spill] sm:$0xff]  ;;  %v15541_v14 = vld [vmem:[#allocation143_spill] sm:$0xff] }
 0x9a8   :  { %5148 = vmatpush.msrb.mxu0 %v15503_v6  ;;  %5171 = vmatpush.msrb.mxu1 %v15504_v60  ;;  %v15542_v0 = vld [vmem:[#allocation144_spill] sm:$0xff]  ;;  %v15543_v34 = vld [vmem:[#allocation133_spill] sm:$0xff]  ;;  %v15544_v41 = vld [vmem:[#allocation134_spill] sm:$0xff] }
 0x9a9   :  { %5194 = vmatpush.msrb.mxu2 %v15505_v17  ;;  %5217 = vmatpush.msrb.mxu3 %v15506_v51  ;;  %v15545_v9 = vld [vmem:[#allocation135_spill] sm:$0xff]  ;;  %v15546_v12 = vld [vmem:[#allocation136_spill] sm:$0xff]  ;;  %v15547_v13 = vld [vmem:[#allocation121_spill] sm:$0xff] }
 0x9aa   :  { %5149 = vmatpush.msrb.mxu0 %v15507_v23  ;;  %5172 = vmatpush.msrb.mxu1 %v15508_v1  ;;  %v15548_v47 = vld [vmem:[#allocation122_spill] sm:$0xff]  ;;  %v15549_v31 = vld [vmem:[#allocation123_spill] sm:$0xff]  ;;  %v15550_v42 = vld [vmem:[#allocation124_spill] sm:$0xff] }
 0x9ab   :  { %5195 = vmatpush.msrb.mxu2 %v15509_v59  ;;  %5218 = vmatpush.msrb.mxu3 %v15510_v35  ;;  %v15551_v29 = vld [vmem:[#allocation113_spill] sm:$0xff]  ;;  %v15552_v53 = vld [vmem:[#allocation114_spill] sm:$0xff]  ;;  %v15553_v18 = vld [vmem:[#allocation115_spill] sm:$0xff] }
 0x9ac   :  { %5150 = vmatpush.msrb.mxu0 %v15511_v55  ;;  %5173 = vmatpush.msrb.mxu1 %v15512_v46  ;;  %v15554_v2 = vld [vmem:[#allocation116_spill] sm:$0xff]  ;;  %v15555_v40 = vld [vmem:[#allocation105_spill] sm:$0xff]  ;;  %v15556_v10 = vld [vmem:[#allocation106_spill] sm:$0xff] }
 0x9ad   :  { %5196 = vmatpush.msrb.mxu2 %v15513_v22  ;;  %5219 = vmatpush.msrb.mxu3 %v15514_v33  ;;  %v15557_v58 = vld [vmem:[#allocation107_spill] sm:$0xff]  ;;  %v15558_v30 = vld [vmem:[#allocation108_spill] sm:$0xff]  ;;  %v15559_v6 = vld [vmem:[#allocation97_spill] sm:$0xff] }
 0x9ae   :  { %5151 = vmatpush.msrb.mxu0 %v15515_v61  ;;  %5174 = vmatpush.msrb.mxu1 %v15516_v44  ;;  %v15560_v60 = vld [vmem:[#allocation98_spill] sm:$0xff]  ;;  %v15561_v17 = vld [vmem:[#allocation99_spill] sm:$0xff]  ;;  %v15562_v51 = vld [vmem:[#allocation100_spill] sm:$0xff] }
 0x9af   :  { %5197 = vmatpush.msrb.mxu2 %v15517_v8  ;;  %5220 = vmatpush.msrb.mxu3 %v15518_v62  ;;  %v15563_v23 = vld [vmem:[#allocation89_spill] sm:$0xff]  ;;  %v15564_v1 = vld [vmem:[#allocation90_spill] sm:$0xff]  ;;  %v15565_v59 = vld [vmem:[#allocation91_spill] sm:$0xff] }
 0x9b0   :  { %5152 = vmatpush.msrb.mxu0 %v15519_v16  ;;  %5175 = vmatpush.msrb.mxu1 %v15520_v27  ;;  %v15566_v35 = vld [vmem:[#allocation92_spill] sm:$0xff]  ;;  %v15567_v55 = vld [vmem:[#allocation81_spill] sm:$0xff]  ;;  %v15568_v46 = vld [vmem:[#allocation82_spill] sm:$0xff] }
 0x9b1   :  { %5198 = vmatpush.msrb.mxu2 %v15521_v57  ;;  %5221 = vmatpush.msrb.mxu3 %v15522_v54  ;;  %v15569_v22 = vld [vmem:[#allocation83_spill] sm:$0xff]  ;;  %v15570_v33 = vld [vmem:[#allocation84_spill] sm:$0xff]  ;;  %v15571_v61 = vld [vmem:[#allocation73_spill] sm:$0xff] }
 0x9b2   :  { %5153 = vmatpush.msrb.mxu0 %v15523_v26  ;;  %5176 = vmatpush.msrb.mxu1 %v15524_v39  ;;  %v15572_v44 = vld [vmem:[#allocation74_spill] sm:$0xff]  ;;  %v15573_v8 = vld [vmem:[#allocation75_spill] sm:$0xff]  ;;  %v15574_v62 = vld [vmem:[#allocation76_spill] sm:$0xff] }
 0x9b3   :  { %5199 = vmatpush.msrb.mxu2 %v15525_v56  ;;  %5222 = vmatpush.msrb.mxu3 %v15526_v4  ;;  %v15575_v16 = vld [vmem:[#allocation65_spill] sm:$0xff]  ;;  %v15576_v27 = vld [vmem:[#allocation66_spill] sm:$0xff]  ;;  %v15577_v57 = vld [vmem:[#allocation67_spill] sm:$0xff] }
 0x9b4   :  { %5154 = vmatpush.msrb.mxu0 %v15527_v5  ;;  %5177 = vmatpush.msrb.mxu1 %v15528_v24  ;;  %v15578_v54 = vld [vmem:[#allocation68_spill] sm:$0xff]  ;;  %v15579_v26 = vld [vmem:[#allocation57_spill] sm:$0xff]  ;;  %v15580_v39 = vld [vmem:[#allocation58_spill] sm:$0xff] }
 0x9b5   :  { %5200 = vmatpush.msrb.mxu2 %v15529_v45  ;;  %5223 = vmatpush.msrb.mxu3 %v15530_v37  ;;  %v15581_v56 = vld [vmem:[#allocation59_spill] sm:$0xff]  ;;  %v15582_v4 = vld [vmem:[#allocation60_spill] sm:$0xff]  ;;  %v15583_v5 = vld [vmem:[#allocation49_spill] sm:$0xff] }
 0x9b6   :  { %5155 = vmatpush.msrb.mxu0 %v15531_v25  ;;  %5178 = vmatpush.msrb.mxu1 %v15532_v43  ;;  %v15584_v24 = vld [vmem:[#allocation50_spill] sm:$0xff]  ;;  %v15586_v45 = vld [vmem:[#allocation52_spill] sm:$0xff]  ;;  %v15587_v37 = vld [vmem:[#allocation41_spill] sm:$0xff] }
 0x9b7   :  { %5201 = vmatpush.msrb.mxu2 %v15533_v19  ;;  %5224 = vmatpush.msrb.mxu3 %v15534_v15  ;;  %v15588_v25 = vld [vmem:[#allocation42_spill] sm:$0xff]  ;;  %v15589_v43 = vld [vmem:[#allocation43_spill] sm:$0xff]  ;;  %v15590_v19 = vld [vmem:[#allocation44_spill] sm:$0xff] }
 0x9b8   :  { %5156 = vmatpush.msrb.mxu0 %v15535_v20  ;;  %5179 = vmatpush.msrb.mxu1 %v15536_v63  ;;  %v15591_v15 = vld [vmem:[#allocation33_spill] sm:$0xff]  ;;  %v15592_v20 = vld [vmem:[#allocation34_spill] sm:$0xff]  ;;  %v15593_v63 = vld [vmem:[#allocation35_spill] sm:$0xff] }
 0x9b9   :  { %5202 = vmatpush.msrb.mxu2 %v15537_v50  ;;  %5225 = vmatpush.msrb.mxu3 %v15538_v7  ;;  %v15594_v50 = vld [vmem:[#allocation36_spill] sm:$0xff]  ;;  %v15595_v7 = vld [vmem:[#allocation25_spill] sm:$0xff] }
 0x9ba   :  { %7282 = vmatmul.msk.f32.vlgmr.msra.gmra.mxu0 %vm3729_vm3, %v13406_v38  ;;  %7284 = vmatmul.msk.f32.vlgmr.msra.gmra.mxu1 %vm3729_vm3, %v13406_v38 }
 0x9bb   :  { %7286 = vmatmul.msk.f32.vlgmr.msra.gmra.mxu2 %vm3729_vm3, %v13406_v38  ;;  %7288 = vmatmul.msk.f32.vlgmr.msra.gmra.mxu3 %vm3729_vm3, %v13406_v38 }
 0x9bc   :  { %5157 = vmatpush.msrb.mxu0 %v15539_v49  ;;  %5180 = vmatpush.msrb.mxu1 %v15540_v36  ;;  %v15596_v49 = vld [vmem:[#allocation26_spill] sm:$0xff]  ;;  %v15597_v36 = vld [vmem:[#allocation27_spill] sm:$0xff] }
 0x9bd   :  { %5203 = vmatpush.msrb.mxu2 %v15541_v14  ;;  %5226 = vmatpush.msrb.mxu3 %v15542_v0  ;;  %v15598_v14 = vld [vmem:[#allocation28_spill] sm:$0xff]  ;;  %v15599_v0 = vld [vmem:[#allocation17_spill] sm:$0xff] }
 0x9be   :  { %5158 = vmatpush.msrb.mxu0 %v15543_v34  ;;  %5181 = vmatpush.msrb.mxu1 %v15544_v41  ;;  %v15600_v34 = vld [vmem:[#allocation18_spill] sm:$0xff]  ;;  %v15602_v41 = vld [vmem:[#allocation20_spill] sm:$0xff] }
 0x9bf   :  { %5204 = vmatpush.msrb.mxu2 %v15545_v9  ;;  %5227 = vmatpush.msrb.mxu3 %v15546_v12  ;;  %v15603_v9 = vld [vmem:[#allocation9_spill] sm:$0xff]  ;;  %v15604_v12 = vld [vmem:[#allocation10_spill] sm:$0xff] }
 0x9c0   :  { %5242 = vmatpush.msra.mxu0 %v15547_v13  ;;  %5265 = vmatpush.msra.mxu1 %v15548_v47  ;;  %v15605_v13 = vld [vmem:[#allocation11_spill] sm:$0xff]  ;;  %v15606_v47 = vld [vmem:[#allocation12_spill] sm:$0xff] }
 0x9c1   :  { %5288 = vmatpush.msra.mxu2 %v15549_v31  ;;  %5311 = vmatpush.msra.mxu3 %v15550_v42  ;;  %v15607_v31 = vld [vmem:[#allocation125_spill] sm:$0xff]  ;;  %v15608_v42 = vld [vmem:[#allocation126_spill] sm:$0xff] }
 0x9c2   :  { %5243 = vmatpush.msra.mxu0 %v15551_v29  ;;  %5266 = vmatpush.msra.mxu1 %v15552_v53  ;;  %v15609_v29 = vld [vmem:[#allocation127_spill] sm:$0xff]  ;;  %v15610_v53 = vld [vmem:[#allocation128_spill] sm:$0xff] }
 0x9c3   :  { %5289 = vmatpush.msra.mxu2 %v15553_v18  ;;  %5312 = vmatpush.msra.mxu3 %v15554_v2  ;;  %v15611_v18 = vld [vmem:[#allocation117_spill] sm:$0xff]  ;;  %v15612_v2 = vld [vmem:[#allocation118_spill] sm:$0xff] }
 0x9c4   :  { %5244 = vmatpush.msra.mxu0 %v15555_v40  ;;  %5267 = vmatpush.msra.mxu1 %v15556_v10  ;;  %v15613_v40 = vld [vmem:[#allocation119_spill] sm:$0xff]  ;;  %v15614_v10 = vld [vmem:[#allocation120_spill] sm:$0xff] }
 0x9c5   :  { %5290 = vmatpush.msra.mxu2 %v15557_v58  ;;  %5313 = vmatpush.msra.mxu3 %v15558_v30  ;;  %v15615_v58 = vld [vmem:[#allocation109_spill] sm:$0xff]  ;;  %v15616_v30 = vld [vmem:[#allocation110_spill] sm:$0xff] }
 0x9c6   :  { %7283 = vmatmul.msk.f32.gmra.mxu0 %vm3729_vm3, %v13410_v32  ;;  %7285 = vmatmul.msk.f32.gmra.mxu1 %vm3729_vm3, %v13410_v32 }
 0x9c7   :  { %7287 = vmatmul.msk.f32.gmra.mxu2 %vm3729_vm3, %v13410_v32  ;;  %7289 = vmatmul.msk.f32.gmra.mxu3 %vm3729_vm3, %v13410_v32 }
 0x9c8   :  { %5245 = vmatpush.msra.mxu0 %v15559_v6  ;;  %5268 = vmatpush.msra.mxu1 %v15560_v60  ;;  %v15617_v6 = vld [vmem:[#allocation111_spill] sm:$0xff]  ;;  %v15618_v60 = vld [vmem:[#allocation112_spill] sm:$0xff] }
 0x9c9   :  { %5291 = vmatpush.msra.mxu2 %v15561_v17  ;;  %5314 = vmatpush.msra.mxu3 %v15562_v51  ;;  %v15619_v17 = vld [vmem:[#allocation101_spill] sm:$0xff]  ;;  %v15620_v51 = vld [vmem:[#allocation102_spill] sm:$0xff] }
 0x9ca   :  { %5246 = vmatpush.msra.mxu0 %v15563_v23  ;;  %5269 = vmatpush.msra.mxu1 %v15564_v1  ;;  %v15621_v23 = vld [vmem:[#allocation103_spill] sm:$0xff]  ;;  %v15622_v1 = vld [vmem:[#allocation104_spill] sm:$0xff] }
 0x9cb   :  { %5292 = vmatpush.msra.mxu2 %v15565_v59  ;;  %5315 = vmatpush.msra.mxu3 %v15566_v35  ;;  %v15623_v59 = vld [vmem:[#allocation93_spill] sm:$0xff]  ;;  %v15624_v35 = vld [vmem:[#allocation94_spill] sm:$0xff] }
 0x9cc   :  { %5247 = vmatpush.msra.mxu0 %v15567_v55  ;;  %5270 = vmatpush.msra.mxu1 %v15568_v46  ;;  %v15625_v55 = vld [vmem:[#allocation95_spill] sm:$0xff]  ;;  %v15626_v46 = vld [vmem:[#allocation96_spill] sm:$0xff] }
 0x9cd   :  { %5293 = vmatpush.msra.mxu2 %v15569_v22  ;;  %5316 = vmatpush.msra.mxu3 %v15570_v33  ;;  %v15627_v22 = vld [vmem:[#allocation85_spill] sm:$0xff]  ;;  %v15628_v33 = vld [vmem:[#allocation86_spill] sm:$0xff] }
 0x9ce   :  { %5248 = vmatpush.msra.mxu0 %v15571_v61  ;;  %5271 = vmatpush.msra.mxu1 %v15572_v44  ;;  %v15629_v61 = vld [vmem:[#allocation87_spill] sm:$0xff]  ;;  %v15630_v44 = vld [vmem:[#allocation88_spill] sm:$0xff] }
 0x9cf   :  { %5294 = vmatpush.msra.mxu2 %v15573_v8  ;;  %5317 = vmatpush.msra.mxu3 %v15574_v62  ;;  %v15631_v8 = vld [vmem:[#allocation77_spill] sm:$0xff]  ;;  %v15632_v62 = vld [vmem:[#allocation78_spill] sm:$0xff] }
 0x9d0   :  { %7290 = vmatmul.msk.f32.vlgmr.msrb.gmra.mxu0 %vm3729_vm3, %v13406_v38  ;;  %7292 = vmatmul.msk.f32.vlgmr.msrb.gmra.mxu1 %vm3729_vm3, %v13406_v38 }
 0x9d1   :  { %7294 = vmatmul.msk.f32.vlgmr.msrb.gmra.mxu2 %vm3729_vm3, %v13406_v38  ;;  %7296 = vmatmul.msk.f32.vlgmr.msrb.gmra.mxu3 %vm3729_vm3, %v13406_v38  ;;  %v15585_v38 = vld [vmem:[#allocation51_spill] sm:$0xff] }
 0x9d2   :  { %5249 = vmatpush.msra.mxu0 %v15575_v16  ;;  %5272 = vmatpush.msra.mxu1 %v15576_v27  ;;  %v15633_v16 = vld [vmem:[#allocation79_spill] sm:$0xff]  ;;  %v15634_v27 = vld [vmem:[#allocation80_spill] sm:$0xff] }
 0x9d3   :  { %5295 = vmatpush.msra.mxu2 %v15577_v57  ;;  %5318 = vmatpush.msra.mxu3 %v15578_v54  ;;  %v15635_v57 = vld [vmem:[#allocation69_spill] sm:$0xff]  ;;  %v15636_v54 = vld [vmem:[#allocation70_spill] sm:$0xff] }
 0x9d4   :  { %5250 = vmatpush.msra.mxu0 %v15579_v26  ;;  %5273 = vmatpush.msra.mxu1 %v15580_v39  ;;  %v15637_v26 = vld [vmem:[#allocation71_spill] sm:$0xff]  ;;  %v15638_v39 = vld [vmem:[#allocation72_spill] sm:$0xff] }
 0x9d5   :  { %5296 = vmatpush.msra.mxu2 %v15581_v56  ;;  %5319 = vmatpush.msra.mxu3 %v15582_v4  ;;  %v15639_v56 = vld [vmem:[#allocation61_spill] sm:$0xff]  ;;  %v15640_v4 = vld [vmem:[#allocation62_spill] sm:$0xff] }
 0x9d6   :  { %5251 = vmatpush.msra.mxu0 %v15583_v5  ;;  %5274 = vmatpush.msra.mxu1 %v15584_v24  ;;  %v15641_v5 = vld [vmem:[#allocation63_spill] sm:$0xff]  ;;  %v15642_v24 = vld [vmem:[#allocation64_spill] sm:$0xff] }
 0x9d7   :  { %5297 = vmatpush.msra.mxu2 %v15585_v38  ;;  %5320 = vmatpush.msra.mxu3 %v15586_v45  ;;  %v15643_v38 = vld [vmem:[#allocation53_spill] sm:$0xff]  ;;  %v15644_v45 = vld [vmem:[#allocation54_spill] sm:$0xff] }
 0x9d8   :  { %5252 = vmatpush.msra.mxu0 %v15587_v37  ;;  %5275 = vmatpush.msra.mxu1 %v15588_v25  ;;  %v15645_v37 = vld [vmem:[#allocation55_spill] sm:$0xff]  ;;  %v15646_v25 = vld [vmem:[#allocation56_spill] sm:$0xff] }
 0x9d9   :  { %5298 = vmatpush.msra.mxu2 %v15589_v43  ;;  %5321 = vmatpush.msra.mxu3 %v15590_v19  ;;  %v15647_v43 = vld [vmem:[#allocation45_spill] sm:$0xff]  ;;  %v15648_v19 = vld [vmem:[#allocation46_spill] sm:$0xff] }
 0x9da   :  { %7291 = vmatmul.msk.f32.gmra.mxu0 %vm3729_vm3, %v13410_v32  ;;  %7293 = vmatmul.msk.f32.gmra.mxu1 %vm3729_vm3, %v13410_v32 }
 0x9db   :  { %7295 = vmatmul.msk.f32.gmra.mxu2 %vm3729_vm3, %v13410_v32  ;;  %7297 = vmatmul.msk.f32.gmra.mxu3 %vm3729_vm3, %v13410_v32  ;;  %v15601_v32 = vld [vmem:[#allocation19_spill] sm:$0xff] }
 0x9dc   :  { %5253 = vmatpush.msra.mxu0 %v15591_v15  ;;  %5276 = vmatpush.msra.mxu1 %v15592_v20  ;;  %v15649_v15 = vld [vmem:[#allocation47_spill] sm:$0xff]  ;;  %v15650_v20 = vld [vmem:[#allocation48_spill] sm:$0xff] }
 0x9dd   :  { %5299 = vmatpush.msra.mxu2 %v15593_v63  ;;  %5322 = vmatpush.msra.mxu3 %v15594_v50  ;;  %v15651_v63 = vld [vmem:[#allocation37_spill] sm:$0xff]  ;;  %v15652_v50 = vld [vmem:[#allocation38_spill] sm:$0xff] }
 0x9de   :  { %5254 = vmatpush.msra.mxu0 %v15595_v7  ;;  %5277 = vmatpush.msra.mxu1 %v15596_v49  ;;  %v15653_v7 = vld [vmem:[#allocation39_spill] sm:$0xff]  ;;  %v15654_v49 = vld [vmem:[#allocation40_spill] sm:$0xff] }
 0x9df   :  { %5300 = vmatpush.msra.mxu2 %v15597_v36  ;;  %5323 = vmatpush.msra.mxu3 %v15598_v14  ;;  %v15655_v36 = vld [vmem:[#allocation29_spill] sm:$0xff]  ;;  %v15656_v14 = vld [vmem:[#allocation30_spill] sm:$0xff] }
 0x9e0   :  { %5255 = vmatpush.msra.mxu0 %v15599_v0  ;;  %5278 = vmatpush.msra.mxu1 %v15600_v34  ;;  %v15657_v0 = vld [vmem:[#allocation31_spill] sm:$0xff]  ;;  %v15658_v34 = vld [vmem:[#allocation32_spill] sm:$0xff] }
 0x9e1   :  { %5301 = vmatpush.msra.mxu2 %v15601_v32  ;;  %5324 = vmatpush.msra.mxu3 %v15602_v41  ;;  %v15659_v32 = vld [vmem:[#allocation21_spill] sm:$0xff]  ;;  %v15660_v41 = vld [vmem:[#allocation22_spill] sm:$0xff] }
 0x9e2   :  { %5256 = vmatpush.msra.mxu0 %v15603_v9  ;;  %5279 = vmatpush.msra.mxu1 %v15604_v12  ;;  %v15661_v9 = vld [vmem:[#allocation23_spill] sm:$0xff]  ;;  %v15662_v12 = vld [vmem:[#allocation24_spill] sm:$0xff] }
 0x9e3   :  { %5302 = vmatpush.msra.mxu2 %v15605_v13  ;;  %5325 = vmatpush.msra.mxu3 %v15606_v47  ;;  %v15663_v13 = vld [vmem:[#allocation13_spill] sm:$0xff]  ;;  %v15664_v47 = vld [vmem:[#allocation14_spill] sm:$0xff] }
 0x9e4   :  { %7298 = vmatmul.msk.f32.vlgmr.msra.gmra.mxu0 %vm3729_vm3, %v13398_v52  ;;  %7300 = vmatmul.msk.f32.vlgmr.msra.gmra.mxu1 %vm3729_vm3, %v13398_v52 }
 0x9e5   :  { %7302 = vmatmul.msk.f32.vlgmr.msra.gmra.mxu2 %vm3729_vm3, %v13398_v52  ;;  %7304 = vmatmul.msk.f32.vlgmr.msra.gmra.mxu3 %vm3729_vm3, %v13398_v52 }
 0x9e6   :  { %5334 = vmatpush.msrb.mxu0 %v15607_v31  ;;  %5357 = vmatpush.msrb.mxu1 %v15608_v42  ;;  %v15665_v31 = vld [vmem:[#allocation15_spill] sm:$0xff]  ;;  %v15666_v42 = vld [vmem:[#allocation16_spill] sm:$0xff] }
 0x9e7   :  { %5380 = vmatpush.msrb.mxu2 %v15609_v29  ;;  %5403 = vmatpush.msrb.mxu3 %v15610_v53  ;;  %v15667_v29 = vld [vmem:[#allocation361_spill] sm:$0xff]  ;;  %v15668_v53 = vld [vmem:[#allocation362_spill] sm:$0xff] }
 0x9e8   :  { %5335 = vmatpush.msrb.mxu0 %v15611_v18  ;;  %5358 = vmatpush.msrb.mxu1 %v15612_v2  ;;  %v15669_v18 = vld [vmem:[#allocation363_spill] sm:$0xff]  ;;  %v15670_v2 = vld [vmem:[#allocation364_spill] sm:$0xff] }
 0x9e9   :  { %5381 = vmatpush.msrb.mxu2 %v15613_v40  ;;  %5404 = vmatpush.msrb.mxu3 %v15614_v10  ;;  %v15671_v40 = vld [vmem:[#allocation353_spill] sm:$0xff]  ;;  %v15672_v10 = vld [vmem:[#allocation354_spill] sm:$0xff] }
 0x9ea   :  { %5336 = vmatpush.msrb.mxu0 %v15615_v58  ;;  %5359 = vmatpush.msrb.mxu1 %v15616_v30  ;;  %v15673_v58 = vld [vmem:[#allocation355_spill] sm:$0xff]  ;;  %v15674_v30 = vld [vmem:[#allocation356_spill] sm:$0xff] }
 0x9eb   :  { %5382 = vmatpush.msrb.mxu2 %v15617_v6  ;;  %5405 = vmatpush.msrb.mxu3 %v15618_v60  ;;  %v15675_v6 = vld [vmem:[#allocation345_spill] sm:$0xff]  ;;  %v15676_v60 = vld [vmem:[#allocation346_spill] sm:$0xff] }
 0x9ec   :  { %5337 = vmatpush.msrb.mxu0 %v15619_v17  ;;  %5360 = vmatpush.msrb.mxu1 %v15620_v51  ;;  %v15678_v17 = vld [vmem:[#allocation348_spill] sm:$0xff]  ;;  %v15679_v51 = vld [vmem:[#allocation337_spill] sm:$0xff] }
 0x9ed   :  { %5383 = vmatpush.msrb.mxu2 %v15621_v23  ;;  %5406 = vmatpush.msrb.mxu3 %v15622_v1  ;;  %v15680_v23 = vld [vmem:[#allocation338_spill] sm:$0xff]  ;;  %v15681_v1 = vld [vmem:[#allocation339_spill] sm:$0xff] }
 0x9ee   :  { %7299 = vmatmul.msk.f32.gmra.mxu0 %vm3729_vm3, %v13402_v3  ;;  %7301 = vmatmul.msk.f32.gmra.mxu1 %vm3729_vm3, %v13402_v3 }
 0x9ef   :  { %7303 = vmatmul.msk.f32.gmra.mxu2 %vm3729_vm3, %v13402_v3  ;;  %7305 = vmatmul.msk.f32.gmra.mxu3 %vm3729_vm3, %v13402_v3 }
 0x9f0   :  { %5338 = vmatpush.msrb.mxu0 %v15623_v59  ;;  %5361 = vmatpush.msrb.mxu1 %v15624_v35  ;;  %v15682_v59 = vld [vmem:[#allocation340_spill] sm:$0xff]  ;;  %v15683_v35 = vld [vmem:[#allocation329_spill] sm:$0xff] }
 0x9f1   :  { %5384 = vmatpush.msrb.mxu2 %v15625_v55  ;;  %5407 = vmatpush.msrb.mxu3 %v15626_v46  ;;  %v15684_v55 = vld [vmem:[#allocation330_spill] sm:$0xff]  ;;  %v15685_v46 = vld [vmem:[#allocation331_spill] sm:$0xff] }
 0x9f2   :  { %5339 = vmatpush.msrb.mxu0 %v15627_v22  ;;  %5362 = vmatpush.msrb.mxu1 %v15628_v33  ;;  %v15686_v22 = vld [vmem:[#allocation332_spill] sm:$0xff]  ;;  %v15687_v33 = vld [vmem:[#allocation321_spill] sm:$0xff] }
 0x9f3   :  { %5385 = vmatpush.msrb.mxu2 %v15629_v61  ;;  %5408 = vmatpush.msrb.mxu3 %v15630_v44  ;;  %v15688_v61 = vld [vmem:[#allocation322_spill] sm:$0xff]  ;;  %v15689_v44 = vld [vmem:[#allocation323_spill] sm:$0xff] }
 0x9f4   :  { %5340 = vmatpush.msrb.mxu0 %v15631_v8  ;;  %5363 = vmatpush.msrb.mxu1 %v15632_v62  ;;  %v15690_v8 = vld [vmem:[#allocation324_spill] sm:$0xff]  ;;  %v15691_v62 = vld [vmem:[#allocation313_spill] sm:$0xff] }
 0x9f5   :  { %5386 = vmatpush.msrb.mxu2 %v15633_v16  ;;  %5409 = vmatpush.msrb.mxu3 %v15634_v27  ;;  %v15692_v16 = vld [vmem:[#allocation314_spill] sm:$0xff]  ;;  %v15694_v27 = vld [vmem:[#allocation316_spill] sm:$0xff] }
 0x9f6   :  { %5341 = vmatpush.msrb.mxu0 %v15635_v57  ;;  %5364 = vmatpush.msrb.mxu1 %v15636_v54  ;;  %v15695_v57 = vld [vmem:[#allocation305_spill] sm:$0xff]  ;;  %v15696_v54 = vld [vmem:[#allocation306_spill] sm:$0xff] }
 0x9f7   :  { %5387 = vmatpush.msrb.mxu2 %v15637_v26  ;;  %5410 = vmatpush.msrb.mxu3 %v15638_v39  ;;  %v15697_v26 = vld [vmem:[#allocation307_spill] sm:$0xff]  ;;  %v15698_v39 = vld [vmem:[#allocation308_spill] sm:$0xff] }
 0x9f8   :  { %5342 = vmatpush.msrb.mxu0 %v15639_v56  ;;  %5365 = vmatpush.msrb.mxu1 %v15640_v4  ;;  %v15699_v56 = vld [vmem:[#allocation297_spill] sm:$0xff]  ;;  %v15700_v4 = vld [vmem:[#allocation298_spill] sm:$0xff] }
 0x9f9   :  { %5388 = vmatpush.msrb.mxu2 %v15641_v5  ;;  %5411 = vmatpush.msrb.mxu3 %v15642_v24  ;;  %v15701_v5 = vld [vmem:[#allocation299_spill] sm:$0xff]  ;;  %v15702_v24 = vld [vmem:[#allocation300_spill] sm:$0xff] }
 0x9fa   :  { %5343 = vmatpush.msrb.mxu0 %v15643_v38  ;;  %5366 = vmatpush.msrb.mxu1 %v15644_v45  ;;  %v15703_v38 = vld [vmem:[#allocation289_spill] sm:$0xff]  ;;  %v15704_v45 = vld [vmem:[#allocation290_spill] sm:$0xff] }
 0x9fb   :  { %5389 = vmatpush.msrb.mxu2 %v15645_v37  ;;  %5412 = vmatpush.msrb.mxu3 %v15646_v25  ;;  %v15705_v37 = vld [vmem:[#allocation291_spill] sm:$0xff]  ;;  %v15706_v25 = vld [vmem:[#allocation292_spill] sm:$0xff] }
 0x9fc   :  { %5344 = vmatpush.msrb.mxu0 %v15647_v43  ;;  %5367 = vmatpush.msrb.mxu1 %v15648_v19  ;;  %v15707_v43 = vld [vmem:[#allocation281_spill] sm:$0xff]  ;;  %v15708_v19 = vld [vmem:[#allocation282_spill] sm:$0xff] }
 0x9fd   :  { %5390 = vmatpush.msrb.mxu2 %v15649_v15  ;;  %5413 = vmatpush.msrb.mxu3 %v15650_v20  ;;  %v15709_v15 = vld [vmem:[#allocation283_spill] sm:$0xff]  ;;  %v15710_v20 = vld [vmem:[#allocation284_spill] sm:$0xff] }
 0x9fe   :  { %5345 = vmatpush.msrb.mxu0 %v15651_v63  ;;  %5368 = vmatpush.msrb.mxu1 %v15652_v50  ;;  %v15711_v63 = vld [vmem:[#allocation273_spill] sm:$0xff]  ;;  %v15712_v50 = vld [vmem:[#allocation274_spill] sm:$0xff] }
 0x9ff   :  { %5391 = vmatpush.msrb.mxu2 %v15653_v7  ;;  %5414 = vmatpush.msrb.mxu3 %v15654_v49  ;;  %v15713_v7 = vld [vmem:[#allocation275_spill] sm:$0xff]  ;;  %v15714_v49 = vld [vmem:[#allocation276_spill] sm:$0xff] }
 0xa00   :  { %5346 = vmatpush.msrb.mxu0 %v15655_v36  ;;  %5369 = vmatpush.msrb.mxu1 %v15656_v14  ;;  %v15715_v36 = vld [vmem:[#allocation265_spill] sm:$0xff]  ;;  %v15716_v14 = vld [vmem:[#allocation266_spill] sm:$0xff] }
 0xa01   :  { %5392 = vmatpush.msrb.mxu2 %v15657_v0  ;;  %5415 = vmatpush.msrb.mxu3 %v15658_v34  ;;  %v15717_v0 = vld [vmem:[#allocation267_spill] sm:$0xff]  ;;  %v15718_v34 = vld [vmem:[#allocation268_spill] sm:$0xff] }
 0xa02   :  { %5347 = vmatpush.msrb.mxu0 %v15659_v32  ;;  %5370 = vmatpush.msrb.mxu1 %v15660_v41  ;;  %v15719_v32 = vld [vmem:[#allocation257_spill] sm:$0xff]  ;;  %v15720_v41 = vld [vmem:[#allocation258_spill] sm:$0xff] }
 0xa03   :  { %5393 = vmatpush.msrb.mxu2 %v15661_v9  ;;  %5416 = vmatpush.msrb.mxu3 %v15662_v12  ;;  %v15721_v9 = vld [vmem:[#allocation259_spill] sm:$0xff]  ;;  %v15722_v12 = vld [vmem:[#allocation260_spill] sm:$0xff] }
 0xa04   :  { %5348 = vmatpush.msrb.mxu0 %v15663_v13  ;;  %5371 = vmatpush.msrb.mxu1 %v15664_v47  ;;  %v15723_v13 = vld [vmem:[#allocation249_spill] sm:$0xff]  ;;  %v15724_v47 = vld [vmem:[#allocation250_spill] sm:$0xff] }
 0xa05   :  { %5394 = vmatpush.msrb.mxu2 %v15665_v31  ;;  %5417 = vmatpush.msrb.mxu3 %v15666_v42  ;;  %v15725_v31 = vld [vmem:[#allocation251_spill] sm:$0xff]  ;;  %v15726_v42 = vld [vmem:[#allocation252_spill] sm:$0xff] }
 0xa06   :  { %7306 = vmatmul.msk.f32.vlgmr.msrb.gmra.mxu0 %vm3729_vm3, %v13398_v52  ;;  %7308 = vmatmul.msk.f32.vlgmr.msrb.gmra.mxu1 %vm3729_vm3, %v13398_v52 }
 0xa07   :  { %7310 = vmatmul.msk.f32.vlgmr.msrb.gmra.mxu2 %vm3729_vm3, %v13398_v52  ;;  %7312 = vmatmul.msk.f32.vlgmr.msrb.gmra.mxu3 %vm3729_vm3, %v13398_v52  ;;  %v15677_v52 = vld [vmem:[#allocation347_spill] sm:$0xff] }
 0xa08   :  { %5553 = vmatpush.msra.mxu0 %v15667_v29  ;;  %5576 = vmatpush.msra.mxu1 %v15668_v53  ;;  %v15727_v29 = vld [vmem:[#allocation365_spill] sm:$0xff]  ;;  %v15728_v53 = vld [vmem:[#allocation366_spill] sm:$0xff] }
 0xa09   :  { %5599 = vmatpush.msra.mxu2 %v15669_v18  ;;  %5622 = vmatpush.msra.mxu3 %v15670_v2  ;;  %v15729_v18 = vld [vmem:[#allocation367_spill] sm:$0xff]  ;;  %v15730_v2 = vld [vmem:[#allocation368_spill] sm:$0xff] }
 0xa0a   :  { %5554 = vmatpush.msra.mxu0 %v15671_v40  ;;  %5577 = vmatpush.msra.mxu1 %v15672_v10  ;;  %v15731_v40 = vld [vmem:[#allocation357_spill] sm:$0xff]  ;;  %v15732_v10 = vld [vmem:[#allocation358_spill] sm:$0xff] }
 0xa0b   :  { %5600 = vmatpush.msra.mxu2 %v15673_v58  ;;  %5623 = vmatpush.msra.mxu3 %v15674_v30  ;;  %v15733_v58 = vld [vmem:[#allocation359_spill] sm:$0xff]  ;;  %v15734_v30 = vld [vmem:[#allocation360_spill] sm:$0xff] }
 0xa0c   :  { %5555 = vmatpush.msra.mxu0 %v15675_v6  ;;  %5578 = vmatpush.msra.mxu1 %v15676_v60  ;;  %v15735_v6 = vld [vmem:[#allocation349_spill] sm:$0xff]  ;;  %v15736_v60 = vld [vmem:[#allocation350_spill] sm:$0xff] }
 0xa0d   :  { %5601 = vmatpush.msra.mxu2 %v15677_v52  ;;  %5624 = vmatpush.msra.mxu3 %v15678_v17  ;;  %v15737_v52 = vld [vmem:[#allocation351_spill] sm:$0xff]  ;;  %v15738_v17 = vld [vmem:[#allocation352_spill] sm:$0xff] }
 0xa0e   :  { %5556 = vmatpush.msra.mxu0 %v15679_v51  ;;  %5579 = vmatpush.msra.mxu1 %v15680_v23  ;;  %v15739_v51 = vld [vmem:[#allocation341_spill] sm:$0xff]  ;;  %v15740_v23 = vld [vmem:[#allocation342_spill] sm:$0xff] }
 0xa0f   :  { %5602 = vmatpush.msra.mxu2 %v15681_v1  ;;  %5625 = vmatpush.msra.mxu3 %v15682_v59  ;;  %v15741_v1 = vld [vmem:[#allocation343_spill] sm:$0xff]  ;;  %v15742_v59 = vld [vmem:[#allocation344_spill] sm:$0xff] }
 0xa10   :  { %7307 = vmatmul.msk.f32.gmra.mxu0 %vm3729_vm3, %v13402_v3  ;;  %7309 = vmatmul.msk.f32.gmra.mxu1 %vm3729_vm3, %v13402_v3 }
 0xa11   :  { %7311 = vmatmul.msk.f32.gmra.mxu2 %vm3729_vm3, %v13402_v3  ;;  %7313 = vmatmul.msk.f32.gmra.mxu3 %vm3729_vm3, %v13402_v3  ;;  %v15693_v3 = vld [vmem:[#allocation315_spill] sm:$0xff] }
 0xa12   :  { %5557 = vmatpush.msra.mxu0 %v15683_v35  ;;  %5580 = vmatpush.msra.mxu1 %v15684_v55  ;;  %v15743_v35 = vld [vmem:[#allocation333_spill] sm:$0xff]  ;;  %v15744_v55 = vld [vmem:[#allocation334_spill] sm:$0xff] }
 0xa13   :  { %5603 = vmatpush.msra.mxu2 %v15685_v46  ;;  %5626 = vmatpush.msra.mxu3 %v15686_v22  ;;  %v15745_v46 = vld [vmem:[#allocation335_spill] sm:$0xff]  ;;  %v15746_v22 = vld [vmem:[#allocation336_spill] sm:$0xff] }
 0xa14   :  { %5558 = vmatpush.msra.mxu0 %v15687_v33  ;;  %5581 = vmatpush.msra.mxu1 %v15688_v61  ;;  %v15747_v33 = vld [vmem:[#allocation325_spill] sm:$0xff]  ;;  %v15748_v61 = vld [vmem:[#allocation326_spill] sm:$0xff] }
 0xa15   :  { %5604 = vmatpush.msra.mxu2 %v15689_v44  ;;  %5627 = vmatpush.msra.mxu3 %v15690_v8  ;;  %v15749_v44 = vld [vmem:[#allocation327_spill] sm:$0xff]  ;;  %v15750_v8 = vld [vmem:[#allocation328_spill] sm:$0xff] }
 0xa16   :  { %5559 = vmatpush.msra.mxu0 %v15691_v62  ;;  %5582 = vmatpush.msra.mxu1 %v15692_v16  ;;  %v15751_v62 = vld [vmem:[#allocation317_spill] sm:$0xff]  ;;  %v15752_v16 = vld [vmem:[#allocation318_spill] sm:$0xff] }
 0xa17   :  { %5605 = vmatpush.msra.mxu2 %v15693_v3  ;;  %5628 = vmatpush.msra.mxu3 %v15694_v27  ;;  %v15753_v3 = vld [vmem:[#allocation319_spill] sm:$0xff]  ;;  %v15754_v27 = vld [vmem:[#allocation320_spill] sm:$0xff] }
 0xa18   :  { %5560 = vmatpush.msra.mxu0 %v15695_v57  ;;  %5583 = vmatpush.msra.mxu1 %v15696_v54  ;;  %v15755_v57 = vld [vmem:[#allocation309_spill] sm:$0xff]  ;;  %v15756_v54 = vld [vmem:[#allocation310_spill] sm:$0xff] }
 0xa19   :  { %5606 = vmatpush.msra.mxu2 %v15697_v26  ;;  %5629 = vmatpush.msra.mxu3 %v15698_v39  ;;  %v15757_v26 = vld [vmem:[#allocation311_spill] sm:$0xff]  ;;  %v15758_v39 = vld [vmem:[#allocation312_spill] sm:$0xff] }
 0xa1a   :  { %5561 = vmatpush.msra.mxu0 %v15699_v56  ;;  %5584 = vmatpush.msra.mxu1 %v15700_v4  ;;  %v15759_v56 = vld [vmem:[#allocation301_spill] sm:$0xff]  ;;  %v15760_v4 = vld [vmem:[#allocation302_spill] sm:$0xff] }
 0xa1b   :  { %5607 = vmatpush.msra.mxu2 %v15701_v5  ;;  %5630 = vmatpush.msra.mxu3 %v15702_v24  ;;  %v15761_v5 = vld [vmem:[#allocation303_spill] sm:$0xff]  ;;  %v15762_v24 = vld [vmem:[#allocation304_spill] sm:$0xff] }
 0xa1c   :  { %5562 = vmatpush.msra.mxu0 %v15703_v38  ;;  %5585 = vmatpush.msra.mxu1 %v15704_v45  ;;  %v15763_v38 = vld [vmem:[#allocation293_spill] sm:$0xff]  ;;  %v15764_v45 = vld [vmem:[#allocation294_spill] sm:$0xff] }
 0xa1d   :  { %5608 = vmatpush.msra.mxu2 %v15705_v37  ;;  %5631 = vmatpush.msra.mxu3 %v15706_v25  ;;  %v15765_v37 = vld [vmem:[#allocation295_spill] sm:$0xff]  ;;  %v15766_v25 = vld [vmem:[#allocation296_spill] sm:$0xff] }
 0xa1e   :  { %5563 = vmatpush.msra.mxu0 %v15707_v43  ;;  %5586 = vmatpush.msra.mxu1 %v15708_v19  ;;  %v15767_v43 = vld [vmem:[#allocation285_spill] sm:$0xff]  ;;  %v15768_v19 = vld [vmem:[#allocation286_spill] sm:$0xff] }
 0xa1f   :  { %5609 = vmatpush.msra.mxu2 %v15709_v15  ;;  %5632 = vmatpush.msra.mxu3 %v15710_v20  ;;  %v15769_v15 = vld [vmem:[#allocation287_spill] sm:$0xff]  ;;  %v15770_v20 = vld [vmem:[#allocation288_spill] sm:$0xff] }
 0xa20   :  { %5564 = vmatpush.msra.mxu0 %v15711_v63  ;;  %5587 = vmatpush.msra.mxu1 %v15712_v50  ;;  %v15771_v63 = vld [vmem:[#allocation277_spill] sm:$0xff]  ;;  %v15772_v50 = vld [vmem:[#allocation278_spill] sm:$0xff] }
 0xa21   :  { %5610 = vmatpush.msra.mxu2 %v15713_v7  ;;  %5633 = vmatpush.msra.mxu3 %v15714_v49  ;;  %v15773_v7 = vld [vmem:[#allocation279_spill] sm:$0xff]  ;;  %v15774_v49 = vld [vmem:[#allocation280_spill] sm:$0xff] }
 0xa22   :  { %5565 = vmatpush.msra.mxu0 %v15715_v36  ;;  %5588 = vmatpush.msra.mxu1 %v15716_v14  ;;  %v15775_v36 = vld [vmem:[#allocation269_spill] sm:$0xff]  ;;  %v15776_v14 = vld [vmem:[#allocation270_spill] sm:$0xff] }
 0xa23   :  { %5611 = vmatpush.msra.mxu2 %v15717_v0  ;;  %5634 = vmatpush.msra.mxu3 %v15718_v34  ;;  %v15777_v0 = vld [vmem:[#allocation271_spill] sm:$0xff]  ;;  %v15778_v34 = vld [vmem:[#allocation272_spill] sm:$0xff] }
 0xa24   :  { %5566 = vmatpush.msra.mxu0 %v15719_v32  ;;  %5589 = vmatpush.msra.mxu1 %v15720_v41  ;;  %v15779_v32 = vld [vmem:[#allocation261_spill] sm:$0xff]  ;;  %v15780_v41 = vld [vmem:[#allocation262_spill] sm:$0xff] }
 0xa25   :  { %5612 = vmatpush.msra.mxu2 %v15721_v9  ;;  %5635 = vmatpush.msra.mxu3 %v15722_v12  ;;  %v15781_v9 = vld [vmem:[#allocation263_spill] sm:$0xff]  ;;  %v15782_v12 = vld [vmem:[#allocation264_spill] sm:$0xff] }
 0xa26   :  { %5567 = vmatpush.msra.mxu0 %v15723_v13  ;;  %5590 = vmatpush.msra.mxu1 %v15724_v47  ;;  %v15783_v13 = vld [vmem:[#allocation253_spill] sm:$0xff]  ;;  %v15784_v47 = vld [vmem:[#allocation254_spill] sm:$0xff] }
 0xa27   :  { %5613 = vmatpush.msra.mxu2 %v15725_v31  ;;  %5636 = vmatpush.msra.mxu3 %v15726_v42  ;;  %v15785_v31 = vld [vmem:[#allocation255_spill] sm:$0xff]  ;;  %v15786_v42 = vld [vmem:[#allocation256_spill] sm:$0xff] }
 0xa28   :  { %7314 = vmatmul.msk.f32.vlgmr.msra.gmra.mxu0 %vm3729_vm3, %v13414_v21  ;;  %7316 = vmatmul.msk.f32.vlgmr.msra.gmra.mxu1 %vm3729_vm3, %v13414_v21 }
 0xa29   :  { %7318 = vmatmul.msk.f32.vlgmr.msra.gmra.mxu2 %vm3729_vm3, %v13414_v21  ;;  %7320 = vmatmul.msk.f32.vlgmr.msra.gmra.mxu3 %vm3729_vm3, %v13414_v21 }
 0xa2a   :  { %5645 = vmatpush.msrb.mxu0 %v15727_v29  ;;  %5668 = vmatpush.msrb.mxu1 %v15728_v53 }
 0xa2b   :  { %5691 = vmatpush.msrb.mxu2 %v15729_v18  ;;  %5714 = vmatpush.msrb.mxu3 %v15730_v2  ;;  %v15787_v18 = vld [vmem:[#allocation481_spill] sm:$0xff]  ;;  %v15788_v2 = vld [vmem:[#allocation482_spill] sm:$0xff] }
 0xa2c   :  { %5646 = vmatpush.msrb.mxu0 %v15731_v40  ;;  %5669 = vmatpush.msrb.mxu1 %v15732_v10  ;;  %v15789_v40 = vld [vmem:[#allocation483_spill] sm:$0xff]  ;;  %v15790_v10 = vld [vmem:[#allocation484_spill] sm:$0xff] }
 0xa2d   :  { %5692 = vmatpush.msrb.mxu2 %v15733_v58  ;;  %5715 = vmatpush.msrb.mxu3 %v15734_v30  ;;  %v15791_v58 = vld [vmem:[#allocation473_spill] sm:$0xff]  ;;  %v15792_v30 = vld [vmem:[#allocation474_spill] sm:$0xff] }
 0xa2e   :  { %5647 = vmatpush.msrb.mxu0 %v15735_v6  ;;  %5670 = vmatpush.msrb.mxu1 %v15736_v60  ;;  %v15793_v6 = vld [vmem:[#allocation475_spill] sm:$0xff]  ;;  %v15794_v60 = vld [vmem:[#allocation476_spill] sm:$0xff] }
 0xa2f   :  { %5693 = vmatpush.msrb.mxu2 %v15737_v52  ;;  %5716 = vmatpush.msrb.mxu3 %v15738_v17  ;;  %v15795_v52 = vld [vmem:[#allocation465_spill] sm:$0xff]  ;;  %v15796_v17 = vld [vmem:[#allocation466_spill] sm:$0xff] }
 0xa30   :  { %5648 = vmatpush.msrb.mxu0 %v15739_v51  ;;  %5671 = vmatpush.msrb.mxu1 %v15740_v23  ;;  %v15797_v23 = vld [vmem:[#allocation467_spill] sm:$0xff] }
 0xa31   :  { %5694 = vmatpush.msrb.mxu2 %v15741_v1  ;;  %5717 = vmatpush.msrb.mxu3 %v15742_v59  ;;  %v15798_v1 = vld [vmem:[#allocation468_spill] sm:$0xff]  ;;  %v15799_v59 = vld [vmem:[#allocation457_spill] sm:$0xff] }
 0xa32   :  { %7315 = vmatmul.msk.f32.gmra.mxu0 %vm3729_vm3, %v13418_v11  ;;  %7317 = vmatmul.msk.f32.gmra.mxu1 %vm3729_vm3, %v13418_v11 }
 0xa33   :  { %7319 = vmatmul.msk.f32.gmra.mxu2 %vm3729_vm3, %v13418_v11  ;;  %7321 = vmatmul.msk.f32.gmra.mxu3 %vm3729_vm3, %v13418_v11 }
 0xa34   :  { %5649 = vmatpush.msrb.mxu0 %v15743_v35  ;;  %5672 = vmatpush.msrb.mxu1 %v15744_v55  ;;  %v15800_v35 = vld [vmem:[#allocation458_spill] sm:$0xff]  ;;  %v15801_v55 = vld [vmem:[#allocation459_spill] sm:$0xff] }
 0xa35   :  { %5695 = vmatpush.msrb.mxu2 %v15745_v46  ;;  %5718 = vmatpush.msrb.mxu3 %v15746_v22  ;;  %v15802_v46 = vld [vmem:[#allocation460_spill] sm:$0xff] }
 0xa36   :  { %5650 = vmatpush.msrb.mxu0 %v15747_v33  ;;  %5673 = vmatpush.msrb.mxu1 %v15748_v61  ;;  %v15803_v61 = vld [vmem:[#allocation449_spill] sm:$0xff] }
 0xa37   :  { %5696 = vmatpush.msrb.mxu2 %v15749_v44  ;;  %5719 = vmatpush.msrb.mxu3 %v15750_v8  ;;  %v13866_v29 = vpop.f32.mrf.mxu0  ;;  %v13868_v53 = vpop.f32.mrf.mxu1  ;;  %v15804_v44 = vld [vmem:[#allocation450_spill] sm:$0xff]  ;;  %v15805_v8 = vld [vmem:[#allocation451_spill] sm:$0xff] }
 0xa38   :  { %5651 = vmatpush.msrb.mxu0 %v15751_v62  ;;  %5674 = vmatpush.msrb.mxu1 %v15752_v16  ;;  %v15806_v62 = vld [vmem:[#allocation452_spill] sm:$0xff]  ;;  %v15807_v16 = vld [vmem:[#allocation441_spill] sm:$0xff] }
 0xa39   :  { %5697 = vmatpush.msrb.mxu2 %v15753_v3  ;;  %5720 = vmatpush.msrb.mxu3 %v15754_v27  ;;  %v15808_v3 = vld [vmem:[#allocation442_spill] sm:$0xff]  ;;  %v15809_v27 = vld [vmem:[#allocation443_spill] sm:$0xff] }
 0xa3a   :  { %5652 = vmatpush.msrb.mxu0 %v15755_v57  ;;  %5675 = vmatpush.msrb.mxu1 %v15756_v54  ;;  %v15810_v57 = vld [vmem:[#allocation444_spill] sm:$0xff]  ;;  %v15811_v54 = vld [vmem:[#allocation433_spill] sm:$0xff] }
 0xa3b   :  { %5698 = vmatpush.msrb.mxu2 %v15757_v26  ;;  %5721 = vmatpush.msrb.mxu3 %v15758_v39  ;;  %v15812_v26 = vld [vmem:[#allocation434_spill] sm:$0xff] }
 0xa3c   :  { %5653 = vmatpush.msrb.mxu0 %v15759_v56  ;;  %5676 = vmatpush.msrb.mxu1 %v15760_v4  ;;  %v15813_v56 = vld [vmem:[#allocation435_spill] sm:$0xff]  ;;  %v15814_v4 = vld [vmem:[#allocation436_spill] sm:$0xff] }
 0xa3d   :  { %5699 = vmatpush.msrb.mxu2 %v15761_v5  ;;  %5722 = vmatpush.msrb.mxu3 %v15762_v24  ;;  %v15815_v5 = vld [vmem:[#allocation425_spill] sm:$0xff]  ;;  %v15816_v24 = vld [vmem:[#allocation426_spill] sm:$0xff] }
 0xa3e   :  { %5654 = vmatpush.msrb.mxu0 %v15763_v38  ;;  %5677 = vmatpush.msrb.mxu1 %v15764_v45  ;;  %v13890_v51 = vpop.f32.mrf.mxu3  ;;  %v15817_v38 = vld [vmem:[#allocation427_spill] sm:$0xff]  ;;  %v15818_v45 = vld [vmem:[#allocation428_spill] sm:$0xff] }
 0xa3f   :  { %5700 = vmatpush.msrb.mxu2 %v15765_v37  ;;  %5723 = vmatpush.msrb.mxu3 %v15766_v25 }
 0xa40   :  { %5655 = vmatpush.msrb.mxu0 %v15767_v43  ;;  %5678 = vmatpush.msrb.mxu1 %v15768_v19  ;;  %v15819_v43 = vld [vmem:[#allocation417_spill] sm:$0xff]  ;;  %v15820_v19 = vld [vmem:[#allocation418_spill] sm:$0xff] }
 0xa41   :  { %5701 = vmatpush.msrb.mxu2 %v15769_v15  ;;  %5724 = vmatpush.msrb.mxu3 %v15770_v20  ;;  %v15821_v15 = vld [vmem:[#allocation419_spill] sm:$0xff]  ;;  %v15822_v20 = vld [vmem:[#allocation420_spill] sm:$0xff] }
 0xa42   :  { %5656 = vmatpush.msrb.mxu0 %v15771_v63  ;;  %5679 = vmatpush.msrb.mxu1 %v15772_v50  ;;  %v15823_v63 = vld [vmem:[#allocation409_spill] sm:$0xff]  ;;  %v15824_v50 = vld [vmem:[#allocation410_spill] sm:$0xff] }
 0xa43   :  { %5702 = vmatpush.msrb.mxu2 %v15773_v7  ;;  %5725 = vmatpush.msrb.mxu3 %v15774_v49  ;;  %v13898_v22 = vpop.f32.mrf.mxu0  ;;  %v13900_v33 = vpop.f32.mrf.mxu1  ;;  %v15825_v7 = vld [vmem:[#allocation411_spill] sm:$0xff]  ;;  %v15826_v49 = vld [vmem:[#allocation412_spill] sm:$0xff] }
 0xa44   :  { %5657 = vmatpush.msrb.mxu0 %v15775_v36  ;;  %5680 = vmatpush.msrb.mxu1 %v15776_v14  ;;  %v15827_v36 = vld [vmem:[#allocation401_spill] sm:$0xff]  ;;  %v15828_v14 = vld [vmem:[#allocation402_spill] sm:$0xff] }
 0xa45   :  { %5703 = vmatpush.msrb.mxu2 %v15777_v0  ;;  %5726 = vmatpush.msrb.mxu3 %v15778_v34  ;;  %v15829_v0 = vld [vmem:[#allocation403_spill] sm:$0xff]  ;;  %v15830_v34 = vld [vmem:[#allocation404_spill] sm:$0xff] }
 0xa46   :  { %5658 = vmatpush.msrb.mxu0 %v15779_v32  ;;  %5681 = vmatpush.msrb.mxu1 %v15780_v41  ;;  %v15831_v32 = vld [vmem:[#allocation393_spill] sm:$0xff]  ;;  %v15832_v41 = vld [vmem:[#allocation394_spill] sm:$0xff] }
 0xa47   :  { %5704 = vmatpush.msrb.mxu2 %v15781_v9  ;;  %5727 = vmatpush.msrb.mxu3 %v15782_v12 }
 0xa48   :  { %5659 = vmatpush.msrb.mxu0 %v15783_v13  ;;  %5682 = vmatpush.msrb.mxu1 %v15784_v47  ;;  %v15833_v13 = vld [vmem:[#allocation395_spill] sm:$0xff]  ;;  %v15834_v47 = vld [vmem:[#allocation396_spill] sm:$0xff] }
 0xa49   :  { %5705 = vmatpush.msrb.mxu2 %v15785_v31  ;;  %5728 = vmatpush.msrb.mxu3 %v15786_v42  ;;  %v15835_v31 = vld [vmem:[#allocation385_spill] sm:$0xff]  ;;  %v15836_v42 = vld [vmem:[#allocation386_spill] sm:$0xff] }
 0xa4a   :  { %7322 = vmatmul.msk.f32.vlgmr.msrb.gmra.mxu0 %vm3729_vm3, %v13414_v21  ;;  %7324 = vmatmul.msk.f32.vlgmr.msrb.gmra.mxu1 %vm3729_vm3, %v13414_v21  ;;  %v13922_v39 = vpop.f32.mrf.mxu3 }
 0xa4b   :  { %7326 = vmatmul.msk.f32.vlgmr.msrb.gmra.mxu2 %vm3729_vm3, %v13414_v21  ;;  %7328 = vmatmul.msk.f32.vlgmr.msrb.gmra.mxu3 %vm3729_vm3, %v13414_v21  ;;  %v13888_v21 = vpop.f32.mrf.mxu2 }
 0xa4c   :  { %5880 = vmatpush.msra.mxu0 %v15787_v18  ;;  %5903 = vmatpush.msra.mxu1 %v15788_v2  ;;  %v15837_v18 = vld [vmem:[#allocation387_spill] sm:$0xff]  ;;  %v15838_v2 = vld [vmem:[#allocation388_spill] sm:$0xff] }
 0xa4d   :  { %5926 = vmatpush.msra.mxu2 %v15789_v40  ;;  %5949 = vmatpush.msra.mxu3 %v15790_v10  ;;  %v13930_v37 = vpop.f32.mrf.mxu0  ;;  %v13932_v25 = vpop.f32.mrf.mxu1 }
 0xa4e   :  { %5881 = vmatpush.msra.mxu0 %v15791_v58  ;;  %5904 = vmatpush.msra.mxu1 %v15792_v30  ;;  %v15839_v58 = vld [vmem:[#allocation377_spill] sm:$0xff]  ;;  %v15840_v30 = vld [vmem:[#allocation378_spill] sm:$0xff] }
 0xa4f   :  { %5927 = vmatpush.msra.mxu2 %v15793_v6  ;;  %5950 = vmatpush.msra.mxu3 %v15794_v60  ;;  %v15841_v6 = vld [vmem:[#allocation379_spill] sm:$0xff]  ;;  %v15842_v60 = vld [vmem:[#allocation380_spill] sm:$0xff] }
 0xa50   :  { %5882 = vmatpush.msra.mxu0 %v15795_v52  ;;  %5905 = vmatpush.msra.mxu1 %v15796_v17  ;;  %v15843_v52 = vld [vmem:[#allocation369_spill] sm:$0xff]  ;;  %v15844_v17 = vld [vmem:[#allocation370_spill] sm:$0xff] }
 0xa51   :  { %5928 = vmatpush.msra.mxu2 %v15797_v23  ;;  %5951 = vmatpush.msra.mxu3 %v15798_v1  ;;  %v15845_v23 = vld [vmem:[#allocation371_spill] sm:$0xff]  ;;  %v15846_v1 = vld [vmem:[#allocation372_spill] sm:$0xff] }
 0xa52   :  { %5883 = vmatpush.msra.mxu0 %v15799_v59  ;;  %5906 = vmatpush.msra.mxu1 %v15800_v35  ;;  %v15847_v59 = vld [vmem:[#allocation485_spill] sm:$0xff]  ;;  %v15848_v35 = vld [vmem:[#allocation486_spill] sm:$0xff] }
 0xa53   :  { %5929 = vmatpush.msra.mxu2 %v15801_v55  ;;  %5952 = vmatpush.msra.mxu3 %v15802_v46 }
 0xa54   :  { %7323 = vmatmul.msk.f32.gmra.mxu0 %vm3729_vm3, %v13418_v11  ;;  %7325 = vmatmul.msk.f32.gmra.mxu1 %vm3729_vm3, %v13418_v11  ;;  %v13950_v12 = vpop.f32.mrf.mxu3 }
 0xa55   :  { %7327 = vmatmul.msk.f32.gmra.mxu2 %vm3729_vm3, %v13418_v11  ;;  %7329 = vmatmul.msk.f32.gmra.mxu3 %vm3729_vm3, %v13418_v11  ;;  %v13920_v11 = vpop.f32.mrf.mxu2 }
 0xa56   :  { %5884 = vmatpush.msra.mxu0 %v15803_v61  ;;  %5907 = vmatpush.msra.mxu1 %v15804_v44  ;;  %v15849_v61 = vld [vmem:[#allocation487_spill] sm:$0xff]  ;;  %v15850_v44 = vld [vmem:[#allocation488_spill] sm:$0xff] }
 0xa57   :  { %5930 = vmatpush.msra.mxu2 %v15805_v8  ;;  %5953 = vmatpush.msra.mxu3 %v15806_v62  ;;  %v13958_v40 = vpop.f32.mrf.mxu0  ;;  %v13960_v10 = vpop.f32.mrf.mxu1  ;;  %v15851_v8 = vld [vmem:[#allocation477_spill] sm:$0xff]  ;;  %v15852_v62 = vld [vmem:[#allocation478_spill] sm:$0xff] }
 0xa58   :  { %5885 = vmatpush.msra.mxu0 %v15807_v16  ;;  %5908 = vmatpush.msra.mxu1 %v15808_v3  ;;  %v15853_v16 = vld [vmem:[#allocation479_spill] sm:$0xff]  ;;  %v15854_v3 = vld [vmem:[#allocation480_spill] sm:$0xff] }
 0xa59   :  { %5931 = vmatpush.msra.mxu2 %v15809_v27  ;;  %5954 = vmatpush.msra.mxu3 %v15810_v57 }
 0xa5a   :  { %5886 = vmatpush.msra.mxu0 %v15811_v54  ;;  %5909 = vmatpush.msra.mxu1 %v15812_v26  ;;  %v15855_v54 = vld [vmem:[#allocation469_spill] sm:$0xff]  ;;  %v15856_v26 = vld [vmem:[#allocation470_spill] sm:$0xff] }
 0xa5b   :  { %5932 = vmatpush.msra.mxu2 %v15813_v56  ;;  %5955 = vmatpush.msra.mxu3 %v15814_v4  ;;  %v15857_v56 = vld [vmem:[#allocation471_spill] sm:$0xff]  ;;  %v15858_v4 = vld [vmem:[#allocation472_spill] sm:$0xff] }
 0xa5c   :  { %5887 = vmatpush.msra.mxu0 %v15815_v5  ;;  %5910 = vmatpush.msra.mxu1 %v15816_v24  ;;  %v15859_v5 = vld [vmem:[#allocation461_spill] sm:$0xff]  ;;  %v15860_v24 = vld [vmem:[#allocation462_spill] sm:$0xff] }
 0xa5d   :  { %5933 = vmatpush.msra.mxu2 %v15817_v38  ;;  %5956 = vmatpush.msra.mxu3 %v15818_v45  ;;  %v13948_v9 = vpop.f32.mrf.mxu2  ;;  %v15861_v38 = vld [vmem:[#allocation463_spill] sm:$0xff]  ;;  %v15862_v45 = vld [vmem:[#allocation464_spill] sm:$0xff] }
 0xa5e   :  { %5888 = vmatpush.msra.mxu0 %v15819_v43  ;;  %5911 = vmatpush.msra.mxu1 %v15820_v19  ;;  %v13982_v46 = vpop.f32.mrf.mxu3  ;;  %v15863_v43 = vld [vmem:[#allocation453_spill] sm:$0xff]  ;;  %v15864_v19 = vld [vmem:[#allocation454_spill] sm:$0xff] }
 0xa5f   :  { %5934 = vmatpush.msra.mxu2 %v15821_v15  ;;  %5957 = vmatpush.msra.mxu3 %v15822_v20 }
 0xa60   :  { %5889 = vmatpush.msra.mxu0 %v15823_v63  ;;  %5912 = vmatpush.msra.mxu1 %v15824_v50  ;;  %v15865_v63 = vld [vmem:[#allocation455_spill] sm:$0xff]  ;;  %v15866_v50 = vld [vmem:[#allocation456_spill] sm:$0xff] }
 0xa61   :  { %5935 = vmatpush.msra.mxu2 %v15825_v7  ;;  %5958 = vmatpush.msra.mxu3 %v15826_v49  ;;  %v13990_v27 = vpop.f32.mrf.mxu0  ;;  %v13992_v57 = vpop.f32.mrf.mxu1  ;;  %v15867_v7 = vld [vmem:[#allocation445_spill] sm:$0xff]  ;;  %v15868_v49 = vld [vmem:[#allocation446_spill] sm:$0xff] }
 0xa62   :  { %5890 = vmatpush.msra.mxu0 %v15827_v36  ;;  %5913 = vmatpush.msra.mxu1 %v15828_v14  ;;  %v15869_v36 = vld [vmem:[#allocation447_spill] sm:$0xff]  ;;  %v15870_v14 = vld [vmem:[#allocation448_spill] sm:$0xff] }
 0xa63   :  { %5936 = vmatpush.msra.mxu2 %v15829_v0  ;;  %5959 = vmatpush.msra.mxu3 %v15830_v34 }
 0xa64   :  { %5891 = vmatpush.msra.mxu0 %v15831_v32  ;;  %5914 = vmatpush.msra.mxu1 %v15832_v41  ;;  %v15871_v32 = vld [vmem:[#allocation437_spill] sm:$0xff]  ;;  %v15872_v41 = vld [vmem:[#allocation438_spill] sm:$0xff] }
 0xa65   :  { %5937 = vmatpush.msra.mxu2 %v15833_v13  ;;  %5960 = vmatpush.msra.mxu3 %v15834_v47  ;;  %v13980_v55 = vpop.f32.mrf.mxu2  ;;  %v15873_v13 = vld [vmem:[#allocation439_spill] sm:$0xff]  ;;  %v15874_v47 = vld [vmem:[#allocation440_spill] sm:$0xff] }
 0xa66   :  { %5892 = vmatpush.msra.mxu0 %v15835_v31  ;;  %5915 = vmatpush.msra.mxu1 %v15836_v42  ;;  %v15875_v31 = vld [vmem:[#allocation429_spill] sm:$0xff]  ;;  %v15876_v42 = vld [vmem:[#allocation430_spill] sm:$0xff] }
 0xa67   :  { %5938 = vmatpush.msra.mxu2 %v15837_v18  ;;  %5961 = vmatpush.msra.mxu3 %v15838_v2  ;;  %v15877_v18 = vld [vmem:[#allocation431_spill] sm:$0xff]  ;;  %v15878_v2 = vld [vmem:[#allocation432_spill] sm:$0xff] }
 0xa68   :  { %5893 = vmatpush.msra.mxu0 %v15839_v58  ;;  %5916 = vmatpush.msra.mxu1 %v15840_v30  ;;  %v14014_v20 = vpop.f32.mrf.mxu3  ;;  %v15879_v58 = vld [vmem:[#allocation421_spill] sm:$0xff]  ;;  %v15880_v30 = vld [vmem:[#allocation422_spill] sm:$0xff] }
 0xa69   :  { %5939 = vmatpush.msra.mxu2 %v15841_v6  ;;  %5962 = vmatpush.msra.mxu3 %v15842_v60  ;;  %v15881_v6 = vld [vmem:[#allocation423_spill] sm:$0xff]  ;;  %v15882_v60 = vld [vmem:[#allocation424_spill] sm:$0xff] }
 0xa6a   :  { %5894 = vmatpush.msra.mxu0 %v15843_v52  ;;  %5917 = vmatpush.msra.mxu1 %v15844_v17  ;;  %v15883_v52 = vld [vmem:[#allocation413_spill] sm:$0xff]  ;;  %v15884_v17 = vld [vmem:[#allocation414_spill] sm:$0xff] }
 0xa6b   :  { %5940 = vmatpush.msra.mxu2 %v15845_v23  ;;  %5963 = vmatpush.msra.mxu3 %v15846_v1  ;;  %v14022_v0 = vpop.f32.mrf.mxu0  ;;  %v14024_v34 = vpop.f32.mrf.mxu1 }
 0xa6c   :  { %7330 = vmatmul.msk.f32.vlgmr.msra.gmra.mxu0 %vm3729_vm3, %v13421_v48  ;;  %7332 = vmatmul.msk.f32.vlgmr.msra.gmra.mxu1 %vm3729_vm3, %v13421_v48 }
 0xa6d   :  { %7334 = vmatmul.msk.f32.vlgmr.msra.gmra.mxu2 %vm3729_vm3, %v13421_v48  ;;  %7336 = vmatmul.msk.f32.vlgmr.msra.gmra.mxu3 %vm3729_vm3, %v13421_v48  ;;  %v14012_v15 = vpop.f32.mrf.mxu2 }
 0xa6e   :  { %5972 = vmatpush.msrb.mxu0 %v15847_v59  ;;  %5995 = vmatpush.msrb.mxu1 %v15848_v35  ;;  %v15885_v59 = vld [vmem:[#allocation415_spill] sm:$0xff]  ;;  %v15886_v35 = vld [vmem:[#allocation416_spill] sm:$0xff] }
 0xa6f   :  { %6018 = vmatpush.msrb.mxu2 %v15849_v61  ;;  %6041 = vmatpush.msrb.mxu3 %v15850_v44 }
 0xa70   :  { %5973 = vmatpush.msrb.mxu0 %v15851_v8  ;;  %5996 = vmatpush.msrb.mxu1 %v15852_v62  ;;  %v15887_v8 = vld [vmem:[#allocation405_spill] sm:$0xff]  ;;  %v15888_v62 = vld [vmem:[#allocation406_spill] sm:$0xff] }
 0xa71   :  { %6019 = vmatpush.msrb.mxu2 %v15853_v16  ;;  %6042 = vmatpush.msrb.mxu3 %v15854_v3 }
 0xa72   :  { %5974 = vmatpush.msrb.mxu0 %v15855_v54  ;;  %5997 = vmatpush.msrb.mxu1 %v15856_v26  ;;  %v14042_v1 = vpop.f32.mrf.mxu3  ;;  %v15889_v54 = vld [vmem:[#allocation407_spill] sm:$0xff]  ;;  %v15890_v26 = vld [vmem:[#allocation408_spill] sm:$0xff] }
 0xa73   :  { %6020 = vmatpush.msrb.mxu2 %v15857_v56  ;;  %6043 = vmatpush.msrb.mxu3 %v15858_v4  ;;  %v15891_v56 = vld [vmem:[#allocation397_spill] sm:$0xff]  ;;  %v15892_v4 = vld [vmem:[#allocation398_spill] sm:$0xff] }
 0xa74   :  { %5975 = vmatpush.msrb.mxu0 %v15859_v5  ;;  %5998 = vmatpush.msrb.mxu1 %v15860_v24  ;;  %v15893_v5 = vld [vmem:[#allocation399_spill] sm:$0xff]  ;;  %v15894_v24 = vld [vmem:[#allocation400_spill] sm:$0xff] }
 0xa75   :  { %6021 = vmatpush.msrb.mxu2 %v15861_v38  ;;  %6044 = vmatpush.msrb.mxu3 %v15862_v45  ;;  %v14040_v23 = vpop.f32.mrf.mxu2  ;;  %v15895_v38 = vld [vmem:[#allocation389_spill] sm:$0xff]  ;;  %v15896_v45 = vld [vmem:[#allocation390_spill] sm:$0xff] }
 0xa76   :  { %7331 = vmatmul.msk.f32.gmra.mxu0 %vm3729_vm3, %v13424_v28  ;;  %7333 = vmatmul.msk.f32.gmra.mxu1 %vm3729_vm3, %v13424_v28 }
 0xa77   :  { %7335 = vmatmul.msk.f32.gmra.mxu2 %vm3729_vm3, %v13424_v28  ;;  %7337 = vmatmul.msk.f32.gmra.mxu3 %vm3729_vm3, %v13424_v28 }
 0xa78   :  { %5976 = vmatpush.msrb.mxu0 %v15863_v43  ;;  %5999 = vmatpush.msrb.mxu1 %v15864_v19  ;;  %v15899_v43 = vld [vmem:[#allocation381_spill] sm:$0xff]  ;;  %v15900_v19 = vld [vmem:[#allocation382_spill] sm:$0xff] }
 0xa79   :  { %6022 = vmatpush.msrb.mxu2 %v15865_v63  ;;  %6045 = vmatpush.msrb.mxu3 %v15866_v50 }
 0xa7a   :  { %5977 = vmatpush.msrb.mxu0 %v15867_v7  ;;  %6000 = vmatpush.msrb.mxu1 %v15868_v49  ;;  %v15901_v7 = vld [vmem:[#allocation383_spill] sm:$0xff]  ;;  %v15902_v49 = vld [vmem:[#allocation384_spill] sm:$0xff] }
 0xa7b   :  { %6023 = vmatpush.msrb.mxu2 %v15869_v36  ;;  %6046 = vmatpush.msrb.mxu3 %v15870_v14 }
 0xa7c   :  { %5978 = vmatpush.msrb.mxu0 %v15871_v32  ;;  %6001 = vmatpush.msrb.mxu1 %v15872_v41  ;;  %v15903_v32 = vld [vmem:[#allocation373_spill] sm:$0xff]  ;;  %v15904_v41 = vld [vmem:[#allocation374_spill] sm:$0xff] }
 0xa7d   :  { %6024 = vmatpush.msrb.mxu2 %v15873_v13  ;;  %6047 = vmatpush.msrb.mxu3 %v15874_v47  ;;  %v15905_v13 = vld [vmem:[#allocation375_spill] sm:$0xff]  ;;  %v15906_v47 = vld [vmem:[#allocation376_spill] sm:$0xff] }
 0xa7e   :  { %5979 = vmatpush.msrb.mxu0 %v15875_v31  ;;  %6002 = vmatpush.msrb.mxu1 %v15876_v42 }
 0xa7f   :  { %6025 = vmatpush.msrb.mxu2 %v15877_v18  ;;  %6048 = vmatpush.msrb.mxu3 %v15878_v2 }
 0xa80   :  { %5980 = vmatpush.msrb.mxu0 %v15879_v58  ;;  %6003 = vmatpush.msrb.mxu1 %v15880_v30 }
 0xa81   :  { %6026 = vmatpush.msrb.mxu2 %v15881_v6  ;;  %6049 = vmatpush.msrb.mxu3 %v15882_v60  ;;  %v6141_v6 = vld [vmem:[%s14597_s6 + $0x60] sm:$0xff] }
 0xa82   :  { %5981 = vmatpush.msrb.mxu0 %v15883_v52  ;;  %6004 = vmatpush.msrb.mxu1 %v15884_v17  ;;  %v6157_v60 = vld [vmem:[%s14597_s6 + $0xe0] sm:$0xff]  ;;  %v6176_v52 = vld [vmem:[%s14597_s6 + $0x178] sm:$0xff] }
 0xa83   :  { %6027 = vmatpush.msrb.mxu2 %v15885_v59  ;;  %6050 = vmatpush.msrb.mxu3 %v15886_v35  ;;  %v5350_v61 = vpop.f32.mrf.mxu0  ;;  %v5373_v44 = vpop.f32.mrf.mxu1  ;;  %v6140_v17 = vld [vmem:[%s14597_s6 + $0x58] sm:$0xff]  ;;  %v6175_v35 = vld [vmem:[%s14597_s6 + $0x170] sm:$0xff] }
 0xa84   :  { %5982 = vmatpush.msrb.mxu0 %v15887_v8  ;;  %6005 = vmatpush.msrb.mxu1 %v15888_v62  ;;  %v14049_v16 = vadd.f32 %v5350_v61, %v13930_v37  ;;  %v14052_v3 = vadd.f32 %v5373_v44, %v13932_v25  ;;  %v15897_v37 = vld [vmem:[#allocation391_spill] sm:$0xff]  ;;  %v15898_v25 = vld [vmem:[#allocation392_spill] sm:$0xff]  ;;  %v6156_v59 = vld [vmem:[%s14597_s6 + $0xd8] sm:$0xff] }
 0xa85   :  { %6028 = vmatpush.msrb.mxu2 %v15889_v54  ;;  %6051 = vmatpush.msrb.mxu3 %v15890_v26  ;;  %v6192_v61 = vld [vmem:[%s14597_s6 + $0x1f8] sm:$0xff]  ;;  %v6139_v44 = vld [vmem:[%s14597_s6 + $0x50] sm:$0xff]  ;;  %v6174_v62 = vld [vmem:[%s14597_s6 + $0x168] sm:$0xff] }
 0xa86   :  { %5983 = vmatpush.msrb.mxu0 %v15891_v56  ;;  %6006 = vmatpush.msrb.mxu1 %v15892_v4  ;;  %v6155_v8 = vld [vmem:[%s14597_s6 + $0xd0] sm:$0xff]  ;;  %v6138_v26 = vld [vmem:[%s14597_s6 + $0x48] sm:$0xff]  ;;  %v6173_v4 = vld [vmem:[%s14597_s6 + $0x160] sm:$0xff] }
 0xa87   :  { %6029 = vmatpush.msrb.mxu2 %v15893_v5  ;;  %6052 = vmatpush.msrb.mxu3 %v15894_v24  ;;  %v6191_v54 = vld [vmem:[%s14597_s6 + $0x1f0] sm:$0xff]  ;;  %v6154_v56 = vld [vmem:[%s14597_s6 + $0xc8] sm:$0xff]  ;;  %v6137_v24 = vld [vmem:[%s14597_s6 + $0x40] sm:$0xff] }
 0xa88   :  { %5984 = vmatpush.msrb.mxu0 %v15895_v38  ;;  %6007 = vmatpush.msrb.mxu1 %v15896_v45  ;;  %v6190_v5 = vld [vmem:[%s14597_s6 + $0x1e8] sm:$0xff]  ;;  %v6153_v38 = vld [vmem:[%s14597_s6 + $0xc0] sm:$0xff]  ;;  %v6172_v45 = vld [vmem:[%s14597_s6 + $0x158] sm:$0xff] }
 0xa89   :  { %6030 = vmatpush.msrb.mxu2 %v15897_v37  ;;  %6053 = vmatpush.msrb.mxu3 %v15898_v25  ;;  %v6189_v37 = vld [vmem:[%s14597_s6 + $0x1e0] sm:$0xff]  ;;  %v6136_v25 = vld [vmem:[%s14597_s6 + $0x38] sm:$0xff] }
 0xa8a   :  { %5985 = vmatpush.msrb.mxu0 %v15899_v43  ;;  %6008 = vmatpush.msrb.mxu1 %v15900_v19  ;;  %v5396_v63 = vpop.f32.mrf.mxu2  ;;  %v5419_v50 = vpop.f32.mrf.mxu3  ;;  %v6152_v43 = vld [vmem:[%s14597_s6 + $0xb8] sm:$0xff]  ;;  %v6171_v19 = vld [vmem:[%s14597_s6 + $0x150] sm:$0xff] }
 0xa8b   :  { %6031 = vmatpush.msrb.mxu2 %v15901_v7  ;;  %6054 = vmatpush.msrb.mxu3 %v15902_v49  ;;  %v14069_v36 = vadd.f32 %v5396_v63, %v13948_v9  ;;  %v14072_v14 = vadd.f32 %v5419_v50, %v13950_v12  ;;  %v6188_v63 = vld [vmem:[%s14597_s6 + $0x1d8] sm:$0xff]  ;;  %v6135_v50 = vld [vmem:[%s14597_s6 + $0x30] sm:$0xff]  ;;  %v6170_v49 = vld [vmem:[%s14597_s6 + $0x148] sm:$0xff] }
 0xa8c   :  { %5986 = vmatpush.msrb.mxu0 %v15903_v32  ;;  %6009 = vmatpush.msrb.mxu1 %v15904_v41  ;;  %v6151_v7 = vld [vmem:[%s14597_s6 + $0xb0] sm:$0xff]  ;;  %v6134_v41 = vld [vmem:[%s14597_s6 + $0x28] sm:$0xff] }
 0xa8d   :  { %6032 = vmatpush.msrb.mxu2 %v15905_v13  ;;  %6055 = vmatpush.msrb.mxu3 %v15906_v47  ;;  %v5353_v31 = vpop.f32.mrf.mxu0  ;;  %v5376_v42 = vpop.f32.mrf.mxu1  ;;  %v6187_v32 = vld [vmem:[%s14597_s6 + $0x1d0] sm:$0xff]  ;;  %v6150_v13 = vld [vmem:[%s14597_s6 + $0xa8] sm:$0xff]  ;;  %v6169_v47 = vld [vmem:[%s14597_s6 + $0x140] sm:$0xff] }
 0xa8e   :  { %7338 = vmatmul.msk.f32.vlgmr.msrb.gmra.mxu0 %vm3729_vm3, %v13421_v48  ;;  %7340 = vmatmul.msk.f32.vlgmr.msrb.gmra.mxu1 %vm3729_vm3, %v13421_v48  ;;  %v14083_v9 = vadd.f32 %v5353_v31, %v13958_v40  ;;  %v14086_v12 = vadd.f32 %v5376_v42, %v13960_v10  ;;  %v6160_v40 = vld [vmem:[%s14597_s6 + $0xf8] sm:$0xff]  ;;  %v6143_v10 = vld [vmem:[%s14597_s6 + $0x70] sm:$0xff]  ;;  %v6186_v31 = vld [vmem:[%s14597_s6 + $0x1c8] sm:$0xff] }
 0xa8f   :  { %7342 = vmatmul.msk.f32.vlgmr.msrb.gmra.mxu2 %vm3729_vm3, %v13421_v48  ;;  %7344 = vmatmul.msk.f32.vlgmr.msrb.gmra.mxu3 %vm3729_vm3, %v13421_v48  ;;  %v6144_v48 = vld [vmem:[%s14597_s6 + $0x78] sm:$0xff]  ;;  %v6133_v42 = vld [vmem:[%s14597_s6 + $0x20] sm:$0xff] }
 0xa90   :  { %6265 = vmatpush.msra.mxu0 %v6144_v48  ;;  %6288 = vmatpush.msra.mxu1 %v6160_v40  ;;  %v6185_v48 = vld [vmem:[%s14597_s6 + $0x1c0] sm:$0xff]  ;;  %v6132_v40 = vld [vmem:[%s14597_s6 + $0x18] sm:$0xff] }
 0xa91   :  { %6311 = vmatpush.msra.mxu2 %v6176_v52  ;;  %6334 = vmatpush.msra.mxu3 %v6192_v61 }
 0xa92   :  { %6266 = vmatpush.msra.mxu0 %v6143_v10  ;;  %v6148_v10 = vld [vmem:[%s14597_s6 + $0x98] sm:$0xff] }
 0xa93   :  { %6312 = vmatpush.msra.mxu2 %v6175_v35  ;;  %6335 = vmatpush.msra.mxu3 %v6191_v54  ;;  %v6166_v35 = vld [vmem:[%s14597_s6 + $0x128] sm:$0xff] }
 0xa94   :  { %v5399_v18 = vpop.f32.mrf.mxu2  ;;  %v5422_v2 = vpop.f32.mrf.mxu3  ;;  %v6146_v54 = vld [vmem:[%s14597_s6 + $0x88] sm:$0xff] }
 0xa95   :  { %v14093_v58 = vadd.f32 %v5399_v18, %v13980_v55  ;;  %v14096_v30 = vadd.f32 %v5422_v2, %v13982_v46  ;;  %v6159_v55 = vld [vmem:[%s14597_s6 + $0xf0] sm:$0xff]  ;;  %v6158_v46 = vld [vmem:[%s14597_s6 + $0xe8] sm:$0xff]  ;;  %6313 = vmatpush.msra.mxu2 %v6174_v62  ;;  %6336 = vmatpush.msra.mxu3 %v6190_v5  ;;  %v6149_v18 = vld [vmem:[%s14597_s6 + $0xa0] sm:$0xff] }
 0xa96   :  { %7339 = vmatmul.msk.f32.gmra.mxu0 %vm3729_vm3, %v13424_v28  ;;  %7341 = vmatmul.msk.f32.gmra.mxu1 %vm3729_vm3, %v13424_v28  ;;  %v6168_v2 = vld [vmem:[%s14597_s6 + $0x138] sm:$0xff]  ;;  %v6130_v62 = vld [vmem:[%s14597_s6 + $0x8] sm:$0xff]  ;;  %v6145_v5 = vld [vmem:[%s14597_s6 + $0x80] sm:$0xff] }
 0xa97   :  { %7343 = vmatmul.msk.f32.gmra.mxu2 %vm3729_vm3, %v13424_v28  ;;  %7345 = vmatmul.msk.f32.gmra.mxu3 %vm3729_vm3, %v13424_v28  ;;  %v6142_v28 = vld [vmem:[%s14597_s6 + $0x68] sm:$0xff] }
 0xa98   :  { %6289 = vmatpush.msra.mxu1 %v6159_v55  ;;  %6267 = vmatpush.msra.mxu0 %v6142_v28  ;;  %v6167_v55 = vld [vmem:[%s14597_s6 + $0x130] sm:$0xff]  ;;  %v6184_v28 = vld [vmem:[%s14597_s6 + $0x1b8] sm:$0xff] }
 0xa99   :  { %6314 = vmatpush.msra.mxu2 %v6173_v4  ;;  %6337 = vmatpush.msra.mxu3 %v6189_v37  ;;  %v6129_v4 = vld [vmem:[%s14597_s6] sm:$0xff]  ;;  %v6224_v37 = vld [vmem:[%s14597_s6 + $0x2f8] sm:$0xff] }
 0xa9a   :  { %6290 = vmatpush.msra.mxu1 %v6158_v46  ;;  %6268 = vmatpush.msra.mxu0 %v6141_v6 }
 0xa9b   :  { %6315 = vmatpush.msra.mxu2 %v6172_v45  ;;  %6338 = vmatpush.msra.mxu3 %v6188_v63  ;;  %v6208_v45 = vld [vmem:[%s14597_s6 + $0x278] sm:$0xff]  ;;  %v6223_v63 = vld [vmem:[%s14597_s6 + $0x2f0] sm:$0xff] }
 0xa9c   :  { %6291 = vmatpush.msra.mxu1 %v6157_v60  ;;  %6269 = vmatpush.msra.mxu0 %v6140_v17  ;;  %v6131_v17 = vld [vmem:[%s14597_s6 + $0x10] sm:$0xff] }
 0xa9d   :  { %6316 = vmatpush.msra.mxu2 %v6171_v19  ;;  %6339 = vmatpush.msra.mxu3 %v6187_v32  ;;  %v6207_v19 = vld [vmem:[%s14597_s6 + $0x270] sm:$0xff] }
 0xa9e   :  { %6292 = vmatpush.msra.mxu1 %v6156_v59  ;;  %6270 = vmatpush.msra.mxu0 %v6139_v44  ;;  %v6147_v59 = vld [vmem:[%s14597_s6 + $0x90] sm:$0xff] }
 0xa9f   :  { %6317 = vmatpush.msra.mxu2 %v6170_v49  ;;  %6340 = vmatpush.msra.mxu3 %v6186_v31  ;;  %v6179_v32 = vld [vmem:[%s14597_s6 + $0x190] sm:$0xff] }
 0xaa0   :  { %6293 = vmatpush.msra.mxu1 %v6155_v8  ;;  %6271 = vmatpush.msra.mxu0 %v6138_v26  ;;  %v6183_v8 = vld [vmem:[%s14597_s6 + $0x1b0] sm:$0xff]  ;;  %v6165_v26 = vld [vmem:[%s14597_s6 + $0x120] sm:$0xff] }
 0xaa1   :  { %6318 = vmatpush.msra.mxu2 %v6169_v47  ;;  %6341 = vmatpush.msra.mxu3 %v6185_v48  ;;  %v6221_v48 = vld [vmem:[%s14597_s6 + $0x2e0] sm:$0xff] }
 0xaa2   :  { %6294 = vmatpush.msra.mxu1 %v6154_v56  ;;  %6272 = vmatpush.msra.mxu0 %v6137_v24  ;;  %v6182_v56 = vld [vmem:[%s14597_s6 + $0x1a8] sm:$0xff]  ;;  %v6164_v24 = vld [vmem:[%s14597_s6 + $0x118] sm:$0xff] }
 0xaa3   :  { %6319 = vmatpush.msra.mxu2 %v6168_v2  ;;  %6342 = vmatpush.msra.mxu3 %v6184_v28  ;;  %v6205_v2 = vld [vmem:[%s14597_s6 + $0x260] sm:$0xff]  ;;  %v6220_v28 = vld [vmem:[%s14597_s6 + $0x2d8] sm:$0xff] }
 0xaa4   :  { %6295 = vmatpush.msra.mxu1 %v6153_v38  ;;  %6273 = vmatpush.msra.mxu0 %v6136_v25  ;;  %v6181_v38 = vld [vmem:[%s14597_s6 + $0x1a0] sm:$0xff]  ;;  %v6163_v25 = vld [vmem:[%s14597_s6 + $0x110] sm:$0xff] }
 0xaa5   :  { %v14241_v46 = vpop.f32.mrf.mxu0  ;;  %v14243_v6 = vpop.f32.mrf.mxu1  ;;  %6320 = vmatpush.msra.mxu2 %v6167_v55  ;;  %6343 = vmatpush.msra.mxu3 %v6183_v8  ;;  %v6204_v55 = vld [vmem:[%s14597_s6 + $0x258] sm:$0xff]  ;;  %v6238_v8 = vld [vmem:[%s14597_s6 + $0x368] sm:$0xff] }
 0xaa6   :  { %6296 = vmatpush.msra.mxu1 %v6152_v43  ;;  %6274 = vmatpush.msra.mxu0 %v6135_v50  ;;  %v6180_v43 = vld [vmem:[%s14597_s6 + $0x198] sm:$0xff]  ;;  %v6162_v50 = vld [vmem:[%s14597_s6 + $0x108] sm:$0xff] }
 0xaa7   :  { %6321 = vmatpush.msra.mxu2 %v6166_v35  ;;  %6344 = vmatpush.msra.mxu3 %v6182_v56  ;;  %v6219_v35 = vld [vmem:[%s14597_s6 + $0x2d0] sm:$0xff]  ;;  %v6202_v56 = vld [vmem:[%s14597_s6 + $0x248] sm:$0xff] }
 0xaa8   :  { %6297 = vmatpush.msra.mxu1 %v6151_v7  ;;  %6275 = vmatpush.msra.mxu0 %v6134_v41  ;;  %v6206_v41 = vld [vmem:[%s14597_s6 + $0x268] sm:$0xff] }
 0xaa9   :  { %6322 = vmatpush.msra.mxu2 %v6165_v26  ;;  %6345 = vmatpush.msra.mxu3 %v6181_v38  ;;  %v6201_v38 = vld [vmem:[%s14597_s6 + $0x240] sm:$0xff] }
 0xaaa   :  { %6298 = vmatpush.msra.mxu1 %v6150_v13  ;;  %6276 = vmatpush.msra.mxu0 %v6133_v42  ;;  %v6222_v13 = vld [vmem:[%s14597_s6 + $0x2e8] sm:$0xff]  ;;  %v6161_v42 = vld [vmem:[%s14597_s6 + $0x100] sm:$0xff] }
 0xaab   :  { %6323 = vmatpush.msra.mxu2 %v6164_v24  ;;  %6346 = vmatpush.msra.mxu3 %v6180_v43  ;;  %v6237_v24 = vld [vmem:[%s14597_s6 + $0x360] sm:$0xff]  ;;  %v6236_v43 = vld [vmem:[%s14597_s6 + $0x358] sm:$0xff] }
 0xaac   :  { %6299 = vmatpush.msra.mxu1 %v6149_v18  ;;  %6277 = vmatpush.msra.mxu0 %v6132_v40  ;;  %v14245_v60 = vpop.f32.mrf.mxu2  ;;  %v14247_v52 = vpop.f32.mrf.mxu3  ;;  %v6178_v18 = vld [vmem:[%s14597_s6 + $0x188] sm:$0xff]  ;;  %v6240_v40 = vld [vmem:[%s14597_s6 + $0x378] sm:$0xff] }
 0xaad   :  { %6324 = vmatpush.msra.mxu2 %v6163_v25  ;;  %6347 = vmatpush.msra.mxu3 %v6179_v32  ;;  %v6235_v32 = vld [vmem:[%s14597_s6 + $0x350] sm:$0xff] }
 0xaae   :  { %6300 = vmatpush.msra.mxu1 %v6148_v10  ;;  %6278 = vmatpush.msra.mxu0 %v6131_v17  ;;  %v6177_v10 = vld [vmem:[%s14597_s6 + $0x180] sm:$0xff]  ;;  %v6239_v17 = vld [vmem:[%s14597_s6 + $0x370] sm:$0xff] }
 0xaaf   :  { %v14258_v61 = vpop.f32.mrf.mxu0  ;;  %v14260_v44 = vpop.f32.mrf.mxu1  ;;  %6325 = vmatpush.msra.mxu2 %v6162_v50  ;;  %6348 = vmatpush.msra.mxu3 %v6178_v18  ;;  %v6251_v50 = vld [vmem:[%s14597_s6 + $0x3d0] sm:$0xff]  ;;  %v14419_v18 = vld [vmem:[%s14596_s5] sm:$0xff] }
 0xab0   :  { %6301 = vmatpush.msra.mxu1 %v6147_v59  ;;  %6279 = vmatpush.msra.mxu0 %v6130_v62  ;;  %v6203_v59 = vld [vmem:[%s14597_s6 + $0x250] sm:$0xff]  ;;  %v6253_v62 = vld [vmem:[%s14597_s6 + $0x3e0] sm:$0xff] }
 0xab1   :  { %6326 = vmatpush.msra.mxu2 %v6161_v42  ;;  %6349 = vmatpush.msra.mxu3 %v6177_v10  ;;  %v6215_v42 = vld [vmem:[%s14597_s6 + $0x2b0] sm:$0xff]  ;;  %v5282_v10 = vadd.f32 %v13992_v57, %v13868_v53 }
 0xab2   :  { %6302 = vmatpush.msra.mxu1 %v6146_v54  ;;  %6280 = vmatpush.msra.mxu0 %v6129_v4  ;;  %v6218_v4 = vld [vmem:[%s14597_s6 + $0x2c8] sm:$0xff] }
 0xab3   :  { %6403 = vmatpush.msrb.mxu2 %v6240_v40  ;;  %6429 = vmatpush.msrb.mxu3 %v6253_v62  ;;  %v5259_v40 = vadd.f32 %v13990_v27, %v13866_v29  ;;  %v6248_v29 = vld [vmem:[%s14597_s6 + $0x3b8] sm:$0xff]  ;;  %v5737_v27 = vadd.f32 %v14243_v6, %v5282_v10  ;;  %v6197_v62 = vld [vmem:[%s14597_s6 + $0x220] sm:$0xff]  ;;  %v6084_v10 = vperm.slane %v14419_v18, 3 }
 0xab4   :  { %6303 = vmatpush.msra.mxu1 %v6145_v5  ;;  %6357 = vmatpush.msrb.mxu0 %v6208_v45  ;;  %v6252_v5 = vld [vmem:[%s14597_s6 + $0x3d8] sm:$0xff]  ;;  %v6217_v45 = vld [vmem:[%s14597_s6 + $0x2c0] sm:$0xff] }
 0xab5   :  { %6404 = vmatpush.msrb.mxu2 %v6239_v17  ;;  %6430 = vmatpush.msrb.mxu3 %v6252_v5  ;;  %v6233_v17 = vld [vmem:[%s14597_s6 + $0x340] sm:$0xff]  ;;  %v5736_v53 = vadd.f32 %v14241_v46, %v5259_v40  ;;  %v6083_v40 = vperm.slane %v14419_v18, 2 }
 0xab6   :  { %6380 = vmatpush.msrb.mxu1 %v6224_v37  ;;  %v14310_v7 = vpop.f32.mrf.mxu2  ;;  %v14312_v49 = vpop.f32.mrf.mxu3  ;;  %6358 = vmatpush.msrb.mxu0 %v6207_v19  ;;  %v6200_v19 = vld [vmem:[%s14597_s6 + $0x238] sm:$0xff]  ;;  %v6213_v46 = vld [vmem:[%s14597_s6 + $0x2a0] sm:$0xff] }
 0xab7   :  { %6405 = vmatpush.msrb.mxu2 %v6238_v8  ;;  %6431 = vmatpush.msrb.mxu3 %v6251_v50  ;;  %v6082_v8 = vperm.slane %v14419_v18, 1  ;;  %v6247_v50 = vld [vmem:[%s14597_s6 + $0x3b0] sm:$0xff] }
 0xab8   :  { %6381 = vmatpush.msrb.mxu1 %v6223_v63  ;;  %6359 = vmatpush.msrb.mxu0 %v6206_v41  ;;  %v6216_v63 = vld [vmem:[%s14597_s6 + $0x2b8] sm:$0xff]  ;;  %v6250_v41 = vld [vmem:[%s14597_s6 + $0x3c8] sm:$0xff] }
 0xab9   :  { %6406 = vmatpush.msrb.mxu2 %v6237_v24  ;;  %6432 = vmatpush.msrb.mxu3 %v6250_v41  ;;  %v5328_v41 = vadd.f32 %v14014_v20, %v13890_v51  ;;  %v6246_v51 = vld [vmem:[%s14597_s6 + $0x3a8] sm:$0xff] }
 0xaba   :  { %6382 = vmatpush.msrb.mxu1 %v6222_v13  ;;  %6360 = vmatpush.msrb.mxu0 %v6205_v2  ;;  %v6199_v13 = vld [vmem:[%s14597_s6 + $0x230] sm:$0xff]  ;;  %v6234_v2 = vld [vmem:[%s14597_s6 + $0x348] sm:$0xff] }
 0xabb   :  { %6407 = vmatpush.msrb.mxu2 %v6236_v43  ;;  %v6231_v43 = vld [vmem:[%s14597_s6 + $0x330] sm:$0xff]  ;;  %v5739_v20 = vadd.f32 %v14247_v52, %v5328_v41  ;;  %v5308_v41 = vadd.f32 %v14040_v23, %v13920_v11 }
 0xabc   :  { %6383 = vmatpush.msrb.mxu1 %v6221_v48  ;;  %6361 = vmatpush.msrb.mxu0 %v6204_v55  ;;  %v6249_v48 = vld [vmem:[%s14597_s6 + $0x3c0] sm:$0xff]  ;;  %v6198_v55 = vld [vmem:[%s14597_s6 + $0x228] sm:$0xff] }
 0xabd   :  { %6408 = vmatpush.msrb.mxu2 %v6235_v32  ;;  %6433 = vmatpush.msrb.mxu3 %v6249_v48  ;;  %v5305_v32 = vadd.f32 %v14012_v15, %v13888_v21  ;;  %v6230_v21 = vld [vmem:[%s14597_s6 + $0x328] sm:$0xff] }
 0xabe   :  { %6384 = vmatpush.msrb.mxu1 %v6220_v28  ;;  %6362 = vmatpush.msrb.mxu0 %v6203_v59  ;;  %v6214_v28 = vld [vmem:[%s14597_s6 + $0x2a8] sm:$0xff] }
 0xabf   :  { %6409 = vmatpush.msrb.mxu2 %v6234_v2  ;;  %6434 = vmatpush.msrb.mxu3 %v6248_v29  ;;  %v5738_v15 = vadd.f32 %v14245_v60, %v5305_v32  ;;  %v5285_v60 = vadd.f32 %v14024_v34, %v13900_v33  ;;  %v6209_v33 = vld [vmem:[%s14597_s6 + $0x280] sm:$0xff] }
 0xac0   :  { %6385 = vmatpush.msrb.mxu1 %v6219_v35  ;;  %6363 = vmatpush.msrb.mxu0 %v6202_v56  ;;  %v6081_v35 = vperm.slane %v14419_v18, 0 }
 0xac1   :  { %6410 = vmatpush.msrb.mxu2 %v6233_v17  ;;  %6435 = vmatpush.msrb.mxu3 %v6247_v50  ;;  %v5262_v17 = vadd.f32 %v14022_v0, %v13898_v22  ;;  %v6193_v22 = vld [vmem:[%s14597_s6 + $0x200] sm:$0xff]  ;;  %v5745_v34 = vadd.f32 %v14260_v44, %v5285_v60  ;;  %v6085_v60 = vperm.slane %v14419_v18, 4 }
 0xac2   :  { %6386 = vmatpush.msrb.mxu1 %v6218_v4  ;;  %6364 = vmatpush.msrb.mxu0 %v6201_v38  ;;  %v6232_v4 = vld [vmem:[%s14597_s6 + $0x338] sm:$0xff] }
 0xac3   :  { %v6196_v38 = vld [vmem:[%s14597_s6 + $0x218] sm:$0xff]  ;;  %6411 = vmatpush.msrb.mxu2 %v6232_v4  ;;  %6436 = vmatpush.msrb.mxu3 %v6246_v51  ;;  %v5744_v0 = vadd.f32 %v14258_v61, %v5262_v17 }
 0xac4   :  { %6387 = vmatpush.msrb.mxu1 %v6217_v45  ;;  %6365 = vmatpush.msrb.mxu0 %v6200_v19  ;;  %v6212_v45 = vld [vmem:[%s14597_s6 + $0x298] sm:$0xff] }
 0xac5   :  { %6412 = vmatpush.msrb.mxu2 %v6231_v43 }
 0xac6   :  { %6388 = vmatpush.msrb.mxu1 %v6216_v63  ;;  %6366 = vmatpush.msrb.mxu0 %v6199_v13  ;;  %v6195_v13 = vld [vmem:[%s14597_s6 + $0x210] sm:$0xff] }
 0xac7   :  { %v14323_v47 = vpop.f32.mrf.mxu0  ;;  %v14325_v31 = vpop.f32.mrf.mxu1  ;;  %6413 = vmatpush.msrb.mxu2 %v6230_v21  ;;  %v6241_v21 = vld [vmem:[%s14597_s6 + $0x380] sm:$0xff] }
 0xac8   :  { %6389 = vmatpush.msrb.mxu1 %v6215_v42  ;;  %6367 = vmatpush.msrb.mxu0 %v6198_v55  ;;  %v6211_v42 = vld [vmem:[%s14597_s6 + $0x290] sm:$0xff]  ;;  %v6194_v55 = vld [vmem:[%s14597_s6 + $0x208] sm:$0xff]  ;;  %v5741_v17 = vadd.f32 %v14325_v31, %v14052_v3  ;;  %v6087_v3 = vperm.slane %v14419_v18, 6 }
 0xaca   :  { %6390 = vmatpush.msrb.mxu1 %v6214_v28  ;;  %6368 = vmatpush.msrb.mxu0 %v6197_v62  ;;  %v6210_v28 = vld [vmem:[%s14597_s6 + $0x288] sm:$0xff] }
 0xacc   :  { %6391 = vmatpush.msrb.mxu1 %v6213_v46  ;;  %6369 = vmatpush.msrb.mxu0 %v6196_v38 }
 0xace   :  { %v14366_v54 = vpop.f32.mrf.mxu2  ;;  %v14368_v26 = vpop.f32.mrf.mxu3  ;;  %6392 = vmatpush.msrb.mxu1 %v6212_v45  ;;  %6370 = vmatpush.msrb.mxu0 %v6195_v13  ;;  %v5331_v13 = vadd.f32 %v14042_v1, %v13922_v39  ;;  %v6225_v1 = vld [vmem:[%s14597_s6 + $0x300] sm:$0xff] }
 0xad0   :  { %6393 = vmatpush.msrb.mxu1 %v6211_v42  ;;  %6371 = vmatpush.msrb.mxu0 %v6194_v55  ;;  %v5747_v11 = vadd.f32 %v14312_v49, %v5331_v13 }
 0xad1   :  { %v14388_v37 = vpop.f32.mrf.mxu0  ;;  %v14390_v25 = vpop.f32.mrf.mxu1 }
 0xad2   :  { %6394 = vmatpush.msrb.mxu1 %v6210_v28  ;;  %6372 = vmatpush.msrb.mxu0 %v6193_v22  ;;  %v5740_v28 = vadd.f32 %v14323_v47, %v14049_v16  ;;  %v5743_v16 = vadd.f32 %v14368_v26, %v14072_v14  ;;  %v6088_v47 = vperm.slane %v14419_v18, 7  ;;  %v5748_v31 = vadd.f32 %v14388_v37, %v14083_v9 }
 0xad4   :  { %6395 = vmatpush.msrb.mxu1 %v6209_v33  ;;  %v5742_v33 = vadd.f32 %v14366_v54, %v14069_v36 }
 0xad8   :  { %v14445_v57 = vpop.f32.mrf.mxu2  ;;  %v14447_v59 = vpop.f32.mrf.mxu3 }
 0xae9   :  { %v5896_v56 = vpop.f32.mrf.mxu0  ;;  %v5919_v6 = vpop.f32.mrf.mxu1 }
 0xaea   :  { %v6063_v5 = vadd.f32 %v5896_v56, %v5736_v53  ;;  %v6064_v24 = vadd.f32 %v5919_v6, %v5737_v27  ;;  %v6229_v53 = vld [vmem:[%s14597_s6 + $0x320] sm:$0xff]  ;;  %v6228_v56 = vld [vmem:[%s14597_s6 + $0x318] sm:$0xff] }
 0xaeb   :  { %v6245_v27 = vld [vmem:[%s14597_s6 + $0x3a0] sm:$0xff]  ;;  %v6244_v6 = vld [vmem:[%s14597_s6 + $0x398] sm:$0xff]  ;;  %6414 = vmatpush.msrb.mxu2 %v6229_v53 }
 0xaec   :  { %v6097_v19 = vadd.f32 %v6081_v35, %v6063_v5  ;;  %v6098_v63 = vadd.f32 %v6082_v8, %v6064_v24  ;;  %6437 = vmatpush.msrb.mxu3 %v6245_v27 }
 0xaed   :  { %6415 = vmatpush.msrb.mxu2 %v6228_v56 }
 0xaee   :  { %v6113_v2 = vmax.f32 %v6097_v19, 0.0  ;;  %v6114_v48 = vmax.f32 %v6098_v63, 0.0  ;;  %6438 = vmatpush.msrb.mxu3 %v6244_v6  ;;  %v6227_v19 = vld [vmem:[%s14597_s6 + $0x310] sm:$0xff] }
 0xaef   :  { %v6243_v63 = vld [vmem:[%s14597_s6 + $0x390] sm:$0xff]  ;;  %6416 = vmatpush.msrb.mxu2 %v6227_v19 }
 0xaf0   :  { %v5942_v52 = vpop.f32.mrf.mxu2  ;;  %v5965_v29 = vpop.f32.mrf.mxu3  ;;  %6281 = vmatmul.f32.vlgmr.msra.gmra.mxu0 %v6113_v2  ;;  %6304 = vmatmul.f32.vlgmr.msra.gmra.mxu1 %v6114_v48  ;;  %v6226_v48 = vld [vmem:[%s14597_s6 + $0x308] sm:$0xff] }
 0xaf1   :  { %v6065_v62 = vadd.f32 %v5942_v52, %v5738_v15  ;;  %v6066_v46 = vadd.f32 %v5965_v29, %v5739_v20  ;;  %6439 = vmatpush.msrb.mxu3 %v6243_v63  ;;  %6417 = vmatpush.msrb.mxu2 %v6226_v48  ;;  %v6086_v52 = vperm.slane %v14419_v18, 5 }
 0xaf3   :  { %v6099_v4 = vadd.f32 %v6083_v40, %v6065_v62  ;;  %v6100_v5 = vadd.f32 %v6084_v10, %v6066_v46  ;;  %v5899_v24 = vpop.f32.mrf.mxu0  ;;  %v5922_v61 = vpop.f32.mrf.mxu1  ;;  %6418 = vmatpush.msrb.mxu2 %v6225_v1 }
 0xaf4   :  { %v6071_v44 = vadd.f32 %v5899_v24, %v5744_v0  ;;  %v6072_v38 = vadd.f32 %v5922_v61, %v5745_v34  ;;  %v5749_v0 = vadd.f32 %v14390_v25, %v14086_v12  ;;  %v5750_v12 = vadd.f32 %v14445_v57, %v14093_v58 }
 0xaf5   :  { %v6115_v45 = vmax.f32 %v6099_v4, 0.0  ;;  %v6116_v43 = vmax.f32 %v6100_v5, 0.0  ;;  %v5751_v25 = vadd.f32 %v14447_v59, %v14096_v30  ;;  %v7398_v30 = vld [vmem:[%s14598_s7] ss:$0 sm:$0xff]  ;;  %s7428_s7 = smov [#allocation4]  }
 0xaf6   :  { %v6105_v50 = vadd.f32 %v6081_v35, %v6071_v44  ;;  %v6106_v32 = vadd.f32 %v6082_v8, %v6072_v38  ;;  %v6242_v35 = vld [vmem:[%s14597_s6 + $0x388] sm:$0xff]  ;;  %v5746_v8 = vadd.f32 %v14310_v7, %v5308_v41  ;;  %s6456_s2 = sshll.u32 %s7428_s7, 4  ;;  %s6457_s2 = int_to_ptr.vmem [resolvable:$true] %s6456_s2 }
 0xaf7   :  { %6327 = vmatmul.f32.vlgmr.msra.gmra.mxu2 %v6115_v45  ;;  %6350 = vmatmul.f32.vlgmr.msra.gmra.mxu3 %v6116_v43 }
 0xaf8   :  { %v6121_v42 = vmax.f32 %v6105_v50, 0.0  ;;  %v6122_v2 = vmax.f32 %v6106_v32, 0.0  ;;  %6440 = vmatpush.msrb.mxu3 %v6242_v35 }
 0xafa   :  { %v5945_v23 = vpop.f32.mrf.mxu2  ;;  %v5968_v39 = vpop.f32.mrf.mxu3  ;;  %6284 = vmatmul.f32.gmra.mxu0 %v6121_v42  ;;  %6307 = vmatmul.f32.gmra.mxu1 %v6122_v2 }
 0xafb   :  { %v6073_v51 = vadd.f32 %v5945_v23, %v5746_v8  ;;  %v6074_v15 = vadd.f32 %v5968_v39, %v5747_v11  ;;  %6441 = vmatpush.msrb.mxu3 %v6241_v21 }
 0xafd   :  { %v6107_v7 = vadd.f32 %v6083_v40, %v6073_v51  ;;  %v6108_v49 = vadd.f32 %v6084_v10, %v6074_v15 }
 0xaff   :  { %v6123_v20 = vmax.f32 %v6107_v7, 0.0  ;;  %v6124_v55 = vmax.f32 %v6108_v49, 0.0 }
 0xb01   :  { %6330 = vmatmul.f32.gmra.mxu2 %v6123_v20  ;;  %6353 = vmatmul.f32.gmra.mxu3 %v6124_v55 }
 0xb0b   :  { %v5988_v40 = vpop.f32.mrf.mxu0  ;;  %v6011_v29 = vpop.f32.mrf.mxu1 }
 0xb0c   :  { %v6067_v53 = vadd.f32 %v5988_v40, %v5740_v28  ;;  %v6068_v10 = vadd.f32 %v6011_v29, %v5741_v17 }
 0xb0e   :  { %v6101_v27 = vadd.f32 %v6085_v60, %v6067_v53  ;;  %v6102_v62 = vadd.f32 %v6086_v52, %v6068_v10 }
 0xb10   :  { %v6117_v46 = vmax.f32 %v6101_v27, 0.0  ;;  %v6118_v22 = vmax.f32 %v6102_v62, 0.0 }
 0xb12   :  { %v6034_v34 = vpop.f32.mrf.mxu2  ;;  %v6057_v56 = vpop.f32.mrf.mxu3  ;;  %6373 = vmatmul.f32.vlgmr.msrb.gmra.mxu0 %v6117_v46  ;;  %6396 = vmatmul.f32.vlgmr.msrb.gmra.mxu1 %v6118_v22 }
 0xb13   :  { %v6069_v6 = vadd.f32 %v6034_v34, %v5742_v33  ;;  %v6070_v4 = vadd.f32 %v6057_v56, %v5743_v16  ;;  %v5991_v36 = vpop.f32.mrf.mxu0  ;;  %v6014_v54 = vpop.f32.mrf.mxu1 }
 0xb14   :  { %v6075_v5 = vadd.f32 %v5991_v36, %v5748_v31  ;;  %v6076_v14 = vadd.f32 %v6014_v54, %v5749_v0 }
 0xb15   :  { %v6103_v26 = vadd.f32 %v6087_v3, %v6069_v6  ;;  %v6104_v24 = vadd.f32 %v6088_v47, %v6070_v4 }
 0xb16   :  { %v6109_v18 = vadd.f32 %v6085_v60, %v6075_v5  ;;  %v6110_v61 = vadd.f32 %v6086_v52, %v6076_v14 }
 0xb17   :  { %v6119_v44 = vmax.f32 %v6103_v26, 0.0  ;;  %v6120_v9 = vmax.f32 %v6104_v24, 0.0 }
 0xb18   :  { %v6125_v37 = vmax.f32 %v6109_v18, 0.0  ;;  %v6126_v38 = vmax.f32 %v6110_v61, 0.0 }
 0xb19   :  { %6419 = vmatmul.f32.vlgmr.msrb.gmra.mxu2 %v6119_v44  ;;  %7346 = vmatmul.msk.f32.vlgmr.msrb.gmra.mxu3 %vm6258_vm4, %v6120_v9 }
 0xb1a   :  { %v6037_v45 = vpop.f32.mrf.mxu2  ;;  %v6060_v43 = vpop.f32.mrf.mxu3  ;;  %6376 = vmatmul.f32.gmra.mxu0 %v6125_v37  ;;  %6399 = vmatmul.f32.gmra.mxu1 %v6126_v38 }
 0xb1b   :  { %v6077_v19 = vadd.f32 %v6037_v45, %v5750_v12  ;;  %v6078_v63 = vadd.f32 %v6060_v43, %v5751_v25 }
 0xb1d   :  { %v6112_v50 = vadd.f32 %v6088_v47, %v6078_v63  ;;  %v6111_v32 = vadd.f32 %v6087_v3, %v6077_v19 }
 0xb1f   :  { %v6128_v41 = vmax.f32 %v6112_v50, 0.0  ;;  %v6127_v13 = vmax.f32 %v6111_v32, 0.0 }
 0xb21   :  { %6422 = vmatmul.f32.gmra.mxu2 %v6127_v13  ;;  %7347 = vmatmul.msk.f32.gmra.mxu3 %vm6258_vm4, %v6128_v41 }
 0xb6d   :  { %v6282_v58 = vpop.f32.mrf.mxu0  ;;  %v6305_v57 = vpop.f32.mrf.mxu1 }
 0xb6e   :  { %v6283_v48 = vadd.f32 %v7398_v30, %v6282_v58 }
 0xb70   :  { %v6306_v35 = vadd.f32 %v6305_v57, %v6283_v48 }
 0xb77   :  { %v6285_v59 = vpop.f32.mrf.mxu0  ;;  %v6308_v8 = vpop.f32.mrf.mxu1 }
 0xb78   :  { %v6286_v39 = vadd.f32 %v7398_v30, %v6285_v59 }
 0xb7a   :  { %v6328_v42 = vpop.f32.mrf.mxu2  ;;  %v6351_v2 = vpop.f32.mrf.mxu3  ;;  %v6309_v15 = vadd.f32 %v6308_v8, %v6286_v39 }
 0xb7b   :  { %v6329_v11 = vadd.f32 %v6328_v42, %v6306_v35 }
 0xb7d   :  { %v6352_v51 = vadd.f32 %v6351_v2, %v6329_v11 }
 0xb84   :  { %v6331_v1 = vpop.f32.mrf.mxu2  ;;  %v6354_v21 = vpop.f32.mrf.mxu3 }
 0xb85   :  { %v6332_v20 = vadd.f32 %v6331_v1, %v6309_v15 }
 0xb87   :  { %v6355_v52 = vadd.f32 %v6354_v21, %v6332_v20 }
 0xb8f   :  { %v6374_v23 = vpop.f32.mrf.mxu0  ;;  %v6397_v49 = vpop.f32.mrf.mxu1 }
 0xb90   :  { %v6375_v7 = vadd.f32 %v6374_v23, %v6352_v51 }
 0xb92   :  { %v6398_v55 = vadd.f32 %v6397_v49, %v6375_v7 }
 0xb97   :  { %v6377_v28 = vpop.f32.mrf.mxu0  ;;  %v6400_v10 = vpop.f32.mrf.mxu1 }
 0xb98   :  { %v6378_v29 = vadd.f32 %v6377_v28, %v6355_v52 }
 0xb9a   :  { %v6401_v27 = vadd.f32 %v6400_v10, %v6378_v29 }
 0xb9c   :  { %v6420_v17 = vpop.f32.mrf.mxu2  ;;  %v6443_v60 = vpop.f32.mrf.mxu3 }
 0xb9d   :  { %v6421_v40 = vadd.f32 %v6420_v17, %v6398_v55 }
 0xb9f   :  { %v6444_v53 = vadd.f32 %v6443_v60, %v6421_v40 }
 0xba1   :  { %6450 = vst.msk [vmem:[#allocation4] sm:$0xff] %vm6449_vm5, %v6444_v53 }
 0xba4   :  { %v6423_v62 = vpop.f32.mrf.mxu2  ;;  %v6446_v22 = vpop.f32.mrf.mxu3 }
 0xba5   :  { %v6424_v46 = vadd.f32 %v6423_v62, %v6401_v27 }
 0xba7   :  { %v6447_v33 = vadd.f32 %v6446_v22, %v6424_v46 }
 0xba9   :  { %6451 = vst.msk [vmem:[#allocation4 + $0x8] sm:$0xff] %vm6449_vm5, %v6447_v33 }
 0xbaa   :  { %6464 = dma.vmem_to_hbm [thread:$0]  %s6457_s2, 256, %s6459_s10, [#allocation5], %s7429_s1, %s7429_s1, %s7427_s13  }
 0xbab   :  { %7425 = dma.done.wait [#allocation5], 256  }
 0xbac   :  { %7426 = vsyncadd [#allocation5], 4294967040 }
 0xbad   :  { %6469 = vsyncpa [#allocation5], 1 }
 0xbae   :  { %6470 = vsyncmov [#allocation3] }
 0xbb1   :  { %s6471_s8 = vpop.sfrf %6470 }
 0xbb2   :  { %p7348_p0 = scmp.ne.s32.totalorder %s6471_s8, 0 }
 0xbb4   :  { %6475 = shalt.err (%p7348_p0)  }

</bundles_post_ra>
